<compile_context>
chip_gen: v7x
topology: tpu7x:2x2x1
jax: 0.10.0
libtpu: 0.0.40
codegen_flags: <defaults>
</compile_context>

<pallas_src>
import jax
import jax.numpy as jnp
from jax import lax
from jax.experimental import pallas as pl
from jax.experimental.pallas import tpu as pltpu

C_IN = 3                   # conv / transposed-conv input channels
C_OUT = 3                  # conv / transposed-conv output channels
K = 5                      # kernel size
STRIDE = 3                 # transposed-conv stride
PH = 3                     # output sub-pixel phases per spatial dim (== STRIDE)
TAP = 2                    # sub-pixel window taps per spatial dim (ceil(K/STRIDE))
M_ROWS = PH * PH * C_OUT   # 27 output rows  (phase_h, phase_w, co)
K_DIM = C_IN * TAP * TAP   # 12 contraction  (ci, dh, dw)
MAX_TILE = 4096            # streamed output-pixel tile width (lane dim)
_HI = jax.lax.Precision.HIGHEST   # f32-accurate MXU passes


def _attention_kernel(p_ref, wct_ref, b_ref, keys_ref, vals_ref, wphase_ref):
    # p_ref     : (NHW, 75)   im2col patches of x for the 5x5 "key" conv
    # wct_ref   : (75, 3)     key-conv weight, rows=(ci,kh,kw), cols=co
    # b_ref     : (1, 3)      key-conv bias
    # keys_ref  : (3, S, NHW) keys regrouped per key-conv output channel
    # vals_ref  : (S, 324)    values pre-scattered into sub-pixel phase layout
    # wphase_ref: (1, 324)    attention-weighted phase-weight matrix (flat)

    # key = conv5x5(x) as an MXU matmul over im2col patches -> (NHW, 3)
    conv = jnp.dot(p_ref[...], wct_ref[...],
                   preferred_element_type=jnp.float32, precision=_HI)
    conv = conv + b_ref[...]
    # logits[s] = keys[s] . flatten(conv); per conv channel so the long
    # reduction stays on the MXU with no in-kernel relayout.
    logits = (
        jnp.dot(keys_ref[0], conv[:, 0:1],
                preferred_element_type=jnp.float32, precision=_HI)
        + jnp.dot(keys_ref[1], conv[:, 1:2],
                  preferred_element_type=jnp.float32, precision=_HI)
        + jnp.dot(keys_ref[2], conv[:, 2:3],
                  preferred_element_type=jnp.float32, precision=_HI)
    )                                                     # (S, 1)
    # softmax over the memory slots (axis 0)
    m = jnp.max(logits, axis=0, keepdims=True)
    e = jnp.exp(logits - m)
    attn = e / jnp.sum(e, axis=0, keepdims=True)          # (S, 1)
    # dynamic phase-weight matrix: sum_s attn[s] * vals_phase[s] -> (1, 324)
    # (2-D sublane reduction; S == one sublane group)
    wphase_ref[...] = jnp.sum(vals_ref[...] * attn, axis=0, keepdims=True)


def _stream_kernel(w_ref, cols_ref, out_ref):
    # w_ref    : (27, 12)    dynamic sub-pixel phase weights (resident)
    # cols_ref : (12, TILE)  2x2-window im2col of x (this tile of output pixels)
    # out_ref  : (27, TILE)  output phases for this tile
    out_ref[...] = jnp.dot(w_ref[...], cols_ref[...],
                           preferred_element_type=jnp.float32, precision=_HI)


def longconv_forward(x, conv_w, conv_b, keys, values):
    N, C, H, W = x.shape
    assert C == C_IN
    S, keysize = keys.shape
    assert keysize == N * C_OUT * H * W
    assert values.shape == (S, C_IN * C_OUT * K * K)
    f32 = jnp.float32
    x = x.astype(f32)

    nhw = N * H * W
    kdim5 = C_IN * K * K                                   # 75

    # ---------- glue: im2col for the 5x5 / pad-2 key conv (no FLOPs) ----------
    xpad = jnp.pad(x, ((0, 0), (0, 0), (2, 2), (2, 2)))
    taps = [xpad[:, :, kh:kh + H, kw:kw + W] for kh in range(K) for kw in range(K)]
    patches = jnp.stack(taps, axis=2)                      # (N, C, 25, H, W)
    patches = patches.transpose(0, 3, 4, 1, 2).reshape(nhw, kdim5)

    wct = conv_w.astype(f32).transpose(1, 2, 3, 0).reshape(kdim5, C_OUT)
    brow = conv_b.astype(f32).reshape(1, C_OUT)

    # regroup keys per key-conv output channel (NCHW flatten order preserved):
    # keys_by_c[c, s, (n,h,w)] = keys[s, (n,c,h,w)]
    keys_by_c = (keys.astype(f32)
                 .reshape(S, N, C_OUT, H, W)
                 .transpose(2, 0, 1, 3, 4)
                 .reshape(C_OUT, S, nhw))

    # ---------- glue: values -> sub-pixel phase-weight layout ----------------
    # kernel[ci,co,kh,kw] with kh = ph + 3*dh (bijective on 0..5 after one zero
    # tap of padding), likewise kw -> (pw, dw).  Rows (ph,pw,co), cols (ci,dh,dw);
    # the padded taps are exactly the invalid (tap >= 5) entries and stay zero.
    v5 = values.astype(f32).reshape(S, C_IN, C_OUT, K, K)
    v6 = jnp.pad(v5, ((0, 0), (0, 0), (0, 0), (0, 1), (0, 1)))       # (S,ci,co,6,6)
    v6 = v6.reshape(S, C_IN, C_OUT, TAP, PH, TAP, PH)                # (s,ci,co,dh,ph,dw,pw)
    vals_phase = (v6.transpose(0, 4, 6, 2, 1, 3, 5)                  # (s,ph,pw,co,ci,dh,dw)
                  .reshape(S, M_ROWS * K_DIM))

    # ---------- Pallas kernel 1: key conv + attention + phase weights --------
    wphase_flat = pl.pallas_call(
        _attention_kernel,
        out_shape=jax.ShapeDtypeStruct((1, M_ROWS * K_DIM), f32),
        grid=(1,),
        in_specs=[
            pl.BlockSpec((nhw, kdim5), lambda i: (0, 0)),
            pl.BlockSpec((kdim5, C_OUT), lambda i: (0, 0)),
            pl.BlockSpec((1, C_OUT), lambda i: (0, 0)),
            pl.BlockSpec((C_OUT, S, nhw), lambda i: (0, 0, 0)),
            pl.BlockSpec((S, M_ROWS * K_DIM), lambda i: (0, 0)),
        ],
        out_specs=pl.BlockSpec((1, M_ROWS * K_DIM), lambda i: (0, 0)),
        compiler_params=pltpu.CompilerParams(dimension_semantics=("arbitrary",)),
        cost_estimate=pl.CostEstimate(
            flops=2 * (nhw * kdim5 * C_OUT + C_OUT * S * nhw + S * M_ROWS * K_DIM),
            transcendentals=S,
            bytes_accessed=4 * (patches.size + wct.size + brow.size
                                + keys_by_c.size + vals_phase.size + M_ROWS * K_DIM),
        ),
    )(patches, wct, brow, keys_by_c, vals_phase)
    wphase = wphase_flat.reshape(M_ROWS, K_DIM)            # tiny XLA reshape

    # ---------- glue: 2x2-window im2col of the UNdilated x (1 zero pad) ------
    # out[n,co,3a+ph,3b+pw] = sum_{ci,dh,dw} x[n,ci,a-dh,b-dw]*kernel[ci,co,ph+3dh,pw+3dw]
    # for a in [0,H], b in [0,W]  (depth-to-space grid of (H+1)x(W+1), cropped).
    HP, WP = H + 1, W + 1
    xp = jnp.pad(x, ((0, 0), (0, 0), (1, 1), (1, 1)))
    taps2 = [xp[:, :, 1 - dh:1 - dh + HP, 1 - dw:1 - dw + WP]
             for dh in range(TAP) for dw in range(TAP)]
    cols = jnp.stack(taps2, axis=2)                        # (N, C, 4, HP, WP)
    cols = cols.transpose(1, 2, 0, 3, 4).reshape(K_DIM, N * HP * WP)

    ncols = N * HP * WP
    tile = min(MAX_TILE, pl.cdiv(ncols, 128) * 128)        # lane-dense, 128-aligned
    ncols_p = pl.cdiv(ncols, tile) * tile
    cols = jnp.pad(cols, ((0, 0), (0, ncols_p - ncols)))

    # ---------- Pallas kernel 2: streamed sub-pixel transposed conv ----------
    out_ph = pl.pallas_call(
        _stream_kernel,
        out_shape=jax.ShapeDtypeStruct((M_ROWS, ncols_p), f32),
        grid=(ncols_p // tile,),
        in_specs=[
            pl.BlockSpec((M_ROWS, K_DIM), lambda j: (0, 0)),   # phase weights (resident)
            pl.BlockSpec((K_DIM, tile), lambda j: (0, j)),     # streamed columns
        ],
        out_specs=pl.BlockSpec((M_ROWS, tile), lambda j: (0, j)),
        compiler_params=pltpu.CompilerParams(
            # no cross-iteration state -> fully parallel (both v7x TensorCores)
            dimension_semantics=("parallel",)),
        cost_estimate=pl.CostEstimate(
            flops=2 * M_ROWS * K_DIM * ncols_p,
            transcendentals=0,
            bytes_accessed=4 * (M_ROWS * K_DIM + K_DIM * ncols_p + M_ROWS * ncols_p),
        ),
    )(wphase, cols)

    # ---------- glue: depth-to-space back to NCHW and crop --------------------
    OH = (H - 1) * STRIDE + K
    OW = (W - 1) * STRIDE + K
    out = out_ph[:, :ncols].reshape(PH, PH, C_OUT, N, HP, WP)   # (ph,pw,co,n,a,b)
    out = out.transpose(3, 2, 4, 0, 5, 1).reshape(N, C_OUT, PH * HP, PH * WP)
    return out[:, :, :OH, :OW]


def longconv_ref(x, conv_w, conv_b, keys, values):
    # Pure-JAX/XLA reference matching the PyTorch forward (independent of the kernels).
    x = x.astype(jnp.float32)
    key = lax.conv_general_dilated(
        x, conv_w, window_strides=(1, 1), padding=((2, 2), (2, 2)),
        dimension_numbers=("NCHW", "OIHW", "NCHW"), precision=_HI)
    key = key + conv_b.reshape(1, C_OUT, 1, 1)
    logits = jnp.dot(keys, key.reshape(-1), precision=_HI)
    attn = jax.nn.softmax(logits, axis=0)
    kern = jnp.sum(values * attn[:, None], axis=0).reshape(C_IN, C_OUT, K, K)
    # conv_transpose2d(x, kern, stride=3, padding=0) as a dilated conv with the
    # spatially-flipped, in/out-swapped kernel.
    w_eq = jnp.flip(kern, (2, 3)).transpose(1, 0, 2, 3)       # OIHW
    return lax.conv_general_dilated(
        x, w_eq, window_strides=(1, 1),
        padding=((K - 1, K - 1), (K - 1, K - 1)), lhs_dilation=(STRIDE, STRIDE),
        dimension_numbers=("NCHW", "OIHW", "NCHW"), precision=_HI)


if __name__ == "__main__":
    rng = jax.random.PRNGKey(0)
    kx, kw, kb, kk, kv = jax.random.split(rng, 5)

    N, H, W = 2, 16, 16
    SIZE = 8
    keysize = N * C_OUT * H * W          # length of key.flatten() -> 1536

    x = jax.random.normal(kx, (N, C_IN, H, W), jnp.float32)
    fan_in = C_IN * K * K
    bound = 1.0 / (fan_in ** 0.5)        # nn.Conv2d default init scale
    conv_w = jax.random.uniform(kw, (C_OUT, C_IN, K, K), jnp.float32, -bound, bound)
    conv_b = jax.random.uniform(kb, (C_OUT,), jnp.float32, -bound, bound)
    keys = jax.random.normal(kk, (SIZE, keysize), jnp.float32)       # Parameter(randn)
    values = jax.random.normal(kv, (SIZE, C_IN * C_OUT * K * K), jnp.float32)

    out = jax.jit(longconv_forward)(x, conv_w, conv_b, keys, values)
    jax.block_until_ready(out)
    assert out.shape == (N, C_OUT, (H - 1) * STRIDE + K, (W - 1) * STRIDE + K)

    ref = longconv_ref(x, conv_w, conv_b, keys, values)
    max_err = float(jnp.max(jnp.abs(out - ref)))
    # Everything stays f32 with HIGHEST-precision MXU contractions; 2e-3 is ample.
    assert jnp.allclose(out, ref, atol=2e-3, rtol=2e-3), f"max abs err {max_err}"

    print("KERNEL_OK")
</pallas_src>

<mosaic_0001>
module attributes {stable_mosaic.version = 11 : i64} {
  func.func @_attention_kernel(%arg0: i32, %arg1: memref<512x75xf32, #tpu.memory_space<vmem>>, %arg2: memref<75x3xf32, #tpu.memory_space<vmem>>, %arg3: memref<1x3xf32, #tpu.memory_space<vmem>>, %arg4: memref<3x8x512xf32, #tpu.memory_space<vmem>>, %arg5: memref<8x324xf32, #tpu.memory_space<vmem>>, %arg6: memref<1x324xf32, #tpu.memory_space<vmem>>) attributes {dimension_semantics = [#tpu.dimension_semantics<arbitrary>], iteration_bounds = array<i64: 1>, scalar_prefetch = 0 : i64, scratch_operands = 0 : i64, tpu.core_type = #tpu.core_type<tc>, window_params = [{pipeline_mode = #tpu.pipeline_mode<synchronous>, transform_indices = @transform_0, window_bounds = array<i64: 512, 75>}, {pipeline_mode = #tpu.pipeline_mode<synchronous>, transform_indices = @transform_1, window_bounds = array<i64: 75, 3>}, {pipeline_mode = #tpu.pipeline_mode<synchronous>, transform_indices = @transform_2, window_bounds = array<i64: 1, 3>}, {pipeline_mode = #tpu.pipeline_mode<synchronous>, transform_indices = @transform_3, window_bounds = array<i64: 3, 8, 512>}, {pipeline_mode = #tpu.pipeline_mode<synchronous>, transform_indices = @transform_4, window_bounds = array<i64: 8, 324>}, {pipeline_mode = #tpu.pipeline_mode<synchronous>, transform_indices = @transform_5, window_bounds = array<i64: 1, 324>}]} {
    %c0 = arith.constant 0 : index
    %c0_0 = arith.constant 0 : index
    %0 = vector.load %arg1[%c0, %c0_0] : memref<512x75xf32, #tpu.memory_space<vmem>>, vector<512x75xf32>
    %c0_1 = arith.constant 0 : index
    %c0_2 = arith.constant 0 : index
    %1 = vector.load %arg2[%c0_1, %c0_2] : memref<75x3xf32, #tpu.memory_space<vmem>>, vector<75x3xf32>
    %cst = arith.constant dense<0.000000e+00> : vector<512x3xf32>
    %2 = tpu.matmul %0, %1, %cst {dimension_numbers = #tpu.dot_dimension_numbers<[1], [0], [0], [1], [0, 0, 1, 1], [], []>, precision = #tpu.contract_precision<fp32>} : vector<512x75xf32>, vector<75x3xf32>, vector<512x3xf32> -> vector<512x3xf32>
    %c0_3 = arith.constant 0 : index
    %c0_4 = arith.constant 0 : index
    %3 = vector.load %arg3[%c0_3, %c0_4] : memref<1x3xf32, #tpu.memory_space<vmem>>, vector<1x3xf32>
    %4 = vector.broadcast %3 : vector<1x3xf32> to vector<512x3xf32>
    %5 = arith.addf %2, %4 : vector<512x3xf32>
    %c0_5 = arith.constant 0 : index
    %c0_6 = arith.constant 0 : index
    %c0_7 = arith.constant 0 : index
    %6 = vector.load %arg4[%c0_5, %c0_6, %c0_7] : memref<3x8x512xf32, #tpu.memory_space<vmem>>, vector<1x8x512xf32>
    %7 = vector.shape_cast %6 : vector<1x8x512xf32> to vector<8x512xf32>
    %8 = vector.extract_strided_slice %5 {offsets = [0, 0], sizes = [512, 1], strides = [1, 1]} : vector<512x3xf32> to vector<512x1xf32>
    %cst_8 = arith.constant dense<0.000000e+00> : vector<8x1xf32>
    %9 = tpu.matmul %7, %8, %cst_8 {dimension_numbers = #tpu.dot_dimension_numbers<[1], [0], [0], [1], [0, 0, 1, 1], [], []>, precision = #tpu.contract_precision<fp32>} : vector<8x512xf32>, vector<512x1xf32>, vector<8x1xf32> -> vector<8x1xf32>
    %c1 = arith.constant 1 : index
    %c0_9 = arith.constant 0 : index
    %c0_10 = arith.constant 0 : index
    %10 = vector.load %arg4[%c1, %c0_9, %c0_10] : memref<3x8x512xf32, #tpu.memory_space<vmem>>, vector<1x8x512xf32>
    %11 = vector.shape_cast %10 : vector<1x8x512xf32> to vector<8x512xf32>
    %12 = vector.extract_strided_slice %5 {offsets = [0, 1], sizes = [512, 1], strides = [1, 1]} : vector<512x3xf32> to vector<512x1xf32>
    %cst_11 = arith.constant dense<0.000000e+00> : vector<8x1xf32>
    %13 = tpu.matmul %11, %12, %cst_11 {dimension_numbers = #tpu.dot_dimension_numbers<[1], [0], [0], [1], [0, 0, 1, 1], [], []>, precision = #tpu.contract_precision<fp32>} : vector<8x512xf32>, vector<512x1xf32>, vector<8x1xf32> -> vector<8x1xf32>
    %14 = arith.addf %9, %13 : vector<8x1xf32>
    %c2 = arith.constant 2 : index
    %c0_12 = arith.constant 0 : index
    %c0_13 = arith.constant 0 : index
    %15 = vector.load %arg4[%c2, %c0_12, %c0_13] : memref<3x8x512xf32, #tpu.memory_space<vmem>>, vector<1x8x512xf32>
    %16 = vector.shape_cast %15 : vector<1x8x512xf32> to vector<8x512xf32>
    %17 = vector.extract_strided_slice %5 {offsets = [0, 2], sizes = [512, 1], strides = [1, 1]} : vector<512x3xf32> to vector<512x1xf32>
    %cst_14 = arith.constant dense<0.000000e+00> : vector<8x1xf32>
    %18 = tpu.matmul %16, %17, %cst_14 {dimension_numbers = #tpu.dot_dimension_numbers<[1], [0], [0], [1], [0, 0, 1, 1], [], []>, precision = #tpu.contract_precision<fp32>} : vector<8x512xf32>, vector<512x1xf32>, vector<8x1xf32> -> vector<8x1xf32>
    %19 = arith.addf %14, %18 : vector<8x1xf32>
    %cst_15 = arith.constant dense<0xFF800000> : vector<1xf32>
    %20 = vector.multi_reduction <maximumf>, %19, %cst_15 [0] : vector<8x1xf32> to vector<1xf32>
    %21 = vector.shape_cast %20 : vector<1xf32> to vector<1x1xf32>
    %22 = vector.broadcast %21 : vector<1x1xf32> to vector<8x1xf32>
    %23 = arith.subf %19, %22 : vector<8x1xf32>
    %24 = math.exp %23 : vector<8x1xf32>
    %cst_16 = arith.constant dense<0.000000e+00> : vector<1xf32>
    %25 = vector.multi_reduction <add>, %24, %cst_16 [0] : vector<8x1xf32> to vector<1xf32>
    %26 = vector.shape_cast %25 : vector<1xf32> to vector<1x1xf32>
    %27 = vector.broadcast %26 : vector<1x1xf32> to vector<8x1xf32>
    %28 = arith.divf %24, %27 : vector<8x1xf32>
    %c0_17 = arith.constant 0 : index
    %c0_18 = arith.constant 0 : index
    %29 = vector.load %arg5[%c0_17, %c0_18] : memref<8x324xf32, #tpu.memory_space<vmem>>, vector<8x324xf32>
    %30 = vector.broadcast %28 : vector<8x1xf32> to vector<8x324xf32>
    %31 = arith.mulf %29, %30 : vector<8x324xf32>
    %cst_19 = arith.constant dense<0.000000e+00> : vector<324xf32>
    %32 = vector.multi_reduction <add>, %31, %cst_19 [0] : vector<8x324xf32> to vector<324xf32>
    %33 = vector.shape_cast %32 : vector<324xf32> to vector<1x324xf32>
    %c0_20 = arith.constant 0 : index
    %c0_21 = arith.constant 0 : index
    %34 = vector.load %arg6[%c0_20, %c0_21] : memref<1x324xf32, #tpu.memory_space<vmem>>, vector<1x324xf32>
    tpu.vector_store %arg6[%c0_20, %c0_21], %33 {strides = array<i32>} : memref<1x324xf32, #tpu.memory_space<vmem>>, vector<1x324xf32>,
    return
  }
  func.func @transform_0(%arg0: i32) -> (i32, i32) {
    %c0_i32 = arith.constant 0 : i32
    %c0_i32_0 = arith.constant 0 : i32
    %c0_i32_1 = arith.constant 0 : i32
    return %c0_i32, %c0_i32_0 : i32, i32
  }
  func.func @transform_1(%arg0: i32) -> (i32, i32) {
    %c0_i32 = arith.constant 0 : i32
    %c0_i32_0 = arith.constant 0 : i32
    %c0_i32_1 = arith.constant 0 : i32
    return %c0_i32, %c0_i32_0 : i32, i32
  }
  func.func @transform_2(%arg0: i32) -> (i32, i32) {
    %c0_i32 = arith.constant 0 : i32
    %c0_i32_0 = arith.constant 0 : i32
    %c0_i32_1 = arith.constant 0 : i32
    return %c0_i32, %c0_i32_0 : i32, i32
  }
  func.func @transform_3(%arg0: i32) -> (i32, i32, i32) {
    %c0_i32 = arith.constant 0 : i32
    %c0_i32_0 = arith.constant 0 : i32
    %c0_i32_1 = arith.constant 0 : i32
    %c0_i32_2 = arith.constant 0 : i32
    return %c0_i32, %c0_i32_0, %c0_i32_1 : i32, i32, i32
  }
  func.func @transform_4(%arg0: i32) -> (i32, i32) {
    %c0_i32 = arith.constant 0 : i32
    %c0_i32_0 = arith.constant 0 : i32
    %c0_i32_1 = arith.constant 0 : i32
    return %c0_i32, %c0_i32_0 : i32, i32
  }
  func.func @transform_5(%arg0: i32) -> (i32, i32) {
    %c0_i32 = arith.constant 0 : i32
    %c0_i32_0 = arith.constant 0 : i32
    %c0_i32_1 = arith.constant 0 : i32
    return %c0_i32, %c0_i32_0 : i32, i32
  }
}

module attributes {stable_mosaic.version = 11 : i64} {
  func.func @_stream_kernel(%arg0: i32, %arg1: memref<27x12xf32, #tpu.memory_space<vmem>>, %arg2: memref<12x640xf32, #tpu.memory_space<vmem>>, %arg3: memref<27x640xf32, #tpu.memory_space<vmem>>) attributes {dimension_semantics = [#tpu.dimension_semantics<parallel>], iteration_bounds = array<i64: 1>, scalar_prefetch = 0 : i64, scratch_operands = 0 : i64, tpu.core_type = #tpu.core_type<tc>, window_params = [{pipeline_mode = #tpu.pipeline_mode<synchronous>, transform_indices = @transform_0, window_bounds = array<i64: 27, 12>}, {transform_indices = @transform_1, window_bounds = array<i64: 12, 640>}, {transform_indices = @transform_2, window_bounds = array<i64: 27, 640>}]} {
    %c0 = arith.constant 0 : index
    %c0_0 = arith.constant 0 : index
    %0 = vector.load %arg1[%c0, %c0_0] : memref<27x12xf32, #tpu.memory_space<vmem>>, vector<27x12xf32>
    %c0_1 = arith.constant 0 : index
    %c0_2 = arith.constant 0 : index
    %1 = vector.load %arg2[%c0_1, %c0_2] : memref<12x640xf32, #tpu.memory_space<vmem>>, vector<12x640xf32>
    %cst = arith.constant dense<0.000000e+00> : vector<27x640xf32>
    %2 = tpu.matmul %0, %1, %cst {dimension_numbers = #tpu.dot_dimension_numbers<[1], [0], [0], [1], [0, 0, 1, 1], [], []>, precision = #tpu.contract_precision<fp32>} : vector<27x12xf32>, vector<12x640xf32>, vector<27x640xf32> -> vector<27x640xf32>
    %c0_3 = arith.constant 0 : index
    %c0_4 = arith.constant 0 : index
    %3 = vector.load %arg3[%c0_3, %c0_4] : memref<27x640xf32, #tpu.memory_space<vmem>>, vector<27x640xf32>
    tpu.vector_store %arg3[%c0_3, %c0_4], %2 {strides = array<i32>} : memref<27x640xf32, #tpu.memory_space<vmem>>, vector<27x640xf32>,
    return
  }
  func.func @transform_0(%arg0: i32) -> (i32, i32) {
    %c0_i32 = arith.constant 0 : i32
    %c0_i32_0 = arith.constant 0 : i32
    %c0_i32_1 = arith.constant 0 : i32
    return %c0_i32, %c0_i32_0 : i32, i32
  }
  func.func @transform_1(%arg0: i32) -> (i32, i32) {
    %c0_i32 = arith.constant 0 : i32
    %c0_i32_0 = arith.constant 0 : i32
    return %c0_i32, %arg0 : i32, i32
  }
  func.func @transform_2(%arg0: i32) -> (i32, i32) {
    %c0_i32 = arith.constant 0 : i32
    %c0_i32_0 = arith.constant 0 : i32
    return %c0_i32, %arg0 : i32, i32
  }
}

</mosaic_0001>

<bundles_post_ra>
// kernel: longconv_forward.3
= control target key start
LH: loop header
LB: loop body
LE: loop exit
PB: predicated region body
PF: predicated region fallthrough
CT: control target
= control target key end

     0   :  { %vm38_vm0 = vcmask 1043456   ;;  %v2213_v2 = vmov 0.0   ;;  %vm25_vm1 = vcmask 97280   ;;  %s2626_s1 = inlined_call_operand.vmem [shape: f32[12,640], index: 1, kind: input, shape index: {}]   ;;  %s2627_s0 = inlined_call_operand.vmem [shape: f32[27,12], index: 0, kind: input, shape index: {}]   ;;  %s2628_s2 = inlined_call_operand.vmem [shape: f32[27,640], index: 2, kind: output, shape index: {}]  }
   0x1   :  { %v16_v0 = vld [vmem:[%s2626_s1 + $0x8] sm:$0xff]  ;;  %v21_v1 = vld [vmem:[%s2626_s1 + $0x30] sm:$0xf]  ;;  %122 = vmatprep.mubr.f32.mxu1 %v2213_v2  ;;  %251 = vmatprep.mubr.f32.mxu0 %v2213_v2  ;;  %v15_v5 = vld [vmem:[%s2626_s1] sm:$0xff] }
   0x2   :  { %v43_v3 = vsel %vm38_vm0, %v21_v1, 0  ;;  %v54_v4 = vand.u32 4294901760, %v16_v0  ;;  %v20_v6 = vld [vmem:[%s2626_s1 + $0x28] sm:$0xf]  ;;  %v56_v9 = vand.u32 4294901760, %v15_v5  ;;  %v11_v10 = vld [vmem:[%s2627_s0] sm:$0xff] }
   0x3   :  { %v58_v7 = vand.u32 4294901760, %v43_v3  ;;  %v40_v8 = vsel %vm38_vm0, %v20_v6, 0  ;;  %v12_v11 = vld [vmem:[%s2627_s0 + $0x8] sm:$0xff]  ;;  %v27_v14 = vsel %vm25_vm1, %v11_v10, 0  ;;  %v13_v24 = vld [vmem:[%s2627_s0 + $0x10] sm:$0xff]  ;;  %v18_v41 = vld [vmem:[%s2626_s1 + $0x18] sm:$0xff] }
   0x4   :  { %v2251_v12 = vsub.f32 %v16_v0, %v54_v4  ;;  %v60_v13 = vand.u32 4294901760, %v40_v8  ;;  %v30_v15 = vsel %vm25_vm1, %v12_v11, 0  ;;  %v2259_v18 = vsub.f32 %v15_v5, %v56_v9  ;;  %v14_v32 = vld [vmem:[%s2627_s0 + $0x18] sm:$0x7]  ;;  %v23_v42 = vld [vmem:[%s2626_s1 + $0x40] sm:$0xf] }
   0x5   :  { %v2255_v16 = vpack.c.bf16 %v58_v7, %v54_v4  ;;  %v2257_v17 = vsub.f32 %v43_v3, %v58_v7  ;;  %v2261_v19 = vand.u32 4294901760, %v27_v14  ;;  %v2268_v23 = vand.u32 4294901760, %v30_v15  ;;  %v22_v55 = vld [vmem:[%s2626_s1 + $0x38] sm:$0xf]  ;;  %v17_v62 = vld [vmem:[%s2626_s1 + $0x10] sm:$0xff] }
   0x6   :  { %v2263_v20 = vpack.c.bf16 %v60_v13, %v56_v9  ;;  %v2265_v21 = vsub.f32 %v40_v8, %v60_v13  ;;  %v169_v22 = vand.u32 4294901760, %v2251_v12  ;;  %v175_v27 = vand.u32 4294901760, %v2259_v18 }
   0x7   :  { %2039 = vmatprep.subr.bf16.mxu1 %v2255_v16  ;;  %v2275_v25 = vsub.f32 %v27_v14, %v2261_v19  ;;  %v181_v26 = vand.u32 4294901760, %v2257_v17  ;;  %v2285_v30 = vsub.f32 %v30_v15, %v2268_v23  ;;  %v2046_v31 = vpack.c.bf16 %v2257_v17, %v2251_v12 }
   0x8   :  { %2041 = vmatpush1.bf16.msra.mxu1 %v2263_v20  ;;  %v170_v28 = vsub.f32 %v2251_v12, %v169_v22  ;;  %v187_v29 = vand.u32 4294901760, %v2265_v21  ;;  %v176_v35 = vsub.f32 %v2259_v18, %v175_v27  ;;  %v33_v36 = vsel %vm25_vm1, %v13_v24, 0 }
   0x9   :  { %v2293_v33 = vand.u32 4294901760, %v2275_v25  ;;  %v182_v34 = vsub.f32 %v2257_v17, %v181_v26  ;;  %v2306_v39 = vand.u32 4294901760, %v2285_v30  ;;  %v2308_v40 = vand.u32 4294901760, %v33_v36 }
   0xa   :  { %v171_v37 = vand.u32 4294901760, %v170_v28  ;;  %v188_v38 = vsub.f32 %v2265_v21, %v187_v29  ;;  %v177_v45 = vand.u32 4294901760, %v176_v35  ;;  %v36_v46 = vsel %vm25_vm1, %v14_v32, 0 }
   0xb   :  { %v126_v43 = vsub.f32 %v2275_v25, %v2293_v33  ;;  %v183_v44 = vand.u32 4294901760, %v182_v34  ;;  %v137_v48 = vsub.f32 %v2285_v30, %v2306_v39  ;;  %v2322_v49 = vsub.f32 %v33_v36, %v2308_v40 }
   0xc   :  { %v189_v47 = vand.u32 4294901760, %v188_v38  ;;  %v2324_v50 = vand.u32 4294901760, %v36_v46  ;;  %v49_v53 = vsel %vm38_vm0, %v23_v42, 0  ;;  %v692_v54 = vand.u32 4294901760, %v18_v41 }
   0xd   :  { %v2326_v51 = vand.u32 4294901760, %v126_v43  ;;  %v2042_v52 = vpack.c.bf16 %v183_v44, %v171_v37  ;;  %v2333_v57 = vand.u32 4294901760, %v2322_v49  ;;  %v2339_v59 = vand.u32 4294901760, %v137_v48 }
   0xe   :  { %v2044_v56 = vpack.c.bf16 %v189_v47, %v177_v45  ;;  %v2336_v58 = vsub.f32 %v36_v46, %v2324_v50  ;;  %v696_v60 = vand.u32 4294901760, %v49_v53  ;;  %v2341_v61 = vsub.f32 %v18_v41, %v692_v54 }
   0xf   :  { %128 = vmatmul.mubr.f32.vlgmr.msra.gmra.mrb[0].mxu1 %v2326_v51  ;;  %2043 = vmatprep.subr.bf16.mxu0 %v2042_v52  ;;  %v2048_v63 = vpack.c.bf16 %v2265_v21, %v2259_v18  ;;  %v148_v0 = vsub.f32 %v2322_v49, %v2333_v57  ;;  %v46_v3 = vsel %vm38_vm0, %v22_v55, 0  ;;  %v694_v6 = vand.u32 4294901760, %v17_v62  ;;  %v24_v18 = vld [vmem:[%s2626_s1 + $0x48] sm:$0xf] }
  0x10   :  { %133 = vmatprep.mubr.f32.mxu1 %v2213_v2  ;;  %2045 = vmatpush1.bf16.msra.mxu0 %v2044_v56  ;;  %v2352_v1 = vand.u32 4294901760, %v2336_v58  ;;  %v2355_v4 = vsub.f32 %v49_v53, %v696_v60  ;;  %v2357_v5 = vpack.c.bf16 %v696_v60, %v692_v54  ;;  %v807_v7 = vand.u32 4294901760, %v2341_v61 }
  0x11   :  { %2110 = vmatprep.subr.bf16.mxu1 %v2042_v52  ;;  %2047 = vmatprep.subr.bf16.mxu0 %v2046_v31  ;;  %v2362_v8 = vand.u32 4294901760, %v148_v0  ;;  %v698_v10 = vand.u32 4294901760, %v46_v3  ;;  %v2370_v13 = vsub.f32 %v17_v62, %v694_v6  ;;  %v2054_v31 = vpack.c.bf16 %v181_v26, %v169_v22 }
  0x12   :  { %2111 = vmatpush1.bf16.msra.mxu1 %v2044_v56  ;;  %v159_v9 = vsub.f32 %v2336_v58, %v2352_v1  ;;  %v819_v11 = vand.u32 4294901760, %v2355_v4  ;;  %v808_v15 = vsub.f32 %v2341_v61, %v807_v7  ;;  %v2070_v42 = vpack.c.bf16 %v2355_v4, %v2341_v61 }
  0x13   :  { %139 = vmatmul.mubr.f32.gmra.mrb[2].mxu1 %v2339_v59  ;;  %253 = vmatmul.mubr.f32.vlgmr.msra.gmra.mrb[0].mxu0 %v2261_v19  ;;  %v2372_v14 = vsub.f32 %v46_v3, %v698_v10  ;;  %v813_v32 = vand.u32 4294901760, %v2370_v13  ;;  %v2398_v12 = vpack.c.bf16 %v698_v10, %v694_v6  ;;  %v2056_v43 = vpack.c.bf16 %v187_v29, %v175_v27  ;;  %v19_v27 = vld [vmem:[%s2626_s1 + $0x20] sm:$0xff] }
  0x14   :  { %144 = vmatprep.mubr.f32.mxu1 %v2213_v2  ;;  %2049 = vmatpush1.bf16.msra.mxu0 %v2048_v63  ;;  %v820_v24 = vsub.f32 %v2355_v4, %v819_v11  ;;  %v2383_v28 = vand.u32 4294901760, %v159_v9  ;;  %v809_v35 = vand.u32 4294901760, %v808_v15  ;;  %v52_v21 = vsel %vm38_vm0, %v24_v18, 0 }
  0x15   :  { %258 = vmatprep.mubr.f32.mxu0 %v2213_v2  ;;  %2051 = vmatprep.subr.bf16.mxu0 %v2255_v16  ;;  %v825_v34 = vand.u32 4294901760, %v2372_v14  ;;  %v814_v17 = vsub.f32 %v2370_v13, %v813_v32  ;;  %v1331_v29 = vand.u32 4294901760, %v19_v27  ;;  %v1334_v44 = vand.u32 4294901760, %v52_v21 }
  0x16   :  { %2063 = vmatprep.subr.bf16.mxu1 %v2357_v5  ;;  %v821_v36 = vand.u32 4294901760, %v820_v24  ;;  %v2078_v56 = vpack.c.bf16 %v819_v11, %v807_v7 }
  0x17   :  { %150 = vmatmul.mubr.f32.gmra.mrb[4].mxu1 %v2362_v8  ;;  %260 = vmatmul.mubr.f32.gmra.mrb[2].mxu0 %v2268_v23  ;;  %v826_v22 = vsub.f32 %v2372_v14, %v825_v34  ;;  %v815_v37 = vand.u32 4294901760, %v814_v17  ;;  %v2451_v45 = vpack.c.bf16 %v1334_v44, %v1331_v29  ;;  %v2453_v46 = vsub.f32 %v19_v27, %v1331_v29 }
  0x18   :  { %155 = vmatprep.mubr.f32.mxu1 %v2213_v2  ;;  %352 = vmatprep.mubr.f32.mxu0 %v2213_v2  ;;  %v2066_v26 = vpack.c.bf16 %v821_v36, %v809_v35  ;;  %v2455_v47 = vsub.f32 %v52_v21, %v1334_v44  ;;  %v2080_v61 = vpack.c.bf16 %v825_v34, %v813_v32 }
  0x19   :  { %v827_v38 = vand.u32 4294901760, %v826_v22  ;;  %v1440_v48 = vand.u32 4294901760, %v2453_v46 }
  0x1a   :  { %v1447_v52 = vand.u32 4294901760, %v2455_v47  ;;  %v2094_v62 = vpack.c.bf16 %v2455_v47, %v2453_v46 }
  0x1b   :  { %161 = vmatmul.mubr.f32.gmra.mrb[6].mxu1 %v2383_v28  ;;  %355 = vmatmul.mubr.f32.vlgmr.msra.gmra.mrb[0].mxu0 %v2275_v25  ;;  %v2068_v41 = vpack.c.bf16 %v827_v38, %v815_v37 }
  0x1c   :  { %265 = vmatprep.mubr.f32.mxu1 %v2213_v2  ;;  %2053 = vmatpush1.bf16.msra.mxu0 %v2263_v20  ;;  %v1448_v53 = vsub.f32 %v2455_v47, %v1447_v52 }
  0x1d   :  { %360 = vmatprep.mubr.f32.mxu0 %v2213_v2  ;;  %2055 = vmatprep.subr.bf16.mxu0 %v2054_v31 }
  0x1e   :  { %v1449_v55 = vand.u32 4294901760, %v1448_v53 }
  0x1f   :  { %267 = vmatmul.mubr.f32.vlgmr.msra.gmra.mrb[4].mxu1 %v2308_v40  ;;  %363 = vmatmul.mubr.f32.gmra.mrb[2].mxu0 %v2285_v30 }
  0x20   :  { %272 = vmatprep.mubr.f32.mxu1 %v2213_v2  ;;  %368 = vmatprep.mubr.f32.mxu0 %v2213_v2 }
  0x21   :  { %2065 = vmatpush1.bf16.msra.mxu1 %v2398_v12 }
  0x22   :  { %2067 = vmatprep.subr.bf16.mxu1 %v2066_v26 }
  0x23   :  { %274 = vmatmul.mubr.f32.gmra.mrb[6].mxu1 %v2324_v50  ;;  %371 = vmatmul.mubr.f32.gmra.mrb[4].mxu0 %v2322_v49 }
  0x24   :  { %760 = vmatprep.mubr.f32.mxu1 %v2213_v2  ;;  %376 = vmatprep.mubr.f32.mxu0 %v2213_v2 }
  0x27   :  { %766 = vmatmul.mubr.f32.vlgmr.msra.gmra.mrb[8].mxu1 %v2326_v51  ;;  %379 = vmatmul.mubr.f32.gmra.mrb[6].mxu0 %v2336_v58 }
  0x28   :  { %771 = vmatprep.mubr.f32.mxu1 %v2213_v2  ;;  %453 = vmatprep.mubr.f32.mxu0 %v2213_v2 }
  0x29   :  { %2069 = vmatpush1.bf16.msra.mxu1 %v2068_v41 }
  0x2a   :  { %2071 = vmatprep.subr.bf16.mxu1 %v2070_v42 }
  0x2b   :  { %777 = vmatmul.mubr.f32.gmra.mrb[10].mxu1 %v2339_v59  ;;  %457 = vmatmul.mubr.f32.vlgmr.msra.gmra.mrb[0].mxu0 %v2293_v33 }
  0x2c   :  { %2057 = vmatpush1.bf16.msra.mxu0 %v2056_v43  ;;  %782 = vmatprep.mubr.f32.mxu1 %v2213_v2 }
  0x2d   :  { %462 = vmatprep.mubr.f32.mxu0 %v2213_v2  ;;  %2059 = vmatprep.subr.bf16.mxu0 %v2255_v16  ;;  %v2072_v16 = vpack.c.bf16 %v2372_v14, %v2370_v13 }
  0x2f   :  { %788 = vmatmul.mubr.f32.gmra.mrb[12].mxu1 %v2362_v8  ;;  %466 = vmatmul.mubr.f32.gmra.mrb[2].mxu0 %v2306_v39 }
  0x30   :  { %793 = vmatprep.mubr.f32.mxu1 %v2213_v2  ;;  %471 = vmatprep.mubr.f32.mxu0 %v2213_v2 }
  0x33   :  { %799 = vmatmul.mubr.f32.gmra.mrb[14].mxu1 %v2383_v28  ;;  %475 = vmatmul.mubr.f32.gmra.mrb[4].mxu0 %v2333_v57 }
  0x34   :  { %889 = vmatprep.mubr.f32.mxu1 %v2213_v2  ;;  %480 = vmatprep.mubr.f32.mxu0 %v2213_v2 }
  0x37   :  { %891 = vmatmul.mubr.f32.vlgmr.msra.gmra.mrb[8].mxu1 %v2261_v19  ;;  %484 = vmatmul.mubr.f32.gmra.mrb[6].mxu0 %v2352_v1 }
  0x38   :  { %896 = vmatprep.mubr.f32.mxu1 %v2213_v2  ;;  %566 = vmatprep.mubr.f32.mxu0 %v2213_v2 }
  0x39   :  { %2073 = vmatpush1.bf16.msra.mxu1 %v2072_v16 }
  0x3a   :  { %2075 = vmatprep.subr.bf16.mxu1 %v2357_v5 }
  0x3b   :  { %898 = vmatmul.mubr.f32.gmra.mrb[10].mxu1 %v2268_v23  ;;  %568 = vmatmul.mubr.f32.vlgmr.msra.gmra.mrb[0].mxu0 %v2261_v19 }
  0x3c   :  { %2061 = vmatpush1.bf16.msra.mxu0 %v2263_v20  ;;  %903 = vmatprep.mubr.f32.mxu1 %v2213_v2  ;;  %v1441_v20 = vsub.f32 %v2453_v46, %v1440_v48 }
  0x3d   :  { %573 = vmatprep.mubr.f32.mxu0 %v2213_v2  ;;  %2087 = vmatprep.subr.bf16.mxu0 %v2451_v45 }
  0x3e   :  { %v1442_v54 = vand.u32 4294901760, %v1441_v20 }
  0x3f   :  { %905 = vmatmul.mubr.f32.gmra.mrb[12].mxu1 %v2308_v40  ;;  %575 = vmatmul.mubr.f32.gmra.mrb[2].mxu0 %v2268_v23 }
  0x40   :  { %910 = vmatprep.mubr.f32.mxu1 %v2213_v2  ;;  %580 = vmatprep.mubr.f32.mxu0 %v2213_v2  ;;  %v2090_v60 = vpack.c.bf16 %v1449_v55, %v1442_v54 }
  0x43   :  { %912 = vmatmul.mubr.f32.gmra.mrb[14].mxu1 %v2324_v50  ;;  %582 = vmatmul.mubr.f32.gmra.mrb[4].mxu0 %v2308_v40 }
  0x44   :  { %990 = vmatprep.mubr.f32.mxu1 %v2213_v2  ;;  %587 = vmatprep.mubr.f32.mxu0 %v2213_v2 }
  0x47   :  { %993 = vmatmul.mubr.f32.vlgmr.msra.gmra.mrb[8].mxu1 %v2275_v25  ;;  %589 = vmatmul.mubr.f32.gmra.mrb[6].mxu0 %v2324_v50 }
  0x48   :  { %998 = vmatprep.mubr.f32.mxu1 %v2213_v2  ;;  %663 = vmatprep.mubr.f32.mxu0 %v2213_v2 }
  0x49   :  { %2077 = vmatpush1.bf16.msra.mxu1 %v2398_v12 }
  0x4a   :  { %2079 = vmatprep.subr.bf16.mxu1 %v2078_v56 }
  0x4b   :  { %1001 = vmatmul.mubr.f32.gmra.mrb[10].mxu1 %v2285_v30  ;;  %665 = vmatmul.mubr.f32.vlgmr.msra.gmra.mrb[0].mxu0 %v2261_v19 }
  0x4c   :  { %1006 = vmatprep.mubr.f32.mxu1 %v2213_v2  ;;  %2089 = vmatpush3.bf16.msra.mxu0 %v2451_v45 }
  0x4d   :  { %670 = vmatprep.mubr.f32.mxu0 %v2213_v2  ;;  %2091 = vmatprep.subr.bf16.mxu0 %v2090_v60 }
  0x4f   :  { %1009 = vmatmul.mubr.f32.gmra.mrb[12].mxu1 %v2322_v49  ;;  %672 = vmatmul.mubr.f32.gmra.mrb[2].mxu0 %v2268_v23 }
  0x50   :  { %1014 = vmatprep.mubr.f32.mxu1 %v2213_v2  ;;  %677 = vmatprep.mubr.f32.mxu0 %v2213_v2 }
  0x53   :  { %1017 = vmatmul.mubr.f32.gmra.mrb[14].mxu1 %v2336_v58  ;;  %679 = vmatmul.mubr.f32.gmra.mrb[4].mxu0 %v2308_v40 }
  0x54   :  { %1091 = vmatprep.mubr.f32.mxu1 %v2213_v2  ;;  %684 = vmatprep.mubr.f32.mxu0 %v2213_v2 }
  0x57   :  { %1095 = vmatmul.mubr.f32.vlgmr.msra.gmra.mrb[8].mxu1 %v2293_v33  ;;  %686 = vmatmul.mubr.f32.gmra.mrb[6].mxu0 %v2324_v50 }
  0x58   :  { %1100 = vmatprep.mubr.f32.mxu1 %v2213_v2  ;;  %1982 = vmatprep.mubr.f32.mxu0 %v2326_v51  ;;  %v2102_v51 = vpack.c.bf16 %v1447_v52, %v1440_v48 }
  0x59   :  { %2081 = vmatpush1.bf16.msra.mxu1 %v2080_v61 }
  0x5a   :  { %2083 = vmatprep.subr.bf16.mxu1 %v2357_v5 }
  0x5b   :  { %1104 = vmatmul.mubr.f32.gmra.mrb[10].mxu1 %v2306_v39  ;;  %1983 = vmatmul.mubr.f32.vlgmr.msra.gmra.mrb[8].mxu0 %v2339_v59 }
  0x5c   :  { %1109 = vmatprep.mubr.f32.mxu1 %v2213_v2  ;;  %2093 = vmatpush3.bf16.msra.mxu0 %v2090_v60 }
  0x5d   :  { %1985 = vmatprep.mubr.f32.mxu0 %v2362_v8  ;;  %2095 = vmatprep.subr.bf16.mxu0 %v2094_v62 }
  0x5f   :  { %1113 = vmatmul.mubr.f32.gmra.mrb[12].mxu1 %v2333_v57  ;;  %1986 = vmatmul.mubr.f32.gmra.mrb[10].mxu0 %v2383_v28 }
  0x60   :  { %1118 = vmatprep.mubr.f32.mxu1 %v2213_v2  ;;  %1992 = vmatprep.mubr.f32.mxu0 %v2261_v19 }
  0x63   :  { %1122 = vmatmul.mubr.f32.gmra.mrb[14].mxu1 %v2352_v1  ;;  %1993 = vmatmul.mubr.f32.vlgmr.msra.gmra.mrb[8].mxu0 %v2268_v23 }
  0x64   :  { %1204 = vmatprep.mubr.f32.mxu1 %v2213_v2  ;;  %2097 = vmatpush3.bf16.msra.mxu0 %v2094_v62 }
  0x65   :  { %1995 = vmatprep.mubr.f32.mxu0 %v2308_v40  ;;  %2099 = vmatprep.subr.bf16.mxu0 %v2451_v45 }
  0x67   :  { %1206 = vmatmul.mubr.f32.vlgmr.msra.gmra.mrb[8].mxu1 %v2261_v19  ;;  %1996 = vmatmul.mubr.f32.gmra.mrb[10].mxu0 %v2324_v50 }
  0x68   :  { %1211 = vmatprep.mubr.f32.mxu1 %v2213_v2  ;;  %2002 = vmatprep.mubr.f32.mxu0 %v2275_v25 }
  0x69   :  { %2085 = vmatpush1.bf16.msra.mxu1 %v2398_v12 }
  0x6b   :  { %1213 = vmatmul.mubr.f32.gmra.mrb[10].mxu1 %v2268_v23  ;;  %2003 = vmatmul.mubr.f32.vlgmr.msra.gmra.mrb[8].mxu0 %v2285_v30 }
  0x6c   :  { %1218 = vmatprep.mubr.f32.mxu1 %v2213_v2  ;;  %2101 = vmatpush3.bf16.msra.mxu0 %v2451_v45 }
  0x6d   :  { %2005 = vmatprep.mubr.f32.mxu0 %v2322_v49  ;;  %2103 = vmatprep.subr.bf16.mxu0 %v2102_v51 }
  0x6f   :  { %1220 = vmatmul.mubr.f32.gmra.mrb[12].mxu1 %v2308_v40  ;;  %2006 = vmatmul.mubr.f32.gmra.mrb[10].mxu0 %v2336_v58 }
  0x70   :  { %1225 = vmatprep.mubr.f32.mxu1 %v2213_v2  ;;  %2012 = vmatprep.mubr.f32.mxu0 %v2293_v33 }
  0x73   :  { %1227 = vmatmul.mubr.f32.gmra.mrb[14].mxu1 %v2324_v50  ;;  %2013 = vmatmul.mubr.f32.vlgmr.msra.gmra.mrb[8].mxu0 %v2306_v39 }
  0x74   :  { %1301 = vmatprep.mubr.f32.mxu1 %v2213_v2  ;;  %2105 = vmatpush3.bf16.msra.mxu0 %v2102_v51 }
  0x75   :  { %2015 = vmatprep.mubr.f32.mxu0 %v2333_v57  ;;  %2107 = vmatprep.subr.bf16.mxu0 %v2451_v45 }
  0x77   :  { %1303 = vmatmul.mubr.f32.vlgmr.msra.gmra.mrb[8].mxu1 %v2261_v19  ;;  %2016 = vmatmul.mubr.f32.gmra.mrb[10].mxu0 %v2352_v1 }
  0x78   :  { %1308 = vmatprep.mubr.f32.mxu1 %v2213_v2  ;;  %2022 = vmatprep.mubr.f32.mxu0 %v2261_v19 }
  0x7b   :  { %1310 = vmatmul.mubr.f32.gmra.mrb[10].mxu1 %v2268_v23  ;;  %2023 = vmatmul.mubr.f32.vlgmr.msra.gmra.mrb[8].mxu0 %v2268_v23 }
  0x7c   :  { %1315 = vmatprep.mubr.f32.mxu1 %v2213_v2  ;;  %2109 = vmatpush3.bf16.msra.mxu0 %v2451_v45 }
  0x7d   :  { %2025 = vmatprep.mubr.f32.mxu0 %v2308_v40 }
  0x7f   :  { %1317 = vmatmul.mubr.f32.gmra.mrb[12].mxu1 %v2308_v40  ;;  %2026 = vmatmul.mubr.f32.gmra.mrb[10].mxu0 %v2324_v50 }
  0x80   :  { %1322 = vmatprep.mubr.f32.mxu1 %v2213_v2  ;;  %2032 = vmatprep.mubr.f32.mxu0 %v2261_v19 }
  0x83   :  { %1324 = vmatmul.mubr.f32.gmra.mrb[14].mxu1 %v2324_v50  ;;  %2033 = vmatmul.mubr.f32.vlgmr.msra.gmra.mrb[8].mxu0 %v2268_v23 }
  0x84   :  { %2035 = vmatprep.mubr.f32.mxu0 %v2308_v40 }
  0x87   :  { %2036 = vmatmul.mubr.f32.gmra.mrb[10].mxu0 %v2324_v50 }
  0xe2   :  { %v129_v25 = vpop.f32.mrb[0].mxu1 }
  0xe3   :  { %v131_v30 = vpop.f32.mrb[1].mxu1 }
  0xe6   :  { %v140_v33 = vpop.f32.mrb[2].mxu1 }
  0xe7   :  { %v142_v39 = vpop.f32.mrb[3].mxu1 }
  0xf2   :  { %v268_v49 = vpop.f32.mrb[4].mxu1 }
  0xf3   :  { %v270_v57 = vpop.f32.mrb[5].mxu1 }
  0xf6   :  { %v275_v58 = vpop.f32.mrb[6].mxu1 }
  0xf7   :  { %v277_v59 = vpop.f32.mrb[7].mxu1 }
 0x11e   :  { %v666_v63 = vpop.f32.mrb[0].mxu0 }
 0x11f   :  { %v2112_v2 = vadd.f32 %v666_v63, %v129_v25  ;;  %v668_v0 = vpop.f32.mrb[1].mxu0 }
 0x120   :  { %v2113_v19 = vadd.f32 %v668_v0, %v131_v30 }
 0x121   :  { %1918 = vst [vmem:[%s2628_s2] sm:$0xff] %v2112_v2 }
 0x122   :  { %1919 = vst [vmem:[%s2628_s2 + $0x8] sm:$0xff] %v2113_v19  ;;  %v673_v23 = vpop.f32.mrb[2].mxu0 }
 0x123   :  { %v2114_v40 = vadd.f32 %v673_v23, %v140_v33  ;;  %v675_v50 = vpop.f32.mrb[3].mxu0 }
 0x124   :  { %v2115_v1 = vadd.f32 %v675_v50, %v142_v39 }
 0x125   :  { %1923 = vst [vmem:[%s2628_s2 + $0x28] sm:$0xff] %v2114_v40 }
 0x126   :  { %1924 = vst [vmem:[%s2628_s2 + $0x30] sm:$0xff] %v2115_v1  ;;  %v680_v3 = vpop.f32.mrb[4].mxu0 }
 0x127   :  { %v2116_v4 = vadd.f32 %v680_v3, %v268_v49  ;;  %v682_v5 = vpop.f32.mrb[5].mxu0 }
 0x128   :  { %v2117_v6 = vadd.f32 %v682_v5, %v270_v57 }
 0x129   :  { %1928 = vst [vmem:[%s2628_s2 + $0x50] sm:$0xff] %v2116_v4 }
 0x12a   :  { %1929 = vst [vmem:[%s2628_s2 + $0x58] sm:$0xff] %v2117_v6  ;;  %v687_v7 = vpop.f32.mrb[6].mxu0 }
 0x12b   :  { %v2118_v8 = vadd.f32 %v687_v7, %v275_v58  ;;  %v689_v9 = vpop.f32.mrb[7].mxu0 }
 0x12c   :  { %v2119_v10 = vadd.f32 %v689_v9, %v277_v59 }
 0x12d   :  { %1933 = vst [vmem:[%s2628_s2 + $0x78] sm:$0x7] %v2118_v8 }
 0x12e   :  { %1934 = vst [vmem:[%s2628_s2 + $0x80] sm:$0x7] %v2119_v10 }
 0x14a   :  { %v1304_v11 = vpop.f32.mrb[8].mxu1 }
 0x14b   :  { %1920 = vst [vmem:[%s2628_s2 + $0x10] sm:$0xff] %v1304_v11  ;;  %v1306_v13 = vpop.f32.mrb[9].mxu1 }
 0x14c   :  { %1921 = vst [vmem:[%s2628_s2 + $0x18] sm:$0xff] %v1306_v13 }
 0x14e   :  { %v1311_v14 = vpop.f32.mrb[10].mxu1 }
 0x14f   :  { %1925 = vst [vmem:[%s2628_s2 + $0x38] sm:$0xff] %v1311_v14  ;;  %v1313_v15 = vpop.f32.mrb[11].mxu1 }
 0x150   :  { %1926 = vst [vmem:[%s2628_s2 + $0x40] sm:$0xff] %v1313_v15 }
 0x152   :  { %v1318_v24 = vpop.f32.mrb[12].mxu1 }
 0x153   :  { %1930 = vst [vmem:[%s2628_s2 + $0x60] sm:$0xff] %v1318_v24  ;;  %v1320_v28 = vpop.f32.mrb[13].mxu1 }
 0x154   :  { %1931 = vst [vmem:[%s2628_s2 + $0x68] sm:$0xff] %v1320_v28 }
 0x156   :  { %v1325_v31 = vpop.f32.mrb[14].mxu1  ;;  %v2034_v32 = vpop.f32.mrb[8].mxu0 }
 0x157   :  { %1935 = vst [vmem:[%s2628_s2 + $0x88] sm:$0x7] %v1325_v31  ;;  %v1327_v34 = vpop.f32.mrb[15].mxu1  ;;  %1927 = vst [vmem:[%s2628_s2 + $0x48] sm:$0xff] %v2034_v32  ;;  %v1896_v35 = vpop.f32.mrb[9].mxu0 }
 0x158   :  { %1936 = vst [vmem:[%s2628_s2 + $0x90] sm:$0x7] %v1327_v34  ;;  %1922 = vst [vmem:[%s2628_s2 + $0x20] sm:$0xff] %v1896_v35 }
 0x15a   :  { %v2037_v36 = vpop.f32.mrb[10].mxu0 }
 0x15b   :  { %1937 = vst [vmem:[%s2628_s2 + $0x98] sm:$0x7] %v2037_v36  ;;  %v1908_v12 = vpop.f32.mrb[11].mxu0 }
 0x15c   :  { %1932 = vst [vmem:[%s2628_s2 + $0x70] sm:$0xff] %v1908_v12 }

// kernel: longconv_forward.2
= control target key start
LH: loop header
LB: loop body
LE: loop exit
PB: predicated region body
PF: predicated region fallthrough
CT: control target
= control target key end

     0   :  { %vm101_vm0 = vcmask 613376   ;;  %vm294_vm1 = vcmask 1042432   ;;  %s13366_s12 = smov 127   ;;  %s13367_s16 = smov 126   ;;  %vm9205_vm2 = vcmask 7168   ;;  %vm9248_vm3 = vcmask 556032   ;;  %s18737_s1 = inlined_call_operand.vmem [shape: f32[75,3], index: 1, kind: input, shape index: {}]   ;;  %s18738_s0 = inlined_call_operand.vmem [shape: f32[512,75], index: 0, kind: input, shape index: {}]   ;;  %s18739_s2 = inlined_call_operand.vmem [shape: f32[1,3], index: 2, kind: input, shape index: {}]   ;;  %s18740_s3 = inlined_call_operand.vmem [shape: f32[3,8,512], index: 3, kind: input, shape index: {}]   ;;  %s18741_s4 = inlined_call_operand.vmem [shape: f32[8,324], index: 4, kind: input, shape index: {}]   ;;  %s18742_s5 = inlined_call_operand.vmem [shape: f32[1,324], index: 5, kind: output, shape index: {}]  }
   0x1   :  { %v84_v0 = vld [vmem:[%s18737_s1] sm:$0xff]  ;;  %v85_v1 = vld [vmem:[%s18737_s1 + $0x8] sm:$0xff]  ;;  %v13409_v2 = vld [vmem:[%s18737_s1 + $0x10] sm:$0xff] }
   0x2   :  { %v299_v3 = vand.u32 4294901760, %v84_v0  ;;  %v302_v4 = vand.u32 4294901760, %v85_v1  ;;  %v13414_v5 = vld [vmem:[%s18737_s1 + $0x18] sm:$0xff]  ;;  %v305_v6 = vand.u32 4294901760, %v13409_v2  ;;  %v13420_v7 = vld [vmem:[%s18737_s1 + $0x20] sm:$0xff]  ;;  %v13425_v8 = vld [vmem:[%s18737_s1 + $0x28] sm:$0xff] }
   0x3   :  { %v308_v9 = vand.u32 4294901760, %v13414_v5  ;;  %v18760_v10 = vand.u32 4294901760, %v13420_v7  ;;  %v18759_v11 = vand.u32 4294901760, %v13425_v8  ;;  %v13433_v12 = vld [vmem:[%s18737_s1 + $0x30] sm:$0xff]  ;;  %v13438_v13 = vld [vmem:[%s18737_s1 + $0x38] sm:$0xff]  ;;  %v20_v16 = vld [vmem:[%s18738_s0] sm:$0xff] }
   0x4   :  { %v13440_v14 = vpack.c.bf16 %v302_v4, %v299_v3  ;;  %v93_v15 = vld [vmem:[%s18737_s1 + $0x48] sm:$0x7]  ;;  %v18757_v18 = vand.u32 4294901760, %v13433_v12  ;;  %v103_v19 = vsel %vm101_vm0, %v20_v16, 0  ;;  %v22_v21 = vld [vmem:[%s18738_s0 + $0x10] sm:$0xff]  ;;  %v23_v22 = vld [vmem:[%s18738_s0 + $0x18] sm:$0xff]  ;;  %v13484_v29 = vsub.f32 %v84_v0, %v299_v3 }
   0x5   :  { %v13452_v17 = vpack.c.bf16 %v308_v9, %v305_v6  ;;  %v21_v20 = vld [vmem:[%s18738_s0 + $0x8] sm:$0xff]  ;;  %v13470_v23 = vpack.c.bf16 %v18759_v11, %v18760_v10  ;;  %v18755_v24 = vand.u32 4294901760, %v13438_v13  ;;  %v13476_v25 = vld [vmem:[%s18737_s1 + $0x40] sm:$0xff]  ;;  %v13478_v26 = vand.u32 4294901760, %v103_v19  ;;  %v26_v54 = vld [vmem:[%s18738_s0 + $0x30] sm:$0xff] }
   0x6   :  { %11702 = vmatprep.subr.bf16.mxu0 %v13440_v14  ;;  %v106_v27 = vsel %vm101_vm0, %v21_v20, 0  ;;  %19691 = vst [vmem:[#allocation6_spill] sm:$0xff] %v13484_v29  ;;  %v13486_v30 = vsub.f32 %v85_v1, %v302_v4  ;;  %v109_v31 = vsel %vm101_vm0, %v22_v21, 0  ;;  %v24_v32 = vld [vmem:[%s18738_s0 + $0x20] sm:$0xff]  ;;  %v25_v33 = vld [vmem:[%s18738_s0 + $0x28] sm:$0xff]  ;;  %v13497_v34 = vsel %vm294_vm1, %v93_v15, 0 }
   0x7   :  { %19687 = vst [vmem:[#allocation2_spill] sm:$0xff] %v13452_v17  ;;  %19688 = vst [vmem:[#allocation3_spill] sm:$0xff] %v13470_v23  ;;  %11704 = vmatpush3.bf16.msra.mxu0 %v13440_v14  ;;  %v13482_v28 = vand.u32 4294901760, %v106_v27  ;;  %v13500_v35 = vsub.f32 %v103_v19, %v13478_v26  ;;  %v13502_v36 = vand.u32 4294901760, %v109_v31  ;;  %v112_v37 = vsel %vm101_vm0, %v23_v22, 0  ;;  %v27_v59 = vld [vmem:[%s18738_s0 + $0x38] sm:$0xff] }
   0x8   :  { %19689 = vst [vmem:[#allocation4_spill] sm:$0xff] %v13478_v26  ;;  %19692 = vst [vmem:[#allocation7_spill] sm:$0xff] %v13486_v30  ;;  %11706 = vmatprep.subr.bf16.mxu0 %v13452_v17  ;;  %v18753_v38 = vand.u32 4294901760, %v13476_v25  ;;  %v18751_v40 = vand.u32 4294901760, %v13484_v29  ;;  %v18750_v41 = vand.u32 4294901760, %v13486_v30  ;;  %v13512_v43 = vand.u32 4294901760, %v112_v37 }
   0x9   :  { %19690 = vst [vmem:[#allocation5_spill] sm:$0xff] %v13482_v28  ;;  %19693 = vst [vmem:[#allocation8_spill] sm:$0xff] %v13500_v35  ;;  %v13507_v39 = vsub.f32 %v106_v27, %v13482_v28  ;;  %v18747_v42 = vand.u32 4294901760, %v13500_v35  ;;  %v115_v44 = vsel %vm101_vm0, %v24_v32, 0  ;;  %v118_v45 = vsel %vm101_vm0, %v25_v33, 0  ;;  %v28_v60 = vld [vmem:[%s18738_s0 + $0x40] sm:$0xff] }
   0xa   :  { %19694 = vst [vmem:[#allocation9_spill] sm:$0xff] %v13502_v36  ;;  %19696 = vst [vmem:[#allocation11_spill] sm:$0xff] %v13512_v43  ;;  %v13521_v46 = vpack.c.bf16 %v18755_v24, %v18757_v18  ;;  %v18752_v47 = vand.u32 4294901760, %v13497_v34  ;;  %v1017_v48 = vsub.f32 %v13484_v29, %v18751_v40  ;;  %v13528_v49 = vsub.f32 %v109_v31, %v13502_v36  ;;  %v29_v61 = vld [vmem:[%s18738_s0 + $0x48] sm:$0xff]  ;;  %v30_v22 = vld [vmem:[%s18738_s0 + $0x50] sm:$0xff] }
   0xb   :  { %19695 = vst [vmem:[#allocation10_spill] sm:$0xff] %v13507_v39  ;;  %11708 = vmatpush3.bf16.msra.mxu0 %v13452_v17  ;;  %v376_v50 = vsub.f32 %v13500_v35, %v18747_v42  ;;  %v1024_v51 = vsub.f32 %v13486_v30, %v18750_v41  ;;  %v13537_v52 = vand.u32 4294901760, %v115_v44  ;;  %v13539_v53 = vand.u32 4294901760, %v118_v45 }
   0xc   :  { %19697 = vst [vmem:[#allocation12_spill] sm:$0xff] %v13521_v46  ;;  %19698 = vst [vmem:[#allocation13_spill] sm:$0xff] %v13528_v49  ;;  %11710 = vmatprep.subr.bf16.mxu0 %v13470_v23  ;;  %v18746_v55 = vand.u32 4294901760, %v13507_v39  ;;  %v13546_v57 = vsub.f32 %v112_v37, %v13512_v43  ;;  %v13565_v62 = vpack.c.bf16 %v18752_v47, %v18753_v38  ;;  %v18743_v63 = vand.u32 4294901760, %v13528_v49 }
   0xd   :  { %19699 = vst [vmem:[#allocation14_spill] sm:$0xff] %v13537_v52  ;;  %19700 = vst [vmem:[#allocation15_spill] sm:$0xff] %v13539_v53  ;;  %v377_v56 = vand.u32 4294901760, %v376_v50  ;;  %v13549_v58 = vsub.f32 %v115_v44, %v13537_v52  ;;  %v121_v0 = vsel %vm101_vm0, %v26_v54, 0  ;;  %v1018_v1 = vand.u32 4294901760, %v1017_v48 }
   0xe   :  { %19701 = vst [vmem:[#allocation16_spill] sm:$0xff] %v13546_v57  ;;  %19703 = vst [vmem:[#allocation18_spill] sm:$0xff] %v13565_v62  ;;  %v1025_v3 = vand.u32 4294901760, %v1024_v51  ;;  %v13571_v4 = vsub.f32 %v118_v45, %v13539_v53  ;;  %v13573_v15 = vand.u32 4294901760, %v121_v0  ;;  %v386_v16 = vsub.f32 %v13507_v39, %v18746_v55  ;;  %v31_v45 = vld [vmem:[%s18738_s0 + $0x58] sm:$0xff] }
   0xf   :  { %19702 = vst [vmem:[#allocation17_spill] sm:$0xff] %v13549_v58  ;;  %11712 = vmatpush3.bf16.msra.mxu0 %v13470_v23  ;;  %11025 = vmatprep.mubr.f32.mxu0 %v377_v56  ;;  %v124_v19 = vsel %vm101_vm0, %v27_v59, 0  ;;  %v127_v20 = vsel %vm101_vm0, %v28_v60, 0  ;;  %v130_v21 = vsel %vm101_vm0, %v29_v61, 0  ;;  %v18744_v27 = vand.u32 4294901760, %v13546_v57  ;;  %v32_v60 = vld [vmem:[%s18738_s0 + $0x60] sm:$0xff] }
  0x10   :  { %11714 = vmatprep.subr.bf16.mxu0 %v13521_v46  ;;  %19704 = vst [vmem:[#allocation19_spill] sm:$0xff] %v13571_v4  ;;  %19705 = vst [vmem:[#allocation20_spill] sm:$0xff] %v13573_v15  ;;  %v18745_v31 = vand.u32 4294901760, %v13549_v58  ;;  %v13587_v32 = vsub.f32 %v121_v0, %v13573_v15  ;;  %v13589_v33 = vand.u32 4294901760, %v124_v19  ;;  %v396_v37 = vsub.f32 %v13528_v49, %v18743_v63 }
  0x11   :  { %v13595_v44 = vand.u32 4294901760, %v127_v20  ;;  %v11721_v48 = vpack.c.bf16 %v1025_v3, %v1018_v1  ;;  %v18748_v50 = vand.u32 4294901760, %v13571_v4  ;;  %v13602_v51 = vand.u32 4294901760, %v130_v21 }
  0x12   :  { %19706 = vst [vmem:[#allocation21_spill] sm:$0xff] %v13587_v32  ;;  %19707 = vst [vmem:[#allocation22_spill] sm:$0xff] %v13589_v33  ;;  %v133_v54 = vsel %vm101_vm0, %v30_v22, 0  ;;  %v18749_v56 = vand.u32 4294901760, %v13587_v32  ;;  %v13607_v59 = vsub.f32 %v124_v19, %v13589_v33  ;;  %v387_v61 = vand.u32 4294901760, %v386_v16 }
  0x13   :  { %11716 = vmatpush3.bf16.msra.mxu0 %v13521_v46  ;;  %19708 = vst [vmem:[#allocation23_spill] sm:$0xff] %v13595_v44  ;;  %19709 = vst [vmem:[#allocation24_spill] sm:$0xff] %v13602_v51  ;;  %v406_v0 = vsub.f32 %v13546_v57, %v18744_v27  ;;  %v416_v1 = vsub.f32 %v13549_v58, %v18745_v31  ;;  %v136_v3 = vsel %vm101_vm0, %v31_v45, 0  ;;  %v397_v22 = vand.u32 4294901760, %v396_v37  ;;  %v33_v45 = vld [vmem:[%s18738_s0 + $0x68] sm:$0xff] }
  0x14   :  { %11718 = vmatprep.subr.bf16.mxu0 %v13565_v62  ;;  %19710 = vst [vmem:[#allocation25_spill] sm:$0xff] %v13607_v59  ;;  %v13621_v19 = vsub.f32 %v127_v20, %v13595_v44  ;;  %v13623_v63 = vand.u32 4294901760, %v133_v54  ;;  %v426_v16 = vsub.f32 %v13571_v4, %v18748_v50  ;;  %v13629_v27 = vsub.f32 %v130_v21, %v13602_v51 }
  0x15   :  { %v139_v31 = vsel %vm101_vm0, %v32_v60, 0  ;;  %v436_v20 = vsub.f32 %v13587_v32, %v18749_v56  ;;  %v18754_v37 = vand.u32 4294901760, %v13607_v59  ;;  %v13639_v55 = vand.u32 4294901760, %v136_v3  ;;  %v34_v60 = vld [vmem:[%s18738_s0 + $0x70] sm:$0xff] }
  0x16   :  { %19711 = vst [vmem:[#allocation26_spill] sm:$0xff] %v13621_v19  ;;  %19712 = vst [vmem:[#allocation27_spill] sm:$0xff] %v13623_v63  ;;  %v407_v42 = vand.u32 4294901760, %v406_v0  ;;  %v417_v50 = vand.u32 4294901760, %v416_v1  ;;  %v13644_v21 = vsub.f32 %v13409_v2, %v305_v6  ;;  %v18758_v56 = vand.u32 4294901760, %v13621_v19  ;;  %v35_v2 = vld [vmem:[%s18738_s0 + $0x78] sm:$0xff] }
  0x17   :  { %11720 = vmatpush3.bf16.msra.mxu0 %v13565_v62  ;;  %19713 = vst [vmem:[#allocation28_spill] sm:$0xff] %v13629_v27  ;;  %19714 = vst [vmem:[#allocation29_spill] sm:$0xff] %v13639_v55  ;;  %v13651_v41 = vsub.f32 %v133_v54, %v13623_v63  ;;  %v13653_v40 = vand.u32 4294901760, %v139_v31  ;;  %v427_v6 = vand.u32 4294901760, %v426_v16  ;;  %v18762_v0 = vand.u32 4294901760, %v13629_v27  ;;  %v36_v16 = vld [vmem:[%s18738_s0 + $0x80] sm:$0xff] }
  0x18   :  { %11722 = vmatprep.subr.bf16.mxu0 %v11721_v48  ;;  %v18756_v1 = vand.u32 4294901760, %v13644_v21  ;;  %v437_v54 = vand.u32 4294901760, %v436_v20  ;;  %v145_v47 = vsel %vm101_vm0, %v34_v60, 0  ;;  %v148_v20 = vsel %vm101_vm0, %v35_v2, 0 }
  0x19   :  { %19715 = vst [vmem:[#allocation30_spill] sm:$0xff] %v13651_v41  ;;  %19716 = vst [vmem:[#allocation31_spill] sm:$0xff] %v13653_v40  ;;  %v456_v60 = vsub.f32 %v13621_v19, %v18758_v56  ;;  %v13693_v24 = vand.u32 4294901760, %v145_v47  ;;  %v151_v18 = vsel %vm101_vm0, %v36_v16, 0  ;;  %v13703_v11 = vand.u32 4294901760, %v148_v20 }
  0x1a   :  { %11026 = vmatmul.mubr.f32.vlgmr.msra.gmra.mrb[0].mxu0 %v387_v61  ;;  %v142_v61 = vsel %vm101_vm0, %v33_v45, 0  ;;  %v13670_v45 = vsub.f32 %v136_v3, %v13639_v55  ;;  %v37_v3 = vld [vmem:[%s18738_s0 + $0x88] sm:$0xff] }
  0x1b   :  { %11724 = vmatpush3.bf16.msra.mxu0 %v11721_v48  ;;  %11028 = vmatprep.mubr.f32.mxu0 %v397_v22  ;;  %v13664_v48 = vsub.f32 %v13414_v5, %v308_v9  ;;  %v446_v22 = vsub.f32 %v13607_v59, %v18754_v37  ;;  %v13676_v38 = vand.u32 4294901760, %v142_v61  ;;  %v1031_v5 = vsub.f32 %v13644_v21, %v18756_v1 }
  0x1c   :  { %19717 = vst [vmem:[#allocation32_spill] sm:$0xff] %v13670_v45  ;;  %v13691_v37 = vsub.f32 %v139_v31, %v13653_v40  ;;  %19720 = vst [vmem:[#allocation35_spill] sm:$0xff] %v13693_v24  ;;  %v154_v31 = vsel %vm101_vm0, %v37_v3, 0  ;;  %v457_v56 = vand.u32 4294901760, %v456_v60  ;;  %v19724_v3 = vand.u32 4294901760, %v13651_v41 }
  0x1d   :  { %19718 = vst [vmem:[#allocation33_spill] sm:$0xff] %v13676_v38  ;;  %v18761_v9 = vand.u32 4294901760, %v13664_v48  ;;  %v1032_v1 = vand.u32 4294901760, %v1031_v5  ;;  %19721 = vst [vmem:[#allocation36_spill] sm:$0xff] %v13703_v11  ;;  %v38_v5 = vld [vmem:[%s18738_s0 + $0x90] sm:$0xff]  ;;  %v447_v10 = vand.u32 4294901760, %v446_v22 }
  0x1e   :  { %11029 = vmatmul.mubr.f32.gmra.mrb[2].mxu0 %v407_v42  ;;  %19719 = vst [vmem:[#allocation34_spill] sm:$0xff] %v13691_v37  ;;  %v13713_v42 = vsub.f32 %v145_v47, %v13693_v24  ;;  %v13722_v22 = vand.u32 4294901760, %v151_v18  ;;  %v157_v62 = vsel %vm101_vm0, %v38_v5, 0 }
  0x1f   :  { %11031 = vmatprep.mubr.f32.mxu0 %v417_v50  ;;  %v1038_v2 = vsub.f32 %v13664_v48, %v18761_v9  ;;  %v466_v50 = vsub.f32 %v13629_v27, %v18762_v0  ;;  %v13710_v9 = vsub.f32 %v142_v61, %v13676_v38  ;;  %v39_v0 = vld [vmem:[%s18738_s0 + $0x98] sm:$0xff]  ;;  %v476_v27 = vsub.f32 %v13651_v41, %v19724_v3  ;;  %v40_v61 = vld [vmem:[%s18738_s0 + $0xa0] sm:$0xff] }
  0x20   :  { %19723 = vst [vmem:[#allocation38_spill] sm:$0xff] %v13713_v42  ;;  %19725 = vst [vmem:[#allocation39_spill] sm:$0xff] %v13722_v22  ;;  %v160_v60 = vsel %vm101_vm0, %v39_v0, 0  ;;  %v19728_v3 = vand.u32 4294901760, %v13670_v45  ;;  %v13746_v0 = vand.u32 4294901760, %v157_v62 }
  0x21   :  { %19722 = vst [vmem:[#allocation37_spill] sm:$0xff] %v13710_v9  ;;  %v1039_v16 = vand.u32 4294901760, %v1038_v2  ;;  %v13727_v2 = vand.u32 4294901760, %v154_v31  ;;  %v467_v19 = vand.u32 4294901760, %v466_v50  ;;  %v18779_v41 = vand.u32 4294901760, %v13710_v9 }
  0x22   :  { %11032 = vmatmul.mubr.f32.gmra.mrb[4].mxu0 %v427_v6  ;;  %v486_v6 = vsub.f32 %v13670_v45, %v19728_v3  ;;  %v477_v5 = vand.u32 4294901760, %v476_v27  ;;  %v19729_v50 = vand.u32 4294901760, %v13691_v37  ;;  %19731 = vst [vmem:[#allocation43_spill] sm:$0xff] %v13746_v0  ;;  %v41_v3 = vld [vmem:[%s18738_s0 + $0xa8] sm:$0xff]  ;;  %v13771_v46 = vsub.f32 %v157_v62, %v13746_v0 }
  0x23   :  { %11034 = vmatprep.mubr.f32.mxu0 %v437_v54  ;;  %v11725_v47 = vpack.c.bf16 %v1039_v16, %v1032_v1  ;;  %19726 = vst [vmem:[#allocation40_spill] sm:$0xff] %v13727_v2  ;;  %v13731_v54 = vsub.f32 %v148_v20, %v13703_v11  ;;  %v163_v16 = vsel %vm101_vm0, %v40_v61, 0  ;;  %v13752_v1 = vsub.f32 %v154_v31, %v13727_v2 }
  0x24   :  { %v496_v20 = vsub.f32 %v13691_v37, %v19729_v50  ;;  %v13754_v61 = vand.u32 4294901760, %v160_v60  ;;  %v506_v50 = vsub.f32 %v13710_v9, %v18779_v41  ;;  %v19735_v37 = vand.u32 4294901760, %v13713_v42  ;;  %19736 = vst [vmem:[#allocation47_spill] sm:$0xff] %v13771_v46 }
  0x25   :  { %19727 = vst [vmem:[#allocation41_spill] sm:$0xff] %v13731_v54  ;;  %11726 = vmatprep.subr.bf16.mxu0 %v11725_v47  ;;  %19732 = vst [vmem:[#allocation44_spill] sm:$0xff] %v13752_v1  ;;  %v166_v45 = vsel %vm101_vm0, %v41_v3, 0 }
  0x26   :  { %11035 = vmatmul.mubr.f32.gmra.mrb[6].mxu0 %v447_v10  ;;  %v13744_v10 = vsub.f32 %v151_v18, %v13722_v22  ;;  %19733 = vst [vmem:[#allocation45_spill] sm:$0xff] %v13754_v61  ;;  %v42_v18 = vld [vmem:[%s18738_s0 + $0xb0] sm:$0xff]  ;;  %v516_v31 = vsub.f32 %v13713_v42, %v19735_v37  ;;  %v497_v27 = vand.u32 4294901760, %v496_v20  ;;  %v13778_v41 = vsub.f32 %v160_v60, %v13754_v61 }
  0x27   :  { %11037 = vmatprep.mubr.f32.mxu0 %v457_v56  ;;  %11728 = vmatpush3.bf16.msra.mxu0 %v11725_v47  ;;  %v13757_v56 = vand.u32 4294901760, %v163_v16  ;;  %v487_v47 = vand.u32 4294901760, %v486_v6  ;;  %v169_v37 = vsel %vm101_vm0, %v42_v18, 0  ;;  %v19738_v20 = vand.u32 4294901760, %v13731_v54 }
  0x28   :  { %19730 = vst [vmem:[#allocation42_spill] sm:$0xff] %v13744_v10  ;;  %19737 = vst [vmem:[#allocation48_spill] sm:$0xff] %v13778_v41  ;;  %v13790_v59 = vand.u32 4294901760, %v166_v45  ;;  %v507_v6 = vand.u32 4294901760, %v506_v50  ;;  %v517_v42 = vand.u32 4294901760, %v516_v31  ;;  %v19741_v18 = vand.u32 4294901760, %v13420_v7 }
  0x29   :  { %19734 = vst [vmem:[#allocation46_spill] sm:$0xff] %v13757_v56  ;;  %v526_v62 = vsub.f32 %v13731_v54, %v19738_v20  ;;  %v13788_v3 = vsub.f32 %v163_v16, %v13757_v56  ;;  %v19743_v32 = vand.u32 4294901760, %v13744_v10  ;;  %v13802_v54 = vand.u32 4294901760, %v169_v37  ;;  %v45_v50 = vld [vmem:[%s18738_s0 + $0xc8] sm:$0xff] }
  0x2a   :  { %11038 = vmatmul.mubr.f32.gmra.mrb[8].mxu0 %v467_v19  ;;  %v43_v19 = vld [vmem:[%s18738_s0 + $0xb8] sm:$0xff]  ;;  %19740 = vst [vmem:[#allocation50_spill] sm:$0xff] %v13790_v59  ;;  %v13796_v9 = vsub.f32 %v13420_v7, %v19741_v18  ;;  %v19745_v31 = vand.u32 4294901760, %v13752_v1  ;;  %v19749_v16 = vand.u32 4294901760, %v13425_v8  ;;  %v19753_v17 = vand.u32 4294901760, %v13778_v41 }
  0x2b   :  { %11040 = vmatprep.mubr.f32.mxu0 %v477_v5  ;;  %v44_v5 = vld [vmem:[%s18738_s0 + $0xc0] sm:$0xff]  ;;  %19739 = vst [vmem:[#allocation49_spill] sm:$0xff] %v13788_v3  ;;  %v172_v60 = vsel %vm101_vm0, %v43_v19, 0  ;;  %v536_v20 = vsub.f32 %v13744_v10, %v19743_v32  ;;  %19744 = vst [vmem:[#allocation52_spill] sm:$0xff] %v13802_v54  ;;  %v46_v32 = vld [vmem:[%s18738_s0 + $0xd0] sm:$0xff]  ;;  %v527_v18 = vand.u32 4294901760, %v526_v62 }
  0x2c   :  { %19742 = vst [vmem:[#allocation51_spill] sm:$0xff] %v13796_v9  ;;  %v546_v7 = vsub.f32 %v13752_v1, %v19745_v31  ;;  %v18802_v19 = vand.u32 4294901760, %v13796_v9  ;;  %v13820_v10 = vand.u32 4294901760, %v172_v60  ;;  %v178_v31 = vsel %vm101_vm0, %v45_v50, 0 }
  0x2d   :  { %v537_v1 = vand.u32 4294901760, %v536_v20  ;;  %v13840_v50 = vsub.f32 %v169_v37, %v13802_v54  ;;  %v181_v58 = vsel %vm101_vm0, %v46_v32, 0  ;;  %v13851_v20 = vand.u32 4294901760, %v178_v31  ;;  %v48_v37 = vld [vmem:[%s18738_s0 + $0xe0] sm:$0xff] }
  0x2e   :  { %11041 = vmatmul.mubr.f32.gmra.mrb[10].mxu0 %v487_v47  ;;  %v175_v47 = vsel %vm101_vm0, %v44_v5, 0  ;;  %v13818_v5 = vsub.f32 %v166_v45, %v13790_v59  ;;  %19747 = vst [vmem:[#allocation54_spill] sm:$0xff] %v13820_v10  ;;  %v1045_v62 = vsub.f32 %v13796_v9, %v18802_v19  ;;  %v13834_v45 = vsub.f32 %v13425_v8, %v19749_v16 }
  0x2f   :  { %11043 = vmatprep.mubr.f32.mxu0 %v497_v27  ;;  %v13822_v4 = vand.u32 4294901760, %v175_v47  ;;  %v47_v27 = vld [vmem:[%s18738_s0 + $0xd8] sm:$0xff]  ;;  %19752 = vst [vmem:[#allocation57_spill] sm:$0xff] %v13840_v50  ;;  %v547_v57 = vand.u32 4294901760, %v546_v7  ;;  %v566_v19 = vsub.f32 %v13778_v41, %v19753_v17  ;;  %19755 = vst [vmem:[#allocation59_spill] sm:$0xff] %v13851_v20  ;;  %v13860_v17 = vand.u32 4294901760, %v181_v58 }
  0x30   :  { %19746 = vst [vmem:[#allocation53_spill] sm:$0xff] %v13818_v5  ;;  %19750 = vst [vmem:[#allocation56_spill] sm:$0xff] %v13834_v45  ;;  %v18811_v49 = vand.u32 4294901760, %v13834_v45  ;;  %v184_v16 = vsel %vm101_vm0, %v47_v27, 0  ;;  %v1046_v32 = vand.u32 4294901760, %v1045_v62  ;;  %v19758_v8 = vand.u32 4294901760, %v13788_v3 }
  0x31   :  { %19748 = vst [vmem:[#allocation55_spill] sm:$0xff] %v13822_v4  ;;  %v13858_v7 = vsub.f32 %v175_v47, %v13822_v4  ;;  %19757 = vst [vmem:[#allocation61_spill] sm:$0xff] %v13860_v17  ;;  %v18818_v47 = vand.u32 4294901760, %v13840_v50  ;;  %v567_v41 = vand.u32 4294901760, %v566_v19  ;;  %v187_v62 = vsel %vm101_vm0, %v48_v37, 0 }
  0x32   :  { %11044 = vmatmul.mubr.f32.gmra.mrb[12].mxu0 %v507_v6  ;;  %v19751_v6 = vand.u32 4294901760, %v13771_v46  ;;  %v19759_v39 = vand.u32 4294901760, %v13818_v5  ;;  %v13877_v35 = vsub.f32 %v178_v31, %v13851_v20  ;;  %v13879_v4 = vand.u32 4294901760, %v184_v16  ;;  %v51_v31 = vld [vmem:[%s18738_s0 + $0xf8] sm:$0xff] }
  0x33   :  { %11046 = vmatprep.mubr.f32.mxu0 %v517_v42  ;;  %v13849_v42 = vsub.f32 %v172_v60, %v13820_v10  ;;  %19756 = vst [vmem:[#allocation60_spill] sm:$0xff] %v13858_v7  ;;  %v1052_v60 = vsub.f32 %v13834_v45, %v18811_v49  ;;  %v13888_v37 = vsub.f32 %v181_v58, %v13860_v17 }
  0x34   :  { %v556_v23 = vsub.f32 %v13771_v46, %v19751_v6  ;;  %v49_v6 = vld [vmem:[%s18738_s0 + $0xe8] sm:$0xff]  ;;  %v586_v49 = vsub.f32 %v13818_v5, %v19759_v39  ;;  %19760 = vst [vmem:[#allocation62_spill] sm:$0xff] %v13877_v35  ;;  %19761 = vst [vmem:[#allocation63_spill] sm:$0xff] %v13879_v4  ;;  %v13896_v5 = vand.u32 4294901760, %v187_v62 }
  0x35   :  { %19754 = vst [vmem:[#allocation58_spill] sm:$0xff] %v13849_v42  ;;  %v1053_v46 = vand.u32 4294901760, %v1052_v60  ;;  %v18823_v19 = vand.u32 4294901760, %v13849_v42  ;;  %19762 = vst [vmem:[#allocation64_spill] sm:$0xff] %v13888_v37 }
  0x36   :  { %11047 = vmatmul.mubr.f32.gmra.mrb[14].mxu0 %v527_v18  ;;  %v557_v27 = vand.u32 4294901760, %v556_v23  ;;  %v576_v18 = vsub.f32 %v13788_v3, %v19758_v8  ;;  %v190_v23 = vsel %vm101_vm0, %v49_v6, 0  ;;  %v596_v6 = vsub.f32 %v13840_v50, %v18818_v47  ;;  %19763 = vst [vmem:[#allocation65_spill] sm:$0xff] %v13896_v5 }
  0x37   :  { %11049 = vmatprep.mubr.f32.mxu0 %v537_v1  ;;  %v50_v1 = vld [vmem:[%s18738_s0 + $0xf0] sm:$0xff]  ;;  %v11729_v39 = vpack.c.bf16 %v1053_v46, %v1046_v32  ;;  %v13901_v58 = vand.u32 4294901760, %v190_v23  ;;  %v587_v32 = vand.u32 4294901760, %v586_v49  ;;  %v606_v47 = vsub.f32 %v13849_v42, %v18823_v19 }
  0x38   :  { %v577_v60 = vand.u32 4294901760, %v576_v18  ;;  %v193_v46 = vsel %vm101_vm0, %v50_v1, 0  ;;  %v196_v18 = vsel %vm101_vm0, %v51_v31, 0  ;;  %v19766_v50 = vand.u32 4294901760, %v13858_v7 }
  0x39   :  { %11730 = vmatprep.subr.bf16.mxu0 %v11729_v39  ;;  %19764 = vst [vmem:[#allocation66_spill] sm:$0xff] %v13901_v58  ;;  %v597_v8 = vand.u32 4294901760, %v596_v6  ;;  %v13925_v31 = vand.u32 4294901760, %v196_v18 }
  0x3a   :  { %11050 = vmatmul.mubr.f32.gmra.mrb[16].mxu0 %v547_v57  ;;  %v52_v57 = vld [vmem:[%s18738_s0 + $0x100] sm:$0xff]  ;;  %v616_v3 = vsub.f32 %v13858_v7, %v19766_v50  ;;  %v53_v50 = vld [vmem:[%s18738_s0 + $0x108] sm:$0xff]  ;;  %v19773_v7 = vand.u32 4294901760, %v13888_v37 }
  0x3b   :  { %11052 = vmatprep.mubr.f32.mxu0 %v557_v27  ;;  %v13906_v27 = vsub.f32 %v184_v16, %v13879_v4  ;;  %11732 = vmatpush3.bf16.msra.mxu0 %v11729_v39  ;;  %v199_v49 = vsel %vm101_vm0, %v52_v57, 0  ;;  %v13918_v16 = vsub.f32 %v187_v62, %v13896_v5  ;;  %v13920_v39 = vand.u32 4294901760, %v193_v46  ;;  %19770 = vst [vmem:[#allocation71_spill] sm:$0xff] %v13925_v31  ;;  %v54_v57 = vld [vmem:[%s18738_s0 + $0x110] sm:$0xff] }
  0x3c   :  { %v13937_v19 = vand.u32 4294901760, %v199_v49  ;;  %v617_v1 = vand.u32 4294901760, %v616_v3  ;;  %v636_v42 = vsub.f32 %v13888_v37, %v19773_v7  ;;  %v202_v4 = vsel %vm101_vm0, %v53_v50, 0  ;;  %v56_v50 = vld [vmem:[%s18738_s0 + $0x120] sm:$0xff] }
  0x3d   :  { %19765 = vst [vmem:[#allocation67_spill] sm:$0xff] %v13906_v27  ;;  %19767 = vst [vmem:[#allocation68_spill] sm:$0xff] %v13918_v16  ;;  %v18834_v6 = vand.u32 4294901760, %v13906_v27  ;;  %v13944_v5 = vsub.f32 %v193_v46, %v13920_v39 }
  0x3e   :  { %11053 = vmatmul.mubr.f32.gmra.mrb[18].mxu0 %v567_v41  ;;  %19768 = vst [vmem:[#allocation69_spill] sm:$0xff] %v13920_v39  ;;  %v13923_v41 = vsub.f32 %v190_v23, %v13901_v58  ;;  %19772 = vst [vmem:[#allocation72_spill] sm:$0xff] %v13937_v19  ;;  %v607_v23 = vand.u32 4294901760, %v606_v47  ;;  %v13953_v47 = vsub.f32 %v196_v18, %v13925_v31  ;;  %v13969_v18 = vand.u32 4294901760, %v202_v4 }
  0x3f   :  { %11055 = vmatprep.mubr.f32.mxu0 %v577_v60  ;;  %v19771_v60 = vand.u32 4294901760, %v13877_v35  ;;  %19774 = vst [vmem:[#allocation73_spill] sm:$0xff] %v13944_v5  ;;  %v13959_v46 = vsub.f32 %v199_v49, %v13937_v19  ;;  %v57_v49 = vld [vmem:[%s18738_s0 + $0x128] sm:$0xff]  ;;  %v637_v37 = vand.u32 4294901760, %v636_v42  ;;  %v211_v39 = vsel %vm101_vm0, %v56_v50, 0 }
  0x40   :  { %19769 = vst [vmem:[#allocation70_spill] sm:$0xff] %v13923_v41  ;;  %19775 = vst [vmem:[#allocation74_spill] sm:$0xff] %v13953_v47  ;;  %v14004_v50 = vsub.f32 %v202_v4, %v13969_v18 }
  0x41   :  { %v626_v62 = vsub.f32 %v13877_v35, %v19771_v60  ;;  %v205_v60 = vsel %vm101_vm0, %v54_v57, 0  ;;  %19776 = vst [vmem:[#allocation75_spill] sm:$0xff] %v13959_v46  ;;  %v19777_v57 = vand.u32 4294901760, %v13433_v12  ;;  %19779 = vst [vmem:[#allocation77_spill] sm:$0xff] %v13969_v18 }
  0x42   :  { %11056 = vmatmul.mubr.f32.gmra.mrb[20].mxu0 %v587_v32  ;;  %v55_v32 = vld [vmem:[%s18738_s0 + $0x118] sm:$0xff]  ;;  %19786 = vst [vmem:[#allocation81_spill] sm:$0xff] %v14004_v50 }
  0x43   :  { %11058 = vmatprep.mubr.f32.mxu0 %v597_v8  ;;  %v627_v7 = vand.u32 4294901760, %v626_v62  ;;  %v646_v8 = vsub.f32 %v13906_v27, %v18834_v6  ;;  %v13967_v58 = vsub.f32 %v13433_v12, %v19777_v57  ;;  %v13971_v62 = vand.u32 4294901760, %v205_v60 }
  0x44   :  { %v208_v3 = vsel %vm101_vm0, %v55_v32, 0  ;;  %v19781_v6 = vand.u32 4294901760, %v13438_v13  ;;  %v19783_v12 = vand.u32 4294901760, %v13918_v16  ;;  %v19784_v32 = vand.u32 4294901760, %v13923_v41 }
  0x45   :  { %19778 = vst [vmem:[#allocation76_spill] sm:$0xff] %v13967_v58  ;;  %19780 = vst [vmem:[#allocation78_spill] sm:$0xff] %v13971_v62  ;;  %v18849_v35 = vand.u32 4294901760, %v13967_v58  ;;  %v647_v31 = vand.u32 4294901760, %v646_v8  ;;  %v14007_v57 = vsub.f32 %v205_v60, %v13971_v62  ;;  %v14018_v8 = vand.u32 4294901760, %v211_v39  ;;  %v60_v60 = vld [vmem:[%s18738_s0 + $0x140] sm:$0xff] }
  0x46   :  { %11059 = vmatmul.mubr.f32.gmra.mrb[22].mxu0 %v607_v23  ;;  %v13980_v27 = vsub.f32 %v13438_v13, %v19781_v6  ;;  %v656_v23 = vsub.f32 %v13918_v16, %v19783_v12  ;;  %v666_v19 = vsub.f32 %v13923_v41, %v19784_v32  ;;  %v214_v6 = vsel %vm101_vm0, %v57_v49, 0  ;;  %v58_v12 = vld [vmem:[%s18738_s0 + $0x130] sm:$0xff]  ;;  %v59_v49 = vld [vmem:[%s18738_s0 + $0x138] sm:$0xff] }
  0x47   :  { %11061 = vmatprep.mubr.f32.mxu0 %v617_v1  ;;  %v13994_v1 = vand.u32 4294901760, %v208_v3  ;;  %v1059_v32 = vsub.f32 %v13967_v58, %v18849_v35  ;;  %19787 = vst [vmem:[#allocation82_spill] sm:$0xff] %v14007_v57  ;;  %v19788_v35 = vand.u32 4294901760, %v13944_v5  ;;  %19789 = vst [vmem:[#allocation83_spill] sm:$0xff] %v14018_v8  ;;  %v14023_v62 = vand.u32 4294901760, %v214_v6 }
  0x48   :  { %19782 = vst [vmem:[#allocation79_spill] sm:$0xff] %v13980_v27  ;;  %v18858_v13 = vand.u32 4294901760, %v13980_v27  ;;  %v657_v41 = vand.u32 4294901760, %v656_v23  ;;  %v667_v16 = vand.u32 4294901760, %v666_v19  ;;  %v217_v18 = vsel %vm101_vm0, %v58_v12, 0 }
  0x49   :  { %19785 = vst [vmem:[#allocation80_spill] sm:$0xff] %v13994_v1  ;;  %v1060_v4 = vand.u32 4294901760, %v1059_v32  ;;  %19790 = vst [vmem:[#allocation84_spill] sm:$0xff] %v14023_v62  ;;  %v14033_v32 = vsub.f32 %v208_v3, %v13994_v1  ;;  %v18867_v19 = vand.u32 4294901760, %v14004_v50  ;;  %v18868_v20 = vand.u32 4294901760, %v14007_v57 }
  0x4a   :  { %11062 = vmatmul.mubr.f32.gmra.mrb[24].mxu0 %v627_v7  ;;  %v1066_v42 = vsub.f32 %v13980_v27, %v18858_v13  ;;  %v676_v7 = vsub.f32 %v13944_v5, %v19788_v35  ;;  %v19792_v13 = vand.u32 4294901760, %v13959_v46  ;;  %v220_v5 = vsel %vm101_vm0, %v59_v49, 0 }
  0x4b   :  { %11064 = vmatprep.mubr.f32.mxu0 %v637_v37  ;;  %v19791_v37 = vand.u32 4294901760, %v13953_v47  ;;  %19793 = vst [vmem:[#allocation85_spill] sm:$0xff] %v14033_v32  ;;  %v14045_v3 = vsub.f32 %v214_v6, %v14023_v62 }
  0x4c   :  { %v1067_v17 = vand.u32 4294901760, %v1066_v42  ;;  %v696_v35 = vsub.f32 %v13959_v46, %v19792_v13  ;;  %v223_v42 = vsel %vm101_vm0, %v60_v60, 0  ;;  %v677_v10 = vand.u32 4294901760, %v676_v7  ;;  %v63_v60 = vld [vmem:[%s18738_s0 + $0x158] sm:$0xff] }
  0x4d   :  { %v686_v23 = vsub.f32 %v13953_v47, %v19791_v37  ;;  %v14040_v37 = vsub.f32 %v211_v39, %v14018_v8  ;;  %v14042_v47 = vand.u32 4294901760, %v217_v18  ;;  %19796 = vst [vmem:[#allocation88_spill] sm:$0xff] %v14045_v3  ;;  %v14047_v13 = vand.u32 4294901760, %v220_v5 }
  0x4e   :  { %11065 = vmatmul.mubr.f32.gmra.mrb[26].mxu0 %v647_v31  ;;  %v11733_v12 = vpack.c.bf16 %v1067_v17, %v1060_v4  ;;  %v61_v31 = vld [vmem:[%s18738_s0 + $0x148] sm:$0xff]  ;;  %v62_v17 = vld [vmem:[%s18738_s0 + $0x150] sm:$0xff]  ;;  %v14056_v39 = vand.u32 4294901760, %v223_v42  ;;  %v697_v6 = vand.u32 4294901760, %v696_v35  ;;  %v706_v7 = vsub.f32 %v14004_v50, %v18867_v19 }
  0x4f   :  { %11067 = vmatprep.mubr.f32.mxu0 %v657_v41  ;;  %19794 = vst [vmem:[#allocation86_spill] sm:$0xff] %v14040_v37  ;;  %19795 = vst [vmem:[#allocation87_spill] sm:$0xff] %v14042_v47  ;;  %v687_v49 = vand.u32 4294901760, %v686_v23  ;;  %v716_v4 = vsub.f32 %v14007_v57, %v18868_v20  ;;  %v14069_v41 = vsub.f32 %v217_v18, %v14042_v47  ;;  %v229_v23 = vsel %vm101_vm0, %v62_v17, 0  ;;  %v64_v20 = vld [vmem:[%s18738_s0 + $0x160] sm:$0xff] }
  0x50   :  { %19797 = vst [vmem:[#allocation89_spill] sm:$0xff] %v14047_v13  ;;  %11734 = vmatprep.subr.bf16.mxu0 %v11733_v12  ;;  %19798 = vst [vmem:[#allocation90_spill] sm:$0xff] %v14056_v39  ;;  %v14075_v19 = vsub.f32 %v220_v5, %v14047_v13  ;;  %v14084_v18 = vsub.f32 %v223_v42, %v14056_v39  ;;  %v707_v17 = vand.u32 4294901760, %v706_v7  ;;  %v14089_v35 = vand.u32 4294901760, %v229_v23  ;;  %v65_v42 = vld [vmem:[%s18738_s0 + $0x168] sm:$0xff] }
  0x51   :  { %11736 = vmatpush3.bf16.msra.mxu0 %v11733_v12  ;;  %19799 = vst [vmem:[#allocation91_spill] sm:$0xff] %v14069_v41  ;;  %v717_v5 = vand.u32 4294901760, %v716_v4  ;;  %v19805_v50 = vand.u32 4294901760, %v14040_v37 }
  0x52   :  { %11068 = vmatmul.mubr.f32.gmra.mrb[28].mxu0 %v667_v16  ;;  %v226_v16 = vsel %vm101_vm0, %v61_v31, 0  ;;  %19800 = vst [vmem:[#allocation92_spill] sm:$0xff] %v14075_v19  ;;  %19802 = vst [vmem:[#allocation93_spill] sm:$0xff] %v14084_v18  ;;  %v232_v31 = vsel %vm101_vm0, %v63_v60, 0  ;;  %v14113_v13 = vsub.f32 %v229_v23, %v14089_v35  ;;  %v19811_v60 = vand.u32 4294901760, %v14069_v41 }
  0x53   :  { %11070 = vmatprep.mubr.f32.mxu0 %v677_v10  ;;  %v19801_v10 = vand.u32 4294901760, %v14033_v32  ;;  %v14087_v57 = vand.u32 4294901760, %v226_v16  ;;  %19804 = vst [vmem:[#allocation95_spill] sm:$0xff] %v14089_v35  ;;  %v736_v46 = vsub.f32 %v14040_v37, %v19805_v50  ;;  %v66_v50 = vld [vmem:[%s18738_s0 + $0x170] sm:$0xff]  ;;  %v19814_v23 = vand.u32 4294901760, %v13497_v34 }
  0x54   :  { %19809 = vst [vmem:[#allocation98_spill] sm:$0xff] %v14113_v13  ;;  %v19827_v62 = vand.u32 4294901760, %v14113_v13 }
  0x55   :  { %v726_v12 = vsub.f32 %v14033_v32, %v19801_v10  ;;  %19803 = vst [vmem:[#allocation94_spill] sm:$0xff] %v14087_v57  ;;  %v235_v10 = vsel %vm101_vm0, %v64_v20, 0  ;;  %v14110_v20 = vsub.f32 %v226_v16, %v14087_v57  ;;  %v737_v32 = vand.u32 4294901760, %v736_v46 }
  0x56   :  { %11071 = vmatmul.mubr.f32.gmra.mrb[30].mxu0 %v687_v49  ;;  %v19806_v49 = vand.u32 4294901760, %v14045_v3  ;;  %v14115_v37 = vand.u32 4294901760, %v235_v10  ;;  %v19812_v16 = vand.u32 4294901760, %v13476_v25  ;;  %v14132_v35 = vsub.f32 %v13497_v34, %v19814_v23 }
  0x57   :  { %11073 = vmatprep.mubr.f32.mxu0 %v697_v6  ;;  %v14103_v6 = vand.u32 4294901760, %v232_v31  ;;  %v727_v4 = vand.u32 4294901760, %v726_v12  ;;  %19808 = vst [vmem:[#allocation97_spill] sm:$0xff] %v14110_v20  ;;  %v67_v12 = vld [vmem:[%s18738_s0 + $0x178] sm:$0xff]  ;;  %v19816_v57 = vand.u32 4294901760, %v14075_v19 }
  0x58   :  { %v746_v7 = vsub.f32 %v14045_v3, %v19806_v49  ;;  %19810 = vst [vmem:[#allocation99_spill] sm:$0xff] %v14115_v37  ;;  %v238_v49 = vsel %vm101_vm0, %v65_v42, 0  ;;  %v14127_v3 = vsub.f32 %v13476_v25, %v19812_v16  ;;  %19815 = vst [vmem:[#allocation101_spill] sm:$0xff] %v14132_v35  ;;  %v244_v25 = vsel %vm101_vm0, %v67_v12, 0  ;;  %v68_v16 = vld [vmem:[%s18738_s0 + $0x180] sm:$0xff]  ;;  %v69_v12 = vld [vmem:[%s18738_s0 + $0x188] sm:$0xff] }
  0x59   :  { %19807 = vst [vmem:[#allocation96_spill] sm:$0xff] %v14103_v6  ;;  %v14138_v46 = vsub.f32 %v232_v31, %v14103_v6 }
  0x5a   :  { %11074 = vmatmul.mubr.f32.gmra.mrb[32].mxu0 %v707_v17  ;;  %v756_v17 = vsub.f32 %v14069_v41, %v19811_v60  ;;  %19813 = vst [vmem:[#allocation100_spill] sm:$0xff] %v14127_v3  ;;  %v747_v42 = vand.u32 4294901760, %v746_v7  ;;  %v241_v60 = vsel %vm101_vm0, %v66_v50, 0  ;;  %v14141_v41 = vand.u32 4294901760, %v238_v49 }
  0x5b   :  { %11076 = vmatprep.mubr.f32.mxu0 %v717_v5  ;;  %v766_v5 = vsub.f32 %v14075_v19, %v19816_v57  ;;  %19817 = vst [vmem:[#allocation102_spill] sm:$0xff] %v14138_v46  ;;  %v19819_v57 = vand.u32 4294901760, %v14084_v18  ;;  %v14155_v19 = vsub.f32 %v235_v10, %v14115_v37  ;;  %v14160_v6 = vand.u32 4294901760, %v241_v60 }
  0x5c   :  { %19818 = vst [vmem:[#allocation103_spill] sm:$0xff] %v14141_v41  ;;  %v757_v34 = vand.u32 4294901760, %v756_v17  ;;  %v247_v37 = vsel %vm101_vm0, %v68_v16, 0  ;;  %v14176_v17 = vsub.f32 %v238_v49, %v14141_v41  ;;  %v796_v16 = vsub.f32 %v14113_v13, %v19827_v62  ;;  %v71_v62 = vld [vmem:[%s18738_s0 + $0x198] sm:$0xff] }
  0x5d   :  { %v776_v31 = vsub.f32 %v14084_v18, %v19819_v57  ;;  %19820 = vst [vmem:[#allocation104_spill] sm:$0xff] %v14155_v19  ;;  %19821 = vst [vmem:[#allocation105_spill] sm:$0xff] %v14160_v6  ;;  %v19823_v57 = vand.u32 4294901760, %v14132_v35  ;;  %v767_v50 = vand.u32 4294901760, %v766_v5  ;;  %v14169_v18 = vand.u32 4294901760, %v244_v25 }
  0x5e   :  { %11077 = vmatmul.mubr.f32.gmra.mrb[34].mxu0 %v727_v4  ;;  %v19822_v4 = vand.u32 4294901760, %v14127_v3  ;;  %19825 = vst [vmem:[#allocation107_spill] sm:$0xff] %v14176_v17  ;;  %v19826_v5 = vand.u32 4294901760, %v14110_v20  ;;  %v18909_v8 = vand.u32 4294901760, %v14155_v19  ;;  %v14187_v49 = vsub.f32 %v241_v60, %v14160_v6 }
  0x5f   :  { %11079 = vmatprep.mubr.f32.mxu0 %v737_v32  ;;  %v1080_v23 = vsub.f32 %v14132_v35, %v19823_v57  ;;  %19824 = vst [vmem:[#allocation106_spill] sm:$0xff] %v14169_v18  ;;  %v70_v32 = vld [vmem:[%s18738_s0 + $0x190] sm:$0xff]  ;;  %v777_v57 = vand.u32 4294901760, %v776_v31  ;;  %v14189_v41 = vand.u32 4294901760, %v247_v37  ;;  %v14193_v31 = vsub.f32 %v244_v25, %v14169_v18 }
  0x60   :  { %v1073_v7 = vsub.f32 %v14127_v3, %v19822_v4  ;;  %v250_v4 = vsel %vm101_vm0, %v69_v12, 0  ;;  %v786_v10 = vsub.f32 %v14110_v20, %v19826_v5  ;;  %19828 = vst [vmem:[#allocation108_spill] sm:$0xff] %v14187_v49  ;;  %v19832_v12 = vand.u32 4294901760, %v14138_v46 }
  0x61   :  { %v1081_v47 = vand.u32 4294901760, %v1080_v23  ;;  %19829 = vst [vmem:[#allocation109_spill] sm:$0xff] %v14189_v41  ;;  %19830 = vst [vmem:[#allocation110_spill] sm:$0xff] %v14193_v31  ;;  %v14195_v23 = vand.u32 4294901760, %v250_v4  ;;  %v816_v5 = vsub.f32 %v14155_v19, %v18909_v8  ;;  %v256_v60 = vsel %vm101_vm0, %v71_v62, 0 }
  0x62   :  { %v1074_v39 = vand.u32 4294901760, %v1073_v7  ;;  %11080 = vmatmul.mubr.f32.gmra.mrb[36].mxu0 %v747_v42  ;;  %v253_v7 = vsel %vm101_vm0, %v70_v32, 0  ;;  %v72_v32 = vld [vmem:[%s18738_s0 + $0x1a0] sm:$0xff]  ;;  %v19836_v13 = vand.u32 4294901760, %v14176_v17  ;;  %v19839_v20 = vand.u32 4294901760, %v14187_v49 }
  0x63   :  { %11082 = vmatprep.mubr.f32.mxu0 %v757_v34  ;;  %19831 = vst [vmem:[#allocation111_spill] sm:$0xff] %v14195_v23  ;;  %v806_v34 = vsub.f32 %v14138_v46, %v19832_v12  ;;  %v14207_v25 = vand.u32 4294901760, %v253_v7  ;;  %v14214_v12 = vsub.f32 %v247_v37, %v14189_v41  ;;  %v259_v8 = vsel %vm101_vm0, %v72_v32, 0 }
  0x64   :  { %v11737_v42 = vpack.c.bf16 %v1081_v47, %v1074_v39  ;;  %v787_v47 = vand.u32 4294901760, %v786_v10  ;;  %v797_v39 = vand.u32 4294901760, %v796_v16  ;;  %v74_v10 = vld [vmem:[%s18738_s0 + $0x1b0] sm:$0xff]  ;;  %v14225_v16 = vsub.f32 %v250_v4, %v14195_v23 }
  0x65   :  { %19833 = vst [vmem:[#allocation112_spill] sm:$0xff] %v14207_v25  ;;  %19834 = vst [vmem:[#allocation113_spill] sm:$0xff] %v14214_v12  ;;  %v807_v37 = vand.u32 4294901760, %v806_v34  ;;  %v826_v62 = vsub.f32 %v14176_v17, %v19836_v13  ;;  %v14232_v19 = vsub.f32 %v253_v7, %v14207_v25  ;;  %v817_v4 = vand.u32 4294901760, %v816_v5  ;;  %v75_v13 = vld [vmem:[%s18738_s0 + $0x1b8] sm:$0xff] }
  0x66   :  { %11738 = vmatprep.subr.bf16.mxu0 %v11737_v42  ;;  %11083 = vmatmul.mubr.f32.gmra.mrb[38].mxu0 %v767_v50  ;;  %v73_v50 = vld [vmem:[%s18738_s0 + $0x1a8] sm:$0xff]  ;;  %19835 = vst [vmem:[#allocation114_spill] sm:$0xff] %v14225_v16  ;;  %v836_v34 = vsub.f32 %v14187_v49, %v19839_v20  ;;  %v14242_v23 = vand.u32 4294901760, %v259_v8  ;;  %v19841_v7 = vand.u32 4294901760, %v14193_v31  ;;  %v268_v17 = vsel %vm101_vm0, %v75_v13, 0 }
  0x67   :  { %11085 = vmatprep.mubr.f32.mxu0 %v777_v57  ;;  %11740 = vmatpush3.bf16.msra.mxu0 %v11737_v42  ;;  %19837 = vst [vmem:[#allocation115_spill] sm:$0xff] %v14232_v19  ;;  %v14234_v42 = vand.u32 4294901760, %v256_v60  ;;  %v262_v46 = vsel %vm101_vm0, %v73_v50, 0  ;;  %v265_v57 = vsel %vm101_vm0, %v74_v10, 0  ;;  %v827_v5 = vand.u32 4294901760, %v826_v62 }
  0x68   :  { %19840 = vst [vmem:[#allocation117_spill] sm:$0xff] %v14242_v23  ;;  %v14254_v20 = vand.u32 4294901760, %v262_v46  ;;  %v14256_v10 = vand.u32 4294901760, %v265_v57  ;;  %v837_v50 = vand.u32 4294901760, %v836_v34  ;;  %v19845_v62 = vand.u32 4294901760, %v14214_v12 }
  0x69   :  { %19838 = vst [vmem:[#allocation116_spill] sm:$0xff] %v14234_v42  ;;  %v14260_v49 = vsub.f32 %v256_v60, %v14234_v42  ;;  %v14271_v25 = vsub.f32 %v259_v8, %v14242_v23  ;;  %v77_v60 = vld [vmem:[%s18738_s0 + $0x1c8] sm:$0xff]  ;;  %v19847_v32 = vand.u32 4294901760, %v14225_v16 }
  0x6a   :  { %11086 = vmatmul.mubr.f32.gmra.mrb[40].mxu0 %v787_v47  ;;  %v846_v47 = vsub.f32 %v14193_v31, %v19841_v7  ;;  %19842 = vst [vmem:[#allocation118_spill] sm:$0xff] %v14254_v20  ;;  %19843 = vst [vmem:[#allocation119_spill] sm:$0xff] %v14256_v10  ;;  %v14265_v7 = vpack.c.bf16 %v13486_v30, %v13484_v29  ;;  %v856_v31 = vsub.f32 %v14214_v12, %v19845_v62 }
  0x6b   :  { %11088 = vmatprep.mubr.f32.mxu0 %v797_v39  ;;  %v76_v39 = vld [vmem:[%s18738_s0 + $0x1c0] sm:$0xff]  ;;  %19844 = vst [vmem:[#allocation120_spill] sm:$0xff] %v14260_v49  ;;  %19846 = vst [vmem:[#allocation121_spill] sm:$0xff] %v14271_v25  ;;  %v866_v30 = vsub.f32 %v14225_v16, %v19847_v32  ;;  %v14286_v8 = vsub.f32 %v262_v46, %v14254_v20  ;;  %v14289_v34 = vsub.f32 %v265_v57, %v14256_v10 }
  0x6c   :  { %v847_v13 = vand.u32 4294901760, %v846_v47  ;;  %11742 = vmatprep.subr.bf16.mxu0 %v14265_v7  ;;  %v78_v47 = vld [vmem:[%s18738_s0 + $0x1d0] sm:$0xff]  ;;  %v14298_v32 = vpack.c.bf16 %v13980_v27, %v13967_v58  ;;  %v19851_v62 = vand.u32 4294901760, %v14232_v19  ;;  %v274_v57 = vsel %vm101_vm0, %v77_v60, 0 }
  0x6d   :  { %19848 = vst [vmem:[#allocation122_spill] sm:$0xff] %v14286_v8  ;;  %19849 = vst [vmem:[#allocation123_spill] sm:$0xff] %v14289_v34  ;;  %v857_v16 = vand.u32 4294901760, %v856_v31  ;;  %v277_v29 = vsel %vm101_vm0, %v78_v47, 0  ;;  %v14320_v31 = vand.u32 4294901760, %v274_v57  ;;  %v19855_v12 = vand.u32 4294901760, %v14260_v49 }
  0x6e   :  { %11089 = vmatmul.mubr.f32.gmra.mrb[42].mxu0 %v807_v37  ;;  %v271_v37 = vsel %vm101_vm0, %v76_v39, 0  ;;  %v14291_v39 = vand.u32 4294901760, %v268_v17  ;;  %v19857_v46 = vand.u32 4294901760, %v14271_v25  ;;  %v14331_v10 = vand.u32 4294901760, %v277_v29 }
  0x6f   :  { %11091 = vmatprep.mubr.f32.mxu0 %v817_v4  ;;  %v14283_v4 = vpack.c.bf16 %v13834_v45, %v13796_v9  ;;  %v876_v45 = vsub.f32 %v14232_v19, %v19851_v62  ;;  %v14304_v9 = vand.u32 4294901760, %v271_v37  ;;  %v80_v62 = vld [vmem:[%s18738_s0 + $0x1e0] sm:$0xff]  ;;  %19854 = vst [vmem:[#allocation127_spill] sm:$0xff] %v14320_v31  ;;  %v886_v58 = vsub.f32 %v14260_v49, %v19855_v12 }
  0x70   :  { %19850 = vst [vmem:[#allocation124_spill] sm:$0xff] %v14291_v39  ;;  %v14318_v60 = vsub.f32 %v268_v17, %v14291_v39  ;;  %v896_v27 = vsub.f32 %v14271_v25, %v19857_v46  ;;  %19858 = vst [vmem:[#allocation129_spill] sm:$0xff] %v14331_v10  ;;  %v14346_v25 = vsub.f32 %v274_v57, %v14320_v31 }
  0x71   :  { %19852 = vst [vmem:[#allocation125_spill] sm:$0xff] %v14304_v9  ;;  %v877_v47 = vand.u32 4294901760, %v876_v45  ;;  %v14326_v19 = vsub.f32 %v271_v37, %v14304_v9  ;;  %v19859_v45 = vand.u32 4294901760, %v14286_v8 }
  0x72   :  { %11092 = vmatmul.mubr.f32.gmra.mrb[44].mxu0 %v827_v5  ;;  %v79_v5 = vld [vmem:[%s18738_s0 + $0x1d8] sm:$0xff]  ;;  %19853 = vst [vmem:[#allocation126_spill] sm:$0xff] %v14318_v60  ;;  %19861 = vst [vmem:[#allocation130_spill] sm:$0xff] %v14346_v25  ;;  %v19865_v49 = vand.u32 4294901760, %v14318_v60 }
  0x73   :  { %11094 = vmatprep.mubr.f32.mxu0 %v837_v50  ;;  %v867_v50 = vand.u32 4294901760, %v866_v30  ;;  %19856 = vst [vmem:[#allocation128_spill] sm:$0xff] %v14326_v19  ;;  %v280_v17 = vsel %vm101_vm0, %v79_v5, 0  ;;  %v81_v30 = vld [vmem:[%s18738_s0 + $0x1e8] sm:$0xff]  ;;  %v906_v12 = vsub.f32 %v14286_v8, %v19859_v45  ;;  %v82_v5 = vld [vmem:[%s18738_s0 + $0x1f0] sm:$0xff]  ;;  %v897_v8 = vand.u32 4294901760, %v896_v27 }
  0x74   :  { %v14352_v9 = vand.u32 4294901760, %v280_v17  ;;  %v286_v57 = vsel %vm101_vm0, %v81_v30, 0  ;;  %v289_v46 = vsel %vm101_vm0, %v82_v5, 0  ;;  %v926_v31 = vsub.f32 %v14318_v60, %v19865_v49 }
  0x76   :  { %11095 = vmatmul.mubr.f32.gmra.mrb[46].mxu0 %v847_v13  ;;  %v283_v13 = vsel %vm101_vm0, %v80_v62, 0  ;;  %v887_v62 = vand.u32 4294901760, %v886_v58  ;;  %19862 = vst [vmem:[#allocation131_spill] sm:$0xff] %v14352_v9  ;;  %v907_v58 = vand.u32 4294901760, %v906_v12  ;;  %v14372_v30 = vsub.f32 %v280_v17, %v14352_v9 }
  0x77   :  { %11097 = vmatprep.mubr.f32.mxu0 %v857_v16  ;;  %v19860_v16 = vand.u32 4294901760, %v14289_v34  ;;  %v14354_v45 = vand.u32 4294901760, %v283_v13  ;;  %v19871_v17 = vand.u32 4294901760, %v14346_v25 }
  0x78   :  { %19867 = vst [vmem:[#allocation134_spill] sm:$0xff] %v14372_v30 }
  0x79   :  { %v916_v37 = vsub.f32 %v14289_v34, %v19860_v16  ;;  %19863 = vst [vmem:[#allocation132_spill] sm:$0xff] %v14354_v45  ;;  %v14357_v16 = vsub.f32 %v277_v29, %v14331_v10  ;;  %v19866_v29 = vand.u32 4294901760, %v14326_v19  ;;  %v14375_v5 = vsub.f32 %v283_v13, %v14354_v45 }
  0x7a   :  { %11098 = vmatmul.mubr.f32.gmra.mrb[48].mxu0 %v867_v50  ;;  %v83_v50 = vld [vmem:[%s18738_s0 + $0x1f8] sm:$0xff]  ;;  %v14377_v10 = vand.u32 4294901760, %v286_v57  ;;  %v18959_v13 = vand.u32 4294901760, %v14372_v30 }
  0x7b   :  { %11100 = vmatprep.mubr.f32.mxu0 %v877_v47  ;;  %19864 = vst [vmem:[#allocation133_spill] sm:$0xff] %v14357_v16  ;;  %v917_v34 = vand.u32 4294901760, %v916_v37  ;;  %v936_v27 = vsub.f32 %v14326_v19, %v19866_v29  ;;  %19868 = vst [vmem:[#allocation135_spill] sm:$0xff] %v14375_v5  ;;  %v14380_v37 = vand.u32 4294901760, %v289_v46  ;;  %v292_v49 = vsel %vm101_vm0, %v83_v50, 0 }
  0x7c   :  { %19869 = vst [vmem:[#allocation136_spill] sm:$0xff] %v14377_v10  ;;  %v927_v47 = vand.u32 4294901760, %v926_v31  ;;  %v946_v29 = vsub.f32 %v14346_v25, %v19871_v17  ;;  %v14390_v19 = vsub.f32 %v286_v57, %v14377_v10  ;;  %v19874_v50 = vand.u32 4294901760, %v14357_v16 }
  0x7d   :  { %19870 = vst [vmem:[#allocation137_spill] sm:$0xff] %v14380_v37  ;;  %v937_v12 = vand.u32 4294901760, %v936_v27  ;;  %v18964_v31 = vand.u32 4294901760, %v14375_v5  ;;  %v966_v57 = vsub.f32 %v14372_v30, %v18959_v13 }
  0x7e   :  { %11101 = vmatmul.mubr.f32.gmra.mrb[50].mxu0 %v887_v62  ;;  %v11757_v62 = vpack.c.bf16 %v14132_v35, %v14127_v3  ;;  %19872 = vst [vmem:[#allocation138_spill] sm:$0xff] %v14390_v19  ;;  %v956_v60 = vsub.f32 %v14357_v16, %v19874_v50  ;;  %v947_v17 = vand.u32 4294901760, %v946_v29  ;;  %v18963_v35 = vand.u32 4294901760, %v14390_v19 }
  0x7f   :  { %11103 = vmatprep.mubr.f32.mxu0 %v897_v8  ;;  %v14392_v8 = vand.u32 4294901760, %v292_v49  ;;  %v976_v50 = vsub.f32 %v14375_v5, %v18964_v31  ;;  %v19894_v31 = vld [vmem:[#allocation94_spill] sm:$0xff] }
  0x80   :  { %v957_v27 = vand.u32 4294901760, %v956_v60  ;;  %v986_v29 = vsub.f32 %v14390_v19, %v18963_v35  ;;  %v19893_v35 = vld [vmem:[#allocation90_spill] sm:$0xff] }
  0x81   :  { %19873 = vst [vmem:[#allocation139_spill] sm:$0xff] %v14392_v8  ;;  %v977_v3 = vand.u32 4294901760, %v976_v50  ;;  %v19882_v50 = vld [vmem:[#allocation65_spill] sm:$0xff] }
  0x82   :  { %11104 = vmatmul.mubr.f32.gmra.mrb[52].mxu0 %v907_v58  ;;  %v14399_v58 = vsub.f32 %v289_v46, %v14380_v37 }
  0x83   :  { %11106 = vmatprep.mubr.f32.mxu0 %v917_v34  ;;  %v14406_v34 = vsub.f32 %v292_v49, %v14392_v8 }
  0x84   :  { %19875 = vst [vmem:[#allocation140_spill] sm:$0xff] %v14399_v58  ;;  %v18962_v46 = vand.u32 4294901760, %v14399_v58 }
  0x85   :  { %19876 = vst [vmem:[#allocation141_spill] sm:$0xff] %v14406_v34  ;;  %v18961_v13 = vand.u32 4294901760, %v14406_v34 }
  0x86   :  { %11107 = vmatmul.mubr.f32.gmra.mrb[54].mxu0 %v927_v47  ;;  %v967_v47 = vand.u32 4294901760, %v966_v57  ;;  %v996_v60 = vsub.f32 %v14399_v58, %v18962_v46  ;;  %v19892_v46 = vld [vmem:[#allocation89_spill] sm:$0xff] }
  0x87   :  { %11109 = vmatprep.mubr.f32.mxu0 %v937_v12  ;;  %v987_v12 = vand.u32 4294901760, %v986_v29  ;;  %v1006_v49 = vsub.f32 %v14406_v34, %v18961_v13  ;;  %v19884_v29 = vld [vmem:[#allocation69_spill] sm:$0xff]  ;;  %v19891_v13 = vld [vmem:[#allocation87_spill] sm:$0xff] }
  0x89   :  { %v1007_v57 = vand.u32 4294901760, %v1006_v49  ;;  %v19887_v49 = vld [vmem:[#allocation77_spill] sm:$0xff] }
  0x8a   :  { %11110 = vmatmul.mubr.f32.gmra.mrb[56].mxu0 %v947_v17  ;;  %v997_v17 = vand.u32 4294901760, %v996_v60  ;;  %v19885_v60 = vld [vmem:[#allocation71_spill] sm:$0xff] }
  0x8b   :  { %11112 = vmatprep.mubr.f32.mxu0 %v957_v27  ;;  %v11745_v27 = vpack.c.bf16 %v13664_v48, %v13644_v21 }
  0x8e   :  { %11113 = vmatmul.mubr.f32.gmra.mrb[58].mxu0 %v967_v47  ;;  %v19883_v47 = vld [vmem:[#allocation66_spill] sm:$0xff] }
  0x8f   :  { %11115 = vmatprep.mubr.f32.mxu0 %v977_v3  ;;  %v19877_v3 = vld [vmem:[#allocation54_spill] sm:$0xff] }
  0x92   :  { %11116 = vmatmul.mubr.f32.gmra.mrb[60].mxu0 %v987_v12  ;;  %v19886_v12 = vld [vmem:[#allocation72_spill] sm:$0xff] }
  0x93   :  { %11118 = vmatprep.mubr.f32.mxu0 %v997_v17  ;;  %v19888_v17 = vld [vmem:[#allocation78_spill] sm:$0xff] }
  0x96   :  { %11119 = vmatmul.mubr.f32.gmra.mrb[62].mxu0 %v1007_v57  ;;  %v19889_v57 = vld [vmem:[#allocation83_spill] sm:$0xff] }
  0x97   :  { %11141 = vmatprep.mubr.f32.mxu0 %v13478_v26  ;;  %v19965_v26 = vld [vmem:[#allocation121_spill] sm:$0xff] }
  0x9a   :  { %11142 = vmatmul.mubr.f32.vlgmr.msra.gmra.mrb[0].mxu0 %v13482_v28  ;;  %v19964_v28 = vld [vmem:[#allocation120_spill] sm:$0xff] }
  0x9b   :  { %11744 = vmatpush3.bf16.msra.mxu0 %v14265_v7  ;;  %11144 = vmatprep.mubr.f32.mxu0 %v13502_v36  ;;  %v19878_v7 = vld [vmem:[#allocation55_spill] sm:$0xff] }
  0x9c   :  { %11746 = vmatprep.subr.bf16.mxu0 %v11745_v27  ;;  %v19963_v36 = vld [vmem:[#allocation115_spill] sm:$0xff] }
  0x9e   :  { %11145 = vmatmul.mubr.f32.gmra.mrb[2].mxu0 %v13512_v43  ;;  %v19961_v43 = vld [vmem:[#allocation113_spill] sm:$0xff] }
  0x9f   :  { %11147 = vmatprep.mubr.f32.mxu0 %v13537_v52  ;;  %11748 = vmatpush3.bf16.msra.mxu0 %v11745_v27  ;;  %v19890_v27 = vld [vmem:[#allocation84_spill] sm:$0xff]  ;;  %v19960_v52 = vld [vmem:[#allocation110_spill] sm:$0xff] }
  0xa0   :  { %11750 = vmatprep.subr.bf16.mxu0 %v14283_v4 }
  0xa2   :  { %11148 = vmatmul.mubr.f32.gmra.mrb[4].mxu0 %v13539_v53  ;;  %v19958_v53 = vld [vmem:[#allocation107_spill] sm:$0xff] }
  0xa3   :  { %11150 = vmatprep.mubr.f32.mxu0 %v13573_v15  ;;  %11752 = vmatpush3.bf16.msra.mxu0 %v14283_v4  ;;  %v19879_v4 = vld [vmem:[#allocation59_spill] sm:$0xff]  ;;  %v19957_v15 = vld [vmem:[#allocation104_spill] sm:$0xff] }
  0xa4   :  { %11754 = vmatprep.subr.bf16.mxu0 %v14298_v32 }
  0xa6   :  { %11151 = vmatmul.mubr.f32.gmra.mrb[6].mxu0 %v13589_v33  ;;  %v19955_v33 = vld [vmem:[#allocation98_spill] sm:$0xff] }
  0xa7   :  { %11153 = vmatprep.mubr.f32.mxu0 %v13595_v44  ;;  %11756 = vmatpush3.bf16.msra.mxu0 %v14298_v32  ;;  %v19880_v32 = vld [vmem:[#allocation61_spill] sm:$0xff] }
  0xa8   :  { %11758 = vmatprep.subr.bf16.mxu0 %v11757_v62  ;;  %v19954_v44 = vld [vmem:[#allocation97_spill] sm:$0xff] }
  0xaa   :  { %11154 = vmatmul.mubr.f32.gmra.mrb[8].mxu0 %v13602_v51  ;;  %v19952_v51 = vld [vmem:[#allocation92_spill] sm:$0xff] }
  0xab   :  { %11156 = vmatprep.mubr.f32.mxu0 %v13623_v63  ;;  %11760 = vmatpush3.bf16.msra.mxu0 %v11757_v62  ;;  %v19881_v62 = vld [vmem:[#allocation63_spill] sm:$0xff] }
  0xac   :  { %11762 = vmatprep.subr.bf16.mxu0 %v13440_v14  ;;  %v19951_v63 = vld [vmem:[#allocation91_spill] sm:$0xff] }
  0xae   :  { %11157 = vmatmul.mubr.f32.gmra.mrb[10].mxu0 %v13639_v55  ;;  %v19950_v55 = vld [vmem:[#allocation88_spill] sm:$0xff] }
  0xaf   :  { %11159 = vmatprep.mubr.f32.mxu0 %v13653_v40  ;;  %v19949_v40 = vld [vmem:[#allocation86_spill] sm:$0xff] }
  0xb2   :  { %11160 = vmatmul.mubr.f32.gmra.mrb[12].mxu0 %v13676_v38  ;;  %v19948_v38 = vld [vmem:[#allocation85_spill] sm:$0xff] }
  0xb3   :  { %11162 = vmatprep.mubr.f32.mxu0 %v13693_v24  ;;  %v19947_v24 = vld [vmem:[#allocation82_spill] sm:$0xff] }
  0xb6   :  { %11163 = vmatmul.mubr.f32.gmra.mrb[14].mxu0 %v13703_v11  ;;  %v19946_v11 = vld [vmem:[#allocation81_spill] sm:$0xff] }
  0xb7   :  { %11165 = vmatprep.mubr.f32.mxu0 %v13722_v22  ;;  %v19945_v22 = vld [vmem:[#allocation75_spill] sm:$0xff] }
  0xba   :  { %11166 = vmatmul.mubr.f32.gmra.mrb[16].mxu0 %v13727_v2  ;;  %v19944_v2 = vld [vmem:[#allocation74_spill] sm:$0xff] }
  0xbb   :  { %11168 = vmatprep.mubr.f32.mxu0 %v13746_v0  ;;  %v19943_v0 = vld [vmem:[#allocation73_spill] sm:$0xff] }
  0xbe   :  { %11169 = vmatmul.mubr.f32.gmra.mrb[18].mxu0 %v13754_v61  ;;  %v19942_v61 = vld [vmem:[#allocation70_spill] sm:$0xff] }
  0xbf   :  { %11171 = vmatprep.mubr.f32.mxu0 %v13757_v56  ;;  %v19941_v56 = vld [vmem:[#allocation68_spill] sm:$0xff] }
  0xc2   :  { %11172 = vmatmul.mubr.f32.gmra.mrb[20].mxu0 %v13790_v59  ;;  %v19940_v59 = vld [vmem:[#allocation67_spill] sm:$0xff] }
  0xc3   :  { %11174 = vmatprep.mubr.f32.mxu0 %v13802_v54  ;;  %v19939_v54 = vld [vmem:[#allocation64_spill] sm:$0xff] }
  0xc6   :  { %11175 = vmatmul.mubr.f32.gmra.mrb[22].mxu0 %v19877_v3  ;;  %v19938_v3 = vld [vmem:[#allocation62_spill] sm:$0xff] }
  0xc7   :  { %11177 = vmatprep.mubr.f32.mxu0 %v19878_v7  ;;  %v19937_v7 = vld [vmem:[#allocation60_spill] sm:$0xff] }
  0xca   :  { %11178 = vmatmul.mubr.f32.gmra.mrb[24].mxu0 %v19879_v4  ;;  %v19936_v4 = vld [vmem:[#allocation58_spill] sm:$0xff] }
  0xcb   :  { %11180 = vmatprep.mubr.f32.mxu0 %v19880_v32  ;;  %v19935_v32 = vld [vmem:[#allocation57_spill] sm:$0xff] }
  0xce   :  { %11181 = vmatmul.mubr.f32.gmra.mrb[26].mxu0 %v19881_v62  ;;  %v19934_v62 = vld [vmem:[#allocation53_spill] sm:$0xff] }
  0xcf   :  { %11183 = vmatprep.mubr.f32.mxu0 %v19882_v50  ;;  %v19933_v50 = vld [vmem:[#allocation49_spill] sm:$0xff] }
  0xd2   :  { %11184 = vmatmul.mubr.f32.gmra.mrb[28].mxu0 %v19883_v47  ;;  %v19928_v47 = vld [vmem:[#allocation41_spill] sm:$0xff] }
  0xd3   :  { %11186 = vmatprep.mubr.f32.mxu0 %v19884_v29  ;;  %v19927_v29 = vld [vmem:[#allocation38_spill] sm:$0xff] }
  0xd6   :  { %11187 = vmatmul.mubr.f32.gmra.mrb[30].mxu0 %v19885_v60  ;;  %v19895_v60 = vld [vmem:[#allocation95_spill] sm:$0xff] }
  0xd7   :  { %11189 = vmatprep.mubr.f32.mxu0 %v19886_v12  ;;  %v19896_v12 = vld [vmem:[#allocation96_spill] sm:$0xff] }
  0xda   :  { %11190 = vmatmul.mubr.f32.gmra.mrb[32].mxu0 %v19887_v49  ;;  %v19897_v49 = vld [vmem:[#allocation99_spill] sm:$0xff] }
  0xdb   :  { %11192 = vmatprep.mubr.f32.mxu0 %v19888_v17  ;;  %v19898_v17 = vld [vmem:[#allocation103_spill] sm:$0xff] }
  0xde   :  { %11193 = vmatmul.mubr.f32.gmra.mrb[34].mxu0 %v13994_v1  ;;  %v19926_v1 = vld [vmem:[#allocation37_spill] sm:$0xff] }
  0xdf   :  { %11195 = vmatprep.mubr.f32.mxu0 %v19889_v57  ;;  %v19925_v57 = vld [vmem:[#allocation34_spill] sm:$0xff] }
  0xe2   :  { %11196 = vmatmul.mubr.f32.gmra.mrb[36].mxu0 %v19890_v27  ;;  %v19924_v27 = vld [vmem:[#allocation32_spill] sm:$0xff] }
  0xe3   :  { %11198 = vmatprep.mubr.f32.mxu0 %v19891_v13  ;;  %v19899_v13 = vld [vmem:[#allocation111_spill] sm:$0xff] }
  0xe6   :  { %11199 = vmatmul.mubr.f32.gmra.mrb[38].mxu0 %v19892_v46  ;;  %v19900_v46 = vld [vmem:[#allocation112_spill] sm:$0xff] }
  0xe7   :  { %11201 = vmatprep.mubr.f32.mxu0 %v19893_v35  ;;  %v19923_v35 = vld [vmem:[#allocation30_spill] sm:$0xff] }
  0xea   :  { %11202 = vmatmul.mubr.f32.gmra.mrb[40].mxu0 %v19894_v31  ;;  %v19922_v31 = vld [vmem:[#allocation28_spill] sm:$0xff] }
  0xeb   :  { %11204 = vmatprep.mubr.f32.mxu0 %v19895_v60 }
  0xee   :  { %11205 = vmatmul.mubr.f32.gmra.mrb[42].mxu0 %v19896_v12  ;;  %v19901_v12 = vld [vmem:[#allocation119_spill] sm:$0xff] }
  0xef   :  { %11207 = vmatprep.mubr.f32.mxu0 %v19897_v49 }
  0xf2   :  { %11208 = vmatmul.mubr.f32.gmra.mrb[44].mxu0 %v19898_v17  ;;  %v19902_v17 = vld [vmem:[#allocation125_spill] sm:$0xff] }
  0xf3   :  { %11210 = vmatprep.mubr.f32.mxu0 %v14160_v6  ;;  %v19903_v6 = vld [vmem:[#allocation127_spill] sm:$0xff] }
  0xf6   :  { %11211 = vmatmul.mubr.f32.gmra.mrb[46].mxu0 %v14169_v18  ;;  %v19904_v18 = vld [vmem:[#allocation129_spill] sm:$0xff] }
  0xf7   :  { %11213 = vmatprep.mubr.f32.mxu0 %v14189_v41  ;;  %v19920_v41 = vld [vmem:[#allocation7_spill] sm:$0xff] }
  0xf8   :  { %v19921_v49 = vand.u32 4294901760, %v19920_v41  ;;  %v19930_v41 = vld [vmem:[#allocation44_spill] sm:$0xff] }
  0xfa   :  { %11214 = vmatmul.mubr.f32.gmra.mrb[48].mxu0 %v19899_v13 }
  0xfb   :  { %11216 = vmatprep.mubr.f32.mxu0 %v19900_v46  ;;  %v19918_v46 = vld [vmem:[#allocation6_spill] sm:$0xff] }
  0xfc   :  { %v19919_v13 = vand.u32 4294901760, %v19918_v46  ;;  %v19929_v46 = vld [vmem:[#allocation42_spill] sm:$0xff] }
  0xfe   :  { %11217 = vmatmul.mubr.f32.gmra.mrb[50].mxu0 %v14234_v42  ;;  %v19917_v42 = vld [vmem:[#allocation18_spill] sm:$0xff]  ;;  %v11781_v60 = vpack.c.bf16 %v19921_v49, %v19919_v13  ;;  %v19931_v13 = vld [vmem:[#allocation47_spill] sm:$0xff]  ;;  %v19932_v49 = vld [vmem:[#allocation48_spill] sm:$0xff] }
  0xff   :  { %11219 = vmatprep.mubr.f32.mxu0 %v14242_v23  ;;  %v19916_v23 = vld [vmem:[#allocation26_spill] sm:$0xff] }
 0x102   :  { %11220 = vmatmul.mubr.f32.gmra.mrb[52].mxu0 %v14254_v20  ;;  %v19905_v20 = vld [vmem:[#allocation8_spill] sm:$0xff] }
 0x103   :  { %11222 = vmatprep.mubr.f32.mxu0 %v19901_v12  ;;  %v19906_v12 = vld [vmem:[#allocation10_spill] sm:$0xff] }
 0x106   :  { %11223 = vmatmul.mubr.f32.gmra.mrb[54].mxu0 %v14291_v39  ;;  %v19915_v39 = vld [vmem:[#allocation25_spill] sm:$0xff] }
 0x107   :  { %11225 = vmatprep.mubr.f32.mxu0 %v19902_v17  ;;  %v19907_v17 = vld [vmem:[#allocation13_spill] sm:$0xff] }
 0x10a   :  { %11226 = vmatmul.mubr.f32.gmra.mrb[56].mxu0 %v19903_v6  ;;  %v19908_v6 = vld [vmem:[#allocation2_spill] sm:$0xff] }
 0x10b   :  { %11228 = vmatprep.mubr.f32.mxu0 %v19904_v18  ;;  %v19909_v18 = vld [vmem:[#allocation16_spill] sm:$0xff] }
 0x10e   :  { %11229 = vmatmul.mubr.f32.gmra.mrb[58].mxu0 %v14352_v9  ;;  %v19910_v9 = vld [vmem:[#allocation17_spill] sm:$0xff] }
 0x10f   :  { %11231 = vmatprep.mubr.f32.mxu0 %v14354_v45  ;;  %v19914_v45 = vld [vmem:[#allocation12_spill] sm:$0xff] }
 0x112   :  { %11232 = vmatmul.mubr.f32.gmra.mrb[60].mxu0 %v14377_v10  ;;  %v19911_v10 = vld [vmem:[#allocation3_spill] sm:$0xff] }
 0x113   :  { %11234 = vmatprep.mubr.f32.mxu0 %v14380_v37  ;;  %v19912_v37 = vld [vmem:[#allocation19_spill] sm:$0xff] }
 0x116   :  { %11235 = vmatmul.mubr.f32.gmra.mrb[62].mxu0 %v14392_v8  ;;  %v19913_v8 = vld [vmem:[#allocation21_spill] sm:$0xff] }
 0x117   :  { %11257 = vmatprep.mubr.f32.mxu0 %v19905_v20 }
 0x11a   :  { %11258 = vmatmul.mubr.f32.vlgmr.msra.gmra.mrb[0].mxu0 %v19906_v12 }
 0x11b   :  { %11764 = vmatpush3.bf16.msra.mxu0 %v13440_v14  ;;  %11260 = vmatprep.mubr.f32.mxu0 %v19907_v17 }
 0x11c   :  { %11766 = vmatprep.subr.bf16.mxu0 %v19908_v6 }
 0x11e   :  { %11261 = vmatmul.mubr.f32.gmra.mrb[2].mxu0 %v19909_v18 }
 0x11f   :  { %11263 = vmatprep.mubr.f32.mxu0 %v19910_v9  ;;  %11768 = vmatpush3.bf16.msra.mxu0 %v19908_v6  ;;  %v19962_v6 = vld [vmem:[#allocation114_spill] sm:$0xff] }
 0x120   :  { %11770 = vmatprep.subr.bf16.mxu0 %v19911_v10 }
 0x122   :  { %11264 = vmatmul.mubr.f32.gmra.mrb[4].mxu0 %v19912_v37 }
 0x123   :  { %11266 = vmatprep.mubr.f32.mxu0 %v19913_v8  ;;  %11772 = vmatpush3.bf16.msra.mxu0 %v19911_v10  ;;  %v19959_v10 = vld [vmem:[#allocation108_spill] sm:$0xff] }
 0x124   :  { %11774 = vmatprep.subr.bf16.mxu0 %v19914_v45 }
 0x126   :  { %11267 = vmatmul.mubr.f32.gmra.mrb[6].mxu0 %v19915_v39 }
 0x127   :  { %11269 = vmatprep.mubr.f32.mxu0 %v19916_v23  ;;  %11776 = vmatpush3.bf16.msra.mxu0 %v19914_v45  ;;  %v19956_v45 = vld [vmem:[#allocation102_spill] sm:$0xff] }
 0x128   :  { %11778 = vmatprep.subr.bf16.mxu0 %v19917_v42 }
 0x12a   :  { %11270 = vmatmul.mubr.f32.gmra.mrb[8].mxu0 %v19922_v31 }
 0x12b   :  { %11272 = vmatprep.mubr.f32.mxu0 %v19923_v35  ;;  %11780 = vmatpush3.bf16.msra.mxu0 %v19917_v42  ;;  %v19953_v42 = vld [vmem:[#allocation93_spill] sm:$0xff] }
 0x12c   :  { %11782 = vmatprep.subr.bf16.mxu0 %v11781_v60 }
 0x12e   :  { %11273 = vmatmul.mubr.f32.gmra.mrb[10].mxu0 %v19924_v27 }
 0x12f   :  { %11275 = vmatprep.mubr.f32.mxu0 %v19925_v57 }
 0x132   :  { %11276 = vmatmul.mubr.f32.gmra.mrb[12].mxu0 %v19926_v1 }
 0x133   :  { %11278 = vmatprep.mubr.f32.mxu0 %v19927_v29 }
 0x136   :  { %11279 = vmatmul.mubr.f32.gmra.mrb[14].mxu0 %v19928_v47 }
 0x137   :  { %11281 = vmatprep.mubr.f32.mxu0 %v19929_v46 }
 0x13a   :  { %11282 = vmatmul.mubr.f32.gmra.mrb[16].mxu0 %v19930_v41 }
 0x13b   :  { %11284 = vmatprep.mubr.f32.mxu0 %v19931_v13 }
 0x13e   :  { %11285 = vmatmul.mubr.f32.gmra.mrb[18].mxu0 %v19932_v49 }
 0x13f   :  { %11287 = vmatprep.mubr.f32.mxu0 %v19933_v50 }
 0x142   :  { %11288 = vmatmul.mubr.f32.gmra.mrb[20].mxu0 %v19934_v62 }
 0x143   :  { %11290 = vmatprep.mubr.f32.mxu0 %v19935_v32 }
 0x146   :  { %11291 = vmatmul.mubr.f32.gmra.mrb[22].mxu0 %v19936_v4 }
 0x147   :  { %11293 = vmatprep.mubr.f32.mxu0 %v19937_v7 }
 0x14a   :  { %11294 = vmatmul.mubr.f32.gmra.mrb[24].mxu0 %v19938_v3 }
 0x14b   :  { %11296 = vmatprep.mubr.f32.mxu0 %v19939_v54 }
 0x14e   :  { %11297 = vmatmul.mubr.f32.gmra.mrb[26].mxu0 %v19940_v59 }
 0x14f   :  { %11299 = vmatprep.mubr.f32.mxu0 %v19941_v56 }
 0x152   :  { %11300 = vmatmul.mubr.f32.gmra.mrb[28].mxu0 %v19942_v61 }
 0x153   :  { %11302 = vmatprep.mubr.f32.mxu0 %v19943_v0 }
 0x156   :  { %11303 = vmatmul.mubr.f32.gmra.mrb[30].mxu0 %v19944_v2 }
 0x157   :  { %11305 = vmatprep.mubr.f32.mxu0 %v19945_v22 }
 0x15a   :  { %11306 = vmatmul.mubr.f32.gmra.mrb[32].mxu0 %v19946_v11 }
 0x15b   :  { %11308 = vmatprep.mubr.f32.mxu0 %v19947_v24 }
 0x15e   :  { %11309 = vmatmul.mubr.f32.gmra.mrb[34].mxu0 %v19948_v38 }
 0x15f   :  { %11311 = vmatprep.mubr.f32.mxu0 %v19949_v40 }
 0x162   :  { %11312 = vmatmul.mubr.f32.gmra.mrb[36].mxu0 %v19950_v55 }
 0x163   :  { %11314 = vmatprep.mubr.f32.mxu0 %v19951_v63 }
 0x166   :  { %11315 = vmatmul.mubr.f32.gmra.mrb[38].mxu0 %v19952_v51 }
 0x167   :  { %11317 = vmatprep.mubr.f32.mxu0 %v19953_v42 }
 0x16a   :  { %11318 = vmatmul.mubr.f32.gmra.mrb[40].mxu0 %v19954_v44 }
 0x16b   :  { %11320 = vmatprep.mubr.f32.mxu0 %v19955_v33  ;;  %v19966_v33 = vld [vmem:[#allocation122_spill] sm:$0xff] }
 0x16e   :  { %11321 = vmatmul.mubr.f32.gmra.mrb[42].mxu0 %v19956_v45  ;;  %v19967_v45 = vld [vmem:[#allocation123_spill] sm:$0xff] }
 0x16f   :  { %11323 = vmatprep.mubr.f32.mxu0 %v19957_v15  ;;  %v19968_v15 = vld [vmem:[#allocation126_spill] sm:$0xff] }
 0x172   :  { %11324 = vmatmul.mubr.f32.gmra.mrb[44].mxu0 %v19958_v53  ;;  %v19969_v53 = vld [vmem:[#allocation128_spill] sm:$0xff] }
 0x173   :  { %11326 = vmatprep.mubr.f32.mxu0 %v19959_v10 }
 0x176   :  { %11327 = vmatmul.mubr.f32.gmra.mrb[46].mxu0 %v19960_v52 }
 0x177   :  { %11329 = vmatprep.mubr.f32.mxu0 %v19961_v43 }
 0x17a   :  { %11330 = vmatmul.mubr.f32.gmra.mrb[48].mxu0 %v19962_v6 }
 0x17b   :  { %11332 = vmatprep.mubr.f32.mxu0 %v19963_v36 }
 0x17e   :  { %11333 = vmatmul.mubr.f32.gmra.mrb[50].mxu0 %v19964_v28 }
 0x17f   :  { %11335 = vmatprep.mubr.f32.mxu0 %v19965_v26 }
 0x182   :  { %11336 = vmatmul.mubr.f32.gmra.mrb[52].mxu0 %v19966_v33 }
 0x183   :  { %11338 = vmatprep.mubr.f32.mxu0 %v19967_v45  ;;  %v19970_v45 = vand.u32 4294901760, %v19905_v20  ;;  %v19979_v20 = vand.u32 4294901760, %v19909_v18  ;;  %v19987_v18 = vld [vmem:[#allocation100_spill] sm:$0xff] }
 0x186   :  { %11339 = vmatmul.mubr.f32.gmra.mrb[54].mxu0 %v19968_v15  ;;  %v19971_v15 = vand.u32 4294901760, %v13644_v21  ;;  %v19980_v21 = vand.u32 4294901760, %v19910_v9 }
 0x187   :  { %11341 = vmatprep.mubr.f32.mxu0 %v19969_v53  ;;  %v19972_v53 = vand.u32 4294901760, %v13664_v48  ;;  %v19983_v48 = vld [vmem:[#allocation79_spill] sm:$0xff] }
 0x18a   :  { %11342 = vmatmul.mubr.f32.gmra.mrb[56].mxu0 %v14346_v25  ;;  %v11785_v25 = vpack.c.bf16 %v19972_v53, %v19971_v15  ;;  %v19981_v53 = vld [vmem:[#allocation76_spill] sm:$0xff] }
 0x18b   :  { %11344 = vmatprep.mubr.f32.mxu0 %v14357_v16  ;;  %v19973_v16 = vand.u32 4294901760, %v19906_v12  ;;  %v19982_v15 = vand.u32 4294901760, %v19981_v53  ;;  %v19998_v12 = vand.u32 4294901760, %v19927_v29  ;;  %v20005_v29 = vand.u32 4294901760, %v19934_v62 }
 0x18c   :  { %v20012_v62 = vand.u32 4294901760, %v19941_v56  ;;  %v20019_v56 = vand.u32 4294901760, %v19948_v38  ;;  %v20026_v38 = vld [vmem:[#allocation98_spill] sm:$0xff] }
 0x18e   :  { %11345 = vmatmul.mubr.f32.gmra.mrb[58].mxu0 %v14372_v30  ;;  %v19977_v30 = vld [vmem:[#allocation56_spill] sm:$0xff] }
 0x18f   :  { %11347 = vmatprep.mubr.f32.mxu0 %v14375_v5  ;;  %v19974_v5 = vand.u32 4294901760, %v19907_v17  ;;  %v20001_v17 = vand.u32 4294901760, %v19930_v41  ;;  %v20008_v41 = vand.u32 4294901760, %v19937_v7  ;;  %v20015_v7 = vand.u32 4294901760, %v19944_v2 }
 0x190   :  { %v20022_v2 = vand.u32 4294901760, %v19951_v63  ;;  %v20032_v63 = vld [vmem:[#allocation107_spill] sm:$0xff] }
 0x192   :  { %11348 = vmatmul.mubr.f32.gmra.mrb[60].mxu0 %v14390_v19  ;;  %v19975_v19 = vld [vmem:[#allocation51_spill] sm:$0xff] }
 0x193   :  { %11350 = vmatprep.mubr.f32.mxu0 %v14399_v58  ;;  %v19976_v58 = vand.u32 4294901760, %v19975_v19  ;;  %v19986_v19 = vand.u32 4294901760, %v19913_v8  ;;  %v19994_v8 = vand.u32 4294901760, %v19923_v35  ;;  %v20000_v35 = vand.u32 4294901760, %v19929_v46 }
 0x194   :  { %v20007_v46 = vand.u32 4294901760, %v19936_v4  ;;  %v20014_v4 = vand.u32 4294901760, %v19943_v0  ;;  %v20021_v0 = vand.u32 4294901760, %v19950_v55  ;;  %v20030_v55 = vld [vmem:[#allocation104_spill] sm:$0xff] }
 0x195   :  { %v20031_v53 = vand.u32 4294901760, %v20030_v55  ;;  %v20094_v55 = vld [vmem:[#allocation63_spill] sm:$0xff] }
 0x196   :  { %11351 = vmatmul.mubr.f32.gmra.mrb[62].mxu0 %v14406_v34  ;;  %v19978_v34 = vand.u32 4294901760, %v19977_v30  ;;  %v19988_v30 = vand.u32 4294901760, %v19987_v18 }
 0x197   :  { %11373 = vmatprep.mubr.f32.mxu0 %v19970_v45  ;;  %v19984_v45 = vand.u32 4294901760, %v19983_v48  ;;  %v20037_v48 = vand.u32 4294901760, %v19962_v6  ;;  %v20047_v6 = vld [vmem:[#allocation128_spill] sm:$0xff] }
 0x198   :  { %v11789_v33 = vpack.c.bf16 %v19978_v34, %v19976_v58  ;;  %v19989_v58 = vld [vmem:[#allocation101_spill] sm:$0xff] }
 0x199   :  { %v19990_v9 = vand.u32 4294901760, %v19989_v58  ;;  %v20048_v58 = vand.u32 4294901760, %v20047_v6  ;;  %v20111_v6 = vld [vmem:[#allocation99_spill] sm:$0xff] }
 0x19a   :  { %11374 = vmatmul.mubr.f32.vlgmr.msra.gmra.mrb[0].mxu0 %v19973_v16  ;;  %v11793_v16 = vpack.c.bf16 %v19984_v45, %v19982_v15  ;;  %v20033_v15 = vand.u32 4294901760, %v20032_v63  ;;  %v20038_v45 = vand.u32 4294901760, %v19963_v36  ;;  %v20049_v36 = vld [vmem:[#allocation130_spill] sm:$0xff] }
 0x19b   :  { %11784 = vmatpush3.bf16.msra.mxu0 %v11781_v60  ;;  %11376 = vmatprep.mubr.f32.mxu0 %v19974_v5  ;;  %v19985_v5 = vand.u32 4294901760, %v19912_v37  ;;  %v11797_v34 = vpack.c.bf16 %v19990_v9, %v19988_v30  ;;  %v19992_v60 = vand.u32 4294901760, %v19916_v23  ;;  %v19993_v37 = vand.u32 4294901760, %v19922_v31  ;;  %v20096_v63 = vld [vmem:[#allocation66_spill] sm:$0xff] }
 0x19c   :  { %11786 = vmatprep.subr.bf16.mxu0 %v11785_v25  ;;  %v19997_v23 = vand.u32 4294901760, %v19926_v1  ;;  %v19999_v31 = vand.u32 4294901760, %v19928_v47  ;;  %v20004_v1 = vand.u32 4294901760, %v19933_v50  ;;  %v20006_v47 = vand.u32 4294901760, %v19935_v32 }
 0x19d   :  { %v20011_v50 = vand.u32 4294901760, %v19940_v59  ;;  %v20013_v32 = vand.u32 4294901760, %v19942_v61  ;;  %v20018_v59 = vand.u32 4294901760, %v19947_v24  ;;  %v20020_v61 = vand.u32 4294901760, %v19949_v40  ;;  %v20028_v40 = vld [vmem:[#allocation102_spill] sm:$0xff] }
 0x19e   :  { %11377 = vmatmul.mubr.f32.gmra.mrb[2].mxu0 %v19979_v20  ;;  %v20025_v24 = vand.u32 4294901760, %v19954_v44  ;;  %v20027_v20 = vand.u32 4294901760, %v20026_v38  ;;  %v20036_v44 = vand.u32 4294901760, %v19961_v43  ;;  %v20045_v43 = vld [vmem:[#allocation126_spill] sm:$0xff]  ;;  %v20050_v9 = vand.u32 4294901760, %v20049_v36  ;;  %v20113_v36 = vld [vmem:[#allocation105_spill] sm:$0xff] }
 0x19f   :  { %11379 = vmatprep.mubr.f32.mxu0 %v19980_v21  ;;  %11788 = vmatpush3.bf16.msra.mxu0 %v11785_v25  ;;  %v19991_v25 = vand.u32 4294901760, %v19915_v39  ;;  %v19996_v39 = vand.u32 4294901760, %v19925_v57  ;;  %v20003_v57 = vand.u32 4294901760, %v19932_v49  ;;  %v20010_v49 = vand.u32 4294901760, %v19939_v54  ;;  %v20090_v38 = vld [vmem:[#allocation54_spill] sm:$0xff] }
 0x1a0   :  { %11790 = vmatprep.subr.bf16.mxu0 %v11789_v33  ;;  %v20017_v54 = vand.u32 4294901760, %v19946_v11  ;;  %v20024_v11 = vand.u32 4294901760, %v19953_v42  ;;  %v20029_v21 = vand.u32 4294901760, %v20028_v40  ;;  %v20035_v42 = vand.u32 4294901760, %v19960_v52  ;;  %v20043_v52 = vld [vmem:[#allocation123_spill] sm:$0xff] }
 0x1a1   :  { %v20044_v18 = vand.u32 4294901760, %v20043_v52  ;;  %v20046_v30 = vand.u32 4294901760, %v20045_v43  ;;  %v20092_v40 = vld [vmem:[#allocation59_spill] sm:$0xff]  ;;  %v20107_v52 = vld [vmem:[#allocation90_spill] sm:$0xff] }
 0x1a2   :  { %11380 = vmatmul.mubr.f32.gmra.mrb[4].mxu0 %v19985_v5  ;;  %v20040_v5 = vand.u32 4294901760, %v19965_v26  ;;  %v20053_v26 = vld [vmem:[#allocation134_spill] sm:$0xff]  ;;  %v20109_v43 = vld [vmem:[#allocation95_spill] sm:$0xff] }
 0x1a3   :  { %11382 = vmatprep.mubr.f32.mxu0 %v19986_v19  ;;  %11792 = vmatpush3.bf16.msra.mxu0 %v11789_v33  ;;  %v19995_v33 = vand.u32 4294901760, %v19924_v27  ;;  %v20002_v27 = vand.u32 4294901760, %v19931_v13  ;;  %v20009_v13 = vand.u32 4294901760, %v19938_v3  ;;  %v20016_v3 = vand.u32 4294901760, %v19945_v22 }
 0x1a4   :  { %11794 = vmatprep.subr.bf16.mxu0 %v11793_v16  ;;  %v20023_v22 = vand.u32 4294901760, %v19952_v51  ;;  %v20034_v51 = vand.u32 4294901760, %v19959_v10  ;;  %v20041_v10 = vld [vmem:[#allocation122_spill] sm:$0xff] }
 0x1a5   :  { %v20042_v19 = vand.u32 4294901760, %v20041_v10  ;;  %v20105_v10 = vld [vmem:[#allocation87_spill] sm:$0xff] }
 0x1a6   :  { %11383 = vmatmul.mubr.f32.gmra.mrb[6].mxu0 %v19991_v25  ;;  %v20054_v25 = vand.u32 4294901760, %v20053_v26  ;;  %v20117_v26 = vld [vmem:[#allocation112_spill] sm:$0xff] }
 0x1a7   :  { %11385 = vmatprep.mubr.f32.mxu0 %v19992_v60  ;;  %11796 = vmatpush3.bf16.msra.mxu0 %v11793_v16  ;;  %v20039_v16 = vand.u32 4294901760, %v19964_v28  ;;  %v20051_v28 = vld [vmem:[#allocation133_spill] sm:$0xff]  ;;  %v20055_v60 = vld [vmem:[#allocation135_spill] sm:$0xff] }
 0x1a8   :  { %11798 = vmatprep.subr.bf16.mxu0 %v11797_v34 }
 0x1aa   :  { %11386 = vmatmul.mubr.f32.gmra.mrb[8].mxu0 %v19993_v37  ;;  %v20056_v37 = vand.u32 4294901760, %v20055_v60  ;;  %v20119_v60 = vld [vmem:[#allocation117_spill] sm:$0xff] }
 0x1ab   :  { %11388 = vmatprep.mubr.f32.mxu0 %v19994_v8  ;;  %11800 = vmatpush3.bf16.msra.mxu0 %v11797_v34  ;;  %v20052_v34 = vand.u32 4294901760, %v20051_v28  ;;  %v20057_v8 = vld [vmem:[#allocation138_spill] sm:$0xff]  ;;  %v20115_v28 = vld [vmem:[#allocation109_spill] sm:$0xff] }
 0x1ac   :  { %11802 = vmatprep.subr.bf16.mxu0 %v13440_v14 }
 0x1ae   :  { %11389 = vmatmul.mubr.f32.gmra.mrb[10].mxu0 %v19995_v33  ;;  %v20058_v33 = vand.u32 4294901760, %v20057_v8  ;;  %v20121_v8 = vld [vmem:[#allocation119_spill] sm:$0xff] }
 0x1af   :  { %11391 = vmatprep.mubr.f32.mxu0 %v19996_v39  ;;  %v20059_v39 = vld [vmem:[#allocation140_spill] sm:$0xff] }
 0x1b2   :  { %11392 = vmatmul.mubr.f32.gmra.mrb[12].mxu0 %v19997_v23  ;;  %v20060_v23 = vand.u32 4294901760, %v20059_v39  ;;  %v20123_v39 = vld [vmem:[#allocation125_spill] sm:$0xff] }
 0x1b3   :  { %11394 = vmatprep.mubr.f32.mxu0 %v19998_v12  ;;  %v20061_v12 = vld [vmem:[#allocation141_spill] sm:$0xff] }
 0x1b6   :  { %11395 = vmatmul.mubr.f32.gmra.mrb[14].mxu0 %v19999_v31  ;;  %v20062_v31 = vand.u32 4294901760, %v20061_v12  ;;  %v20125_v12 = vld [vmem:[#allocation129_spill] sm:$0xff] }
 0x1b7   :  { %11397 = vmatprep.mubr.f32.mxu0 %v20000_v35  ;;  %v20063_v35 = vld [vmem:[#allocation4_spill] sm:$0xff] }
 0x1ba   :  { %11398 = vmatmul.mubr.f32.gmra.mrb[16].mxu0 %v20001_v17  ;;  %v20064_v17 = vld [vmem:[#allocation5_spill] sm:$0xff] }
 0x1bb   :  { %11400 = vmatprep.mubr.f32.mxu0 %v20002_v27  ;;  %v20065_v27 = vld [vmem:[#allocation9_spill] sm:$0xff] }
 0x1be   :  { %11401 = vmatmul.mubr.f32.gmra.mrb[18].mxu0 %v20003_v57  ;;  %v20066_v57 = vld [vmem:[#allocation2_spill] sm:$0xff] }
 0x1bf   :  { %11403 = vmatprep.mubr.f32.mxu0 %v20004_v1  ;;  %v20067_v1 = vld [vmem:[#allocation11_spill] sm:$0xff] }
 0x1c2   :  { %11404 = vmatmul.mubr.f32.gmra.mrb[20].mxu0 %v20005_v29  ;;  %v20068_v29 = vld [vmem:[#allocation14_spill] sm:$0xff] }
 0x1c3   :  { %11406 = vmatprep.mubr.f32.mxu0 %v20006_v47  ;;  %v20069_v47 = vld [vmem:[#allocation3_spill] sm:$0xff] }
 0x1c6   :  { %11407 = vmatmul.mubr.f32.gmra.mrb[22].mxu0 %v20007_v46  ;;  %v20070_v46 = vld [vmem:[#allocation15_spill] sm:$0xff] }
 0x1c7   :  { %11409 = vmatprep.mubr.f32.mxu0 %v20008_v41  ;;  %v20071_v41 = vld [vmem:[#allocation20_spill] sm:$0xff] }
 0x1ca   :  { %11410 = vmatmul.mubr.f32.gmra.mrb[24].mxu0 %v20009_v13  ;;  %v20072_v13 = vld [vmem:[#allocation12_spill] sm:$0xff] }
 0x1cb   :  { %11412 = vmatprep.mubr.f32.mxu0 %v20010_v49  ;;  %v20074_v49 = vld [vmem:[#allocation23_spill] sm:$0xff] }
 0x1ce   :  { %11413 = vmatmul.mubr.f32.gmra.mrb[26].mxu0 %v20011_v50  ;;  %v20075_v50 = vld [vmem:[#allocation18_spill] sm:$0xff] }
 0x1cf   :  { %11415 = vmatprep.mubr.f32.mxu0 %v20012_v62  ;;  %v20076_v62 = vld [vmem:[#allocation24_spill] sm:$0xff] }
 0x1d2   :  { %11416 = vmatmul.mubr.f32.gmra.mrb[28].mxu0 %v20013_v32  ;;  %v20077_v32 = vld [vmem:[#allocation27_spill] sm:$0xff] }
 0x1d3   :  { %11418 = vmatprep.mubr.f32.mxu0 %v20014_v4  ;;  %v20078_v4 = vld [vmem:[#allocation29_spill] sm:$0xff] }
 0x1d6   :  { %11419 = vmatmul.mubr.f32.gmra.mrb[30].mxu0 %v20015_v7  ;;  %v20079_v7 = vld [vmem:[#allocation31_spill] sm:$0xff] }
 0x1d7   :  { %11421 = vmatprep.mubr.f32.mxu0 %v20016_v3  ;;  %v20080_v3 = vld [vmem:[#allocation33_spill] sm:$0xff] }
 0x1da   :  { %11422 = vmatmul.mubr.f32.gmra.mrb[32].mxu0 %v20017_v54  ;;  %v20081_v54 = vld [vmem:[#allocation35_spill] sm:$0xff] }
 0x1db   :  { %11424 = vmatprep.mubr.f32.mxu0 %v20018_v59  ;;  %v20082_v59 = vld [vmem:[#allocation36_spill] sm:$0xff] }
 0x1de   :  { %11425 = vmatmul.mubr.f32.gmra.mrb[34].mxu0 %v20019_v56  ;;  %v20083_v56 = vld [vmem:[#allocation39_spill] sm:$0xff] }
 0x1df   :  { %11427 = vmatprep.mubr.f32.mxu0 %v20020_v61  ;;  %v20084_v61 = vld [vmem:[#allocation40_spill] sm:$0xff] }
 0x1e2   :  { %11428 = vmatmul.mubr.f32.gmra.mrb[36].mxu0 %v20021_v0  ;;  %v20085_v0 = vld [vmem:[#allocation43_spill] sm:$0xff] }
 0x1e3   :  { %11430 = vmatprep.mubr.f32.mxu0 %v20022_v2  ;;  %v20086_v2 = vld [vmem:[#allocation45_spill] sm:$0xff] }
 0x1e6   :  { %11431 = vmatmul.mubr.f32.gmra.mrb[38].mxu0 %v20023_v22  ;;  %v20087_v22 = vld [vmem:[#allocation46_spill] sm:$0xff] }
 0x1e7   :  { %11433 = vmatprep.mubr.f32.mxu0 %v20024_v11  ;;  %v20088_v11 = vld [vmem:[#allocation50_spill] sm:$0xff] }
 0x1ea   :  { %11434 = vmatmul.mubr.f32.gmra.mrb[40].mxu0 %v20025_v24  ;;  %v20089_v24 = vld [vmem:[#allocation52_spill] sm:$0xff] }
 0x1eb   :  { %11436 = vmatprep.mubr.f32.mxu0 %v20027_v20  ;;  %v20091_v20 = vld [vmem:[#allocation55_spill] sm:$0xff] }
 0x1ee   :  { %11437 = vmatmul.mubr.f32.gmra.mrb[42].mxu0 %v20029_v21  ;;  %v20093_v21 = vld [vmem:[#allocation61_spill] sm:$0xff] }
 0x1ef   :  { %11439 = vmatprep.mubr.f32.mxu0 %v20031_v53  ;;  %v20095_v53 = vld [vmem:[#allocation65_spill] sm:$0xff] }
 0x1f2   :  { %11440 = vmatmul.mubr.f32.gmra.mrb[44].mxu0 %v20033_v15  ;;  %v20097_v15 = vld [vmem:[#allocation69_spill] sm:$0xff] }
 0x1f3   :  { %11442 = vmatprep.mubr.f32.mxu0 %v20034_v51  ;;  %v20098_v51 = vld [vmem:[#allocation71_spill] sm:$0xff] }
 0x1f6   :  { %11443 = vmatmul.mubr.f32.gmra.mrb[46].mxu0 %v20035_v42  ;;  %v20099_v42 = vld [vmem:[#allocation72_spill] sm:$0xff] }
 0x1f7   :  { %11445 = vmatprep.mubr.f32.mxu0 %v20036_v44  ;;  %v20100_v44 = vld [vmem:[#allocation77_spill] sm:$0xff] }
 0x1fa   :  { %11446 = vmatmul.mubr.f32.gmra.mrb[48].mxu0 %v20037_v48  ;;  %v20101_v48 = vld [vmem:[#allocation78_spill] sm:$0xff] }
 0x1fb   :  { %11448 = vmatprep.mubr.f32.mxu0 %v20038_v45  ;;  %v20102_v45 = vld [vmem:[#allocation80_spill] sm:$0xff] }
 0x1fe   :  { %11449 = vmatmul.mubr.f32.gmra.mrb[50].mxu0 %v20039_v16  ;;  %v20103_v16 = vld [vmem:[#allocation83_spill] sm:$0xff] }
 0x1ff   :  { %11451 = vmatprep.mubr.f32.mxu0 %v20040_v5  ;;  %v20104_v5 = vld [vmem:[#allocation84_spill] sm:$0xff] }
 0x202   :  { %11452 = vmatmul.mubr.f32.gmra.mrb[52].mxu0 %v20042_v19  ;;  %v20106_v19 = vld [vmem:[#allocation89_spill] sm:$0xff] }
 0x203   :  { %11454 = vmatprep.mubr.f32.mxu0 %v20044_v18  ;;  %v20108_v18 = vld [vmem:[#allocation94_spill] sm:$0xff] }
 0x206   :  { %11455 = vmatmul.mubr.f32.gmra.mrb[54].mxu0 %v20046_v30  ;;  %v20110_v30 = vld [vmem:[#allocation96_spill] sm:$0xff] }
 0x207   :  { %11457 = vmatprep.mubr.f32.mxu0 %v20048_v58  ;;  %v20112_v58 = vld [vmem:[#allocation103_spill] sm:$0xff] }
 0x20a   :  { %11458 = vmatmul.mubr.f32.gmra.mrb[56].mxu0 %v20050_v9  ;;  %v20114_v9 = vld [vmem:[#allocation106_spill] sm:$0xff] }
 0x20b   :  { %11460 = vmatprep.mubr.f32.mxu0 %v20052_v34  ;;  %v20116_v34 = vld [vmem:[#allocation111_spill] sm:$0xff] }
 0x20e   :  { %11461 = vmatmul.mubr.f32.gmra.mrb[58].mxu0 %v20054_v25  ;;  %v20118_v25 = vld [vmem:[#allocation116_spill] sm:$0xff] }
 0x20f   :  { %11463 = vmatprep.mubr.f32.mxu0 %v20056_v37  ;;  %v20120_v37 = vld [vmem:[#allocation118_spill] sm:$0xff] }
 0x212   :  { %11464 = vmatmul.mubr.f32.gmra.mrb[60].mxu0 %v20058_v33  ;;  %v20122_v33 = vld [vmem:[#allocation124_spill] sm:$0xff] }
 0x213   :  { %11466 = vmatprep.mubr.f32.mxu0 %v20060_v23  ;;  %v20124_v23 = vld [vmem:[#allocation127_spill] sm:$0xff] }
 0x216   :  { %11467 = vmatmul.mubr.f32.gmra.mrb[62].mxu0 %v20062_v31  ;;  %v20126_v31 = vld [vmem:[#allocation131_spill] sm:$0xff] }
 0x217   :  { %11489 = vmatprep.mubr.f32.mxu0 %v20063_v35 }
 0x21a   :  { %11490 = vmatmul.mubr.f32.vlgmr.msra.gmra.mrb[0].mxu0 %v20064_v17 }
 0x21b   :  { %11804 = vmatpush3.bf16.msra.mxu0 %v13440_v14  ;;  %11492 = vmatprep.mubr.f32.mxu0 %v20065_v27  ;;  %v20073_v14 = vld [vmem:[#allocation22_spill] sm:$0xff] }
 0x21c   :  { %11806 = vmatprep.subr.bf16.mxu0 %v20066_v57 }
 0x21e   :  { %11493 = vmatmul.mubr.f32.gmra.mrb[2].mxu0 %v20067_v1 }
 0x21f   :  { %11495 = vmatprep.mubr.f32.mxu0 %v20068_v29  ;;  %11808 = vmatpush3.bf16.msra.mxu0 %v20066_v57  ;;  %v20127_v57 = vld [vmem:[#allocation132_spill] sm:$0xff] }
 0x220   :  { %11810 = vmatprep.subr.bf16.mxu0 %v20069_v47 }
 0x222   :  { %11496 = vmatmul.mubr.f32.gmra.mrb[4].mxu0 %v20070_v46 }
 0x223   :  { %11498 = vmatprep.mubr.f32.mxu0 %v20071_v41  ;;  %11812 = vmatpush3.bf16.msra.mxu0 %v20069_v47  ;;  %v20128_v47 = vld [vmem:[#allocation136_spill] sm:$0xff] }
 0x224   :  { %11814 = vmatprep.subr.bf16.mxu0 %v20072_v13 }
 0x226   :  { %11499 = vmatmul.mubr.f32.gmra.mrb[6].mxu0 %v20073_v14 }
 0x227   :  { %11501 = vmatprep.mubr.f32.mxu0 %v20074_v49  ;;  %11816 = vmatpush3.bf16.msra.mxu0 %v20072_v13  ;;  %v20129_v13 = vld [vmem:[#allocation137_spill] sm:$0xff] }
 0x228   :  { %11818 = vmatprep.subr.bf16.mxu0 %v20075_v50 }
 0x22a   :  { %11502 = vmatmul.mubr.f32.gmra.mrb[8].mxu0 %v20076_v62 }
 0x22b   :  { %11504 = vmatprep.mubr.f32.mxu0 %v20077_v32  ;;  %11820 = vmatpush3.bf16.msra.mxu0 %v20075_v50  ;;  %v20130_v50 = vld [vmem:[#allocation139_spill] sm:$0xff] }
 0x22e   :  { %11505 = vmatmul.mubr.f32.gmra.mrb[10].mxu0 %v20078_v4 }
 0x22f   :  { %11507 = vmatprep.mubr.f32.mxu0 %v20079_v7 }
 0x232   :  { %11508 = vmatmul.mubr.f32.gmra.mrb[12].mxu0 %v20080_v3 }
 0x233   :  { %11510 = vmatprep.mubr.f32.mxu0 %v20081_v54 }
 0x236   :  { %11511 = vmatmul.mubr.f32.gmra.mrb[14].mxu0 %v20082_v59 }
 0x237   :  { %11513 = vmatprep.mubr.f32.mxu0 %v20083_v56 }
 0x23a   :  { %11514 = vmatmul.mubr.f32.gmra.mrb[16].mxu0 %v20084_v61 }
 0x23b   :  { %11516 = vmatprep.mubr.f32.mxu0 %v20085_v0 }
 0x23e   :  { %11517 = vmatmul.mubr.f32.gmra.mrb[18].mxu0 %v20086_v2 }
 0x23f   :  { %11519 = vmatprep.mubr.f32.mxu0 %v20087_v22 }
 0x242   :  { %11520 = vmatmul.mubr.f32.gmra.mrb[20].mxu0 %v20088_v11 }
 0x243   :  { %11522 = vmatprep.mubr.f32.mxu0 %v20089_v24 }
 0x246   :  { %11523 = vmatmul.mubr.f32.gmra.mrb[22].mxu0 %v20090_v38 }
 0x247   :  { %11525 = vmatprep.mubr.f32.mxu0 %v20091_v20 }
 0x24a   :  { %11526 = vmatmul.mubr.f32.gmra.mrb[24].mxu0 %v20092_v40 }
 0x24b   :  { %11528 = vmatprep.mubr.f32.mxu0 %v20093_v21 }
 0x24e   :  { %11529 = vmatmul.mubr.f32.gmra.mrb[26].mxu0 %v20094_v55 }
 0x24f   :  { %11531 = vmatprep.mubr.f32.mxu0 %v20095_v53 }
 0x252   :  { %11532 = vmatmul.mubr.f32.gmra.mrb[28].mxu0 %v20096_v63 }
 0x253   :  { %11534 = vmatprep.mubr.f32.mxu0 %v20097_v15 }
 0x256   :  { %11535 = vmatmul.mubr.f32.gmra.mrb[30].mxu0 %v20098_v51 }
 0x257   :  { %11537 = vmatprep.mubr.f32.mxu0 %v20099_v42 }
 0x25a   :  { %11538 = vmatmul.mubr.f32.gmra.mrb[32].mxu0 %v20100_v44 }
 0x25b   :  { %11540 = vmatprep.mubr.f32.mxu0 %v20101_v48 }
 0x25e   :  { %11541 = vmatmul.mubr.f32.gmra.mrb[34].mxu0 %v20102_v45 }
 0x25f   :  { %11543 = vmatprep.mubr.f32.mxu0 %v20103_v16 }
 0x262   :  { %11544 = vmatmul.mubr.f32.gmra.mrb[36].mxu0 %v20104_v5 }
 0x263   :  { %11546 = vmatprep.mubr.f32.mxu0 %v20105_v10 }
 0x266   :  { %11547 = vmatmul.mubr.f32.gmra.mrb[38].mxu0 %v20106_v19 }
 0x267   :  { %11549 = vmatprep.mubr.f32.mxu0 %v20107_v52 }
 0x26a   :  { %11550 = vmatmul.mubr.f32.gmra.mrb[40].mxu0 %v20108_v18 }
 0x26b   :  { %11552 = vmatprep.mubr.f32.mxu0 %v20109_v43 }
 0x26e   :  { %11553 = vmatmul.mubr.f32.gmra.mrb[42].mxu0 %v20110_v30 }
 0x26f   :  { %11555 = vmatprep.mubr.f32.mxu0 %v20111_v6 }
 0x272   :  { %11556 = vmatmul.mubr.f32.gmra.mrb[44].mxu0 %v20112_v58 }
 0x273   :  { %11558 = vmatprep.mubr.f32.mxu0 %v20113_v36 }
 0x276   :  { %11559 = vmatmul.mubr.f32.gmra.mrb[46].mxu0 %v20114_v9 }
 0x277   :  { %11561 = vmatprep.mubr.f32.mxu0 %v20115_v28 }
 0x27a   :  { %11562 = vmatmul.mubr.f32.gmra.mrb[48].mxu0 %v20116_v34 }
 0x27b   :  { %11564 = vmatprep.mubr.f32.mxu0 %v20117_v26 }
 0x27e   :  { %11565 = vmatmul.mubr.f32.gmra.mrb[50].mxu0 %v20118_v25 }
 0x27f   :  { %11567 = vmatprep.mubr.f32.mxu0 %v20119_v60 }
 0x282   :  { %11568 = vmatmul.mubr.f32.gmra.mrb[52].mxu0 %v20120_v37 }
 0x283   :  { %11570 = vmatprep.mubr.f32.mxu0 %v20121_v8 }
 0x286   :  { %11571 = vmatmul.mubr.f32.gmra.mrb[54].mxu0 %v20122_v33 }
 0x287   :  { %11573 = vmatprep.mubr.f32.mxu0 %v20123_v39 }
 0x28a   :  { %11574 = vmatmul.mubr.f32.gmra.mrb[56].mxu0 %v20124_v23 }
 0x28b   :  { %11576 = vmatprep.mubr.f32.mxu0 %v20125_v12 }
 0x28e   :  { %11577 = vmatmul.mubr.f32.gmra.mrb[58].mxu0 %v20126_v31 }
 0x28f   :  { %11579 = vmatprep.mubr.f32.mxu0 %v20127_v57 }
 0x292   :  { %11580 = vmatmul.mubr.f32.gmra.mrb[60].mxu0 %v20128_v47 }
 0x293   :  { %11582 = vmatprep.mubr.f32.mxu0 %v20129_v13 }
 0x296   :  { %11583 = vmatmul.mubr.f32.gmra.mrb[62].mxu0 %v20130_v50 }
 0x297   :  { %11605 = vmatprep.mubr.f32.mxu0 %v20063_v35  ;;  %v14856_v35 = vld [vmem:[%s18739_s2] ss:$0 sm:$0xff] }
 0x29a   :  { %11606 = vmatmul.mubr.f32.vlgmr.msra.gmra.mrb[0].mxu0 %v20064_v17 }
 0x29b   :  { %11608 = vmatprep.mubr.f32.mxu0 %v20065_v27 }
 0x29e   :  { %11609 = vmatmul.mubr.f32.gmra.mrb[2].mxu0 %v20067_v1 }
 0x29f   :  { %11611 = vmatprep.mubr.f32.mxu0 %v20068_v29 }
 0x2a2   :  { %11612 = vmatmul.mubr.f32.gmra.mrb[4].mxu0 %v20070_v46 }
 0x2a3   :  { %11614 = vmatprep.mubr.f32.mxu0 %v20071_v41 }
 0x2a6   :  { %11615 = vmatmul.mubr.f32.gmra.mrb[6].mxu0 %v20073_v14 }
 0x2a7   :  { %11617 = vmatprep.mubr.f32.mxu0 %v20074_v49 }
 0x2aa   :  { %11618 = vmatmul.mubr.f32.gmra.mrb[8].mxu0 %v20076_v62 }
 0x2ab   :  { %11620 = vmatprep.mubr.f32.mxu0 %v20077_v32 }
 0x2ae   :  { %11621 = vmatmul.mubr.f32.gmra.mrb[10].mxu0 %v20078_v4 }
 0x2af   :  { %11623 = vmatprep.mubr.f32.mxu0 %v20079_v7 }
 0x2b2   :  { %11624 = vmatmul.mubr.f32.gmra.mrb[12].mxu0 %v20080_v3 }
 0x2b3   :  { %11626 = vmatprep.mubr.f32.mxu0 %v20081_v54 }
 0x2b6   :  { %11627 = vmatmul.mubr.f32.gmra.mrb[14].mxu0 %v20082_v59 }
 0x2b7   :  { %11629 = vmatprep.mubr.f32.mxu0 %v20083_v56 }
 0x2ba   :  { %11630 = vmatmul.mubr.f32.gmra.mrb[16].mxu0 %v20084_v61 }
 0x2bb   :  { %11632 = vmatprep.mubr.f32.mxu0 %v20085_v0 }
 0x2be   :  { %11633 = vmatmul.mubr.f32.gmra.mrb[18].mxu0 %v20086_v2 }
 0x2bf   :  { %11635 = vmatprep.mubr.f32.mxu0 %v20087_v22 }
 0x2c2   :  { %11636 = vmatmul.mubr.f32.gmra.mrb[20].mxu0 %v20088_v11 }
 0x2c3   :  { %11638 = vmatprep.mubr.f32.mxu0 %v20089_v24 }
 0x2c6   :  { %11639 = vmatmul.mubr.f32.gmra.mrb[22].mxu0 %v20090_v38 }
 0x2c7   :  { %11641 = vmatprep.mubr.f32.mxu0 %v20091_v20 }
 0x2ca   :  { %11642 = vmatmul.mubr.f32.gmra.mrb[24].mxu0 %v20092_v40 }
 0x2cb   :  { %11644 = vmatprep.mubr.f32.mxu0 %v20093_v21 }
 0x2ce   :  { %11645 = vmatmul.mubr.f32.gmra.mrb[26].mxu0 %v20094_v55 }
 0x2cf   :  { %11647 = vmatprep.mubr.f32.mxu0 %v20095_v53 }
 0x2d2   :  { %11648 = vmatmul.mubr.f32.gmra.mrb[28].mxu0 %v20096_v63 }
 0x2d3   :  { %11650 = vmatprep.mubr.f32.mxu0 %v20097_v15 }
 0x2d6   :  { %11651 = vmatmul.mubr.f32.gmra.mrb[30].mxu0 %v20098_v51 }
 0x2d7   :  { %11653 = vmatprep.mubr.f32.mxu0 %v20099_v42 }
 0x2da   :  { %11654 = vmatmul.mubr.f32.gmra.mrb[32].mxu0 %v20100_v44 }
 0x2db   :  { %11656 = vmatprep.mubr.f32.mxu0 %v20101_v48 }
 0x2de   :  { %11657 = vmatmul.mubr.f32.gmra.mrb[34].mxu0 %v20102_v45 }
 0x2df   :  { %11659 = vmatprep.mubr.f32.mxu0 %v20103_v16 }
 0x2e2   :  { %11660 = vmatmul.mubr.f32.gmra.mrb[36].mxu0 %v20104_v5 }
 0x2e3   :  { %11662 = vmatprep.mubr.f32.mxu0 %v20105_v10 }
 0x2e6   :  { %11663 = vmatmul.mubr.f32.gmra.mrb[38].mxu0 %v20106_v19 }
 0x2e7   :  { %11665 = vmatprep.mubr.f32.mxu0 %v20107_v52 }
 0x2ea   :  { %11666 = vmatmul.mubr.f32.gmra.mrb[40].mxu0 %v20108_v18 }
 0x2eb   :  { %11668 = vmatprep.mubr.f32.mxu0 %v20109_v43 }
 0x2ee   :  { %11669 = vmatmul.mubr.f32.gmra.mrb[42].mxu0 %v20110_v30 }
 0x2ef   :  { %11671 = vmatprep.mubr.f32.mxu0 %v20111_v6 }
 0x2f2   :  { %11672 = vmatmul.mubr.f32.gmra.mrb[44].mxu0 %v20112_v58 }
 0x2f3   :  { %11674 = vmatprep.mubr.f32.mxu0 %v20113_v36 }
 0x2f6   :  { %11675 = vmatmul.mubr.f32.gmra.mrb[46].mxu0 %v20114_v9 }
 0x2f7   :  { %11677 = vmatprep.mubr.f32.mxu0 %v20115_v28 }
 0x2fa   :  { %11678 = vmatmul.mubr.f32.gmra.mrb[48].mxu0 %v20116_v34 }
 0x2fb   :  { %11680 = vmatprep.mubr.f32.mxu0 %v20117_v26 }
 0x2fe   :  { %11681 = vmatmul.mubr.f32.gmra.mrb[50].mxu0 %v20118_v25 }
 0x2ff   :  { %11683 = vmatprep.mubr.f32.mxu0 %v20119_v60 }
 0x302   :  { %11684 = vmatmul.mubr.f32.gmra.mrb[52].mxu0 %v20120_v37 }
 0x303   :  { %11686 = vmatprep.mubr.f32.mxu0 %v20121_v8 }
 0x306   :  { %11687 = vmatmul.mubr.f32.gmra.mrb[54].mxu0 %v20122_v33 }
 0x307   :  { %11689 = vmatprep.mubr.f32.mxu0 %v20123_v39 }
 0x30a   :  { %11690 = vmatmul.mubr.f32.gmra.mrb[56].mxu0 %v20124_v23 }
 0x30b   :  { %11692 = vmatprep.mubr.f32.mxu0 %v20125_v12 }
 0x30e   :  { %11693 = vmatmul.mubr.f32.gmra.mrb[58].mxu0 %v20126_v31 }
 0x30f   :  { %11695 = vmatprep.mubr.f32.mxu0 %v20127_v57 }
 0x312   :  { %11696 = vmatmul.mubr.f32.gmra.mrb[60].mxu0 %v20128_v47 }
 0x313   :  { %11698 = vmatprep.mubr.f32.mxu0 %v20129_v13 }
 0x316   :  { %11699 = vmatmul.mubr.f32.gmra.mrb[62].mxu0 %v20130_v50 }
 0x36d   :  { %v11607_v17 = vpop.f32.mrb[0].mxu0 }
 0x36e   :  { %v14859_v27 = vadd.f32 %v11607_v17, %v14856_v35  ;;  %v3188_v1 = vpop.f32.mrb[1].mxu0 }
 0x36f   :  { %v14862_v29 = vadd.f32 %v14856_v35, %v3188_v1 }
 0x370   :  { %20131 = vst [vmem:[#allocation8_spill] sm:$0xff] %v14859_v27  ;;  %v19080_v46 = vand.u32 4294901760, %v14859_v27  ;;  %3645 = vrot.lane.b32.xlu1 %v14859_v27, %s13366_s12 }
 0x371   :  { %20132 = vst [vmem:[#allocation10_spill] sm:$0xff] %v14862_v29  ;;  %v19081_v41 = vand.u32 4294901760, %v14862_v29  ;;  %v11610_v14 = vpop.f32.mrb[2].mxu0 }
 0x372   :  { %v14871_v49 = vsub.f32 %v14859_v27, %v19080_v46  ;;  %v14874_v62 = vadd.f32 %v11610_v14, %v14856_v35  ;;  %v3200_v32 = vpop.f32.mrb[3].mxu0 }
 0x373   :  { %v14879_v4 = vsub.f32 %v14862_v29, %v19081_v41  ;;  %v14882_v7 = vadd.f32 %v14856_v35, %v3200_v32 }
 0x374   :  { %20133 = vst [vmem:[#allocation13_spill] sm:$0xff] %v14871_v49  ;;  %20134 = vst [vmem:[#allocation16_spill] sm:$0xff] %v14874_v62  ;;  %v19076_v3 = vand.u32 4294901760, %v14874_v62  ;;  %3643 = vrot.lane.b32.xlu1 %v14862_v29, %s13366_s12  ;;  %v19059_v54 = vand.u32 4294901760, %v14871_v49 }
 0x375   :  { %20135 = vst [vmem:[#allocation17_spill] sm:$0xff] %v14879_v4  ;;  %20136 = vst [vmem:[#allocation19_spill] sm:$0xff] %v14882_v7  ;;  %v19077_v59 = vand.u32 4294901760, %v14882_v7  ;;  %v11613_v56 = vpop.f32.mrb[4].mxu0  ;;  %3647 = vrot.lane.b32.xlu0 %v14882_v7, %s13366_s12  ;;  %v19060_v61 = vand.u32 4294901760, %v14879_v4 }
 0x376   :  { %v14895_v0 = vsub.f32 %v14874_v62, %v19076_v3  ;;  %v14898_v2 = vadd.f32 %v11613_v56, %v14856_v35  ;;  %v3212_v22 = vpop.f32.mrb[5].mxu0 }
 0x377   :  { %v14903_v11 = vsub.f32 %v14882_v7, %v19077_v59  ;;  %v14906_v24 = vadd.f32 %v14856_v35, %v3212_v22  ;;  %v14915_v20 = vpack.c.bf16 %v19059_v54, %v19060_v61 }
 0x378   :  { %20137 = vst [vmem:[#allocation21_spill] sm:$0xff] %v14895_v0  ;;  %20138 = vst [vmem:[#allocation25_spill] sm:$0xff] %v14898_v2  ;;  %v19072_v38 = vand.u32 4294901760, %v14898_v2  ;;  %3649 = vrot.lane.b32.xlu1 %v14874_v62, %s13366_s12  ;;  %v19055_v53 = vand.u32 4294901760, %v14895_v0 }
 0x379   :  { %20139 = vst [vmem:[#allocation26_spill] sm:$0xff] %v14903_v11  ;;  %20140 = vst [vmem:[#allocation6_spill] sm:$0xff] %v14906_v24  ;;  %v19073_v40 = vand.u32 4294901760, %v14906_v24  ;;  %v11616_v21 = vpop.f32.mrb[6].mxu0  ;;  %3651 = vrot.lane.b32.xlu0 %v14906_v24, %s13366_s12  ;;  %v19054_v55 = vand.u32 4294901760, %v14903_v11 }
 0x37a   :  { %20141 = vst [vmem:[#allocation7_spill] sm:$0xff] %v14915_v20  ;;  %v14925_v63 = vsub.f32 %v14898_v2, %v19072_v38  ;;  %v14928_v15 = vadd.f32 %v11616_v21, %v14856_v35  ;;  %v3224_v51 = vpop.f32.mrb[7].mxu0 }
 0x37b   :  { %v14933_v42 = vsub.f32 %v14906_v24, %v19073_v40  ;;  %v14936_v44 = vadd.f32 %v14856_v35, %v3224_v51  ;;  %v14948_v5 = vpack.c.bf16 %v19055_v53, %v19054_v55 }
 0x37c   :  { %20142 = vst [vmem:[#allocation28_spill] sm:$0xff] %v14925_v63  ;;  %20143 = vst [vmem:[#allocation30_spill] sm:$0xff] %v14928_v15  ;;  %v19070_v48 = vand.u32 4294901760, %v14928_v15  ;;  %3653 = vrot.lane.b32.xlu1 %v14898_v2, %s13366_s12  ;;  %v19052_v43 = vand.u32 4294901760, %v14925_v63 }
 0x37d   :  { %20144 = vst [vmem:[#allocation32_spill] sm:$0xff] %v14933_v42  ;;  %20145 = vst [vmem:[#allocation34_spill] sm:$0xff] %v14936_v44  ;;  %v19071_v45 = vand.u32 4294901760, %v14936_v44  ;;  %v11619_v16 = vpop.f32.mrb[8].mxu0  ;;  %3655 = vrot.lane.b32.xlu0 %v14936_v44, %s13366_s12  ;;  %v19053_v18 = vand.u32 4294901760, %v14933_v42 }
 0x37e   :  { %20146 = vst [vmem:[#allocation37_spill] sm:$0xff] %v14948_v5  ;;  %v14953_v10 = vsub.f32 %v14928_v15, %v19070_v48  ;;  %v14956_v19 = vadd.f32 %v11619_v16, %v14856_v35  ;;  %v3236_v52 = vpop.f32.mrb[9].mxu0 }
 0x37f   :  { %v14963_v30 = vsub.f32 %v14936_v44, %v19071_v45  ;;  %v14966_v6 = vadd.f32 %v14856_v35, %v3236_v52  ;;  %v14988_v37 = vpack.c.bf16 %v19052_v43, %v19053_v18 }
 0x380   :  { %20147 = vst [vmem:[#allocation38_spill] sm:$0xff] %v14953_v10  ;;  %20148 = vst [vmem:[#allocation41_spill] sm:$0xff] %v14956_v19  ;;  %v19066_v58 = vand.u32 4294901760, %v14956_v19  ;;  %3657 = vrot.lane.b32.xlu1 %v14928_v15, %s13366_s12  ;;  %v19049_v34 = vand.u32 4294901760, %v14953_v10 }
 0x381   :  { %20149 = vst [vmem:[#allocation42_spill] sm:$0xff] %v14963_v30  ;;  %20150 = vst [vmem:[#allocation44_spill] sm:$0xff] %v14966_v6  ;;  %v19069_v36 = vand.u32 4294901760, %v14966_v6  ;;  %v11622_v9 = vpop.f32.mrb[10].mxu0  ;;  %3659 = vrot.lane.b32.xlu0 %v14966_v6, %s13366_s12  ;;  %v19048_v28 = vand.u32 4294901760, %v14963_v30 }
 0x382   :  { %v14979_v26 = vsub.f32 %v14956_v19, %v19066_v58  ;;  %v14982_v25 = vadd.f32 %v11622_v9, %v14856_v35  ;;  %v3248_v60 = vpop.f32.mrb[11].mxu0  ;;  %20153 = vst [vmem:[#allocation49_spill] sm:$0xff] %v14988_v37 }
 0x383   :  { %v14993_v8 = vsub.f32 %v14966_v6, %v19069_v36  ;;  %v14996_v33 = vadd.f32 %v14856_v35, %v3248_v60  ;;  %v15008_v31 = vpack.c.bf16 %v19049_v34, %v19048_v28 }
 0x384   :  { %20151 = vst [vmem:[#allocation47_spill] sm:$0xff] %v14979_v26  ;;  %20152 = vst [vmem:[#allocation48_spill] sm:$0xff] %v14982_v25  ;;  %v19064_v39 = vand.u32 4294901760, %v14982_v25  ;;  %3661 = vrot.lane.b32.xlu1 %v14956_v19, %s13366_s12  ;;  %v19050_v17 = vand.u32 4294901760, %v14979_v26 }
 0x385   :  { %20154 = vst [vmem:[#allocation53_spill] sm:$0xff] %v14993_v8  ;;  %20155 = vst [vmem:[#allocation57_spill] sm:$0xff] %v14996_v33  ;;  %v19065_v23 = vand.u32 4294901760, %v14996_v33  ;;  %v11625_v12 = vpop.f32.mrb[12].mxu0  ;;  %3663 = vrot.lane.b32.xlu0 %v14996_v33, %s13366_s12  ;;  %v19051_v50 = vand.u32 4294901760, %v14993_v8 }
 0x386   :  { %20156 = vst [vmem:[#allocation58_spill] sm:$0xff] %v15008_v31  ;;  %v15013_v57 = vsub.f32 %v14982_v25, %v19064_v39  ;;  %v15016_v47 = vadd.f32 %v11625_v12, %v14856_v35  ;;  %v3260_v13 = vpop.f32.mrb[13].mxu0 }
 0x387   :  { %v15023_v1 = vsub.f32 %v14996_v33, %v19065_v23  ;;  %v15026_v14 = vadd.f32 %v14856_v35, %v3260_v13  ;;  %v15048_v60 = vpack.c.bf16 %v19050_v17, %v19051_v50 }
 0x388   :  { %20157 = vst [vmem:[#allocation60_spill] sm:$0xff] %v15013_v57  ;;  %20158 = vst [vmem:[#allocation62_spill] sm:$0xff] %v15016_v47  ;;  %v19061_v32 = vand.u32 4294901760, %v15016_v47  ;;  %3665 = vrot.lane.b32.xlu1 %v14982_v25, %s13366_s12  ;;  %v19056_v51 = vand.u32 4294901760, %v15013_v57 }
 0x389   :  { %20159 = vst [vmem:[#allocation64_spill] sm:$0xff] %v15023_v1  ;;  %20160 = vst [vmem:[#allocation67_spill] sm:$0xff] %v15026_v14  ;;  %v19063_v56 = vand.u32 4294901760, %v15026_v14  ;;  %v11628_v22 = vpop.f32.mrb[14].mxu0  ;;  %3667 = vrot.lane.b32.xlu0 %v15026_v14, %s13366_s12  ;;  %v19057_v21 = vand.u32 4294901760, %v15023_v1 }
 0x38a   :  { %v15039_v16 = vsub.f32 %v15016_v47, %v19061_v32  ;;  %v15042_v52 = vadd.f32 %v11628_v22, %v14856_v35  ;;  %v3272_v9 = vpop.f32.mrb[15].mxu0  ;;  %20163 = vst [vmem:[#allocation73_spill] sm:$0xff] %v15048_v60 }
 0x38b   :  { %v15053_v12 = vsub.f32 %v15026_v14, %v19063_v56  ;;  %v15056_v13 = vadd.f32 %v14856_v35, %v3272_v9  ;;  %v15066_v17 = vpack.c.bf16 %v19056_v51, %v19057_v21 }
 0x38c   :  { %20161 = vst [vmem:[#allocation68_spill] sm:$0xff] %v15039_v16  ;;  %20162 = vst [vmem:[#allocation70_spill] sm:$0xff] %v15042_v52  ;;  %v19058_v28 = vand.u32 4294901760, %v15042_v52  ;;  %3669 = vrot.lane.b32.xlu1 %v15016_v47, %s13366_s12  ;;  %v19067_v55 = vand.u32 4294901760, %v15039_v16 }
 0x38d   :  { %20164 = vst [vmem:[#allocation74_spill] sm:$0xff] %v15053_v12  ;;  %20165 = vst [vmem:[#allocation75_spill] sm:$0xff] %v15056_v13  ;;  %v19062_v22 = vand.u32 4294901760, %v15056_v13  ;;  %v11631_v34 = vpop.f32.mrb[16].mxu0  ;;  %v19068_v18 = vand.u32 4294901760, %v15053_v12 }
 0x38e   :  { %20166 = vst [vmem:[#allocation81_spill] sm:$0xff] %v15066_v17  ;;  %v15071_v50 = vsub.f32 %v15042_v52, %v19058_v28  ;;  %v15074_v9 = vadd.f32 %v11631_v34, %v14856_v35  ;;  %v3284_v43 = vpop.f32.mrb[17].mxu0  ;;  %v9294_v17 = vld [vmem:[%s18740_s3 + $0x28] sm:$0xff] }
 0x38f   :  { %v15081_v53 = vsub.f32 %v15056_v13, %v19062_v22  ;;  %v15084_v51 = vadd.f32 %v14856_v35, %v3284_v43  ;;  %v15104_v56 = vpack.c.bf16 %v19067_v55, %v19068_v18 }
 0x390   :  { %20167 = vst [vmem:[#allocation82_spill] sm:$0xff] %v15071_v50  ;;  %20168 = vst [vmem:[#allocation85_spill] sm:$0xff] %v15074_v9  ;;  %3677 = vrot.lane.b32.xlu0 %v15074_v9, %s13366_s12  ;;  %v19082_v21 = vand.u32 4294901760, %v15074_v9  ;;  %v19074_v61 = vand.u32 4294901760, %v15071_v50 }
 0x391   :  { %20169 = vst [vmem:[#allocation86_spill] sm:$0xff] %v15081_v53  ;;  %20170 = vst [vmem:[#allocation88_spill] sm:$0xff] %v15084_v51  ;;  %v11634_v34 = vpop.f32.mrb[18].mxu0  ;;  %v19087_v28 = vand.u32 4294901760, %v15084_v51  ;;  %v19075_v54 = vand.u32 4294901760, %v15081_v53 }
 0x392   :  { %v15093_v32 = vadd.f32 %v11634_v34, %v14856_v35  ;;  %v3296_v22 = vpop.f32.mrb[19].mxu0  ;;  %v15098_v43 = vsub.f32 %v15074_v9, %v19082_v21  ;;  %20173 = vst [vmem:[#allocation93_spill] sm:$0xff] %v15104_v56 }
 0x393   :  { %v15107_v39 = vadd.f32 %v14856_v35, %v3296_v22  ;;  %v15112_v34 = vsub.f32 %v15084_v51, %v19087_v28  ;;  %v15124_v22 = vpack.c.bf16 %v19074_v61, %v19075_v54 }
 0x394   :  { %20171 = vst [vmem:[#allocation91_spill] sm:$0xff] %v15093_v32  ;;  %20172 = vst [vmem:[#allocation92_spill] sm:$0xff] %v15098_v43  ;;  %3675 = vrot.lane.b32.xlu0 %v15084_v51, %s13366_s12  ;;  %3681 = vrot.lane.b32.xlu1 %v15093_v32, %s13366_s12  ;;  %v19078_v23 = vand.u32 4294901760, %v15093_v32  ;;  %v19084_v38 = vand.u32 4294901760, %v15098_v43 }
 0x395   :  { %20174 = vst [vmem:[#allocation97_spill] sm:$0xff] %v15107_v39  ;;  %20175 = vst [vmem:[#allocation108_spill] sm:$0xff] %v15112_v34  ;;  %v11637_v58 = vpop.f32.mrb[20].mxu0  ;;  %v19079_v55 = vand.u32 4294901760, %v15107_v39  ;;  %v19085_v45 = vand.u32 4294901760, %v15112_v34 }
 0x396   :  { %20176 = vst [vmem:[#allocation110_spill] sm:$0xff] %v15124_v22  ;;  %v15127_v18 = vadd.f32 %v11637_v58, %v14856_v35  ;;  %v3308_v36 = vpop.f32.mrb[21].mxu0  ;;  %v15132_v48 = vsub.f32 %v15093_v32, %v19078_v23 }
 0x397   :  { %v15137_v40 = vadd.f32 %v14856_v35, %v3308_v36  ;;  %v15142_v61 = vsub.f32 %v15107_v39, %v19079_v55  ;;  %v15164_v41 = vpack.c.bf16 %v19084_v38, %v19085_v45 }
 0x398   :  { %20177 = vst [vmem:[#allocation113_spill] sm:$0xff] %v15127_v18  ;;  %20178 = vst [vmem:[#allocation114_spill] sm:$0xff] %v15132_v48  ;;  %3679 = vrot.lane.b32.xlu0 %v15107_v39, %s13366_s12  ;;  %3685 = vrot.lane.b32.xlu1 %v15127_v18, %s13366_s12  ;;  %v19083_v58 = vand.u32 4294901760, %v15127_v18  ;;  %v19089_v36 = vand.u32 4294901760, %v15132_v48 }
 0x399   :  { %20179 = vst [vmem:[#allocation115_spill] sm:$0xff] %v15137_v40  ;;  %20180 = vst [vmem:[#allocation120_spill] sm:$0xff] %v15142_v61  ;;  %v11640_v54 = vpop.f32.mrb[22].mxu0  ;;  %v19086_v3 = vand.u32 4294901760, %v15137_v40  ;;  %v19088_v59 = vand.u32 4294901760, %v15142_v61 }
 0x39a   :  { %v15153_v23 = vadd.f32 %v11640_v54, %v14856_v35  ;;  %v3320_v55 = vpop.f32.mrb[23].mxu0  ;;  %v15158_v46 = vsub.f32 %v15127_v18, %v19083_v58  ;;  %20183 = vst [vmem:[#allocation56_spill] sm:$0xff] %v15164_v41 }
 0x39b   :  { %v15169_v21 = vsub.f32 %v15137_v40, %v19086_v3  ;;  %v15179_v58 = vpack.c.bf16 %v19089_v36, %v19088_v59  ;;  %v15182_v38 = vadd.f32 %v14856_v35, %v3320_v55 }
 0x39c   :  { %20181 = vst [vmem:[#allocation121_spill] sm:$0xff] %v15153_v23  ;;  %20182 = vst [vmem:[#allocation51_spill] sm:$0xff] %v15158_v46  ;;  %3683 = vrot.lane.b32.xlu0 %v15137_v40, %s13366_s12  ;;  %3689 = vrot.lane.b32.xlu1 %v15153_v23, %s13366_s12  ;;  %v19090_v22 = vand.u32 4294901760, %v15158_v46  ;;  %v20198_v53 = vand.u32 4294901760, %v15153_v23 }
 0x39d   :  { %20184 = vst [vmem:[#allocation76_spill] sm:$0xff] %v15169_v21  ;;  %v11643_v54 = vpop.f32.mrb[24].mxu0  ;;  %20185 = vst [vmem:[#allocation79_spill] sm:$0xff] %v15179_v58  ;;  %v19091_v28 = vand.u32 4294901760, %v15169_v21 }
 0x39e   :  { %20186 = vst [vmem:[#allocation100_spill] sm:$0xff] %v15182_v38  ;;  %v15185_v45 = vadd.f32 %v11643_v54, %v14856_v35  ;;  %v3332_v3 = vpop.f32.mrb[25].mxu0  ;;  %v15257_v12 = vsub.f32 %v15153_v23, %v20198_v53 }
 0x39f   :  { %v15194_v59 = vadd.f32 %v14856_v35, %v3332_v3  ;;  %v15203_v36 = vpack.c.bf16 %v19090_v22, %v19091_v28  ;;  %v15212_v3 = vand.u32 4294901760, %v9294_v17 }
 0x3a0   :  { %20187 = vst [vmem:[#allocation101_spill] sm:$0xff] %v15185_v45  ;;  %3687 = vrot.lane.b32.xlu0 %v15182_v38, %s13366_s12  ;;  %3693 = vrot.lane.b32.xlu1 %v15185_v45, %s13366_s12  ;;  %20199 = vst [vmem:[#allocation134_spill] sm:$0xff] %v15257_v12  ;;  %v20204_v41 = vand.u32 4294901760, %v15185_v45 }
 0x3a1   :  { %v11646_v56 = vpop.f32.mrb[26].mxu0  ;;  %20188 = vst [vmem:[#allocation98_spill] sm:$0xff] %v15194_v59  ;;  %20190 = vst [vmem:[#allocation104_spill] sm:$0xff] %v15203_v36  ;;  %v15221_v28 = vsub.f32 %v9294_v17, %v15212_v3 }
 0x3a2   :  { %v15197_v55 = vadd.f32 %v11646_v56, %v14856_v35  ;;  %v3344_v54 = vpop.f32.mrb[27].mxu0  ;;  %20191 = vst [vmem:[#allocation107_spill] sm:$0xff] %v15212_v3  ;;  %v15272_v50 = vsub.f32 %v15185_v45, %v20204_v41 }
 0x3a3   :  { %v15215_v60 = vadd.f32 %v14856_v35, %v3344_v54  ;;  %20194 = vst [vmem:[#allocation126_spill] sm:$0xff] %v15221_v28  ;;  %v19096_v36 = vand.u32 4294901760, %v15221_v28 }
 0x3a4   :  { %20189 = vst [vmem:[#allocation102_spill] sm:$0xff] %v15197_v55  ;;  %3691 = vrot.lane.b32.xlu0 %v15194_v59, %s13366_s12  ;;  %3697 = vrot.lane.b32.xlu1 %v15197_v55, %s13366_s12  ;;  %20205 = vst [vmem:[#allocation140_spill] sm:$0xff] %v15272_v50 }
 0x3a5   :  { %v11649_v56 = vpop.f32.mrb[28].mxu0  ;;  %20192 = vst [vmem:[#allocation122_spill] sm:$0xff] %v15215_v60  ;;  %v3934_v17 = vsub.f32 %v15221_v28, %v19096_v36 }
 0x3a6   :  { %v15218_v31 = vadd.f32 %v11649_v56, %v14856_v35  ;;  %v3356_v22 = vpop.f32.mrb[29].mxu0 }
 0x3a7   :  { %v15224_v37 = vadd.f32 %v14856_v35, %v3356_v22  ;;  %v20202_v22 = vand.u32 4294901760, %v15194_v59 }
 0x3a8   :  { %20193 = vst [vmem:[#allocation123_spill] sm:$0xff] %v15218_v31  ;;  %3695 = vrot.lane.b32.xlu0 %v15215_v60, %s13366_s12  ;;  %3701 = vrot.lane.b32.xlu1 %v15218_v31, %s13366_s12  ;;  %v20212_v1 = vand.u32 4294901760, %v15218_v31 }
 0x3a9   :  { %20195 = vst [vmem:[#allocation128_spill] sm:$0xff] %v15224_v37  ;;  %v11652_v54 = vpop.f32.mrb[30].mxu0  ;;  %v20210_v57 = vand.u32 4294901760, %v15224_v37 }
 0x3aa   :  { %v15232_v5 = vadd.f32 %v11652_v54, %v14856_v35  ;;  %v3368_v56 = vpop.f32.mrb[31].mxu0  ;;  %v3935_v54 = vand.u32 4294901760, %v3934_v17  ;;  %v20200_v17 = vand.u32 4294901760, %v15182_v38 }
 0x3ab   :  { %v15240_v20 = vadd.f32 %v14856_v35, %v3368_v56  ;;  %v15267_v56 = vsub.f32 %v15194_v59, %v20202_v22  ;;  %v15291_v41 = vsub.f32 %v15224_v37, %v20210_v57 }
 0x3ac   :  { %20196 = vst [vmem:[#allocation130_spill] sm:$0xff] %v15232_v5  ;;  %3699 = vrot.lane.b32.xlu0 %v15224_v37, %s13366_s12  ;;  %3705 = vrot.lane.b32.xlu1 %v15232_v5, %s13366_s12  ;;  %v15262_v36 = vsub.f32 %v15182_v38, %v20200_v17  ;;  %v20208_v17 = vand.u32 4294901760, %v15215_v60  ;;  %v20216_v10 = vand.u32 4294901760, %v15232_v5 }
 0x3ad   :  { %20197 = vst [vmem:[#allocation133_spill] sm:$0xff] %v15240_v20  ;;  %v11655_v58 = vpop.f32.mrb[32].mxu0  ;;  %3936 = vmatprep.mubr.f32.mxu1 %v3935_v54  ;;  %20203 = vst [vmem:[#allocation138_spill] sm:$0xff] %v15267_v56  ;;  %v20206_v54 = vand.u32 4294901760, %v15197_v55  ;;  %v20214_v8 = vand.u32 4294901760, %v15240_v20  ;;  %v20224_v42 = vand.u32 4294901760, %v15267_v56 }
 0x3ae   :  { %v3380_v16 = vpop.f32.mrb[33].mxu0  ;;  %20201 = vst [vmem:[#allocation135_spill] sm:$0xff] %v15262_v36  ;;  %v15286_v22 = vsub.f32 %v15215_v60, %v20208_v17  ;;  %20211 = vst [vmem:[#allocation5_spill] sm:$0xff] %v15291_v41  ;;  %v15306_v17 = vsub.f32 %v15232_v5, %v20216_v10  ;;  %v15309_v63 = vadd.f32 %v11655_v58, %v14856_v35  ;;  %v20221_v10 = vand.u32 4294901760, %v15262_v36 }
 0x3af   :  { %v15277_v53 = vsub.f32 %v15197_v55, %v20206_v54  ;;  %v15296_v54 = vsub.f32 %v15218_v31, %v20212_v1  ;;  %v15301_v30 = vsub.f32 %v15240_v20, %v20214_v8  ;;  %v15326_v21 = vadd.f32 %v14856_v35, %v3380_v16 }
 0x3b0   :  { %3703 = vrot.lane.b32.xlu0 %v15240_v20, %s13366_s12  ;;  %3673 = vrot.lane.b32.xlu1 %v15042_v52, %s13366_s12  ;;  %20209 = vst [vmem:[#allocation4_spill] sm:$0xff] %v15286_v22  ;;  %20217 = vst [vmem:[#allocation11_spill] sm:$0xff] %v15306_v17  ;;  %v20222_v8 = vand.u32 4294901760, %v15257_v12  ;;  %v20225_v58 = vand.u32 4294901760, %v15272_v50 }
 0x3b1   :  { %20207 = vst [vmem:[#allocation141_spill] sm:$0xff] %v15277_v53  ;;  %20213 = vst [vmem:[#allocation9_spill] sm:$0xff] %v15296_v54  ;;  %v11658_v26 = vpop.f32.mrb[34].mxu0  ;;  %v20228_v16 = vand.u32 4294901760, %v15277_v53 }
 0x3b2   :  { %20215 = vst [vmem:[#allocation2_spill] sm:$0xff] %v15301_v30  ;;  %20218 = vst [vmem:[#allocation14_spill] sm:$0xff] %v15309_v63  ;;  %v3392_v57 = vpop.f32.mrb[35].mxu0  ;;  %v15329_v0 = vadd.f32 %v11658_v26, %v14856_v35  ;;  %v15335_v48 = vpack.c.bf16 %v20222_v8, %v20221_v10  ;;  %v15341_v1 = vpack.c.bf16 %v20225_v58, %v20224_v42  ;;  %v20227_v26 = vand.u32 4294901760, %v15286_v22 }
 0x3b3   :  { %20219 = vst [vmem:[#allocation3_spill] sm:$0xff] %v15326_v21  ;;  %v20230_v10 = vand.u32 4294901760, %v15291_v41  ;;  %v20231_v8 = vand.u32 4294901760, %v15296_v54  ;;  %v20233_v58 = vand.u32 4294901760, %v15301_v30  ;;  %v15366_v56 = vadd.f32 %v14856_v35, %v3392_v57 }
 0x3b4   :  { %3671 = vrot.lane.b32.xlu0 %v15056_v13, %s13366_s12  ;;  %3709 = vrot.lane.b32.xlu1 %v15309_v63, %s13366_s12  ;;  %20220 = vst [vmem:[#allocation15_spill] sm:$0xff] %v15329_v0  ;;  %20223 = vst [vmem:[#allocation20_spill] sm:$0xff] %v15335_v48  ;;  %v15351_v46 = vpack.c.bf16 %v20228_v16, %v20227_v26 }
 0x3b5   :  { %v11661_v11 = vpop.f32.mrb[36].mxu0  ;;  %20226 = vst [vmem:[#allocation12_spill] sm:$0xff] %v15341_v1  ;;  %v15357_v48 = vpack.c.bf16 %v20231_v8, %v20230_v10  ;;  %v20234_v1 = vand.u32 4294901760, %v15306_v17  ;;  %20236 = vst [vmem:[#allocation24_spill] sm:$0xff] %v15366_v56 }
 0x3b6   :  { %v3404_v61 = vpop.f32.mrb[37].mxu0  ;;  %20229 = vst [vmem:[#allocation22_spill] sm:$0xff] %v15351_v46  ;;  %v15369_v53 = vadd.f32 %v11661_v11, %v14856_v35 }
 0x3b7   :  { %20232 = vst [vmem:[#allocation23_spill] sm:$0xff] %v15357_v48  ;;  %v15363_v50 = vpack.c.bf16 %v20234_v1, %v20233_v58  ;;  %v15376_v10 = vadd.f32 %v14856_v35, %v3404_v61 }
 0x3b8   :  { %3707 = vrot.lane.b32.xlu0 %v15326_v21, %s13366_s12  ;;  %3713 = vrot.lane.b32.xlu1 %v15329_v0, %s13366_s12  ;;  %20237 = vst [vmem:[#allocation27_spill] sm:$0xff] %v15369_v53 }
 0x3b9   :  { %v11664_v42 = vpop.f32.mrb[38].mxu0  ;;  %20235 = vst [vmem:[#allocation18_spill] sm:$0xff] %v15363_v50  ;;  %20238 = vst [vmem:[#allocation29_spill] sm:$0xff] %v15376_v10 }
 0x3ba   :  { %v3416_v26 = vpop.f32.mrb[39].mxu0  ;;  %v15379_v1 = vadd.f32 %v11664_v42, %v14856_v35 }
 0x3bb   :  { %v15386_v57 = vadd.f32 %v14856_v35, %v3416_v26 }
 0x3bc   :  { %3711 = vrot.lane.b32.xlu0 %v15366_v56, %s13366_s12  ;;  %3717 = vrot.lane.b32.xlu1 %v15369_v53, %s13366_s12  ;;  %20239 = vst [vmem:[#allocation31_spill] sm:$0xff] %v15379_v1 }
 0x3bd   :  { %v11667_v16 = vpop.f32.mrb[40].mxu0  ;;  %20240 = vst [vmem:[#allocation33_spill] sm:$0xff] %v15386_v57 }
 0x3be   :  { %v3428_v8 = vpop.f32.mrb[41].mxu0  ;;  %v15389_v58 = vadd.f32 %v11667_v16, %v14856_v35 }
 0x3bf   :  { %v15396_v42 = vadd.f32 %v14856_v35, %v3428_v8 }
 0x3c0   :  { %3715 = vrot.lane.b32.xlu0 %v15376_v10, %s13366_s12  ;;  %3721 = vrot.lane.b32.xlu1 %v15379_v1, %s13366_s12  ;;  %20241 = vst [vmem:[#allocation35_spill] sm:$0xff] %v15389_v58 }
 0x3c1   :  { %v11670_v11 = vpop.f32.mrb[42].mxu0  ;;  %20242 = vst [vmem:[#allocation36_spill] sm:$0xff] %v15396_v42 }
 0x3c2   :  { %v3440_v50 = vpop.f32.mrb[43].mxu0  ;;  %v15399_v48 = vadd.f32 %v11670_v11, %v14856_v35 }
 0x3c3   :  { %v15408_v16 = vadd.f32 %v14856_v35, %v3440_v50 }
 0x3c4   :  { %3719 = vrot.lane.b32.xlu0 %v15386_v57, %s13366_s12  ;;  %3725 = vrot.lane.b32.xlu1 %v15389_v58, %s13366_s12  ;;  %20243 = vst [vmem:[#allocation39_spill] sm:$0xff] %v15399_v48 }
 0x3c5   :  { %v11673_v61 = vpop.f32.mrb[44].mxu0  ;;  %20244 = vst [vmem:[#allocation40_spill] sm:$0xff] %v15408_v16 }
 0x3c6   :  { %v3452_v46 = vpop.f32.mrb[45].mxu0  ;;  %v15411_v17 = vadd.f32 %v11673_v61, %v14856_v35 }
 0x3c7   :  { %v15420_v30 = vadd.f32 %v14856_v35, %v3452_v46 }
 0x3c8   :  { %3723 = vrot.lane.b32.xlu0 %v15396_v42, %s13366_s12  ;;  %3729 = vrot.lane.b32.xlu1 %v15399_v48, %s13366_s12  ;;  %20245 = vst [vmem:[#allocation43_spill] sm:$0xff] %v15411_v17 }
 0x3c9   :  { %v15405_v26 = vpop.f32.mrb[46].mxu0  ;;  %20246 = vst [vmem:[#allocation45_spill] sm:$0xff] %v15420_v30 }
 0x3ca   :  { %v15413_v8 = vpop.f32.mrb[47].mxu0 }
 0x3cb   :  { %v15602_v14 = vadd.f32 %v14856_v35, %v15413_v8 }
 0x3cc   :  { %3727 = vrot.lane.b32.xlu0 %v15408_v16, %s13366_s12  ;;  %3733 = vrot.lane.b32.xlu1 %v15411_v17, %s13366_s12 }
 0x3cd   :  { %v11679_v11 = vpop.f32.mrb[48].mxu0  ;;  %20278 = vst [vmem:[#allocation109_spill] sm:$0xff] %v15602_v14 }
 0x3ce   :  { %v15423_v54 = vadd.f32 %v11679_v11, %v14856_v35  ;;  %v3476_v50 = vpop.f32.mrb[49].mxu0 }
 0x3cf   :  { %v15430_v41 = vadd.f32 %v14856_v35, %v3476_v50 }
 0x3d0   :  { %20247 = vst [vmem:[#allocation46_spill] sm:$0xff] %v15423_v54  ;;  %3731 = vrot.lane.b32.xlu0 %v15420_v30, %s13366_s12  ;;  %3741 = vrot.lane.b32.xlu1 %v15423_v54, %s13366_s12 }
 0x3d1   :  { %v11682_v61 = vpop.f32.mrb[50].mxu0  ;;  %20248 = vst [vmem:[#allocation50_spill] sm:$0xff] %v15430_v41  ;;  %v19161_v50 = vand.u32 4294901760, %v15430_v41 }
 0x3d2   :  { %v15433_v22 = vadd.f32 %v11682_v61, %v14856_v35  ;;  %v3488_v12 = vpop.f32.mrb[51].mxu0  ;;  %v19166_v61 = vand.u32 4294901760, %v15423_v54 }
 0x3d3   :  { %v15440_v11 = vadd.f32 %v14856_v35, %v3488_v12  ;;  %v15460_v34 = vsub.f32 %v15430_v41, %v19161_v50 }
 0x3d4   :  { %20249 = vst [vmem:[#allocation52_spill] sm:$0xff] %v15433_v22  ;;  %3739 = vrot.lane.b32.xlu0 %v15430_v41, %s13366_s12  ;;  %3745 = vrot.lane.b32.xlu1 %v15433_v22, %s13366_s12  ;;  %v15465_v30 = vsub.f32 %v15423_v54, %v19166_v61 }
 0x3d5   :  { %v11685_v46 = vpop.f32.mrb[52].mxu0  ;;  %20250 = vst [vmem:[#allocation54_spill] sm:$0xff] %v15440_v11  ;;  %20254 = vst [vmem:[#allocation63_spill] sm:$0xff] %v15460_v34  ;;  %v19182_v16 = vand.u32 4294901760, %v15460_v34  ;;  %v20289_v60 = vand.u32 4294901760, %v15440_v11 }
 0x3d6   :  { %v15443_v36 = vadd.f32 %v11685_v46, %v14856_v35  ;;  %v3500_v49 = vpop.f32.mrb[53].mxu0  ;;  %20255 = vst [vmem:[#allocation65_spill] sm:$0xff] %v15465_v30  ;;  %v19181_v48 = vand.u32 4294901760, %v15465_v30 }
 0x3d7   :  { %v15452_v43 = vadd.f32 %v14856_v35, %v3500_v49 }
 0x3d8   :  { %20251 = vst [vmem:[#allocation55_spill] sm:$0xff] %v15443_v36  ;;  %3743 = vrot.lane.b32.xlu0 %v15440_v11, %s13366_s12  ;;  %3749 = vrot.lane.b32.xlu1 %v15443_v36, %s13366_s12  ;;  %v15495_v57 = vpack.c.bf16 %v19181_v48, %v19182_v16  ;;  %v9293_v48 = vld [vmem:[%s18740_s3 + $0x20] sm:$0xff] }
 0x3d9   :  { %v11688_v4 = vpop.f32.mrb[54].mxu0  ;;  %20252 = vst [vmem:[#allocation59_spill] sm:$0xff] %v15452_v43 }
 0x3da   :  { %v15455_v12 = vadd.f32 %v11688_v4, %v14856_v35  ;;  %v3512_v46 = vpop.f32.mrb[55].mxu0  ;;  %20260 = vst [vmem:[#allocation77_spill] sm:$0xff] %v15495_v57 }
 0x3db   :  { %v15472_v4 = vadd.f32 %v14856_v35, %v3512_v46 }
 0x3dc   :  { %20253 = vst [vmem:[#allocation61_spill] sm:$0xff] %v15455_v12  ;;  %3747 = vrot.lane.b32.xlu0 %v15452_v43, %s13366_s12  ;;  %3753 = vrot.lane.b32.xlu1 %v15455_v12, %s13366_s12 }
 0x3dd   :  { %v11691_v49 = vpop.f32.mrb[56].mxu0  ;;  %20256 = vst [vmem:[#allocation66_spill] sm:$0xff] %v15472_v4 }
 0x3de   :  { %v15475_v17 = vadd.f32 %v11691_v49, %v14856_v35  ;;  %v3524_v50 = vpop.f32.mrb[57].mxu0 }
 0x3df   :  { %v15484_v42 = vadd.f32 %v14856_v35, %v3524_v50 }
 0x3e0   :  { %20257 = vst [vmem:[#allocation69_spill] sm:$0xff] %v15475_v17  ;;  %3751 = vrot.lane.b32.xlu0 %v15472_v4, %s13366_s12  ;;  %3757 = vrot.lane.b32.xlu1 %v15475_v17, %s13366_s12 }
 0x3e1   :  { %v11694_v61 = vpop.f32.mrb[58].mxu0  ;;  %20258 = vst [vmem:[#allocation71_spill] sm:$0xff] %v15484_v42 }
 0x3e2   :  { %v15487_v46 = vadd.f32 %v11694_v61, %v14856_v35  ;;  %v15489_v49 = vpop.permute.xlu1 %3645  ;;  %v3536_v58 = vpop.f32.mrb[59].mxu0 }
 0x3e3   :  { %v19187_v1 = vand.u32 4294901760, %v15489_v49  ;;  %v15503_v61 = vadd.f32 %v14856_v35, %v3536_v58 }
 0x3e4   :  { %20259 = vst [vmem:[#allocation72_spill] sm:$0xff] %v15487_v46  ;;  %3755 = vrot.lane.b32.xlu0 %v15484_v42, %s13366_s12  ;;  %3761 = vrot.lane.b32.xlu1 %v15487_v46, %s13366_s12 }
 0x3e5   :  { %v11697_v50 = vpop.f32.mrb[60].mxu0  ;;  %20261 = vst [vmem:[#allocation78_spill] sm:$0xff] %v15503_v61  ;;  %v15516_v16 = vsub.f32 %v15489_v49, %v19187_v1  ;;  %v15531_v1 = vand.u32 4294901760, %v9293_v48 }
 0x3e6   :  { %v15506_v28 = vadd.f32 %v11697_v50, %v14856_v35  ;;  %v3548_v34 = vpop.f32.mrb[61].mxu0  ;;  %v15508_v10 = vpop.permute.xlu1 %3643 }
 0x3e7   :  { %20263 = vst [vmem:[#allocation83_spill] sm:$0xff] %v15516_v16  ;;  %v19200_v57 = vand.u32 4294901760, %v15508_v10  ;;  %v15519_v30 = vpop.permute.xlu0 %3647  ;;  %20265 = vst [vmem:[#allocation87_spill] sm:$0xff] %v15531_v1  ;;  %v15534_v56 = vadd.f32 %v14856_v35, %v3548_v34  ;;  %v15562_v63 = vsub.f32 %v9293_v48, %v15531_v1  ;;  %v15572_v34 = vadd.f32 %v15405_v26, %v14856_v35 }
 0x3e8   :  { %20262 = vst [vmem:[#allocation80_spill] sm:$0xff] %v15506_v28  ;;  %3759 = vrot.lane.b32.xlu0 %v15503_v61, %s13366_s12  ;;  %3765 = vrot.lane.b32.xlu1 %v15506_v28, %s13366_s12  ;;  %v20268_v13 = vand.u32 4294901760, %v15519_v30 }
 0x3e9   :  { %v15529_v50 = vsub.f32 %v15508_v10, %v19200_v57  ;;  %v11700_v53 = vpop.f32.mrb[62].mxu0  ;;  %20266 = vst [vmem:[#allocation89_spill] sm:$0xff] %v15534_v56  ;;  %20270 = vst [vmem:[#allocation95_spill] sm:$0xff] %v15562_v63 }
 0x3ea   :  { %v15537_v0 = vadd.f32 %v11700_v53, %v14856_v35  ;;  %v3560_v58 = vpop.f32.mrb[63].mxu0  ;;  %v15539_v21 = vpop.permute.xlu1 %3649  ;;  %v15549_v52 = vsub.f32 %v15519_v30, %v20268_v13  ;;  %v20271_v13 = vand.u32 4294901760, %v15516_v16  ;;  %20273 = vst [vmem:[#allocation99_spill] sm:$0xff] %v15572_v34 }
 0x3eb   :  { %20264 = vst [vmem:[#allocation84_spill] sm:$0xff] %v15529_v50  ;;  %v19216_v41 = vand.u32 4294901760, %v15529_v50  ;;  %v19211_v54 = vand.u32 4294901760, %v15539_v21  ;;  %v15544_v57 = vpop.permute.xlu0 %3651  ;;  %v15575_v3 = vadd.f32 %v14856_v35, %v3560_v58 }
 0x3ec   :  { %20267 = vst [vmem:[#allocation90_spill] sm:$0xff] %v15537_v0  ;;  %3763 = vrot.lane.b32.xlu0 %v15534_v56, %s13366_s12  ;;  %3769 = vrot.lane.b32.xlu1 %v15537_v0, %s13366_s12  ;;  %v20279_v26 = vand.u32 4294901760, %v15549_v52 }
 0x3ed   :  { %v15559_v53 = vsub.f32 %v15539_v21, %v19211_v54  ;;  %v15568_v20 = vpack.c.bf16 %v20271_v13, %v19216_v41  ;;  %20274 = vst [vmem:[#allocation103_spill] sm:$0xff] %v15575_v3  ;;  %v20275_v13 = vand.u32 4294901760, %v15544_v57 }
 0x3ee   :  { %v15577_v5 = vpop.permute.xlu1 %3653 }
 0x3ef   :  { %20269 = vst [vmem:[#allocation94_spill] sm:$0xff] %v15559_v53  ;;  %20272 = vst [vmem:[#allocation96_spill] sm:$0xff] %v15568_v20  ;;  %v19223_v48 = vand.u32 4294901760, %v15577_v5  ;;  %v15581_v1 = vpop.permute.xlu0 %3655  ;;  %v15587_v41 = vsub.f32 %v15544_v57, %v20275_v13  ;;  %v20280_v20 = vand.u32 4294901760, %v15559_v53 }
 0x3f0   :  { %3767 = vrot.lane.b32.xlu0 %v15575_v3, %s13366_s12  ;;  %3737 = vrot.lane.b32.xlu1 %v15572_v34, %s13366_s12  ;;  %v20282_v8 = vand.u32 4294901760, %v15581_v1  ;;  %v20284_v34 = vand.u32 4294901760, %v15562_v63 }
 0x3f1   :  { %20276 = vst [vmem:[#allocation105_spill] sm:$0xff] %v15587_v41  ;;  %v15597_v58 = vsub.f32 %v15577_v5, %v19223_v48  ;;  %v15610_v47 = vpack.c.bf16 %v20280_v20, %v20279_v26  ;;  %v19239_v35 = vand.u32 4294901760, %v15587_v41  ;;  %v20287_v26 = vand.u32 4294901760, %v15433_v22 }
 0x3f2   :  { %v15604_v13 = vpop.permute.xlu1 %3657  ;;  %v15622_v33 = vsub.f32 %v15581_v1, %v20282_v8  ;;  %v15638_v8 = vsub.f32 %v15562_v63, %v20284_v34 }
 0x3f3   :  { %20277 = vst [vmem:[#allocation106_spill] sm:$0xff] %v15597_v58  ;;  %20281 = vst [vmem:[#allocation111_spill] sm:$0xff] %v15610_v47  ;;  %v19238_v37 = vand.u32 4294901760, %v15597_v58  ;;  %v19229_v48 = vand.u32 4294901760, %v15604_v13  ;;  %v15615_v31 = vpop.permute.xlu0 %3659 }
 0x3f4   :  { %3735 = vrot.lane.b32.xlu0 %v15602_v14, %s13366_s12  ;;  %7322 = vrot.lane.b32.xlu1 %v15074_v9, %s13367_s16  ;;  %20285 = vst [vmem:[#allocation116_spill] sm:$0xff] %v15638_v8  ;;  %v15651_v9 = vsub.f32 %v15433_v22, %v20287_v26  ;;  %v20306_v14 = vand.u32 4294901760, %v15484_v42  ;;  %v20308_v26 = vand.u32 4294901760, %v15475_v17 }
 0x3f5   :  { %v15633_v54 = vsub.f32 %v15604_v13, %v19229_v48  ;;  %v15646_v47 = vpack.c.bf16 %v19238_v37, %v19239_v35  ;;  %v15662_v37 = vsub.f32 %v15440_v11, %v20289_v60  ;;  %v20292_v60 = vand.u32 4294901760, %v15443_v36 }
 0x3f6   :  { %v15640_v20 = vpop.permute.xlu1 %3661  ;;  %20288 = vst [vmem:[#allocation118_spill] sm:$0xff] %v15651_v9 }
 0x3f7   :  { %20283 = vst [vmem:[#allocation112_spill] sm:$0xff] %v15633_v54  ;;  %20286 = vst [vmem:[#allocation117_spill] sm:$0xff] %v15646_v47  ;;  %v19248_v63 = vand.u32 4294901760, %v15640_v20  ;;  %v15657_v25 = vpop.permute.xlu0 %3663  ;;  %v20291_v47 = vand.u32 4294901760, %v15615_v31  ;;  %v15679_v34 = vsub.f32 %v15443_v36, %v20292_v60  ;;  %v20295_v11 = vand.u32 4294901760, %v15633_v54 }
 0x3f8   :  { %20290 = vst [vmem:[#allocation119_spill] sm:$0xff] %v15662_v37  ;;  %7320 = vrot.lane.b32.xlu0 %v15084_v51, %s13367_s16  ;;  %7290 = vrot.lane.b32.xlu1 %v14859_v27, %s13367_s16  ;;  %v20294_v27 = vand.u32 4294901760, %v15622_v33  ;;  %v20297_v60 = vand.u32 4294901760, %v15452_v43 }
 0x3f9   :  { %v15669_v48 = vsub.f32 %v15615_v31, %v20291_v47  ;;  %20293 = vst [vmem:[#allocation124_spill] sm:$0xff] %v15679_v34  ;;  %v15684_v35 = vsub.f32 %v15640_v20, %v19248_v63  ;;  %v20299_v63 = vand.u32 4294901760, %v15455_v12 }
 0x3fa   :  { %v15689_v51 = vpop.permute.xlu1 %3665  ;;  %v15695_v22 = vpack.c.bf16 %v20295_v11, %v20294_v27  ;;  %v15700_v36 = vsub.f32 %v15452_v43, %v20297_v60  ;;  %v20301_v27 = vand.u32 4294901760, %v15472_v4  ;;  %v20316_v43 = vand.u32 4294901760, %v15529_v50 }
 0x3fb   :  { %v15705_v47 = vsub.f32 %v15455_v12, %v20299_v63  ;;  %v19258_v8 = vand.u32 4294901760, %v15689_v51  ;;  %v15710_v55 = vpop.permute.xlu0 %3667  ;;  %v20303_v63 = vand.u32 4294901760, %v15657_v25 }
 0x3fc   :  { %20296 = vst [vmem:[#allocation125_spill] sm:$0xff] %v15695_v22  ;;  %20298 = vst [vmem:[#allocation127_spill] sm:$0xff] %v15700_v36  ;;  %v15715_v11 = vsub.f32 %v15472_v4, %v20301_v27  ;;  %7288 = vrot.lane.b32.xlu0 %v14862_v29, %s13367_s16  ;;  %7326 = vrot.lane.b32.xlu1 %v15093_v32, %s13367_s16  ;;  %v15743_v22 = vsub.f32 %v15475_v17, %v20308_v26  ;;  %v20310_v27 = vand.u32 4294901760, %v15669_v48 }
 0x3fd   :  { %20300 = vst [vmem:[#allocation129_spill] sm:$0xff] %v15705_v47  ;;  %v15722_v12 = vsub.f32 %v15657_v25, %v20303_v63  ;;  %v15733_v60 = vsub.f32 %v15689_v51, %v19258_v8  ;;  %v15738_v63 = vsub.f32 %v15484_v42, %v20306_v14  ;;  %v20311_v4 = vand.u32 4294901760, %v15684_v35 }
 0x3fe   :  { %20302 = vst [vmem:[#allocation131_spill] sm:$0xff] %v15715_v11  ;;  %20309 = vst [vmem:[#allocation139_spill] sm:$0xff] %v15743_v22  ;;  %v15746_v32 = vpop.permute.xlu1 %3669  ;;  %v20313_v26 = vand.u32 4294901760, %v15710_v55  ;;  %v3951_v14 = vsub.f32 %v15529_v50, %v20316_v43  ;;  %v20324_v50 = vand.u32 4294901760, %v15503_v61  ;;  %v20326_v42 = vand.u32 4294901760, %v15549_v52 }
 0x3ff   :  { %20304 = vst [vmem:[#allocation132_spill] sm:$0xff] %v15722_v12  ;;  %20305 = vst [vmem:[#allocation136_spill] sm:$0xff] %v15733_v60  ;;  %v15752_v8 = vpack.c.bf16 %v20311_v4, %v20310_v27  ;;  %v19272_v17 = vand.u32 4294901760, %v15746_v32  ;;  %v20315_v4 = vand.u32 4294901760, %v15516_v16  ;;  %v20327_v22 = vand.u32 4294901760, %v15508_v10 }
 0x400   :  { %20307 = vst [vmem:[#allocation137_spill] sm:$0xff] %v15738_v63  ;;  %v15761_v29 = vsub.f32 %v15710_v55, %v20313_v26  ;;  %7324 = vrot.lane.b32.xlu0 %v15107_v39, %s13367_s16  ;;  %7294 = vrot.lane.b32.xlu1 %v14874_v62, %s13367_s16  ;;  %v20320_v39 = vand.u32 4294901760, %v15559_v53  ;;  %v20321_v26 = vand.u32 4294901760, %v15722_v12  ;;  %v3952_v63 = vand.u32 4294901760, %v3951_v14 }
 0x401   :  { %20312 = vst [vmem:[#allocation142_spill] sm:$0xff] %v15752_v8  ;;  %v3958_v27 = vsub.f32 %v15516_v16, %v20315_v4  ;;  %v15780_v34 = vsub.f32 %v15746_v32, %v19272_v17  ;;  %v20318_v4 = vand.u32 4294901760, %v15487_v46  ;;  %v20322_v16 = vand.u32 4294901760, %v15733_v60 }
 0x402   :  { %20314 = vst [vmem:[#allocation143_spill] sm:$0xff] %v15761_v29  ;;  %v3972_v62 = vsub.f32 %v15559_v53, %v20320_v39  ;;  %v3678_v8 = vpop.permute.xlu0 %3677  ;;  %v19288_v39 = vand.u32 4294901760, %v15761_v29  ;;  %v20332_v10 = vand.u32 4294901760, %v15587_v41  ;;  %v20334_v14 = vand.u32 4294901760, %v15539_v21 }
 0x403   :  { %20317 = vst [vmem:[#allocation144_spill] sm:$0xff] %v15780_v34  ;;  %v15785_v6 = vsub.f32 %v15487_v46, %v20318_v4  ;;  %v15796_v17 = vpack.c.bf16 %v20322_v16, %v20321_v26  ;;  %v15801_v4 = vsub.f32 %v15503_v61, %v20324_v50  ;;  %v3965_v46 = vsub.f32 %v15549_v52, %v20326_v42 }
 0x404   :  { %v19287_v53 = vand.u32 4294901760, %v15780_v34  ;;  %v20328_v16 = vand.u32 4294901760, %v15489_v49  ;;  %v3887_v50 = vand.u32 4294901760, %v3678_v8  ;;  %7292 = vrot.lane.b32.xlu0 %v14882_v7, %s13367_s16  ;;  %7330 = vrot.lane.b32.xlu1 %v15127_v18, %s13367_s16  ;;  %v20330_v42 = vand.u32 4294901760, %v15506_v28 }
 0x405   :  { %20319 = vst [vmem:[#allocation145_spill] sm:$0xff] %v15785_v6  ;;  %20323 = vst [vmem:[#allocation146_spill] sm:$0xff] %v15796_v17  ;;  %v3959_v17 = vand.u32 4294901760, %v3958_v27  ;;  %v3979_v49 = vsub.f32 %v15587_v41, %v20332_v10  ;;  %v20337_v7 = vand.u32 4294901760, %v15597_v58 }
 0x406   :  { %20325 = vst [vmem:[#allocation147_spill] sm:$0xff] %v15801_v4  ;;  %v15813_v26 = vpack.c.bf16 %v20328_v16, %v20327_v22  ;;  %v15822_v43 = vsub.f32 %v15506_v28, %v20330_v42  ;;  %v20333_v22 = vand.u32 4294901760, %v15519_v30  ;;  %v15837_v16 = vpack.c.bf16 %v19287_v53, %v19288_v39  ;;  %v3676_v10 = vpop.permute.xlu0 %3675  ;;  %v3682_v61 = vpop.permute.xlu1 %3681 }
 0x407   :  { %v3973_v42 = vand.u32 4294901760, %v3972_v62  ;;  %v3986_v28 = vsub.f32 %v15597_v58, %v20337_v7  ;;  %v20338_v30 = vand.u32 4294901760, %v15534_v56  ;;  %v20340_v53 = vand.u32 4294901760, %v15622_v33 }
 0x408   :  { %20329 = vst [vmem:[#allocation148_spill] sm:$0xff] %v15813_v26  ;;  %20331 = vst [vmem:[#allocation149_spill] sm:$0xff] %v15822_v43  ;;  %v15831_v27 = vpack.c.bf16 %v20334_v14, %v20333_v22  ;;  %v3966_v14 = vand.u32 4294901760, %v3965_v46  ;;  %v3884_v18 = vand.u32 4294901760, %v3676_v10  ;;  %v20341_v62 = vand.u32 4294901760, %v15544_v57  ;;  %7328 = vrot.lane.b32.xlu0 %v15137_v40, %s13367_s16  ;;  %7298 = vrot.lane.b32.xlu1 %v14898_v2, %s13367_s16 }
 0x409   :  { %20336 = vst [vmem:[#allocation151_spill] sm:$0xff] %v15837_v16  ;;  %v15846_v21 = vsub.f32 %v15534_v56, %v20338_v30  ;;  %v3993_v39 = vsub.f32 %v15622_v33, %v20340_v53  ;;  %v20342_v16 = vand.u32 4294901760, %v15577_v5  ;;  %v20344_v58 = vand.u32 4294901760, %v15633_v54 }
 0x40a   :  { %20335 = vst [vmem:[#allocation150_spill] sm:$0xff] %v15831_v27  ;;  %v15861_v30 = vsub.f32 %v3678_v8, %v3887_v50  ;;  %v3893_v56 = vand.u32 4294901760, %v3682_v61  ;;  %v15867_v46 = vpack.c.bf16 %v3959_v17, %v3952_v63  ;;  %v3980_v57 = vand.u32 4294901760, %v3979_v49  ;;  %v3686_v22 = vpop.permute.xlu1 %3685 }
 0x40b   :  { %20339 = vst [vmem:[#allocation152_spill] sm:$0xff] %v15846_v21  ;;  %v15856_v7 = vpack.c.bf16 %v20342_v16, %v20341_v62  ;;  %v4000_v41 = vsub.f32 %v15633_v54, %v20344_v58  ;;  %v15869_v53 = vsub.f32 %v3676_v10, %v3884_v18  ;;  %v15871_v5 = vpack.c.bf16 %v3887_v50, %v3884_v18  ;;  %v3680_v62 = vpop.permute.xlu0 %3679 }
 0x40c   :  { %v20346_v16 = vand.u32 4294901760, %v15575_v3  ;;  %v3987_v8 = vand.u32 4294901760, %v3986_v28  ;;  %v20348_v40 = vand.u32 4294901760, %v15581_v1  ;;  %v20349_v54 = vand.u32 4294901760, %v15604_v13  ;;  %7296 = vrot.lane.b32.xlu0 %v14906_v24, %s13367_s16  ;;  %7334 = vrot.lane.b32.xlu1 %v15153_v23, %s13367_s16 }
 0x40d   :  { %20343 = vst [vmem:[#allocation153_spill] sm:$0xff] %v15856_v7  ;;  %20345 = vst [vmem:[#allocation154_spill] sm:$0xff] %v15871_v5  ;;  %v15884_v17 = vpack.c.bf16 %v3973_v42, %v3966_v14  ;;  %v20351_v63 = vand.u32 4294901760, %v15537_v0  ;;  %v3994_v50 = vand.u32 4294901760, %v3993_v39  ;;  %v20353_v49 = vand.u32 4294901760, %v15669_v48  ;;  %11822 = vmatprep.subr.bf16.mxu1 %v15871_v5 }
 0x40e   :  { %v15876_v58 = vsub.f32 %v15575_v3, %v20346_v16  ;;  %v15882_v2 = vpack.c.bf16 %v20349_v54, %v20348_v40  ;;  %v3890_v16 = vand.u32 4294901760, %v3680_v62  ;;  %v4001_v1 = vand.u32 4294901760, %v4000_v41  ;;  %11824 = vmatpush3.bf16.msra.mxu1 %v15813_v26  ;;  %v3690_v24 = vpop.permute.xlu1 %3689 }
 0x40f   :  { %v15889_v18 = vsub.f32 %v15537_v0, %v20351_v63  ;;  %v4007_v28 = vsub.f32 %v15669_v48, %v20353_v49  ;;  %v15897_v54 = vsub.f32 %v3682_v61, %v3893_v56  ;;  %v3899_v13 = vand.u32 4294901760, %v3686_v22 }
 0x410   :  { %20347 = vst [vmem:[#allocation155_spill] sm:$0xff] %v15876_v58  ;;  %20350 = vst [vmem:[#allocation156_spill] sm:$0xff] %v15882_v2  ;;  %v20354_v39 = vand.u32 4294901760, %v15684_v35  ;;  %v15906_v14 = vsub.f32 %v3680_v62, %v3890_v16  ;;  %v15909_v41 = vpack.c.bf16 %v3893_v56, %v3890_v16  ;;  %v20356_v61 = vand.u32 4294901760, %v15615_v31  ;;  %v3684_v62 = vpop.permute.xlu0 %3683  ;;  %7332 = vrot.lane.b32.xlu0 %v15182_v38, %s13367_s16 }
 0x411   :  { %20352 = vst [vmem:[#allocation157_spill] sm:$0xff] %v15889_v18  ;;  %v20357_v63 = vand.u32 4294901760, %v15640_v20  ;;  %v20359_v40 = vand.u32 4294901760, %v15722_v12  ;;  %v20360_v23 = vand.u32 4294901760, %v15733_v60  ;;  %v15923_v3 = vpack.c.bf16 %v3987_v8, %v3980_v57  ;;  %7302 = vrot.lane.b32.xlu1 %v14928_v15, %s13367_s16 }
 0x412   :  { %v4014_v42 = vsub.f32 %v15684_v35, %v20354_v39  ;;  %20355 = vst [vmem:[#allocation158_spill] sm:$0xff] %v15909_v41  ;;  %v20361_v56 = vand.u32 4294901760, %v15869_v53  ;;  %v20362_v31 = vand.u32 4294901760, %v15861_v30  ;;  %v4008_v20 = vand.u32 4294901760, %v4007_v28  ;;  %11826 = vmatprep.subr.bf16.mxu1 %v15909_v41  ;;  %v3694_v38 = vpop.permute.xlu1 %3693 }
 0x413   :  { %v15915_v49 = vpack.c.bf16 %v20357_v63, %v20356_v61  ;;  %v4021_v10 = vsub.f32 %v15722_v12, %v20359_v40  ;;  %v4028_v39 = vsub.f32 %v15733_v60, %v20360_v23  ;;  %v3896_v63 = vand.u32 4294901760, %v3684_v62  ;;  %11828 = vmatpush3.bf16.msra.mxu1 %v15831_v27 }
 0x414   :  { %v15929_v16 = vpack.c.bf16 %v20362_v31, %v20361_v56  ;;  %v20364_v40 = vand.u32 4294901760, %v15657_v25  ;;  %v20365_v23 = vand.u32 4294901760, %v15689_v51  ;;  %v4083_v57 = vand.u32 4294901760, %v15897_v54  ;;  %v3688_v61 = vpop.permute.xlu0 %3687  ;;  %7300 = vrot.lane.b32.xlu0 %v14936_v44, %s13367_s16 }
 0x415   :  { %20358 = vst [vmem:[#allocation159_spill] sm:$0xff] %v15915_v49  ;;  %v15940_v8 = vsub.f32 %v3686_v22, %v3899_v13  ;;  %v3905_v5 = vand.u32 4294901760, %v3690_v24  ;;  %v15946_v28 = vpack.c.bf16 %v4001_v1, %v3994_v50  ;;  %v4015_v56 = vand.u32 4294901760, %v4014_v42  ;;  %7338 = vrot.lane.b32.xlu1 %v15185_v45, %s13367_s16 }
 0x416   :  { %20363 = vst [vmem:[#allocation160_spill] sm:$0xff] %v15929_v16  ;;  %v15937_v26 = vpack.c.bf16 %v20365_v23, %v20364_v40  ;;  %v20367_v25 = vand.u32 4294901760, %v15761_v29  ;;  %v15951_v31 = vsub.f32 %v3684_v62, %v3896_v63  ;;  %v15954_v22 = vpack.c.bf16 %v3899_v13, %v3896_v63  ;;  %v3698_v44 = vpop.permute.xlu1 %3697 }
 0x417   :  { %v4022_v40 = vand.u32 4294901760, %v4021_v10  ;;  %v4029_v23 = vand.u32 4294901760, %v4028_v39  ;;  %v20369_v16 = vand.u32 4294901760, %v15906_v14  ;;  %v20371_v1 = vand.u32 4294901760, %v15780_v34 }
 0x418   :  { %20366 = vst [vmem:[#allocation161_spill] sm:$0xff] %v15937_v26  ;;  %v4035_v51 = vsub.f32 %v15761_v29, %v20367_v25  ;;  %20368 = vst [vmem:[#allocation162_spill] sm:$0xff] %v15954_v22  ;;  %v4090_v62 = vand.u32 4294901760, %v15951_v31  ;;  %v3902_v25 = vand.u32 4294901760, %v3688_v61  ;;  %11830 = vmatprep.subr.bf16.mxu1 %v15954_v22  ;;  %v4097_v13 = vand.u32 4294901760, %v15940_v8  ;;  %v3692_v27 = vpop.permute.xlu0 %3691  ;;  %7336 = vrot.lane.b32.xlu0 %v15194_v59, %s13367_s16  ;;  %v20385_v59 = vld [vmem:[#allocation124_spill] sm:$0xff] }
 0x419   :  { %v15958_v15 = vpack.c.bf16 %v4083_v57, %v20369_v16  ;;  %v4042_v42 = vsub.f32 %v15780_v34, %v20371_v1  ;;  %v15968_v39 = vsub.f32 %v3690_v24, %v3905_v5  ;;  %v3911_v63 = vand.u32 4294901760, %v3694_v38  ;;  %11832 = vmatpush3.bf16.msra.mxu1 %v15856_v7  ;;  %7306 = vrot.lane.b32.xlu1 %v14956_v19, %s13367_s16  ;;  %v20403_v34 = vld [vmem:[#allocation137_spill] sm:$0xff]  ;;  %v20405_v29 = vld [vmem:[#allocation139_spill] sm:$0xff] }
 0x41a   :  { %v20372_v16 = vand.u32 4294901760, %v15710_v55  ;;  %v20373_v1 = vand.u32 4294901760, %v15746_v32  ;;  %v15980_v22 = vsub.f32 %v3688_v61, %v3902_v25  ;;  %v15983_v24 = vpack.c.bf16 %v3905_v5, %v3902_v25 }
 0x41b   :  { %20370 = vst [vmem:[#allocation163_spill] sm:$0xff] %v15958_v15  ;;  %v4036_v15 = vand.u32 4294901760, %v4035_v51  ;;  %v15985_v10 = vpack.c.bf16 %v4015_v56, %v4008_v20  ;;  %v15987_v41 = vpack.c.bf16 %v4029_v23, %v4022_v40  ;;  %v15989_v45 = vpack.c.bf16 %v4097_v13, %v4090_v62 }
 0x41c   :  { %v15978_v50 = vpack.c.bf16 %v20373_v1, %v20372_v16  ;;  %20375 = vst [vmem:[#allocation165_spill] sm:$0xff] %v15983_v24  ;;  %v20377_v32 = vand.u32 4294901760, %v15662_v37  ;;  %v20378_v51 = vand.u32 4294901760, %v15651_v9  ;;  %v4043_v16 = vand.u32 4294901760, %v4042_v42  ;;  %11834 = vmatprep.subr.bf16.mxu1 %v15983_v24  ;;  %v3702_v9 = vpop.permute.xlu1 %3701 }
 0x41d   :  { %20376 = vst [vmem:[#allocation166_spill] sm:$0xff] %v15989_v45  ;;  %v4104_v5 = vand.u32 4294901760, %v15980_v22  ;;  %v3908_v25 = vand.u32 4294901760, %v3692_v27  ;;  %v4111_v56 = vand.u32 4294901760, %v15968_v39  ;;  %v16002_v40 = vsub.f32 %v3694_v38, %v3911_v63  ;;  %11836 = vmatpush3.bf16.msra.mxu1 %v15882_v2 }
 0x41e   :  { %20374 = vst [vmem:[#allocation164_spill] sm:$0xff] %v15978_v50  ;;  %v15996_v61 = vpack.c.bf16 %v20378_v51, %v20377_v32  ;;  %v3917_v23 = vand.u32 4294901760, %v3698_v44  ;;  %v20380_v42 = vand.u32 4294901760, %v15861_v30  ;;  %v20382_v38 = vand.u32 4294901760, %v15869_v53 }
 0x41f   :  { %v16011_v32 = vsub.f32 %v3692_v27, %v3908_v25  ;;  %v16014_v51 = vpack.c.bf16 %v3911_v63, %v3908_v25  ;;  %v4084_v37 = vsub.f32 %v15897_v54, %v4083_v57  ;;  %v16021_v19 = vpack.c.bf16 %v4111_v56, %v4104_v5 }
 0x420   :  { %20379 = vst [vmem:[#allocation167_spill] sm:$0xff] %v15996_v61  ;;  %v4070_v1 = vsub.f32 %v15861_v30, %v20380_v42  ;;  %v4063_v20 = vsub.f32 %v15869_v53, %v20382_v38  ;;  %v3696_v61 = vpop.permute.xlu0 %3695  ;;  %v20384_v27 = vand.u32 4294901760, %v15700_v36  ;;  %v20386_v45 = vand.u32 4294901760, %v20385_v59  ;;  %v20390_v59 = vld [vmem:[#allocation44_spill] sm:$0xff] }
 0x421   :  { %20381 = vst [vmem:[#allocation168_spill] sm:$0xff] %v16014_v51  ;;  %20383 = vst [vmem:[#allocation169_spill] sm:$0xff] %v16021_v19  ;;  %v4118_v25 = vand.u32 4294901760, %v16011_v32  ;;  %v3914_v2 = vand.u32 4294901760, %v3696_v61  ;;  %11838 = vmatprep.subr.bf16.mxu1 %v16014_v51  ;;  %v20388_v38 = vand.u32 4294901760, %v15906_v14  ;;  %v16035_v57 = vpack.c.bf16 %v4043_v16, %v4036_v15  ;;  %7304 = vrot.lane.b32.xlu0 %v20390_v59, %s13367_s16 }
 0x422   :  { %v16028_v63 = vpack.c.bf16 %v20386_v45, %v20384_v27  ;;  %v4125_v19 = vand.u32 4294901760, %v16002_v40  ;;  %v16038_v42 = vsub.f32 %v3698_v44, %v3917_v23  ;;  %v3923_v36 = vand.u32 4294901760, %v3702_v9  ;;  %v20391_v45 = vld [vmem:[#allocation102_spill] sm:$0xff]  ;;  %11840 = vmatpush3.bf16.msra.mxu1 %v15915_v49  ;;  %v3706_v44 = vpop.permute.xlu1 %3705 }
 0x423   :  { %v4077_v55 = vsub.f32 %v15906_v14, %v20388_v38  ;;  %7342 = vrot.lane.b32.xlu1 %v20391_v45, %s13367_s16  ;;  %v4071_v27 = vand.u32 4294901760, %v4070_v1  ;;  %v16047_v51 = vpack.c.bf16 %v3917_v23, %v3914_v2  ;;  %v4064_v15 = vand.u32 4294901760, %v4063_v20 }
 0x424   :  { %20387 = vst [vmem:[#allocation170_spill] sm:$0xff] %v16028_v63  ;;  %20389 = vst [vmem:[#allocation171_spill] sm:$0xff] %v16038_v42  ;;  %v16044_v63 = vsub.f32 %v3696_v61, %v3914_v2  ;;  %v4091_v16 = vsub.f32 %v15951_v31, %v4090_v62  ;;  %v3700_v38 = vpop.permute.xlu0 %3699  ;;  %v4085_v24 = vand.u32 4294901760, %v4084_v37  ;;  %v4098_v7 = vsub.f32 %v15940_v8, %v4097_v13 }
 0x425   :  { %20392 = vst [vmem:[#allocation172_spill] sm:$0xff] %v16047_v51  ;;  %v16051_v0 = vpack.c.bf16 %v4125_v19, %v4118_v25  ;;  %v20394_v59 = vand.u32 4294901760, %v15715_v11  ;;  %v20395_v1 = vand.u32 4294901760, %v15705_v47  ;;  %v3920_v2 = vand.u32 4294901760, %v3700_v38  ;;  %11842 = vmatprep.subr.bf16.mxu1 %v16047_v51  ;;  %v20399_v47 = vld [vmem:[#allocation48_spill] sm:$0xff] }
 0x426   :  { %v4132_v45 = vand.u32 4294901760, %v16044_v63  ;;  %v4078_v20 = vand.u32 4294901760, %v4077_v55  ;;  %v4105_v62 = vsub.f32 %v15980_v22, %v4104_v5  ;;  %v4139_v37 = vand.u32 4294901760, %v16038_v42  ;;  %11844 = vmatpush3.bf16.msra.mxu1 %v15937_v26  ;;  %v3674_v11 = vpop.permute.xlu1 %3673 }
 0x427   :  { %20393 = vst [vmem:[#allocation173_spill] sm:$0xff] %v16051_v0  ;;  %v16057_v61 = vpack.c.bf16 %v20395_v1, %v20394_v59  ;;  %v16063_v23 = vsub.f32 %v3702_v9, %v3923_v36  ;;  %v3929_v13 = vand.u32 4294901760, %v3706_v44  ;;  %v20398_v0 = vld [vmem:[#allocation122_spill] sm:$0xff]  ;;  %7310 = vrot.lane.b32.xlu1 %v20399_v47, %s13367_s16  ;;  %v4112_v59 = vsub.f32 %v15968_v39, %v4111_v56 }
 0x428   :  { %7340 = vrot.lane.b32.xlu0 %v20398_v0, %s13367_s16  ;;  %v16070_v1 = vsub.f32 %v3700_v38, %v3920_v2  ;;  %v16073_v55 = vpack.c.bf16 %v3923_v36, %v3920_v2  ;;  %v16075_v5 = vpack.c.bf16 %v4071_v27, %v4064_v15  ;;  %v3704_v9 = vpop.permute.xlu0 %3703  ;;  %v4099_v51 = vand.u32 4294901760, %v4098_v7  ;;  %v20408_v2 = vld [vmem:[#allocation57_spill] sm:$0xff] }
 0x429   :  { %20396 = vst [vmem:[#allocation174_spill] sm:$0xff] %v16057_v61  ;;  %20397 = vst [vmem:[#allocation175_spill] sm:$0xff] %v16063_v23  ;;  %v4092_v61 = vand.u32 4294901760, %v4091_v16  ;;  %v4126_v49 = vsub.f32 %v16002_v40, %v4125_v19  ;;  %v16078_v0 = vpack.c.bf16 %v4139_v37, %v4132_v45  ;;  %v20404_v47 = vand.u32 4294901760, %v20403_v34 }
 0x42a   :  { %20400 = vst [vmem:[#allocation176_spill] sm:$0xff] %v16070_v1  ;;  %20401 = vst [vmem:[#allocation177_spill] sm:$0xff] %v16073_v55  ;;  %v20406_v56 = vand.u32 4294901760, %v20405_v29  ;;  %v4146_v26 = vand.u32 4294901760, %v16070_v1  ;;  %v3926_v36 = vand.u32 4294901760, %v3704_v9  ;;  %11846 = vmatprep.subr.bf16.mxu1 %v16073_v55  ;;  %v16088_v27 = vpack.c.bf16 %v4085_v24, %v4078_v20  ;;  %v20409_v29 = vld [vmem:[#allocation123_spill] sm:$0xff]  ;;  %v3710_v34 = vpop.permute.xlu1 %3709 }
 0x42b   :  { %20402 = vst [vmem:[#allocation178_spill] sm:$0xff] %v16078_v0  ;;  %v4106_v15 = vand.u32 4294901760, %v4105_v62  ;;  %v4153_v7 = vand.u32 4294901760, %v16063_v23  ;;  %v16091_v16 = vsub.f32 %v3706_v44, %v3929_v13  ;;  %v3881_v19 = vand.u32 4294901760, %v3674_v11  ;;  %7346 = vrot.lane.b32.xlu1 %v20409_v29, %s13367_s16  ;;  %11848 = vmatpush3.bf16.msra.mxu1 %v15978_v50 }
 0x42c   :  { %v16084_v38 = vpack.c.bf16 %v20406_v56, %v20404_v47  ;;  %7308 = vrot.lane.b32.xlu0 %v20408_v2, %s13367_s16  ;;  %v4113_v47 = vand.u32 4294901760, %v4112_v59  ;;  %v9298_v56 = vld [vmem:[%s18740_s3 + $0x48] sm:$0xff]  ;;  %v16103_v24 = vpack.c.bf16 %v3929_v13, %v3926_v36  ;;  %v16105_v44 = vpack.c.bf16 %v4099_v51, %v4092_v61  ;;  %v3672_v62 = vpop.permute.xlu0 %3671  ;;  %v20414_v61 = vld [vmem:[#allocation62_spill] sm:$0xff] }
 0x42d   :  { %v4119_v20 = vsub.f32 %v16011_v32, %v4118_v25  ;;  %v4127_v2 = vand.u32 4294901760, %v4126_v49  ;;  %v4140_v29 = vsub.f32 %v16038_v42, %v4139_v37  ;;  %v16109_v59 = vpack.c.bf16 %v4153_v7, %v4146_v26  ;;  %v20413_v49 = vld [vmem:[#allocation128_spill] sm:$0xff] }
 0x42e   :  { %20407 = vst [vmem:[#allocation179_spill] sm:$0xff] %v16084_v38  ;;  %v16100_v38 = vsub.f32 %v3704_v9, %v3926_v36  ;;  %20410 = vst [vmem:[#allocation180_spill] sm:$0xff] %v16103_v24  ;;  %v16111_v0 = vand.u32 4294901760, %v9298_v56  ;;  %v3878_v55 = vand.u32 4294901760, %v3672_v62  ;;  %v4701_v60 = vand.u32 4294901760, %v3710_v34  ;;  %11850 = vmatprep.subr.bf16.mxu1 %v16103_v24  ;;  %v3714_v24 = vpop.permute.xlu1 %3713 }
 0x42f   :  { %20411 = vst [vmem:[#allocation181_spill] sm:$0xff] %v16109_v59  ;;  %v16115_v13 = vpack.c.bf16 %v4113_v47, %v4106_v15  ;;  %v4167_v51 = vand.u32 4294901760, %v16091_v16  ;;  %v16118_v25 = vsub.f32 %v3674_v11, %v3881_v19  ;;  %7314 = vrot.lane.b32.xlu1 %v20414_v61, %s13367_s16  ;;  %v4133_v37 = vsub.f32 %v16044_v63, %v4132_v45 }
 0x430   :  { %20412 = vst [vmem:[#allocation182_spill] sm:$0xff] %v16111_v0  ;;  %7344 = vrot.lane.b32.xlu0 %v20413_v49, %s13367_s16  ;;  %v16126_v36 = vsub.f32 %v9298_v56, %v16111_v0  ;;  %v16128_v9 = vsub.f32 %v3672_v62, %v3878_v55  ;;  %v16130_v59 = vsub.f32 %v3710_v34, %v4701_v60  ;;  %v4120_v47 = vand.u32 4294901760, %v4119_v20  ;;  %v3708_v11 = vpop.permute.xlu0 %3707 }
 0x431   :  { %v16132_v15 = vpack.c.bf16 %v3881_v19, %v3878_v55  ;;  %v4141_v50 = vand.u32 4294901760, %v4140_v29  ;;  %v4147_v49 = vsub.f32 %v16070_v1, %v4146_v26  ;;  %v20418_v12 = vand.u32 4294901760, %v16100_v38  ;;  %v20420_v26 = vld [vmem:[#allocation67_spill] sm:$0xff] }
 0x432   :  { %20415 = vst [vmem:[#allocation183_spill] sm:$0xff] %v16126_v36  ;;  %20416 = vst [vmem:[#allocation184_spill] sm:$0xff] %v16130_v59  ;;  %v19359_v45 = vand.u32 4294901760, %v16126_v36  ;;  %v4819_v62 = vand.u32 4294901760, %v16130_v59  ;;  %v4698_v34 = vand.u32 4294901760, %v3708_v11  ;;  %v4154_v55 = vsub.f32 %v16063_v23, %v4153_v7 }
 0x433   :  { %20417 = vst [vmem:[#allocation185_spill] sm:$0xff] %v16132_v15  ;;  %v16137_v61 = vpack.c.bf16 %v4167_v51, %v20418_v12  ;;  %11852 = vmatpush3.bf16.msra.mxu1 %v16132_v15  ;;  %v4055_v19 = vand.u32 4294901760, %v16118_v25  ;;  %v4707_v29 = vand.u32 4294901760, %v3714_v24  ;;  %v20421_v12 = vld [vmem:[#allocation130_spill] sm:$0xff]  ;;  %v4134_v20 = vand.u32 4294901760, %v4133_v37  ;;  %v20425_v37 = vld [vmem:[#allocation116_spill] sm:$0xff] }
 0x434   :  { %7312 = vrot.lane.b32.xlu0 %v20420_v26, %s13367_s16  ;;  %7350 = vrot.lane.b32.xlu1 %v20421_v12, %s13367_s16  ;;  %v7579_v56 = vsub.f32 %v16126_v36, %v19359_v45  ;;  %v16152_v0 = vpack.c.bf16 %v4701_v60, %v4698_v34  ;;  %v16157_v7 = vpack.c.bf16 %v4127_v2, %v4120_v47  ;;  %v3712_v23 = vpop.permute.xlu0 %3711  ;;  %v3718_v12 = vpop.permute.xlu1 %3717  ;;  %v20426_v1 = vand.u32 4294901760, %v20425_v37  ;;  %v20429_v47 = vld [vmem:[#allocation107_spill] sm:$0xff]  ;;  %v20430_v37 = vld [vmem:[#allocation133_spill] sm:$0xff] }
 0x435   :  { %20419 = vst [vmem:[#allocation186_spill] sm:$0xff] %v16137_v61  ;;  %v16154_v61 = vsub.f32 %v3708_v11, %v4698_v34  ;;  %11854 = vmatprep.subr.bf16.mxu1 %v16075_v5  ;;  %v16160_v15 = vsub.f32 %v16091_v16, %v4167_v51  ;;  %v16162_v26 = vsub.f32 %v3714_v24, %v4707_v29  ;;  %v4148_v42 = vand.u32 4294901760, %v4147_v49 }
 0x436   :  { %20422 = vst [vmem:[#allocation187_spill] sm:$0xff] %v16152_v0  ;;  %3942 = vmatmul.mubr.f32.vlgmr.msra.gmra.mrb[0].mxu1 %v20426_v1  ;;  %v20427_v60 = vand.u32 4294901760, %v16128_v9  ;;  %v7580_v11 = vand.u32 4294901760, %v7579_v56  ;;  %v4820_v5 = vsub.f32 %v16130_v59, %v4819_v62  ;;  %v4155_v24 = vand.u32 4294901760, %v4154_v55  ;;  %v20431_v56 = vld [vmem:[#allocation70_spill] sm:$0xff] }
 0x437   :  { %20423 = vst [vmem:[#allocation188_spill] sm:$0xff] %v16154_v61  ;;  %20424 = vst [vmem:[#allocation189_spill] sm:$0xff] %v16162_v26  ;;  %v4812_v2 = vand.u32 4294901760, %v16154_v61  ;;  %11856 = vmatpush3.bf16.msra.mxu1 %v15867_v46  ;;  %4172 = vmatprep.mubr.f32.mxu1 %v20429_v47  ;;  %v4833_v1 = vand.u32 4294901760, %v16162_v26  ;;  %v4704_v49 = vand.u32 4294901760, %v3712_v23  ;;  %v4713_v34 = vand.u32 4294901760, %v3718_v12 }
 0x438   :  { %v16168_v45 = vpack.c.bf16 %v4055_v19, %v20427_v60  ;;  %7348 = vrot.lane.b32.xlu0 %v20430_v37, %s13367_s16  ;;  %7318 = vrot.lane.b32.xlu1 %v20431_v56, %s13367_s16  ;;  %v16181_v60 = vpack.c.bf16 %v4141_v50, %v4134_v20  ;;  %v16184_v0 = vsub.f32 %v16118_v25, %v4055_v19  ;;  %v3716_v50 = vpop.permute.xlu0 %3715  ;;  %v3722_v20 = vpop.permute.xlu1 %3721  ;;  %v4821_v19 = vand.u32 4294901760, %v4820_v5 }
 0x439   :  { %v4813_v46 = vsub.f32 %v16154_v61, %v4812_v2  ;;  %11858 = vmatprep.subr.bf16.mxu1 %v16088_v27  ;;  %7581 = vmatprep.mubr.f32.mxu0 %v7580_v11  ;;  %v16189_v51 = vpack.c.bf16 %v4819_v62, %v4812_v2  ;;  %v16191_v59 = vpack.c.bf16 %v4707_v29, %v4704_v49  ;;  %v4710_v61 = vand.u32 4294901760, %v3716_v50 }
 0x43a   :  { %20428 = vst [vmem:[#allocation116_spill] sm:$0xff] %v16168_v45  ;;  %v16193_v37 = vsub.f32 %v3712_v23, %v4704_v49  ;;  %v16195_v36 = vsub.f32 %v3718_v12, %v4713_v34  ;;  %v16197_v56 = vpack.c.bf16 %v4155_v24, %v4148_v42  ;;  %v4719_v47 = vand.u32 4294901760, %v3722_v20  ;;  %v20436_v12 = vld [vmem:[#allocation75_spill] sm:$0xff]  ;;  %v20437_v42 = vld [vmem:[#allocation46_spill] sm:$0xff] }
 0x43b   :  { %20432 = vst [vmem:[#allocation190_spill] sm:$0xff] %v16189_v51  ;;  %20433 = vst [vmem:[#allocation191_spill] sm:$0xff] %v16191_v59  ;;  %v4814_v45 = vand.u32 4294901760, %v4813_v46  ;;  %11860 = vmatpush3.bf16.msra.mxu1 %v15884_v17  ;;  %v4834_v27 = vsub.f32 %v16162_v26, %v4833_v1  ;;  %v16209_v11 = vpack.c.bf16 %v4713_v34, %v4710_v61  ;;  %v20441_v2 = vand.u32 4294901760, %v16100_v38  ;;  %v20565_v26 = vld [vmem:[#allocation95_spill] sm:$0xff] }
 0x43c   :  { %20434 = vst [vmem:[#allocation192_spill] sm:$0xff] %v16193_v37  ;;  %20435 = vst [vmem:[#allocation193_spill] sm:$0xff] %v16195_v36  ;;  %v4826_v62 = vand.u32 4294901760, %v16193_v37  ;;  %v4847_v29 = vand.u32 4294901760, %v16195_v36  ;;  %7316 = vrot.lane.b32.xlu0 %v20436_v12, %s13367_s16  ;;  %7386 = vrot.lane.b32.xlu1 %v20437_v42, %s13367_s16  ;;  %v16211_v5 = vsub.f32 %v3716_v50, %v4710_v61  ;;  %v3720_v23 = vpop.permute.xlu0 %3719  ;;  %v3726_v55 = vpop.permute.xlu1 %3725 }
 0x43d   :  { %20438 = vst [vmem:[#allocation194_spill] sm:$0xff] %v16209_v11  ;;  %v16213_v17 = vsub.f32 %v3722_v20, %v4719_v47  ;;  %11862 = vmatprep.subr.bf16.mxu1 %v16105_v44  ;;  %v16219_v24 = vsub.f32 %v16100_v38, %v20441_v2  ;;  %v16223_v42 = vpack.c.bf16 %v4821_v19, %v4814_v45  ;;  %v4716_v20 = vand.u32 4294901760, %v3720_v23  ;;  %v20444_v45 = vld [vmem:[#allocation50_spill] sm:$0xff] }
 0x43e   :  { %20439 = vst [vmem:[#allocation195_spill] sm:$0xff] %v16211_v5  ;;  %v4827_v49 = vsub.f32 %v16193_v37, %v4826_v62  ;;  %v4848_v46 = vsub.f32 %v16195_v36, %v4847_v29  ;;  %v16225_v34 = vpack.c.bf16 %v4833_v1, %v4826_v62  ;;  %v4840_v61 = vand.u32 4294901760, %v16211_v5  ;;  %v20445_v1 = vld [vmem:[#allocation14_spill] sm:$0xff] }
 0x43f   :  { %20440 = vst [vmem:[#allocation196_spill] sm:$0xff] %v16213_v17  ;;  %20442 = vst [vmem:[#allocation197_spill] sm:$0xff] %v16223_v42  ;;  %v4861_v50 = vand.u32 4294901760, %v16213_v17  ;;  %11864 = vmatpush3.bf16.msra.mxu1 %v15923_v3  ;;  %v4835_v12 = vand.u32 4294901760, %v4834_v27  ;;  %v4725_v37 = vand.u32 4294901760, %v3726_v55  ;;  %v16238_v62 = vpack.c.bf16 %v4719_v47, %v4716_v20 }
 0x440   :  { %20443 = vst [vmem:[#allocation198_spill] sm:$0xff] %v16225_v34  ;;  %v4828_v51 = vand.u32 4294901760, %v4827_v49  ;;  %7384 = vrot.lane.b32.xlu0 %v20444_v45, %s13367_s16  ;;  %7354 = vrot.lane.b32.xlu1 %v20445_v1, %s13367_s16  ;;  %v4841_v19 = vsub.f32 %v16211_v5, %v4840_v61  ;;  %v16240_v44 = vsub.f32 %v3720_v23, %v4716_v20  ;;  %v4162_v3 = vand.u32 4294901760, %v16219_v24  ;;  %v3724_v2 = vpop.permute.xlu0 %3723  ;;  %v3730_v34 = vpop.permute.xlu1 %3729  ;;  %v20451_v20 = vld [vmem:[#allocation3_spill] sm:$0xff] }
 0x441   :  { %20446 = vst [vmem:[#allocation199_spill] sm:$0xff] %v16238_v62  ;;  %11866 = vmatprep.subr.bf16.mxu1 %v16115_v13  ;;  %v4862_v27 = vsub.f32 %v16213_v17, %v4861_v50  ;;  %v16245_v49 = vsub.f32 %v3726_v55, %v4725_v37  ;;  %v16249_v36 = vpack.c.bf16 %v4847_v29, %v4840_v61  ;;  %v4849_v1 = vand.u32 4294901760, %v4848_v46 }
 0x442   :  { %20447 = vst [vmem:[#allocation200_spill] sm:$0xff] %v16240_v44  ;;  %v16247_v45 = vpack.c.bf16 %v4835_v12, %v4828_v51  ;;  %v4842_v5 = vand.u32 4294901760, %v4841_v19  ;;  %v4854_v47 = vand.u32 4294901760, %v16240_v44  ;;  %v4722_v24 = vand.u32 4294901760, %v3724_v2  ;;  %v20452_v51 = vld [vmem:[#allocation52_spill] sm:$0xff] }
 0x443   :  { %20448 = vst [vmem:[#allocation201_spill] sm:$0xff] %v16245_v49  ;;  %20450 = vst [vmem:[#allocation203_spill] sm:$0xff] %v16249_v36  ;;  %11868 = vmatpush3.bf16.msra.mxu1 %v15946_v28  ;;  %v4875_v13 = vand.u32 4294901760, %v16245_v49  ;;  %v4731_v55 = vand.u32 4294901760, %v3730_v34  ;;  %v20453_v29 = vand.u32 4294901760, %v15801_v4  ;;  %v20454_v12 = vand.u32 4294901760, %v15785_v6 }
 0x444   :  { %20449 = vst [vmem:[#allocation202_spill] sm:$0xff] %v16247_v45  ;;  %7352 = vrot.lane.b32.xlu0 %v20451_v20, %s13367_s16  ;;  %7390 = vrot.lane.b32.xlu1 %v20452_v51, %s13367_s16  ;;  %v20456_v61 = vand.u32 4294901760, %v16128_v9  ;;  %v4855_v19 = vsub.f32 %v16240_v44, %v4854_v47  ;;  %v16273_v23 = vpack.c.bf16 %v4849_v1, %v4842_v5  ;;  %v4863_v51 = vand.u32 4294901760, %v4862_v27  ;;  %v20465_v27 = vld [vmem:[#allocation54_spill] sm:$0xff]  ;;  %v20520_v44 = vld [vmem:[#allocation71_spill] sm:$0xff] }
 0x445   :  { %v16264_v46 = vpack.c.bf16 %v20454_v12, %v20453_v29  ;;  %11870 = vmatprep.subr.bf16.mxu1 %v16157_v7  ;;  %v16275_v20 = vpack.c.bf16 %v4861_v50, %v4854_v47  ;;  %v16277_v36 = vpack.c.bf16 %v4725_v37, %v4722_v24  ;;  %v16279_v4 = vsub.f32 %v3724_v2, %v4722_v24  ;;  %v3728_v12 = vpop.permute.xlu0 %3727 }
 0x446   :  { %v16269_v28 = vsub.f32 %v16128_v9, %v20456_v61  ;;  %20457 = vst [vmem:[#allocation205_spill] sm:$0xff] %v16273_v23  ;;  %v16281_v29 = vsub.f32 %v3730_v34, %v4731_v55  ;;  %v4856_v6 = vand.u32 4294901760, %v4855_v19  ;;  %v4728_v61 = vand.u32 4294901760, %v3728_v12 }
 0x447   :  { %20455 = vst [vmem:[#allocation204_spill] sm:$0xff] %v16264_v46  ;;  %20458 = vst [vmem:[#allocation206_spill] sm:$0xff] %v16275_v20  ;;  %v3734_v46 = vpop.permute.xlu1 %3733  ;;  %11872 = vmatpush3.bf16.msra.mxu1 %v15985_v10  ;;  %v20462_v7 = vand.u32 4294901760, %v15846_v21  ;;  %v20463_v5 = vand.u32 4294901760, %v15822_v43  ;;  %v4876_v37 = vsub.f32 %v16245_v49, %v4875_v13  ;;  %v4868_v2 = vand.u32 4294901760, %v16279_v4  ;;  %v20466_v10 = vld [vmem:[#allocation15_spill] sm:$0xff] }
 0x448   :  { %20459 = vst [vmem:[#allocation207_spill] sm:$0xff] %v16277_v36  ;;  %20460 = vst [vmem:[#allocation208_spill] sm:$0xff] %v16279_v4  ;;  %v4737_v17 = vand.u32 4294901760, %v3734_v46  ;;  %v4889_v1 = vand.u32 4294901760, %v16281_v29  ;;  %7388 = vrot.lane.b32.xlu0 %v20465_v27, %s13367_s16  ;;  %7358 = vrot.lane.b32.xlu1 %v20466_v10, %s13367_s16  ;;  %v16299_v47 = vpack.c.bf16 %v4731_v55, %v4728_v61  ;;  %v20471_v21 = vand.u32 4294901760, %v16160_v15  ;;  %v20473_v20 = vld [vmem:[#allocation24_spill] sm:$0xff] }
 0x449   :  { %20461 = vst [vmem:[#allocation209_spill] sm:$0xff] %v16281_v29  ;;  %v16288_v50 = vpack.c.bf16 %v20463_v5, %v20462_v7  ;;  %v16301_v24 = vsub.f32 %v3728_v12, %v4728_v61  ;;  %11874 = vmatprep.subr.bf16.mxu1 %v16181_v60  ;;  %v16306_v7 = vpack.c.bf16 %v4863_v51, %v4856_v6  ;;  %v4877_v51 = vand.u32 4294901760, %v4876_v37  ;;  %v20613_v36 = vld [vmem:[#allocation96_spill] sm:$0xff] }
 0x44a   :  { %20467 = vst [vmem:[#allocation211_spill] sm:$0xff] %v16299_v47  ;;  %v16303_v19 = vsub.f32 %v3734_v46, %v4737_v17  ;;  %v4869_v5 = vsub.f32 %v16279_v4, %v4868_v2  ;;  %v4890_v34 = vsub.f32 %v16281_v29, %v4889_v1  ;;  %v11881_v27 = vpack.c.bf16 %v20471_v21, %v4162_v3  ;;  %v20474_v21 = vld [vmem:[#allocation55_spill] sm:$0xff] }
 0x44b   :  { %20464 = vst [vmem:[#allocation210_spill] sm:$0xff] %v16288_v50  ;;  %20468 = vst [vmem:[#allocation212_spill] sm:$0xff] %v16301_v24  ;;  %v3732_v50 = vpop.permute.xlu0 %3731  ;;  %v3742_v43 = vpop.permute.xlu1 %3741  ;;  %v16312_v10 = vpack.c.bf16 %v4875_v13, %v4868_v2  ;;  %v4882_v55 = vand.u32 4294901760, %v16301_v24  ;;  %11876 = vmatpush3.bf16.msra.mxu1 %v15987_v41  ;;  %v20475_v15 = vand.u32 4294901760, %v15876_v58  ;;  %v20476_v3 = vand.u32 4294901760, %v15889_v18 }
 0x44c   :  { %20469 = vst [vmem:[#allocation213_spill] sm:$0xff] %v16303_v19  ;;  %20470 = vst [vmem:[#allocation214_spill] sm:$0xff] %v16306_v7  ;;  %v4903_v60 = vand.u32 4294901760, %v16303_v19  ;;  %v4734_v6 = vand.u32 4294901760, %v3732_v50  ;;  %v4870_v12 = vand.u32 4294901760, %v4869_v5  ;;  %v4749_v61 = vand.u32 4294901760, %v3742_v43  ;;  %7356 = vrot.lane.b32.xlu0 %v20473_v20, %s13367_s16  ;;  %7394 = vrot.lane.b32.xlu1 %v20474_v21, %s13367_s16 }
 0x44d   :  { %20472 = vst [vmem:[#allocation215_spill] sm:$0xff] %v16312_v10  ;;  %v16327_v13 = vpack.c.bf16 %v20476_v3, %v20475_v15  ;;  %v4050_v2 = vand.u32 4294901760, %v16269_v28  ;;  %v4883_v46 = vsub.f32 %v16301_v24, %v4882_v55  ;;  %11878 = vmatprep.subr.bf16.mxu1 %v16197_v56  ;;  %v16341_v15 = vpack.c.bf16 %v4889_v1, %v4882_v55  ;;  %v20503_v24 = vld [vmem:[#allocation66_spill] sm:$0xff] }
 0x44e   :  { %v16331_v41 = vpack.c.bf16 %v4737_v17, %v4734_v6  ;;  %v16333_v37 = vsub.f32 %v3732_v50, %v4734_v6  ;;  %v4904_v5 = vsub.f32 %v16303_v19, %v4903_v60  ;;  %v16337_v20 = vsub.f32 %v3742_v43, %v4749_v61  ;;  %v20483_v6 = vld [vmem:[#allocation59_spill] sm:$0xff] }
 0x44f   :  { %20477 = vst [vmem:[#allocation216_spill] sm:$0xff] %v16327_v13  ;;  %v3740_v21 = vpop.permute.xlu0 %3739  ;;  %v3746_v58 = vpop.permute.xlu1 %3745  ;;  %v16339_v10 = vpack.c.bf16 %v4877_v51, %v4870_v12  ;;  %20482 = vst [vmem:[#allocation221_spill] sm:$0xff] %v16341_v15  ;;  %v4891_v3 = vand.u32 4294901760, %v4890_v34  ;;  %v4884_v28 = vand.u32 4294901760, %v4883_v46  ;;  %11880 = vmatpush3.bf16.msra.mxu1 %v16035_v57  ;;  %v20484_v51 = vld [vmem:[#allocation27_spill] sm:$0xff]  ;;  %v11885_v34 = vpack.c.bf16 %v15861_v30, %v15869_v53 }
 0x450   :  { %20478 = vst [vmem:[#allocation217_spill] sm:$0xff] %v16331_v41  ;;  %20479 = vst [vmem:[#allocation218_spill] sm:$0xff] %v16333_v37  ;;  %v4896_v13 = vand.u32 4294901760, %v16333_v37  ;;  %v4931_v56 = vand.u32 4294901760, %v16337_v20  ;;  %v4746_v50 = vand.u32 4294901760, %v3740_v21  ;;  %v4755_v43 = vand.u32 4294901760, %v3746_v58  ;;  %7392 = vrot.lane.b32.xlu0 %v20483_v6, %s13367_s16  ;;  %7362 = vrot.lane.b32.xlu1 %v20484_v51, %s13367_s16 }
 0x451   :  { %20480 = vst [vmem:[#allocation219_spill] sm:$0xff] %v16337_v20  ;;  %20481 = vst [vmem:[#allocation220_spill] sm:$0xff] %v16339_v10  ;;  %11882 = vmatprep.subr.bf16.mxu1 %v11881_v27  ;;  %v20485_v55 = vand.u32 4294901760, %v16184_v0  ;;  %v16357_v57 = vpack.c.bf16 %v4891_v3, %v4884_v28  ;;  %v4905_v17 = vand.u32 4294901760, %v4904_v5 }
 0x452   :  { %v4897_v1 = vsub.f32 %v16333_v37, %v4896_v13  ;;  %v16359_v12 = vpack.c.bf16 %v4903_v60, %v4896_v13  ;;  %v16361_v18 = vpack.c.bf16 %v4749_v61, %v4746_v50  ;;  %v16363_v6 = vsub.f32 %v3740_v21, %v4746_v50  ;;  %v20491_v13 = vld [vmem:[#allocation29_spill] sm:$0xff]  ;;  %v20494_v21 = vld [vmem:[#allocation83_spill] sm:$0xff] }
 0x453   :  { %v11883_v46 = vpack.c.bf16 %v20485_v55, %v4050_v2  ;;  %20486 = vst [vmem:[#allocation222_spill] sm:$0xff] %v16357_v57  ;;  %v16365_v15 = vsub.f32 %v3746_v58, %v4755_v43  ;;  %v3744_v51 = vpop.permute.xlu0 %3743  ;;  %v3750_v19 = vpop.permute.xlu1 %3749  ;;  %v4932_v53 = vsub.f32 %v16337_v20, %v4931_v56  ;;  %v20492_v61 = vld [vmem:[#allocation61_spill] sm:$0xff]  ;;  %v20493_v58 = vld [vmem:[#allocation84_spill] sm:$0xff] }
 0x454   :  { %20487 = vst [vmem:[#allocation223_spill] sm:$0xff] %v16359_v12  ;;  %20488 = vst [vmem:[#allocation224_spill] sm:$0xff] %v16361_v18  ;;  %v4898_v30 = vand.u32 4294901760, %v4897_v1  ;;  %v4752_v27 = vand.u32 4294901760, %v3744_v51  ;;  %v4761_v37 = vand.u32 4294901760, %v3750_v19  ;;  %v4924_v0 = vand.u32 4294901760, %v16363_v6  ;;  %7360 = vrot.lane.b32.xlu0 %v20491_v13, %s13367_s16  ;;  %7398 = vrot.lane.b32.xlu1 %v20492_v61, %s13367_s16 }
 0x455   :  { %20489 = vst [vmem:[#allocation225_spill] sm:$0xff] %v16363_v6  ;;  %20490 = vst [vmem:[#allocation226_spill] sm:$0xff] %v16365_v15  ;;  %11884 = vmatpush3.bf16.msra.mxu1 %v11883_v46  ;;  %v4945_v60 = vand.u32 4294901760, %v16365_v15  ;;  %v11887_v2 = vpack.c.bf16 %v20494_v21, %v20493_v58  ;;  %v20499_v13 = vld [vmem:[#allocation87_spill] sm:$0xff]  ;;  %v11889_v58 = vpack.c.bf16 %v15897_v54, %v15906_v14  ;;  %v20500_v21 = vld [vmem:[#allocation94_spill] sm:$0xff] }
 0x456   :  { %v16378_v3 = vpack.c.bf16 %v4755_v43, %v4752_v27  ;;  %v16380_v28 = vsub.f32 %v3744_v51, %v4752_v27  ;;  %v16382_v50 = vsub.f32 %v3750_v19, %v4761_v37  ;;  %11886 = vmatprep.subr.bf16.mxu1 %v11885_v34  ;;  %v16384_v1 = vpack.c.bf16 %v4905_v17, %v4898_v30  ;;  %v20502_v17 = vld [vmem:[#allocation126_spill] sm:$0xff]  ;;  %v20504_v54 = vld [vmem:[#allocation31_spill] sm:$0xff] }
 0x457   :  { %v4925_v55 = vsub.f32 %v16363_v6, %v4924_v0  ;;  %v3748_v46 = vpop.permute.xlu0 %3747  ;;  %v3754_v61 = vpop.permute.xlu1 %3753  ;;  %v11891_v43 = vpack.c.bf16 %v20500_v21, %v15549_v52  ;;  %v16392_v5 = vpack.c.bf16 %v4931_v56, %v4924_v0  ;;  %v4933_v30 = vand.u32 4294901760, %v4932_v53  ;;  %v20507_v53 = vld [vmem:[#allocation105_spill] sm:$0xff]  ;;  %v20508_v21 = vld [vmem:[#allocation106_spill] sm:$0xff] }
 0x458   :  { %20495 = vst [vmem:[#allocation84_spill] sm:$0xff] %v16378_v3  ;;  %20496 = vst [vmem:[#allocation83_spill] sm:$0xff] %v16380_v28  ;;  %4174 = vmatmul.mubr.f32.vlgmr.msra.gmra.mrb[2].mxu1 %v20499_v13  ;;  %v4938_v19 = vand.u32 4294901760, %v16380_v28  ;;  %v4758_v51 = vand.u32 4294901760, %v3748_v46  ;;  %v4767_v34 = vand.u32 4294901760, %v3754_v61  ;;  %v4946_v27 = vsub.f32 %v16365_v15, %v4945_v60  ;;  %7396 = vrot.lane.b32.xlu0 %v20503_v24, %s13367_s16 }
 0x459   :  { %20497 = vst [vmem:[#allocation227_spill] sm:$0xff] %v16382_v50  ;;  %20498 = vst [vmem:[#allocation228_spill] sm:$0xff] %v16384_v1  ;;  %11888 = vmatpush3.bf16.msra.mxu1 %v11887_v2  ;;  %4309 = vmatprep.mubr.f32.mxu1 %v20502_v17  ;;  %v4959_v12 = vand.u32 4294901760, %v16382_v50  ;;  %v4926_v52 = vand.u32 4294901760, %v4925_v55  ;;  %v11893_v55 = vpack.c.bf16 %v15940_v8, %v15951_v31 }
 0x45a   :  { %20501 = vst [vmem:[#allocation87_spill] sm:$0xff] %v16392_v5  ;;  %7366 = vrot.lane.b32.xlu1 %v20504_v54, %s13367_s16  ;;  %v4939_v56 = vsub.f32 %v16380_v28, %v4938_v19  ;;  %v16405_v0 = vpack.c.bf16 %v4761_v37, %v4758_v51  ;;  %v16407_v2 = vsub.f32 %v3748_v46, %v4758_v51  ;;  %v4947_v8 = vand.u32 4294901760, %v4946_v27  ;;  %v20568_v28 = vld [vmem:[#allocation148_spill] sm:$0xff] }
 0x45b   :  { %11890 = vmatprep.subr.bf16.mxu1 %v11889_v58  ;;  %v11895_v5 = vpack.c.bf16 %v20508_v21, %v20507_v53  ;;  %v16411_v29 = vsub.f32 %v3754_v61, %v4767_v34  ;;  %v3752_v24 = vpop.permute.xlu0 %3751  ;;  %v3758_v4 = vpop.permute.xlu1 %3757  ;;  %v16415_v54 = vpack.c.bf16 %v4933_v30, %v4926_v52  ;;  %v16417_v14 = vpack.c.bf16 %v4945_v60, %v4938_v19  ;;  %v20512_v53 = vld [vmem:[#allocation33_spill] sm:$0xff] }
 0x45c   :  { %20505 = vst [vmem:[#allocation94_spill] sm:$0xff] %v16405_v0  ;;  %20506 = vst [vmem:[#allocation126_spill] sm:$0xff] %v16407_v2  ;;  %v4952_v37 = vand.u32 4294901760, %v16407_v2  ;;  %v4764_v49 = vand.u32 4294901760, %v3752_v24  ;;  %v4773_v46 = vand.u32 4294901760, %v3758_v4  ;;  %v4940_v58 = vand.u32 4294901760, %v4939_v56  ;;  %7364 = vrot.lane.b32.xlu0 %v20512_v53, %s13367_s16 }
 0x45d   :  { %20509 = vst [vmem:[#allocation105_spill] sm:$0xff] %v16411_v29  ;;  %20510 = vst [vmem:[#allocation106_spill] sm:$0xff] %v16415_v54  ;;  %11892 = vmatpush3.bf16.msra.mxu1 %v11891_v43  ;;  %v4960_v51 = vsub.f32 %v16382_v50, %v4959_v12  ;;  %v4973_v61 = vand.u32 4294901760, %v16411_v29  ;;  %v20513_v21 = vld [vmem:[#allocation69_spill] sm:$0xff]  ;;  %v11897_v53 = vpack.c.bf16 %v15968_v39, %v15980_v22  ;;  %v20521_v22 = vld [vmem:[#allocation35_spill] sm:$0xff] }
 0x45e   :  { %20511 = vst [vmem:[#allocation229_spill] sm:$0xff] %v16417_v14  ;;  %7402 = vrot.lane.b32.xlu1 %v20513_v21, %s13367_s16  ;;  %v4953_v60 = vsub.f32 %v16407_v2, %v4952_v37  ;;  %v16429_v19 = vpack.c.bf16 %v4767_v34, %v4764_v49  ;;  %v16431_v43 = vsub.f32 %v3752_v24, %v4764_v49  ;;  %v20517_v21 = vld [vmem:[#allocation112_spill] sm:$0xff]  ;;  %v20564_v50 = vld [vmem:[#allocation154_spill] sm:$0xff] }
 0x45f   :  { %v16433_v30 = vsub.f32 %v3758_v4, %v4773_v46  ;;  %11894 = vmatprep.subr.bf16.mxu1 %v11893_v55  ;;  %v3756_v52 = vpop.permute.xlu0 %3755  ;;  %v3762_v56 = vpop.permute.xlu1 %3761  ;;  %v11899_v27 = vpack.c.bf16 %v20517_v21, %v15622_v33  ;;  %v16439_v14 = vpack.c.bf16 %v4947_v8, %v4940_v58  ;;  %v16441_v31 = vpack.c.bf16 %v4959_v12, %v4952_v37 }
 0x460   :  { %20514 = vst [vmem:[#allocation230_spill] sm:$0xff] %v16429_v19  ;;  %20515 = vst [vmem:[#allocation231_spill] sm:$0xff] %v16431_v43  ;;  %v4966_v34 = vand.u32 4294901760, %v16431_v43  ;;  %v4770_v24 = vand.u32 4294901760, %v3756_v52  ;;  %v4779_v4 = vand.u32 4294901760, %v3762_v56  ;;  %v4974_v55 = vsub.f32 %v16411_v29, %v4973_v61  ;;  %7400 = vrot.lane.b32.xlu0 %v20520_v44, %s13367_s16  ;;  %v20533_v29 = vld [vmem:[#allocation132_spill] sm:$0xff] }
 0x461   :  { %20516 = vst [vmem:[#allocation232_spill] sm:$0xff] %v16433_v30  ;;  %20518 = vst [vmem:[#allocation112_spill] sm:$0xff] %v16439_v14  ;;  %v4987_v49 = vand.u32 4294901760, %v16433_v30  ;;  %11896 = vmatpush3.bf16.msra.mxu1 %v11895_v5  ;;  %v4954_v33 = vand.u32 4294901760, %v4953_v60  ;;  %v4961_v39 = vand.u32 4294901760, %v4960_v51  ;;  %v11901_v5 = vpack.c.bf16 %v16002_v40, %v16011_v32  ;;  %v20527_v40 = vld [vmem:[#allocation36_spill] sm:$0xff] }
 0x462   :  { %20519 = vst [vmem:[#allocation233_spill] sm:$0xff] %v16441_v31  ;;  %7370 = vrot.lane.b32.xlu1 %v20521_v22, %s13367_s16  ;;  %v4967_v37 = vsub.f32 %v16431_v43, %v4966_v34  ;;  %v16453_v58 = vpack.c.bf16 %v4773_v46, %v4770_v24  ;;  %v16455_v21 = vsub.f32 %v3756_v52, %v4770_v24  ;;  %v20528_v32 = vld [vmem:[#allocation72_spill] sm:$0xff]  ;;  %v4975_v24 = vand.u32 4294901760, %v4974_v55 }
 0x463   :  { %11898 = vmatprep.subr.bf16.mxu1 %v11897_v53  ;;  %v4988_v8 = vsub.f32 %v16433_v30, %v4987_v49  ;;  %v16460_v44 = vsub.f32 %v3762_v56, %v4779_v4  ;;  %v3760_v22 = vpop.permute.xlu0 %3759  ;;  %v3766_v60 = vpop.permute.xlu1 %3765  ;;  %v16462_v51 = vpack.c.bf16 %v4961_v39, %v4954_v33  ;;  %v16464_v31 = vpack.c.bf16 %v4973_v61, %v4966_v34  ;;  %v20537_v30 = vld [vmem:[#allocation78_spill] sm:$0xff] }
 0x464   :  { %20522 = vst [vmem:[#allocation234_spill] sm:$0xff] %v16453_v58  ;;  %20523 = vst [vmem:[#allocation235_spill] sm:$0xff] %v16455_v21  ;;  %v4980_v12 = vand.u32 4294901760, %v16455_v21  ;;  %v4776_v46 = vand.u32 4294901760, %v3760_v22  ;;  %v4785_v43 = vand.u32 4294901760, %v3766_v60  ;;  %v4968_v52 = vand.u32 4294901760, %v4967_v37  ;;  %7368 = vrot.lane.b32.xlu0 %v20527_v40, %s13367_s16 }
 0x465   :  { %20524 = vst [vmem:[#allocation236_spill] sm:$0xff] %v16460_v44  ;;  %20525 = vst [vmem:[#allocation237_spill] sm:$0xff] %v16462_v51  ;;  %11900 = vmatpush3.bf16.msra.mxu1 %v11899_v27  ;;  %v5001_v53 = vand.u32 4294901760, %v16460_v44  ;;  %v11903_v56 = vpack.c.bf16 %v15684_v35, %v15669_v48  ;;  %v20534_v48 = vld [vmem:[#allocation136_spill] sm:$0xff] }
 0x466   :  { %20526 = vst [vmem:[#allocation238_spill] sm:$0xff] %v16464_v31  ;;  %7406 = vrot.lane.b32.xlu1 %v20528_v32, %s13367_s16  ;;  %v4981_v34 = vsub.f32 %v16455_v21, %v4980_v12  ;;  %v16477_v33 = vpack.c.bf16 %v4779_v4, %v4776_v46  ;;  %v16479_v27 = vsub.f32 %v3760_v22, %v4776_v46  ;;  %v20532_v32 = vld [vmem:[#allocation171_spill] sm:$0xff] }
 0x467   :  { %v16481_v39 = vsub.f32 %v3766_v60, %v4785_v43  ;;  %11902 = vmatprep.subr.bf16.mxu1 %v11901_v5  ;;  %v3764_v37 = vpop.permute.xlu0 %3763  ;;  %v3770_v40 = vpop.permute.xlu1 %3769  ;;  %v11905_v31 = vpack.c.bf16 %v20532_v32, %v16044_v63  ;;  %v11907_v35 = vpack.c.bf16 %v20534_v48, %v20533_v29  ;;  %v16487_v55 = vpack.c.bf16 %v4975_v24, %v4968_v52  ;;  %v20538_v63 = vld [vmem:[#allocation39_spill] sm:$0xff] }
 0x468   :  { %20529 = vst [vmem:[#allocation239_spill] sm:$0xff] %v16477_v33  ;;  %20530 = vst [vmem:[#allocation240_spill] sm:$0xff] %v16479_v27  ;;  %v16489_v61 = vpack.c.bf16 %v4987_v49, %v4980_v12  ;;  %v4994_v4 = vand.u32 4294901760, %v16479_v27  ;;  %v4782_v21 = vand.u32 4294901760, %v3764_v37  ;;  %v4791_v22 = vand.u32 4294901760, %v3770_v40  ;;  %7404 = vrot.lane.b32.xlu0 %v20537_v30, %s13367_s16 }
 0x469   :  { %20531 = vst [vmem:[#allocation241_spill] sm:$0xff] %v16481_v39  ;;  %20535 = vst [vmem:[#allocation171_spill] sm:$0xff] %v16487_v55  ;;  %11904 = vmatpush3.bf16.msra.mxu1 %v11903_v56  ;;  %v4989_v60 = vand.u32 4294901760, %v4988_v8  ;;  %v5002_v5 = vsub.f32 %v16460_v44, %v5001_v53  ;;  %v4982_v29 = vand.u32 4294901760, %v4981_v34  ;;  %v20541_v8 = vld [vmem:[#allocation143_spill] sm:$0xff]  ;;  %v20542_v56 = vld [vmem:[#allocation144_spill] sm:$0xff] }
 0x46a   :  { %20536 = vst [vmem:[#allocation132_spill] sm:$0xff] %v16489_v61  ;;  %7374 = vrot.lane.b32.xlu1 %v20538_v63, %s13367_s16  ;;  %v4995_v12 = vsub.f32 %v16479_v27, %v4994_v4  ;;  %v16501_v52 = vpack.c.bf16 %v4785_v43, %v4782_v21  ;;  %v16503_v32 = vsub.f32 %v3764_v37, %v4782_v21  ;;  %v20544_v61 = vld [vmem:[#allocation176_spill] sm:$0xff]  ;;  %v20545_v63 = vld [vmem:[#allocation175_spill] sm:$0xff]  ;;  %v20548_v37 = vand.u32 4294901760, %v16481_v39 }
 0x46b   :  { %11906 = vmatprep.subr.bf16.mxu1 %v11905_v31  ;;  %v11911_v24 = vpack.c.bf16 %v20542_v56, %v20541_v8  ;;  %v16507_v48 = vsub.f32 %v3770_v40, %v4791_v22  ;;  %v3768_v46 = vpop.permute.xlu0 %3767  ;;  %v3738_v30 = vpop.permute.xlu1 %3737  ;;  %v11909_v34 = vpack.c.bf16 %v20545_v63, %v20544_v61  ;;  %v16511_v2 = vpack.c.bf16 %v4989_v60, %v4982_v29  ;;  %v20549_v56 = vld [vmem:[#allocation40_spill] sm:$0xff]  ;;  %v20596_v55 = vld [vmem:[#allocation159_spill] sm:$0xff] }
 0x46c   :  { %20539 = vst [vmem:[#allocation136_spill] sm:$0xff] %v16501_v52  ;;  %20540 = vst [vmem:[#allocation242_spill] sm:$0xff] %v16503_v32  ;;  %v16513_v49 = vpack.c.bf16 %v5001_v53, %v4994_v4  ;;  %v5008_v43 = vand.u32 4294901760, %v16503_v32  ;;  %v4788_v27 = vand.u32 4294901760, %v3768_v46  ;;  %v4743_v21 = vand.u32 4294901760, %v3738_v30  ;;  %7372 = vrot.lane.b32.xlu0 %v20549_v56, %s13367_s16  ;;  %v20550_v61 = vld [vmem:[#allocation80_spill] sm:$0xff] }
 0x46d   :  { %20543 = vst [vmem:[#allocation143_spill] sm:$0xff] %v16507_v48  ;;  %20546 = vst [vmem:[#allocation144_spill] sm:$0xff] %v16511_v2  ;;  %11908 = vmatpush3.bf16.msra.mxu1 %v11907_v35  ;;  %v4996_v31 = vand.u32 4294901760, %v4995_v12  ;;  %v5016_v40 = vsub.f32 %v16481_v39, %v20548_v37  ;;  %v5003_v53 = vand.u32 4294901760, %v5002_v5  ;;  %v11913_v8 = vpack.c.bf16 %v16091_v16, %v16100_v38 }
 0x46e   :  { %20547 = vst [vmem:[#allocation176_spill] sm:$0xff] %v16513_v49  ;;  %7410 = vrot.lane.b32.xlu1 %v20550_v61, %s13367_s16  ;;  %v5009_v60 = vsub.f32 %v16503_v32, %v5008_v43  ;;  %v16527_v35 = vpack.c.bf16 %v4791_v22, %v4788_v27  ;;  %v16529_v63 = vsub.f32 %v3768_v46, %v4788_v27  ;;  %v20555_v27 = vand.u32 4294901760, %v16507_v48  ;;  %v20556_v22 = vld [vmem:[#allocation89_spill] sm:$0xff]  ;;  %v20557_v46 = vld [vmem:[#allocation43_spill] sm:$0xff] }
 0x46f   :  { %v16531_v29 = vsub.f32 %v3738_v30, %v4743_v21  ;;  %11910 = vmatprep.subr.bf16.mxu1 %v11909_v34  ;;  %v3736_v12 = vpop.permute.xlu0 %3735  ;;  %v7323_v37 = vpop.permute.xlu1 %7322  ;;  %v16535_v56 = vpack.c.bf16 %v5003_v53, %v4996_v31  ;;  %v5017_v16 = vand.u32 4294901760, %v5016_v40 }
 0x470   :  { %20551 = vst [vmem:[#allocation175_spill] sm:$0xff] %v16527_v35  ;;  %20552 = vst [vmem:[#allocation243_spill] sm:$0xff] %v16529_v63  ;;  %v5022_v5 = vand.u32 4294901760, %v16529_v63  ;;  %v4740_v61 = vand.u32 4294901760, %v3736_v12  ;;  %v7532_v49 = vand.u32 4294901760, %v7323_v37  ;;  %v5030_v30 = vsub.f32 %v16507_v48, %v20555_v27  ;;  %7408 = vrot.lane.b32.xlu0 %v20556_v22, %s13367_s16  ;;  %v20608_v35 = vld [vmem:[#allocation185_spill] sm:$0xff] }
 0x471   :  { %20553 = vst [vmem:[#allocation244_spill] sm:$0xff] %v16531_v29  ;;  %20554 = vst [vmem:[#allocation245_spill] sm:$0xff] %v16535_v56  ;;  %v4917_v4 = vand.u32 4294901760, %v16531_v29  ;;  %11912 = vmatpush3.bf16.msra.mxu1 %v11911_v24  ;;  %v5010_v38 = vand.u32 4294901760, %v5009_v60  ;;  %v11915_v24 = vpack.c.bf16 %v16118_v25, %v16128_v9  ;;  %v20562_v9 = vld [vmem:[#allocation90_spill] sm:$0xff] }
 0x472   :  { %7378 = vrot.lane.b32.xlu1 %v20557_v46, %s13367_s16  ;;  %v5023_v34 = vsub.f32 %v16529_v63, %v5022_v5  ;;  %v16547_v31 = vpack.c.bf16 %v4743_v21, %v4740_v61  ;;  %v16549_v53 = vsub.f32 %v3736_v12, %v4740_v61  ;;  %11914 = vmatprep.subr.bf16.mxu1 %v11913_v8  ;;  %v20561_v8 = vld [vmem:[#allocation45_spill] sm:$0xff]  ;;  %v5031_v25 = vand.u32 4294901760, %v5030_v30 }
 0x473   :  { %v4918_v27 = vsub.f32 %v16531_v29, %v4917_v4  ;;  %v7321_v32 = vpop.permute.xlu0 %7320  ;;  %v7291_v44 = vpop.permute.xlu1 %7290  ;;  %v16554_v22 = vpack.c.bf16 %v5017_v16, %v5010_v38  ;;  %v16559_v60 = vsub.f32 %v7323_v37, %v7532_v49  ;;  %v20566_v30 = vand.u32 4294901760, %v16481_v39 }
 0x474   :  { %20558 = vst [vmem:[#allocation246_spill] sm:$0xff] %v16547_v31  ;;  %20559 = vst [vmem:[#allocation247_spill] sm:$0xff] %v16549_v53  ;;  %v4910_v46 = vand.u32 4294901760, %v16549_v53  ;;  %v7529_v21 = vand.u32 4294901760, %v7321_v32  ;;  %v7484_v61 = vand.u32 4294901760, %v7291_v44  ;;  %7376 = vrot.lane.b32.xlu0 %v20561_v8, %s13367_s16  ;;  %v5024_v37 = vand.u32 4294901760, %v5023_v34 }
 0x475   :  { %20560 = vst [vmem:[#allocation248_spill] sm:$0xff] %v16554_v22  ;;  %11916 = vmatpush3.bf16.msra.mxu1 %v11915_v24  ;;  %v4919_v40 = vand.u32 4294901760, %v4918_v27  ;;  %v20569_v27 = vld [vmem:[#allocation103_spill] sm:$0xff]  ;;  %v20575_v34 = vld [vmem:[#allocation158_spill] sm:$0xff]  ;;  %v20604_v31 = vld [vmem:[#allocation164_spill] sm:$0xff] }
 0x476   :  { %7414 = vrot.lane.b32.xlu1 %v20562_v9, %s13367_s16  ;;  %v4911_v12 = vsub.f32 %v16549_v53, %v4910_v46  ;;  %v16566_v38 = vpack.c.bf16 %v7532_v49, %v7529_v21  ;;  %v16568_v16 = vsub.f32 %v7321_v32, %v7529_v21  ;;  %11918 = vmatprep.subr.bf16.mxu1 %v20564_v50  ;;  %v20570_v9 = vld [vmem:[#allocation99_spill] sm:$0xff] }
 0x477   :  { %v16571_v29 = vsub.f32 %v7291_v44, %v7484_v61  ;;  %v7289_v24 = vpop.permute.xlu0 %7288  ;;  %v7327_v8 = vpop.permute.xlu1 %7326  ;;  %v16578_v53 = vpack.c.bf16 %v20566_v30, %v5008_v43  ;;  %v16589_v30 = vpack.c.bf16 %v5031_v25, %v5024_v37 }
 0x478   :  { %20563 = vst [vmem:[#allocation249_spill] sm:$0xff] %v16566_v38  ;;  %4312 = vmatmul.mubr.f32.vlgmr.msra.gmra.mrb[4].mxu1 %v20565_v26  ;;  %v4912_v49 = vand.u32 4294901760, %v4911_v12  ;;  %v7481_v32 = vand.u32 4294901760, %v7289_v24  ;;  %v7538_v21 = vand.u32 4294901760, %v7327_v8  ;;  %12590 = vmatprep.subr.bf16.mxu0 %v16566_v38  ;;  %v20572_v12 = vand.u32 4294901760, %v16507_v48 }
 0x479   :  { %20567 = vst [vmem:[#allocation154_spill] sm:$0xff] %v16578_v53  ;;  %11920 = vmatpush3.bf16.msra.mxu1 %v20568_v28  ;;  %7412 = vrot.lane.b32.xlu0 %v20569_v27, %s13367_s16  ;;  %20571 = vst [vmem:[#allocation95_spill] sm:$0xff] %v16589_v30  ;;  %v20576_v27 = vand.u32 4294901760, %v20502_v17  ;;  %v20581_v17 = vld [vmem:[#allocation109_spill] sm:$0xff] }
 0x47a   :  { %7382 = vrot.lane.b32.xlu1 %v20570_v9, %s13367_s16  ;;  %v16593_v53 = vpack.c.bf16 %v20572_v12, %v5022_v5  ;;  %v16595_v63 = vpack.c.bf16 %v7484_v61, %v7481_v32  ;;  %v16597_v38 = vsub.f32 %v7289_v24, %v7481_v32  ;;  %v16599_v44 = vsub.f32 %v7327_v8, %v7538_v21  ;;  %v20580_v32 = vld [vmem:[#allocation150_spill] sm:$0xff] }
 0x47b   :  { %11922 = vmatprep.subr.bf16.mxu1 %v20575_v34  ;;  %4416 = vmatprep.mubr.f32.mxu1 %v20576_v27  ;;  %v20577_v9 = vand.u32 4294901760, %v16571_v29  ;;  %v7325_v37 = vpop.permute.xlu0 %7324  ;;  %v7295_v43 = vpop.permute.xlu1 %7294  ;;  %v16607_v48 = vpack.c.bf16 %v4919_v40, %v4912_v49  ;;  %v16609_v5 = vpack.c.bf16 %v4917_v4, %v4910_v46  ;;  %v20582_v27 = vld [vmem:[#allocation162_spill] sm:$0xff]  ;;  %v20583_v40 = vand.u32 4294901760, %v16568_v16 }
 0x47c   :  { %20573 = vst [vmem:[#allocation148_spill] sm:$0xff] %v16593_v53  ;;  %20574 = vst [vmem:[#allocation250_spill] sm:$0xff] %v16595_v63  ;;  %v19411_v61 = vand.u32 4294901760, %v16597_v38  ;;  %v7535_v24 = vand.u32 4294901760, %v7325_v37  ;;  %v7490_v8 = vand.u32 4294901760, %v7295_v43  ;;  %12592 = vmatpush3.bf16.msra.mxu0 %v16595_v63  ;;  %v20584_v46 = vand.u32 4294901760, %v16559_v60 }
 0x47d   :  { %v7603_v25 = vsub.f32 %v16571_v29, %v20577_v9  ;;  %20578 = vst [vmem:[#allocation158_spill] sm:$0xff] %v16607_v48  ;;  %20579 = vst [vmem:[#allocation251_spill] sm:$0xff] %v16609_v5  ;;  %11924 = vmatpush3.bf16.msra.mxu1 %v20580_v32  ;;  %7380 = vrot.lane.b32.xlu0 %v20581_v17, %s13367_s16  ;;  %v7708_v4 = vsub.f32 %v16568_v16, %v20583_v40  ;;  %v20586_v40 = vand.u32 4294901760, %v16599_v44 }
 0x47e   :  { %11926 = vmatprep.subr.bf16.mxu1 %v20582_v27  ;;  %v7715_v49 = vsub.f32 %v16559_v60, %v20584_v46  ;;  %v7596_v12 = vsub.f32 %v16597_v38, %v19411_v61  ;;  %v16627_v63 = vpack.c.bf16 %v7538_v21, %v7535_v24  ;;  %v16629_v5 = vsub.f32 %v7325_v37, %v7535_v24  ;;  %v20587_v61 = vld [vmem:[#allocation153_spill] sm:$0xff] }
 0x47f   :  { %v16631_v17 = vsub.f32 %v7295_v43, %v7490_v8  ;;  %v7293_v53 = vpop.permute.xlu0 %7292  ;;  %v7331_v9 = vpop.permute.xlu1 %7330  ;;  %v7709_v39 = vand.u32 4294901760, %v7708_v4  ;;  %v7729_v6 = vsub.f32 %v16599_v44, %v20586_v40  ;;  %v7604_v21 = vand.u32 4294901760, %v7603_v25  ;;  %v20588_v43 = vld [vmem:[#allocation165_spill] sm:$0xff] }
 0x480   :  { %20585 = vst [vmem:[#allocation150_spill] sm:$0xff] %v16627_v63  ;;  %v7716_v15 = vand.u32 4294901760, %v7715_v49  ;;  %v7597_v20 = vand.u32 4294901760, %v7596_v12  ;;  %v7487_v48 = vand.u32 4294901760, %v7293_v53  ;;  %v7544_v30 = vand.u32 4294901760, %v7331_v9  ;;  %12594 = vmatprep.subr.bf16.mxu0 %v16627_v63 }
 0x481   :  { %v19414_v46 = vand.u32 4294901760, %v16631_v17  ;;  %11928 = vmatpush3.bf16.msra.mxu1 %v20587_v61  ;;  %v19415_v37 = vand.u32 4294901760, %v16629_v5 }
 0x482   :  { %11930 = vmatprep.subr.bf16.mxu1 %v20588_v43  ;;  %v16641_v24 = vpack.c.bf16 %v7716_v15, %v7709_v39  ;;  %v16646_v49 = vpack.c.bf16 %v7490_v8, %v7487_v48  ;;  %v16648_v12 = vsub.f32 %v7293_v53, %v7487_v48  ;;  %v16650_v40 = vsub.f32 %v7331_v9, %v7544_v30  ;;  %v20593_v48 = vld [vmem:[#allocation168_spill] sm:$0xff] }
 0x483   :  { %v7617_v4 = vsub.f32 %v16631_v17, %v19414_v46  ;;  %v7329_v1 = vpop.permute.xlu0 %7328  ;;  %v7299_v22 = vpop.permute.xlu1 %7298  ;;  %v16652_v63 = vpack.c.bf16 %v7604_v21, %v7597_v20  ;;  %v7722_v25 = vsub.f32 %v16629_v5, %v19415_v37  ;;  %v7730_v46 = vand.u32 4294901760, %v7729_v6 }
 0x484   :  { %20589 = vst [vmem:[#allocation162_spill] sm:$0xff] %v16641_v24  ;;  %20590 = vst [vmem:[#allocation153_spill] sm:$0xff] %v16646_v49  ;;  %v19419_v15 = vand.u32 4294901760, %v16648_v12  ;;  %v7541_v39 = vand.u32 4294901760, %v7329_v1  ;;  %v20592_v24 = vld [vmem:[#allocation156_spill] sm:$0xff]  ;;  %12596 = vmatpush3.bf16.msra.mxu0 %v16646_v49  ;;  %v7496_v8 = vand.u32 4294901760, %v7299_v22 }
 0x485   :  { %20591 = vst [vmem:[#allocation165_spill] sm:$0xff] %v16652_v63  ;;  %11932 = vmatpush3.bf16.msra.mxu1 %v20592_v24  ;;  %v19418_v53 = vand.u32 4294901760, %v16650_v40  ;;  %v7723_v9 = vand.u32 4294901760, %v7722_v25  ;;  %v7618_v25 = vand.u32 4294901760, %v7617_v4 }
 0x486   :  { %11934 = vmatprep.subr.bf16.mxu1 %v20593_v48  ;;  %v7610_v20 = vsub.f32 %v16648_v12, %v19419_v15  ;;  %v16665_v21 = vpack.c.bf16 %v7544_v30, %v7541_v39  ;;  %v16667_v37 = vsub.f32 %v7329_v1, %v7541_v39  ;;  %v16669_v63 = vsub.f32 %v7299_v22, %v7496_v8  ;;  %v20597_v22 = vld [vmem:[#allocation172_spill] sm:$0xff] }
 0x487   :  { %v7297_v57 = vpop.permute.xlu0 %7296  ;;  %v7335_v56 = vpop.permute.xlu1 %7334  ;;  %v16671_v49 = vpack.c.bf16 %v7730_v46, %v7723_v9  ;;  %v7743_v10 = vsub.f32 %v16650_v40, %v19418_v53 }
 0x488   :  { %20594 = vst [vmem:[#allocation156_spill] sm:$0xff] %v16665_v21  ;;  %v7611_v6 = vand.u32 4294901760, %v7610_v20  ;;  %v7493_v2 = vand.u32 4294901760, %v7297_v57  ;;  %v7550_v7 = vand.u32 4294901760, %v7335_v56  ;;  %12598 = vmatprep.subr.bf16.mxu0 %v16665_v21  ;;  %v19422_v1 = vand.u32 4294901760, %v16669_v63 }
 0x489   :  { %20595 = vst [vmem:[#allocation168_spill] sm:$0xff] %v16671_v49  ;;  %11936 = vmatpush3.bf16.msra.mxu1 %v20596_v55  ;;  %v19423_v30 = vand.u32 4294901760, %v16667_v37 }
 0x48a   :  { %11938 = vmatprep.subr.bf16.mxu1 %v20597_v22  ;;  %v16681_v46 = vpack.c.bf16 %v7496_v8, %v7493_v2  ;;  %v16683_v39 = vsub.f32 %v7297_v57, %v7493_v2  ;;  %v16685_v9 = vsub.f32 %v7335_v56, %v7550_v7  ;;  %v16687_v4 = vpack.c.bf16 %v7618_v25, %v7611_v6  ;;  %v20600_v57 = vld [vmem:[#allocation161_spill] sm:$0xff] }
 0x48b   :  { %v7631_v20 = vsub.f32 %v16669_v63, %v19422_v1  ;;  %v7333_v53 = vpop.permute.xlu0 %7332  ;;  %v7303_v15 = vpop.permute.xlu1 %7302  ;;  %v7736_v21 = vsub.f32 %v16667_v37, %v19423_v30  ;;  %v20601_v2 = vld [vmem:[#allocation177_spill] sm:$0xff]  ;;  %v7744_v6 = vand.u32 4294901760, %v7743_v10 }
 0x48c   :  { %20598 = vst [vmem:[#allocation159_spill] sm:$0xff] %v16681_v46  ;;  %20599 = vst [vmem:[#allocation172_spill] sm:$0xff] %v16687_v4  ;;  %v19428_v49 = vand.u32 4294901760, %v16683_v39  ;;  %v7547_v8 = vand.u32 4294901760, %v7333_v53  ;;  %v7502_v23 = vand.u32 4294901760, %v7303_v15  ;;  %12600 = vmatpush3.bf16.msra.mxu0 %v16681_v46  ;;  %v19427_v56 = vand.u32 4294901760, %v16685_v9 }
 0x48d   :  { %11940 = vmatpush3.bf16.msra.mxu1 %v20600_v57  ;;  %v7737_v25 = vand.u32 4294901760, %v7736_v21 }
 0x48e   :  { %11942 = vmatprep.subr.bf16.mxu1 %v20601_v2  ;;  %v7624_v1 = vsub.f32 %v16683_v39, %v19428_v49  ;;  %v16703_v4 = vpack.c.bf16 %v7550_v7, %v7547_v8  ;;  %v16705_v30 = vsub.f32 %v7303_v15, %v7502_v23  ;;  %v16707_v51 = vsub.f32 %v7333_v53, %v7547_v8  ;;  %v20605_v15 = vld [vmem:[#allocation180_spill] sm:$0xff]  ;;  %v20649_v2 = vld [vmem:[#allocation186_spill] sm:$0xff] }
 0x48f   :  { %v7301_v45 = vpop.permute.xlu0 %7300  ;;  %v7339_v14 = vpop.permute.xlu1 %7338  ;;  %v16709_v42 = vpack.c.bf16 %v7744_v6, %v7737_v25  ;;  %v7757_v46 = vsub.f32 %v16685_v9, %v19427_v56  ;;  %v7632_v7 = vand.u32 4294901760, %v7631_v20 }
 0x490   :  { %20602 = vst [vmem:[#allocation161_spill] sm:$0xff] %v16703_v4  ;;  %v7625_v21 = vand.u32 4294901760, %v7624_v1  ;;  %v19433_v10 = vand.u32 4294901760, %v16705_v30  ;;  %v7499_v54 = vand.u32 4294901760, %v7301_v45  ;;  %12602 = vmatprep.subr.bf16.mxu0 %v16703_v4  ;;  %v7556_v6 = vand.u32 4294901760, %v7339_v14 }
 0x491   :  { %20603 = vst [vmem:[#allocation252_spill] sm:$0xff] %v16709_v42  ;;  %11944 = vmatpush3.bf16.msra.mxu1 %v20604_v31  ;;  %v20612_v52 = vand.u32 4294901760, %v16707_v51  ;;  %v20636_v31 = vld [vmem:[#allocation142_spill] sm:$0xff] }
 0x492   :  { %11946 = vmatprep.subr.bf16.mxu1 %v20605_v15  ;;  %v7645_v53 = vsub.f32 %v16705_v30, %v19433_v10  ;;  %v16721_v8 = vpack.c.bf16 %v7502_v23, %v7499_v54  ;;  %v16723_v25 = vsub.f32 %v7301_v45, %v7499_v54  ;;  %v16726_v42 = vpack.c.bf16 %v7632_v7, %v7625_v21  ;;  %v20609_v10 = vld [vmem:[#allocation160_spill] sm:$0xff] }
 0x493   :  { %v7337_v1 = vpop.permute.xlu0 %7336  ;;  %v7307_v56 = vpop.permute.xlu1 %7306  ;;  %v16739_v21 = vsub.f32 %v7339_v14, %v7556_v6 }
 0x494   :  { %20606 = vst [vmem:[#allocation253_spill] sm:$0xff] %v16721_v8  ;;  %20607 = vst [vmem:[#allocation254_spill] sm:$0xff] %v16726_v42  ;;  %v19439_v4 = vand.u32 4294901760, %v16723_v25  ;;  %v7553_v20 = vand.u32 4294901760, %v7337_v1  ;;  %12604 = vmatpush3.bf16.msra.mxu0 %v16721_v8  ;;  %v7508_v41 = vand.u32 4294901760, %v7307_v56  ;;  %v20611_v42 = vand.u32 4294901760, %v20565_v26 }
 0x495   :  { %11948 = vmatpush3.bf16.msra.mxu1 %v20608_v35  ;;  %v7646_v14 = vand.u32 4294901760, %v7645_v53  ;;  %v20630_v35 = vld [vmem:[#allocation125_spill] sm:$0xff] }
 0x496   :  { %11950 = vmatprep.subr.bf16.mxu1 %v20609_v10  ;;  %v7638_v45 = vsub.f32 %v16723_v25, %v19439_v4  ;;  %v16735_v23 = vpack.c.bf16 %v7556_v6, %v7553_v20  ;;  %v16737_v54 = vsub.f32 %v7337_v1, %v7553_v20  ;;  %v16741_v7 = vsub.f32 %v7307_v56, %v7508_v41  ;;  %v20614_v6 = vld [vmem:[#allocation163_spill] sm:$0xff] }
 0x497   :  { %v7305_v49 = vpop.permute.xlu0 %7304  ;;  %v7343_v8 = vpop.permute.xlu1 %7342  ;;  %v7750_v10 = vsub.f32 %v16707_v51, %v20612_v52  ;;  %v20615_v1 = vld [vmem:[#allocation107_spill] sm:$0xff] }
 0x498   :  { %20610 = vst [vmem:[#allocation160_spill] sm:$0xff] %v16735_v23  ;;  %4420 = vmatmul.mubr.f32.vlgmr.msra.gmra.mrb[6].mxu1 %v20611_v42  ;;  %v7639_v47 = vand.u32 4294901760, %v7638_v45  ;;  %v7505_v33 = vand.u32 4294901760, %v7305_v49  ;;  %v7562_v4 = vand.u32 4294901760, %v7343_v8  ;;  %12606 = vmatprep.subr.bf16.mxu0 %v16735_v23  ;;  %v19446_v56 = vand.u32 4294901760, %v16741_v7 }
 0x499   :  { %11952 = vmatpush3.bf16.msra.mxu1 %v20613_v36  ;;  %4586 = vmatprep.mubr.f32.mxu1 %v20615_v1  ;;  %v7751_v45 = vand.u32 4294901760, %v7750_v10 }
 0x49a   :  { %11954 = vmatprep.subr.bf16.mxu1 %v20614_v6  ;;  %v16754_v42 = vpack.c.bf16 %v7508_v41, %v7505_v33  ;;  %v16756_v20 = vsub.f32 %v7305_v49, %v7505_v33  ;;  %v16758_v52 = vsub.f32 %v7343_v8, %v7562_v4  ;;  %v7659_v36 = vsub.f32 %v16741_v7, %v19446_v56  ;;  %v20618_v33 = vld [vmem:[#allocation111_spill] sm:$0xff]  ;;  %v20619_v49 = vld [vmem:[#allocation166_spill] sm:$0xff] }
 0x49b   :  { %v7341_v53 = vpop.permute.xlu0 %7340  ;;  %v7311_v23 = vpop.permute.xlu1 %7310  ;;  %v7758_v6 = vand.u32 4294901760, %v7757_v46  ;;  %v16764_v62 = vpack.c.bf16 %v7646_v14, %v7639_v47  ;;  %v20621_v56 = vand.u32 4294901760, %v16737_v54 }
 0x49c   :  { %20616 = vst [vmem:[#allocation96_spill] sm:$0xff] %v16754_v42  ;;  %v19449_v26 = vand.u32 4294901760, %v16756_v20  ;;  %v7559_v41 = vand.u32 4294901760, %v7341_v53  ;;  %v7514_v19 = vand.u32 4294901760, %v7311_v23  ;;  %12608 = vmatpush3.bf16.msra.mxu0 %v16754_v42  ;;  %v19452_v8 = vand.u32 4294901760, %v16758_v52 }
 0x49d   :  { %20617 = vst [vmem:[#allocation163_spill] sm:$0xff] %v16764_v62  ;;  %11956 = vmatpush3.bf16.msra.mxu1 %v20618_v33  ;;  %v16771_v10 = vpack.c.bf16 %v7758_v6, %v7751_v45  ;;  %v7764_v46 = vsub.f32 %v16737_v54, %v20621_v56  ;;  %v20623_v45 = vand.u32 4294901760, %v16739_v21 }
 0x49e   :  { %11958 = vmatprep.subr.bf16.mxu1 %v20619_v49  ;;  %v7652_v47 = vsub.f32 %v16756_v20, %v19449_v26  ;;  %v16779_v14 = vpack.c.bf16 %v7562_v4, %v7559_v41  ;;  %v16781_v58 = vsub.f32 %v7341_v53, %v7559_v41  ;;  %v16783_v33 = vsub.f32 %v7311_v23, %v7514_v19  ;;  %v20624_v53 = vld [vmem:[#allocation117_spill] sm:$0xff]  ;;  %v9297_v23 = vld [vmem:[%s18740_s3 + $0x40] sm:$0xff] }
 0x49f   :  { %20620 = vst [vmem:[#allocation107_spill] sm:$0xff] %v16771_v10  ;;  %v7309_v42 = vpop.permute.xlu0 %7308  ;;  %v7347_v49 = vpop.permute.xlu1 %7346  ;;  %v7765_v62 = vand.u32 4294901760, %v7764_v46  ;;  %v7771_v6 = vsub.f32 %v16739_v21, %v20623_v45  ;;  %v7785_v56 = vsub.f32 %v16758_v52, %v19452_v8  ;;  %v7660_v41 = vand.u32 4294901760, %v7659_v36  ;;  %v20625_v46 = vld [vmem:[#allocation169_spill] sm:$0xff] }
 0x4a0   :  { %20622 = vst [vmem:[#allocation111_spill] sm:$0xff] %v16779_v14  ;;  %v7653_v10 = vand.u32 4294901760, %v7652_v47  ;;  %v19458_v26 = vand.u32 4294901760, %v16783_v33  ;;  %v7511_v4 = vand.u32 4294901760, %v7309_v42  ;;  %v7568_v11 = vand.u32 4294901760, %v7347_v49  ;;  %12610 = vmatprep.subr.bf16.mxu0 %v16779_v14 }
 0x4a1   :  { %11960 = vmatpush3.bf16.msra.mxu1 %v20624_v53  ;;  %v19459_v45 = vand.u32 4294901760, %v16781_v58  ;;  %v7772_v0 = vand.u32 4294901760, %v7771_v6  ;;  %v16808_v18 = vand.u32 4294901760, %v9297_v23 }
 0x4a2   :  { %11962 = vmatprep.subr.bf16.mxu1 %v20625_v46  ;;  %v7673_v47 = vsub.f32 %v16783_v33, %v19458_v26  ;;  %v16802_v8 = vpack.c.bf16 %v7514_v19, %v7511_v4  ;;  %v16804_v59 = vsub.f32 %v7309_v42, %v7511_v4  ;;  %v16806_v53 = vsub.f32 %v7347_v49, %v7568_v11  ;;  %v20631_v49 = vld [vmem:[#allocation173_spill] sm:$0xff] }
 0x4a3   :  { %v7345_v14 = vpop.permute.xlu0 %7344  ;;  %v7315_v3 = vpop.permute.xlu1 %7314  ;;  %20627 = vst [vmem:[#allocation117_spill] sm:$0xff] %v16808_v18  ;;  %v16810_v36 = vpack.c.bf16 %v7772_v0, %v7765_v62  ;;  %v16812_v46 = vpack.c.bf16 %v7660_v41, %v7653_v10  ;;  %v7778_v6 = vsub.f32 %v16781_v58, %v19459_v45  ;;  %v7786_v0 = vand.u32 4294901760, %v7785_v56 }
 0x4a4   :  { %20626 = vst [vmem:[#allocation166_spill] sm:$0xff] %v16802_v8  ;;  %v19462_v26 = vand.u32 4294901760, %v16804_v59  ;;  %v7565_v19 = vand.u32 4294901760, %v7345_v14  ;;  %12612 = vmatpush3.bf16.msra.mxu0 %v16802_v8  ;;  %v7520_v42 = vand.u32 4294901760, %v7315_v3  ;;  %v19463_v4 = vand.u32 4294901760, %v16806_v53 }
 0x4a5   :  { %20628 = vst [vmem:[#allocation169_spill] sm:$0xff] %v16810_v36  ;;  %20629 = vst [vmem:[#allocation255_spill] sm:$0xff] %v16812_v46  ;;  %11964 = vmatpush3.bf16.msra.mxu1 %v20630_v35  ;;  %v7779_v62 = vand.u32 4294901760, %v7778_v6  ;;  %v16832_v8 = vsub.f32 %v9297_v23, %v16808_v18  ;;  %v7674_v6 = vand.u32 4294901760, %v7673_v47 }
 0x4a6   :  { %11966 = vmatprep.subr.bf16.mxu1 %v20631_v49  ;;  %v7666_v10 = vsub.f32 %v16804_v59, %v19462_v26  ;;  %v16825_v41 = vpack.c.bf16 %v7568_v11, %v7565_v19  ;;  %v16827_v45 = vsub.f32 %v7345_v14, %v7565_v19  ;;  %v16829_v46 = vsub.f32 %v7315_v3, %v7520_v42  ;;  %v20637_v14 = vld [vmem:[#allocation178_spill] sm:$0xff] }
 0x4a7   :  { %v7313_v35 = vpop.permute.xlu0 %7312  ;;  %v7351_v36 = vpop.permute.xlu1 %7350  ;;  %20634 = vst [vmem:[#allocation256_spill] sm:$0xff] %v16832_v8  ;;  %v16834_v49 = vpack.c.bf16 %v7786_v0, %v7779_v62  ;;  %v7799_v56 = vsub.f32 %v16806_v53, %v19463_v4 }
 0x4a8   :  { %20632 = vst [vmem:[#allocation125_spill] sm:$0xff] %v16825_v41  ;;  %20633 = vst [vmem:[#allocation173_spill] sm:$0xff] %v16829_v46  ;;  %v7667_v15 = vand.u32 4294901760, %v7666_v10  ;;  %v7517_v26 = vand.u32 4294901760, %v7313_v35  ;;  %v7574_v11 = vand.u32 4294901760, %v7351_v36  ;;  %12614 = vmatprep.subr.bf16.mxu0 %v16825_v41  ;;  %v19466_v3 = vand.u32 4294901760, %v16829_v46 }
 0x4a9   :  { %20635 = vst [vmem:[#allocation257_spill] sm:$0xff] %v16834_v49  ;;  %11968 = vmatpush3.bf16.msra.mxu1 %v20636_v31  ;;  %v19467_v23 = vand.u32 4294901760, %v16827_v45 }
 0x4aa   :  { %11970 = vmatprep.subr.bf16.mxu1 %v20637_v14  ;;  %v16844_v19 = vpack.c.bf16 %v7520_v42, %v7517_v26  ;;  %v16846_v62 = vsub.f32 %v7313_v35, %v7517_v26  ;;  %v16848_v0 = vsub.f32 %v7351_v36, %v7574_v11  ;;  %v16850_v47 = vpack.c.bf16 %v7674_v6, %v7667_v15  ;;  %v20641_v36 = vld [vmem:[#allocation146_spill] sm:$0xff]  ;;  %v20642_v15 = vld [vmem:[#allocation181_spill] sm:$0xff] }
 0x4ab   :  { %v7687_v31 = vsub.f32 %v16829_v46, %v19466_v3  ;;  %v7349_v10 = vpop.permute.xlu0 %7348  ;;  %v7319_v4 = vpop.permute.xlu1 %7318  ;;  %v7792_v14 = vsub.f32 %v16827_v45, %v19467_v23 }
 0x4ac   :  { %20638 = vst [vmem:[#allocation142_spill] sm:$0xff] %v16844_v19  ;;  %20639 = vst [vmem:[#allocation178_spill] sm:$0xff] %v16846_v62  ;;  %v19474_v42 = vand.u32 4294901760, %v16846_v62  ;;  %v7571_v26 = vand.u32 4294901760, %v7349_v10  ;;  %v7526_v35 = vand.u32 4294901760, %v7319_v4  ;;  %12616 = vmatpush3.bf16.msra.mxu0 %v16844_v19  ;;  %v20645_v19 = vand.u32 4294901760, %v16832_v8 }
 0x4ad   :  { %20640 = vst [vmem:[#allocation258_spill] sm:$0xff] %v16850_v47  ;;  %11972 = vmatpush3.bf16.msra.mxu1 %v20641_v36  ;;  %v7793_v3 = vand.u32 4294901760, %v7792_v14  ;;  %v7800_v47 = vand.u32 4294901760, %v7799_v56  ;;  %v20647_v56 = vand.u32 4294901760, %v16848_v0 }
 0x4ae   :  { %11974 = vmatprep.subr.bf16.mxu1 %v20642_v15  ;;  %v7680_v41 = vsub.f32 %v16846_v62, %v19474_v42  ;;  %v16867_v49 = vpack.c.bf16 %v7574_v11, %v7571_v26  ;;  %v16869_v23 = vsub.f32 %v7349_v10, %v7571_v26  ;;  %v16871_v18 = vsub.f32 %v7319_v4, %v7526_v35  ;;  %v20648_v26 = vld [vmem:[#allocation151_spill] sm:$0xff] }
 0x4af   :  { %v7317_v46 = vpop.permute.xlu0 %7316  ;;  %v16873_v36 = vpop.permute.xlu1 %7386  ;;  %v7585_v15 = vsub.f32 %v16832_v8, %v20645_v19  ;;  %v16878_v6 = vpack.c.bf16 %v7800_v47, %v7793_v3  ;;  %v7813_v14 = vsub.f32 %v16848_v0, %v20647_v56  ;;  %v7688_v62 = vand.u32 4294901760, %v7687_v31 }
 0x4b0   :  { %20643 = vst [vmem:[#allocation146_spill] sm:$0xff] %v16867_v49  ;;  %20644 = vst [vmem:[#allocation181_spill] sm:$0xff] %v16873_v36  ;;  %v7681_v42 = vand.u32 4294901760, %v7680_v41  ;;  %v19479_v11 = vand.u32 4294901760, %v16871_v18  ;;  %v7523_v10 = vand.u32 4294901760, %v7317_v46  ;;  %v19480_v4 = vand.u32 4294901760, %v16873_v36  ;;  %12618 = vmatprep.subr.bf16.mxu0 %v16867_v49 }
 0x4b1   :  { %20646 = vst [vmem:[#allocation259_spill] sm:$0xff] %v16878_v6  ;;  %11976 = vmatpush3.bf16.msra.mxu1 %v20648_v26  ;;  %v7586_v3 = vand.u32 4294901760, %v7585_v15  ;;  %v7814_v15 = vand.u32 4294901760, %v7813_v14 }
 0x4b2   :  { %11978 = vmatprep.subr.bf16.mxu1 %v20649_v2  ;;  %v7701_v19 = vsub.f32 %v16871_v18, %v19479_v11  ;;  %v16892_v47 = vpack.c.bf16 %v7526_v35, %v7523_v10  ;;  %v16894_v41 = vsub.f32 %v7317_v46, %v7523_v10  ;;  %v16899_v56 = vsub.f32 %v16873_v36, %v19480_v4  ;;  %v20656_v4 = vld [vmem:[#allocation116_spill] sm:$0xff] }
 0x4b3   :  { %v16901_v26 = vpop.permute.xlu0 %7384  ;;  %v16903_v31 = vpop.permute.xlu1 %7354  ;;  %v12653_v2 = vpack.c.bf16 %v16559_v60, %v16568_v16  ;;  %v16907_v49 = vpack.c.bf16 %v7688_v62, %v7681_v42  ;;  %v20655_v35 = vand.u32 4294901760, %v16869_v23 }
 0x4b4   :  { %20650 = vst [vmem:[#allocation151_spill] sm:$0xff] %v16892_v47  ;;  %20651 = vst [vmem:[#allocation186_spill] sm:$0xff] %v16899_v56  ;;  %v19483_v10 = vand.u32 4294901760, %v16894_v41  ;;  %12620 = vmatpush3.bf16.msra.mxu0 %v16892_v47  ;;  %v19486_v6 = vand.u32 4294901760, %v16903_v31  ;;  %v19488_v62 = vand.u32 4294901760, %v16899_v56 }
 0x4b5   :  { %20652 = vst [vmem:[#allocation260_spill] sm:$0xff] %v16901_v26  ;;  %20653 = vst [vmem:[#allocation261_spill] sm:$0xff] %v16903_v31  ;;  %v7806_v46 = vsub.f32 %v16869_v23, %v20655_v35  ;;  %11980 = vmatpush3.bf16.msra.mxu1 %v20656_v4  ;;  %12654 = vmatprep.subr.bf16.mxu0 %v12653_v2  ;;  %v12655_v35 = vpack.c.bf16 %v16571_v29, %v16597_v38  ;;  %v20657_v4 = vand.u32 4294901760, %v16901_v26 }
 0x4b6   :  { %20654 = vst [vmem:[#allocation262_spill] sm:$0xff] %v16907_v49  ;;  %11982 = vmatprep.subr.bf16.mxu1 %v20564_v50  ;;  %v7694_v11 = vsub.f32 %v16894_v41, %v19483_v10  ;;  %v12657_v50 = vpack.c.bf16 %v16599_v44, %v16629_v5  ;;  %v16934_v2 = vsub.f32 %v16903_v31, %v19486_v6  ;;  %v7702_v6 = vand.u32 4294901760, %v7701_v19  ;;  %v20663_v19 = vld [vmem:[#allocation183_spill] sm:$0xff] }
 0x4b7   :  { %v7807_v42 = vand.u32 4294901760, %v7806_v46  ;;  %v16927_v47 = vsub.f32 %v16901_v26, %v20657_v4  ;;  %v16936_v14 = vpop.permute.xlu0 %7352  ;;  %v16939_v46 = vpop.permute.xlu1 %7390  ;;  %7587 = vmatmul.mubr.f32.vlgmr.msra.gmra.mrb[64].mxu0 %v7586_v3  ;;  %v8577_v4 = vsub.f32 %v16899_v56, %v19488_v62 }
 0x4b8   :  { %20659 = vst [vmem:[#allocation263_spill] sm:$0xff] %v16934_v2  ;;  %4588 = vmatmul.mubr.f32.vlgmr.msra.gmra.mrb[8].mxu1 %v20499_v13  ;;  %v7695_v49 = vand.u32 4294901760, %v7694_v11  ;;  %v19490_v36 = vand.u32 4294901760, %v16936_v14  ;;  %v19489_v26 = vand.u32 4294901760, %v16939_v46  ;;  %12656 = vmatpush3.bf16.msra.mxu0 %v12655_v35  ;;  %v19491_v31 = vand.u32 4294901760, %v16934_v2 }
 0x4b9   :  { %20658 = vst [vmem:[#allocation116_spill] sm:$0xff] %v16927_v47  ;;  %v16941_v10 = vpack.c.bf16 %v7814_v15, %v7807_v42  ;;  %11984 = vmatpush3.bf16.msra.mxu1 %v20568_v28  ;;  %12658 = vmatprep.subr.bf16.mxu0 %v12657_v50  ;;  %v19492_v3 = vand.u32 4294901760, %v16927_v47  ;;  %v12659_v42 = vpack.c.bf16 %v16631_v17, %v16648_v12 }
 0x4ba   :  { %11986 = vmatprep.subr.bf16.mxu1 %v20575_v34  ;;  %v16957_v11 = vsub.f32 %v16936_v14, %v19490_v36  ;;  %v16962_v28 = vsub.f32 %v16939_v46, %v19489_v26  ;;  %4690 = vmatprep.mubr.f32.mxu1 %v20615_v1  ;;  %v8465_v34 = vsub.f32 %v16934_v2, %v19491_v31 }
 0x4bb   :  { %20660 = vst [vmem:[#allocation264_spill] sm:$0xff] %v16941_v10  ;;  %7954 = vmatprep.mubr.f32.mxu0 %v20663_v19  ;;  %v16969_v15 = vpop.permute.xlu0 %7388  ;;  %v16971_v35 = vpop.permute.xlu1 %7358  ;;  %v12661_v50 = vpack.c.bf16 %v16650_v40, %v16667_v37  ;;  %v16975_v62 = vpack.c.bf16 %v7702_v6, %v7695_v49  ;;  %v8570_v26 = vsub.f32 %v16927_v47, %v19492_v3  ;;  %v8578_v6 = vand.u32 4294901760, %v8577_v4 }
 0x4bc   :  { %20661 = vst [vmem:[#allocation265_spill] sm:$0xff] %v16957_v11  ;;  %20662 = vst [vmem:[#allocation266_spill] sm:$0xff] %v16962_v28  ;;  %v19493_v1 = vand.u32 4294901760, %v16957_v11  ;;  %v19494_v36 = vand.u32 4294901760, %v16969_v15  ;;  %12660 = vmatpush3.bf16.msra.mxu0 %v12659_v42  ;;  %v19501_v31 = vand.u32 4294901760, %v16962_v28  ;;  %v8466_v56 = vand.u32 4294901760, %v8465_v34 }
 0x4bd   :  { %20664 = vst [vmem:[#allocation267_spill] sm:$0xff] %v16975_v62  ;;  %11988 = vmatpush3.bf16.msra.mxu1 %v20580_v32  ;;  %12662 = vmatprep.subr.bf16.mxu0 %v12661_v50  ;;  %v8571_v49 = vand.u32 4294901760, %v8570_v26  ;;  %v12663_v62 = vpack.c.bf16 %v16669_v63, %v16683_v39  ;;  %v20666_v32 = vand.u32 4294901760, %v16971_v35  ;;  %v9296_v26 = vld [vmem:[%s18740_s3 + $0x38] sm:$0xff]  ;;  %v12665_v50 = vpack.c.bf16 %v16685_v9, %v16707_v51 }
 0x4be   :  { %11990 = vmatprep.subr.bf16.mxu1 %v20582_v27  ;;  %v8458_v3 = vsub.f32 %v16957_v11, %v19493_v1  ;;  %v16994_v19 = vsub.f32 %v16969_v15, %v19494_v36  ;;  %v8591_v36 = vsub.f32 %v16962_v28, %v19501_v31 }
 0x4bf   :  { %v16999_v27 = vsub.f32 %v16971_v35, %v20666_v32  ;;  %v17004_v4 = vpop.permute.xlu0 %7356  ;;  %v17006_v42 = vpop.permute.xlu1 %7394  ;;  %v17010_v1 = vpack.c.bf16 %v8578_v6, %v8571_v49  ;;  %v17020_v49 = vand.u32 4294901760, %v9296_v26 }
 0x4c0   :  { %20665 = vst [vmem:[#allocation268_spill] sm:$0xff] %v16994_v19  ;;  %20668 = vst [vmem:[#allocation270_spill] sm:$0xff] %v17006_v42  ;;  %v8459_v10 = vand.u32 4294901760, %v8458_v3  ;;  %v19503_v2 = vand.u32 4294901760, %v17004_v4  ;;  %v19506_v11 = vand.u32 4294901760, %v17006_v42  ;;  %12664 = vmatpush3.bf16.msra.mxu0 %v12663_v62  ;;  %v12667_v3 = vpack.c.bf16 %v16705_v30, %v16723_v25 }
 0x4c1   :  { %20667 = vst [vmem:[#allocation269_spill] sm:$0xff] %v16999_v27  ;;  %20669 = vst [vmem:[#allocation271_spill] sm:$0xff] %v17010_v1  ;;  %v19502_v32 = vand.u32 4294901760, %v16999_v27  ;;  %11992 = vmatpush3.bf16.msra.mxu1 %v20587_v61  ;;  %12666 = vmatprep.subr.bf16.mxu0 %v12665_v50  ;;  %v12669_v50 = vpack.c.bf16 %v16739_v21, %v16737_v54 }
 0x4c2   :  { %11994 = vmatprep.subr.bf16.mxu1 %v20588_v43  ;;  %v17031_v61 = vsub.f32 %v17004_v4, %v19503_v2  ;;  %v17036_v43 = vsub.f32 %v17006_v42, %v19506_v11  ;;  %v17044_v6 = vpack.c.bf16 %v8466_v56, %v8459_v10  ;;  %v8592_v10 = vand.u32 4294901760, %v8591_v36 }
 0x4c3   :  { %v8479_v31 = vsub.f32 %v16999_v27, %v19502_v32  ;;  %v17038_v62 = vpop.permute.xlu0 %7392  ;;  %v17040_v34 = vpop.permute.xlu1 %7362  ;;  %v20675_v32 = vand.u32 4294901760, %v16994_v19 }
 0x4c4   :  { %20670 = vst [vmem:[#allocation272_spill] sm:$0xff] %v17031_v61  ;;  %20671 = vst [vmem:[#allocation273_spill] sm:$0xff] %v17036_v43  ;;  %v19509_v2 = vand.u32 4294901760, %v17031_v61  ;;  %v19510_v27 = vand.u32 4294901760, %v17038_v62  ;;  %12668 = vmatpush3.bf16.msra.mxu0 %v12667_v3  ;;  %v19515_v11 = vand.u32 4294901760, %v17040_v34  ;;  %v19518_v28 = vand.u32 4294901760, %v17036_v43 }
 0x4c5   :  { %20672 = vst [vmem:[#allocation274_spill] sm:$0xff] %v17038_v62  ;;  %20673 = vst [vmem:[#allocation275_spill] sm:$0xff] %v17040_v34  ;;  %v8584_v1 = vsub.f32 %v16994_v19, %v20675_v32  ;;  %11996 = vmatpush3.bf16.msra.mxu1 %v20592_v24  ;;  %12670 = vmatprep.subr.bf16.mxu0 %v12669_v50  ;;  %v17066_v3 = vsub.f32 %v9296_v26, %v17020_v49  ;;  %v8480_v26 = vand.u32 4294901760, %v8479_v31 }
 0x4c6   :  { %20674 = vst [vmem:[#allocation276_spill] sm:$0xff] %v17044_v6  ;;  %11998 = vmatprep.subr.bf16.mxu1 %v20593_v48  ;;  %v12671_v6 = vpack.c.bf16 %v16741_v7, %v16756_v20  ;;  %v8472_v32 = vsub.f32 %v17031_v61, %v19509_v2  ;;  %v17063_v24 = vsub.f32 %v17038_v62, %v19510_v27  ;;  %v20696_v62 = vld [vmem:[#allocation180_spill] sm:$0xff] }
 0x4c7   :  { %v8585_v56 = vand.u32 4294901760, %v8584_v1  ;;  %20677 = vst [vmem:[#allocation278_spill] sm:$0xff] %v17066_v3  ;;  %v17071_v48 = vsub.f32 %v17040_v34, %v19515_v11  ;;  %v17073_v36 = vpop.permute.xlu0 %7360  ;;  %v17075_v1 = vpop.permute.xlu1 %7398  ;;  %v12673_v50 = vpack.c.bf16 %v16758_v52, %v16781_v58  ;;  %v8605_v27 = vsub.f32 %v17036_v43, %v19518_v28  ;;  %v20688_v43 = vld [vmem:[#allocation178_spill] sm:$0xff] }
 0x4c8   :  { %20676 = vst [vmem:[#allocation277_spill] sm:$0xff] %v17063_v24  ;;  %20679 = vst [vmem:[#allocation280_spill] sm:$0xff] %v17073_v36  ;;  %v8473_v61 = vand.u32 4294901760, %v8472_v32  ;;  %v19519_v19 = vand.u32 4294901760, %v17073_v36  ;;  %v19520_v11 = vand.u32 4294901760, %v17075_v1  ;;  %12672 = vmatpush3.bf16.msra.mxu0 %v12671_v6  ;;  %v12677_v28 = vpack.c.bf16 %v16806_v53, %v16827_v45 }
 0x4c9   :  { %20678 = vst [vmem:[#allocation279_spill] sm:$0xff] %v17071_v48  ;;  %20680 = vst [vmem:[#allocation281_spill] sm:$0xff] %v17075_v1  ;;  %v17079_v2 = vpack.c.bf16 %v8592_v10, %v8585_v56  ;;  %12000 = vmatpush3.bf16.msra.mxu1 %v20596_v55  ;;  %v19521_v47 = vand.u32 4294901760, %v17071_v48  ;;  %12674 = vmatprep.subr.bf16.mxu0 %v12673_v50  ;;  %v19528_v56 = vand.u32 4294901760, %v17063_v24 }
 0x4ca   :  { %12002 = vmatprep.subr.bf16.mxu1 %v20597_v22  ;;  %v12675_v10 = vpack.c.bf16 %v16783_v33, %v16804_v59  ;;  %v17095_v31 = vsub.f32 %v17073_v36, %v19519_v19  ;;  %v17100_v55 = vsub.f32 %v17075_v1, %v19520_v11  ;;  %v17102_v6 = vpack.c.bf16 %v8480_v26, %v8473_v61  ;;  %v20689_v1 = vld [vmem:[#allocation173_spill] sm:$0xff]  ;;  %v20695_v36 = vld [vmem:[#allocation164_spill] sm:$0xff] }
 0x4cb   :  { %20681 = vst [vmem:[#allocation282_spill] sm:$0xff] %v17079_v2  ;;  %v8493_v22 = vsub.f32 %v17071_v48, %v19521_v47  ;;  %v17107_v32 = vpop.permute.xlu0 %7396  ;;  %v8598_v11 = vsub.f32 %v17063_v24, %v19528_v56  ;;  %v20687_v47 = vld [vmem:[#allocation177_spill] sm:$0xff]  ;;  %v8606_v19 = vand.u32 4294901760, %v8605_v27  ;;  %v12679_v34 = vpack.c.bf16 %v20689_v1, %v20688_v43 }
 0x4cc   :  { %20682 = vst [vmem:[#allocation283_spill] sm:$0xff] %v17095_v31  ;;  %20683 = vst [vmem:[#allocation284_spill] sm:$0xff] %v17100_v55  ;;  %v17109_v50 = vpop.permute.xlu1 %7366  ;;  %v19529_v61 = vand.u32 4294901760, %v17095_v31  ;;  %v19530_v26 = vand.u32 4294901760, %v17107_v32  ;;  %12676 = vmatpush3.bf16.msra.mxu0 %v12675_v10  ;;  %v12681_v27 = vpack.c.bf16 %v16848_v0, %v16869_v23  ;;  %v20692_v10 = vand.u32 4294901760, %v17066_v3 }
 0x4cd   :  { %20684 = vst [vmem:[#allocation285_spill] sm:$0xff] %v17102_v6  ;;  %20685 = vst [vmem:[#allocation286_spill] sm:$0xff] %v17107_v32  ;;  %12004 = vmatpush3.bf16.msra.mxu1 %v20600_v57  ;;  %12678 = vmatprep.subr.bf16.mxu0 %v12677_v28  ;;  %v8599_v48 = vand.u32 4294901760, %v8598_v11  ;;  %v20690_v57 = vand.u32 4294901760, %v17109_v50  ;;  %v8494_v42 = vand.u32 4294901760, %v8493_v22  ;;  %v20697_v22 = vand.u32 4294901760, %v16568_v16 }
 0x4ce   :  { %20686 = vst [vmem:[#allocation287_spill] sm:$0xff] %v17109_v50  ;;  %12006 = vmatprep.subr.bf16.mxu1 %v20687_v47  ;;  %v8486_v56 = vsub.f32 %v17095_v31, %v19529_v61  ;;  %v17131_v6 = vsub.f32 %v17107_v32, %v19530_v26  ;;  %v4796_v61 = vsub.f32 %v17066_v3, %v20692_v10  ;;  %v20694_v26 = vand.u32 4294901760, %v17100_v55  ;;  %v20701_v16 = vld [vmem:[#allocation224_spill] sm:$0xff] }
 0x4cf   :  { %v17136_v47 = vsub.f32 %v17109_v50, %v20690_v57  ;;  %v17138_v28 = vpop.permute.xlu0 %7364  ;;  %v17147_v2 = vpack.c.bf16 %v8606_v19, %v8599_v48  ;;  %v12683_v48 = vpack.c.bf16 %v16871_v18, %v16894_v41 }
 0x4d0   :  { %v17140_v11 = vpop.permute.xlu1 %7402  ;;  %v8619_v31 = vsub.f32 %v17100_v55, %v20694_v26  ;;  %v8487_v24 = vand.u32 4294901760, %v8486_v56  ;;  %v19541_v50 = vand.u32 4294901760, %v17138_v28  ;;  %12680 = vmatpush3.bf16.msra.mxu0 %v12679_v34  ;;  %v19549_v19 = vand.u32 4294901760, %v17131_v6 }
 0x4d1   :  { %20691 = vst [vmem:[#allocation177_spill] sm:$0xff] %v17136_v47  ;;  %20693 = vst [vmem:[#allocation178_spill] sm:$0xff] %v17147_v2  ;;  %v19540_v57 = vand.u32 4294901760, %v17136_v47  ;;  %v19542_v32 = vand.u32 4294901760, %v17140_v11  ;;  %12008 = vmatpush3.bf16.msra.mxu1 %v20695_v36  ;;  %12682 = vmatprep.subr.bf16.mxu0 %v12681_v27  ;;  %v20698_v27 = vand.u32 4294901760, %v16559_v60  ;;  %v4797_v55 = vand.u32 4294901760, %v4796_v61 }
 0x4d2   :  { %12010 = vmatprep.subr.bf16.mxu1 %v20696_v62  ;;  %v17166_v26 = vsub.f32 %v17138_v28, %v19541_v50  ;;  %v8612_v50 = vsub.f32 %v17131_v6, %v19549_v19  ;;  %v20702_v61 = vand.u32 4294901760, %v16597_v38  ;;  %v20705_v19 = vand.u32 4294901760, %v16599_v44 }
 0x4d3   :  { %v8507_v56 = vsub.f32 %v17136_v47, %v19540_v57  ;;  %v17171_v34 = vsub.f32 %v17140_v11, %v19542_v32  ;;  %v17173_v62 = vpop.permute.xlu0 %7400  ;;  %v12717_v10 = vpack.c.bf16 %v20698_v27, %v20697_v22  ;;  %v17181_v57 = vpack.c.bf16 %v8494_v42, %v8487_v24  ;;  %v20700_v47 = vld [vmem:[#allocation185_spill] sm:$0xff] }
 0x4d4   :  { %v17175_v36 = vpop.permute.xlu1 %7370  ;;  %v19550_v2 = vand.u32 4294901760, %v17166_v26  ;;  %v19551_v32 = vand.u32 4294901760, %v17173_v62  ;;  %12684 = vmatpush3.bf16.msra.mxu0 %v12683_v48  ;;  %v8613_v42 = vand.u32 4294901760, %v8612_v50  ;;  %v8620_v24 = vand.u32 4294901760, %v8619_v31 }
 0x4d5   :  { %20699 = vst [vmem:[#allocation173_spill] sm:$0xff] %v17181_v57  ;;  %12012 = vmatpush3.bf16.msra.mxu1 %v20700_v47  ;;  %v19553_v3 = vand.u32 4294901760, %v17175_v36  ;;  %12718 = vmatprep.subr.bf16.mxu0 %v12717_v10  ;;  %v19552_v60 = vand.u32 4294901760, %v17171_v34  ;;  %v20703_v47 = vand.u32 4294901760, %v16571_v29  ;;  %v20704_v10 = vand.u32 4294901760, %v16629_v5 }
 0x4d6   :  { %12014 = vmatprep.subr.bf16.mxu1 %v20701_v16  ;;  %v8500_v22 = vsub.f32 %v17166_v26, %v19550_v2  ;;  %v17198_v27 = vsub.f32 %v17173_v62, %v19551_v32  ;;  %v17219_v29 = vpack.c.bf16 %v8620_v24, %v8613_v42  ;;  %v20736_v16 = vld [vmem:[#allocation234_spill] sm:$0xff] }
 0x4d7   :  { %v12719_v48 = vpack.c.bf16 %v20703_v47, %v20702_v61  ;;  %v12721_v50 = vpack.c.bf16 %v20705_v19, %v20704_v10  ;;  %v17211_v31 = vsub.f32 %v17175_v36, %v19553_v3  ;;  %v17213_v2 = vpop.permute.xlu0 %7368  ;;  %7957 = vmatmul.mubr.f32.vlgmr.msra.gmra.mrb[66].mxu0 %v16832_v8  ;;  %v8633_v38 = vsub.f32 %v17171_v34, %v19552_v60  ;;  %v20707_v61 = vld [vmem:[#allocation187_spill] sm:$0xff]  ;;  %v20708_v10 = vld [vmem:[#allocation84_spill] sm:$0xff]  ;;  %v20711_v3 = vld [vmem:[#allocation182_spill] sm:$0xff] }
 0x4d8   :  { %4692 = vmatmul.mubr.f32.vlgmr.msra.gmra.mrb[10].mxu1 %v20499_v13  ;;  %v17216_v32 = vpop.permute.xlu1 %7406  ;;  %20706 = vst [vmem:[#allocation164_spill] sm:$0xff] %v17219_v29  ;;  %v8501_v44 = vand.u32 4294901760, %v8500_v22  ;;  %v19554_v5 = vand.u32 4294901760, %v17213_v2  ;;  %v8508_v47 = vand.u32 4294901760, %v8507_v56  ;;  %v20710_v56 = vand.u32 4294901760, %v16631_v17  ;;  %8231 = vmatprep.mubr.f32.mxu0 %v20711_v3  ;;  %v20716_v8 = vld [vmem:[#allocation191_spill] sm:$0xff] }
 0x4d9   :  { %v19555_v19 = vand.u32 4294901760, %v17216_v32  ;;  %12016 = vmatpush3.bf16.msra.mxu1 %v20707_v61  ;;  %12720 = vmatpush3.bf16.msra.mxu0 %v12719_v48  ;;  %v19556_v13 = vand.u32 4294901760, %v17211_v31  ;;  %v20709_v48 = vand.u32 4294901760, %v16648_v12  ;;  %v20712_v29 = vand.u32 4294901760, %v16667_v37  ;;  %v20717_v3 = vld [vmem:[#allocation94_spill] sm:$0xff] }
 0x4da   :  { %12018 = vmatprep.subr.bf16.mxu1 %v20708_v10  ;;  %12722 = vmatprep.subr.bf16.mxu0 %v12721_v50  ;;  %v17233_v24 = vsub.f32 %v17213_v2, %v19554_v5  ;;  %v17256_v12 = vpack.c.bf16 %v8508_v47, %v8501_v44  ;;  %v20715_v17 = vand.u32 4294901760, %v17198_v27  ;;  %v20720_v47 = vand.u32 4294901760, %v16669_v63  ;;  %v20725_v10 = vld [vmem:[#allocation194_spill] sm:$0xff] }
 0x4db   :  { %v17238_v22 = vsub.f32 %v17216_v32, %v19555_v19  ;;  %v12723_v60 = vpack.c.bf16 %v20710_v56, %v20709_v48  ;;  %4798 = vmatprep.mubr.f32.mxu1 %v4797_v55  ;;  %v8521_v50 = vsub.f32 %v17211_v31, %v19556_v13  ;;  %v17248_v42 = vpop.permute.xlu0 %7404  ;;  %v20713_v19 = vand.u32 4294901760, %v16650_v40  ;;  %v20726_v61 = vld [vmem:[#allocation230_spill] sm:$0xff] }
 0x4dc   :  { %v17250_v5 = vpop.permute.xlu1 %7374  ;;  %20714 = vst [vmem:[#allocation180_spill] sm:$0xff] %v17256_v12  ;;  %v8626_v55 = vsub.f32 %v17198_v27, %v20715_v17  ;;  %v19558_v48 = vand.u32 4294901760, %v17233_v24  ;;  %v19559_v56 = vand.u32 4294901760, %v17248_v42  ;;  %v20722_v37 = vand.u32 4294901760, %v16685_v9 }
 0x4dd   :  { %v12725_v57 = vpack.c.bf16 %v20713_v19, %v20712_v29  ;;  %v19560_v13 = vand.u32 4294901760, %v17250_v5  ;;  %12020 = vmatpush3.bf16.msra.mxu1 %v20716_v8  ;;  %12724 = vmatpush3.bf16.msra.mxu0 %v12723_v60  ;;  %v8634_v29 = vand.u32 4294901760, %v8633_v38  ;;  %v9295_v38 = vld [vmem:[%s18740_s3 + $0x30] sm:$0xff] }
 0x4de   :  { %12022 = vmatprep.subr.bf16.mxu1 %v20717_v3  ;;  %v8627_v40 = vand.u32 4294901760, %v8626_v55  ;;  %v8514_v44 = vsub.f32 %v17233_v24, %v19558_v48  ;;  %v17273_v19 = vsub.f32 %v17248_v42, %v19559_v56  ;;  %v20721_v56 = vand.u32 4294901760, %v16707_v51 }
 0x4df   :  { %12726 = vmatprep.subr.bf16.mxu0 %v12725_v57  ;;  %v17278_v60 = vsub.f32 %v17250_v5, %v19560_v13  ;;  %v20719_v57 = vand.u32 4294901760, %v16683_v39  ;;  %v17287_v55 = vpop.permute.xlu0 %7372  ;;  %v20724_v39 = vand.u32 4294901760, %v17238_v22  ;;  %v8522_v51 = vand.u32 4294901760, %v8521_v50 }
 0x4e0   :  { %v17289_v48 = vpop.permute.xlu1 %7410  ;;  %v12729_v12 = vpack.c.bf16 %v20722_v37, %v20721_v56  ;;  %v17295_v13 = vpack.c.bf16 %v8634_v29, %v8627_v40  ;;  %v19562_v3 = vand.u32 4294901760, %v17287_v55  ;;  %v17305_v9 = vand.u32 4294901760, %v9295_v38  ;;  %v9300_v56 = vld [vmem:[%s18740_s3 + $0x58] sm:$0xff] }
 0x4e1   :  { %20718 = vst [vmem:[#allocation185_spill] sm:$0xff] %v17278_v60  ;;  %v12727_v17 = vpack.c.bf16 %v20720_v47, %v20719_v57  ;;  %v8647_v63 = vsub.f32 %v17238_v22, %v20724_v39  ;;  %v8515_v57 = vand.u32 4294901760, %v8514_v44  ;;  %v19561_v47 = vand.u32 4294901760, %v17278_v60  ;;  %12024 = vmatpush3.bf16.msra.mxu1 %v20725_v10 }
 0x4e2   :  { %20723 = vst [vmem:[#allocation288_spill] sm:$0xff] %v17295_v13  ;;  %v19563_v8 = vand.u32 4294901760, %v17289_v48  ;;  %12026 = vmatprep.subr.bf16.mxu1 %v20726_v61  ;;  %v17317_v29 = vsub.f32 %v17287_v55, %v19562_v3  ;;  %v20729_v44 = vand.u32 4294901760, %v16705_v30  ;;  %v20731_v13 = vand.u32 4294901760, %v16739_v21 }
 0x4e3   :  { %12728 = vmatpush3.bf16.msra.mxu0 %v12727_v17  ;;  %v8535_v40 = vsub.f32 %v17278_v60, %v19561_v47  ;;  %v17328_v39 = vpop.permute.xlu0 %7408  ;;  %v20730_v47 = vand.u32 4294901760, %v16737_v54  ;;  %v17336_v61 = vpack.c.bf16 %v8522_v51, %v8515_v57  ;;  %v20733_v10 = vand.u32 4294901760, %v17273_v19  ;;  %v20744_v60 = vld [vmem:[#allocation207_spill] sm:$0xff] }
 0x4e4   :  { %12730 = vmatprep.subr.bf16.mxu0 %v12729_v12  ;;  %20727 = vst [vmem:[#allocation289_spill] sm:$0xff] %v17317_v29  ;;  %v17322_v50 = vsub.f32 %v17289_v48, %v19563_v8  ;;  %v20728_v12 = vand.u32 4294901760, %v16723_v25  ;;  %v17330_v37 = vpop.permute.xlu1 %7378  ;;  %v19564_v25 = vand.u32 4294901760, %v17317_v29  ;;  %v19565_v30 = vand.u32 4294901760, %v17328_v39 }
 0x4e5   :  { %v12733_v3 = vpack.c.bf16 %v20731_v13, %v20730_v47  ;;  %20732 = vst [vmem:[#allocation290_spill] sm:$0xff] %v17336_v61  ;;  %v8640_v8 = vsub.f32 %v17273_v19, %v20733_v10  ;;  %v8648_v57 = vand.u32 4294901760, %v8647_v63  ;;  %v20737_v51 = vand.u32 4294901760, %v16756_v20 }
 0x4e6   :  { %v12731_v17 = vpack.c.bf16 %v20729_v44, %v20728_v12  ;;  %v20734_v12 = vld [vmem:[#allocation199_spill] sm:$0xff]  ;;  %v17344_v44 = vand.u32 4294901760, %v9300_v56  ;;  %v8528_v10 = vsub.f32 %v17317_v29, %v19564_v25  ;;  %v17355_v47 = vsub.f32 %v17328_v39, %v19565_v30 }
 0x4e7   :  { %12028 = vmatpush3.bf16.msra.mxu1 %v20734_v12  ;;  %v8641_v13 = vand.u32 4294901760, %v8640_v8  ;;  %v20739_v8 = vand.u32 4294901760, %v17330_v37  ;;  %v17369_v21 = vpop.permute.xlu0 %7376  ;;  %v20740_v30 = vand.u32 4294901760, %v16781_v58  ;;  %v20741_v61 = vand.u32 4294901760, %v16758_v52  ;;  %v20745_v29 = vld [vmem:[#allocation239_spill] sm:$0xff] }
 0x4e8   :  { %12732 = vmatpush3.bf16.msra.mxu0 %v12731_v17  ;;  %20735 = vst [vmem:[#allocation291_spill] sm:$0xff] %v17344_v44  ;;  %12030 = vmatprep.subr.bf16.mxu1 %v20736_v16  ;;  %v20738_v17 = vand.u32 4294901760, %v16741_v7  ;;  %v17371_v25 = vpop.permute.xlu1 %7414  ;;  %v20743_v7 = vand.u32 4294901760, %v17322_v50  ;;  %v17388_v52 = vsub.f32 %v9300_v56, %v17344_v44  ;;  %v20774_v44 = vld [vmem:[#allocation246_spill] sm:$0xff] }
 0x4e9   :  { %12734 = vmatprep.subr.bf16.mxu0 %v12733_v3  ;;  %v17362_v3 = vsub.f32 %v9295_v38, %v17305_v9  ;;  %v17367_v63 = vsub.f32 %v17330_v37, %v20739_v8  ;;  %v12737_v20 = vpack.c.bf16 %v20741_v61, %v20740_v30  ;;  %v17377_v16 = vpack.c.bf16 %v8648_v57, %v8641_v13 }
 0x4ea   :  { %v12735_v54 = vpack.c.bf16 %v20738_v17, %v20737_v51  ;;  %v8661_v38 = vsub.f32 %v17322_v50, %v20743_v7  ;;  %v8536_v51 = vand.u32 4294901760, %v8535_v40  ;;  %v8529_v17 = vand.u32 4294901760, %v8528_v10  ;;  %20746 = vst [vmem:[#allocation293_spill] sm:$0xff] %v17388_v52 }
 0x4eb   :  { %20742 = vst [vmem:[#allocation292_spill] sm:$0xff] %v17377_v16  ;;  %v19570_v8 = vand.u32 4294901760, %v17369_v21  ;;  %v19571_v12 = vand.u32 4294901760, %v17371_v25  ;;  %12032 = vmatpush3.bf16.msra.mxu1 %v20744_v60  ;;  %v19572_v58 = vand.u32 4294901760, %v17367_v63  ;;  %v20748_v13 = vand.u32 4294901760, %v16783_v33 }
 0x4ec   :  { %12736 = vmatpush3.bf16.msra.mxu0 %v12735_v54  ;;  %12034 = vmatprep.subr.bf16.mxu1 %v20745_v29  ;;  %v20747_v54 = vand.u32 4294901760, %v16804_v59  ;;  %v17405_v10 = vpack.c.bf16 %v8536_v51, %v8529_v17  ;;  %v17412_v7 = vpop.permute.xlu1 %7382  ;;  %v20752_v33 = vand.u32 4294901760, %v17355_v47 }
 0x4ed   :  { %12738 = vmatprep.subr.bf16.mxu0 %v12737_v20  ;;  %v17394_v40 = vsub.f32 %v17369_v21, %v19570_v8  ;;  %v17399_v30 = vsub.f32 %v17371_v25, %v19571_v12  ;;  %v8549_v56 = vsub.f32 %v17367_v63, %v19572_v58  ;;  %v17410_v20 = vpop.permute.xlu0 %7412  ;;  %v20750_v8 = vand.u32 4294901760, %v16827_v45  ;;  %v20753_v58 = vld [vmem:[#allocation211_spill] sm:$0xff] }
 0x4ee   :  { %v12739_v57 = vpack.c.bf16 %v20748_v13, %v20747_v54  ;;  %20749 = vst [vmem:[#allocation294_spill] sm:$0xff] %v17405_v10  ;;  %v20751_v12 = vand.u32 4294901760, %v16806_v53  ;;  %v8654_v51 = vsub.f32 %v17355_v47, %v20752_v33  ;;  %v19574_v54 = vand.u32 4294901760, %v17410_v20  ;;  %v20754_v10 = vld [vmem:[#allocation136_spill] sm:$0xff] }
 0x4ef   :  { %v19573_v17 = vand.u32 4294901760, %v17394_v40  ;;  %v19575_v13 = vand.u32 4294901760, %v17412_v7  ;;  %12036 = vmatpush3.bf16.msra.mxu1 %v20753_v58  ;;  %v20756_v45 = vand.u32 4294901760, %v20689_v1  ;;  %v20757_v53 = vand.u32 4294901760, %v16869_v23  ;;  %v20762_v23 = vld [vmem:[#allocation217_spill] sm:$0xff] }
 0x4f0   :  { %v12741_v61 = vpack.c.bf16 %v20751_v12, %v20750_v8  ;;  %12740 = vmatpush3.bf16.msra.mxu0 %v12739_v57  ;;  %12038 = vmatprep.subr.bf16.mxu1 %v20754_v10  ;;  %v8655_v12 = vand.u32 4294901760, %v8654_v51  ;;  %v8662_v8 = vand.u32 4294901760, %v8661_v38  ;;  %v17435_v59 = vsub.f32 %v17410_v20, %v19574_v54 }
 0x4f1   :  { %v8542_v33 = vsub.f32 %v17394_v40, %v19573_v17  ;;  %v17440_v57 = vsub.f32 %v17412_v7, %v19575_v13  ;;  %v17446_v38 = vpop.permute.xlu0 %7380  ;;  %v20758_v17 = vand.u32 4294901760, %v16848_v0  ;;  %v20759_v54 = vand.u32 4294901760, %v17362_v3  ;;  %v20763_v0 = vld [vmem:[#allocation175_spill] sm:$0xff] }
 0x4f2   :  { %12742 = vmatprep.subr.bf16.mxu0 %v12741_v61  ;;  %v20755_v61 = vand.u32 4294901760, %v20688_v43  ;;  %v17455_v58 = vpack.c.bf16 %v8662_v8, %v8655_v12  ;;  %v20761_v13 = vand.u32 4294901760, %v17399_v30  ;;  %v8550_v29 = vand.u32 4294901760, %v8549_v56 }
 0x4f3   :  { %v12745_v16 = vpack.c.bf16 %v20758_v17, %v20757_v53  ;;  %v4802_v10 = vsub.f32 %v17362_v3, %v20759_v54  ;;  %v8543_v1 = vand.u32 4294901760, %v8542_v33  ;;  %12040 = vmatpush3.bf16.msra.mxu1 %v20762_v23  ;;  %v20764_v17 = vand.u32 4294901760, %v17388_v52 }
 0x4f4   :  { %v12743_v51 = vpack.c.bf16 %v20756_v45, %v20755_v61  ;;  %20760 = vst [vmem:[#allocation295_spill] sm:$0xff] %v17455_v58  ;;  %v8675_v43 = vsub.f32 %v17399_v30, %v20761_v13  ;;  %v19576_v45 = vand.u32 4294901760, %v17440_v57  ;;  %v19577_v61 = vand.u32 4294901760, %v17446_v38  ;;  %12042 = vmatprep.subr.bf16.mxu1 %v20763_v0  ;;  %v20770_v58 = vld [vmem:[#allocation181_spill] sm:$0xff] }
 0x4f5   :  { %v8441_v54 = vsub.f32 %v17388_v52, %v20764_v17  ;;  %v20765_v12 = vand.u32 4294901760, %v16894_v41  ;;  %v20766_v8 = vand.u32 4294901760, %v16871_v18  ;;  %v17480_v33 = vpack.c.bf16 %v8550_v29, %v8543_v1  ;;  %v20775_v18 = vld [vmem:[#allocation106_spill] sm:$0xff]  ;;  %v20777_v1 = vld [vmem:[#allocation261_spill] sm:$0xff] }
 0x4f6   :  { %12744 = vmatpush3.bf16.msra.mxu0 %v12743_v51  ;;  %v8563_v56 = vsub.f32 %v17440_v57, %v19576_v45  ;;  %v17474_v13 = vsub.f32 %v17446_v38, %v19577_v61  ;;  %v20768_v51 = vld [vmem:[#allocation260_spill] sm:$0xff]  ;;  %v20771_v53 = vand.u32 4294901760, %v20770_v58  ;;  %v4803_v23 = vand.u32 4294901760, %v4802_v10 }
 0x4f7   :  { %12746 = vmatprep.subr.bf16.mxu0 %v12745_v16  ;;  %v12747_v16 = vpack.c.bf16 %v20766_v8, %v20765_v12  ;;  %20767 = vst [vmem:[#allocation296_spill] sm:$0xff] %v17480_v33  ;;  %v20769_v17 = vand.u32 4294901760, %v20768_v51  ;;  %v20773_v45 = vand.u32 4294901760, %v17435_v59  ;;  %12044 = vmatpush3.bf16.msra.mxu1 %v20774_v44  ;;  %v8676_v29 = vand.u32 4294901760, %v8675_v43 }
 0x4f8   :  { %v19581_v61 = vand.u32 4294901760, %v17474_v13  ;;  %12046 = vmatprep.subr.bf16.mxu1 %v20775_v18  ;;  %v20776_v58 = vand.u32 4294901760, %v16936_v14  ;;  %v8442_v12 = vand.u32 4294901760, %v8441_v54  ;;  %v20780_v8 = vand.u32 4294901760, %v16969_v15  ;;  %v20785_v18 = vld [vmem:[#allocation197_spill] sm:$0xff] }
 0x4f9   :  { %v17486_v0 = vpack.c.bf16 %v20771_v53, %v20769_v17  ;;  %v8668_v60 = vsub.f32 %v17435_v59, %v20773_v45  ;;  %v20778_v53 = vand.u32 4294901760, %v20777_v1  ;;  %v8564_v14 = vand.u32 4294901760, %v8563_v56  ;;  %v20791_v56 = vld [vmem:[#allocation274_spill] sm:$0xff] }
 0x4fa   :  { %12748 = vmatpush3.bf16.msra.mxu0 %v12747_v16  ;;  %v8556_v45 = vsub.f32 %v17474_v13, %v19581_v61  ;;  %v20781_v16 = vand.u32 4294901760, %v16939_v46  ;;  %4804 = vmatmul.mubr.f32.vlgmr.msra.gmra.mrb[12].mxu1 %v4803_v23  ;;  %v20787_v15 = vand.u32 4294901760, %v17004_v4  ;;  %v20788_v46 = vand.u32 4294901760, %v16971_v35  ;;  %v20797_v4 = vld [vmem:[#allocation237_spill] sm:$0xff]  ;;  %v20798_v35 = vld [vmem:[#allocation280_spill] sm:$0xff] }
 0x4fb   :  { %20772 = vst [vmem:[#allocation260_spill] sm:$0xff] %v17486_v0  ;;  %12782 = vmatprep.subr.bf16.mxu0 %v17486_v0  ;;  %v8669_v41 = vand.u32 4294901760, %v8668_v60  ;;  %v17499_v10 = vpack.c.bf16 %v20778_v53, %v20776_v58  ;;  %v20783_v60 = vld [vmem:[#allocation117_spill] sm:$0xff]  ;;  %12048 = vmatpush3.bf16.msra.mxu1 %v20785_v18  ;;  %v20786_v58 = vld [vmem:[#allocation112_spill] sm:$0xff] }
 0x4fc   :  { %v17508_v51 = vpack.c.bf16 %v20781_v16, %v20780_v8  ;;  %v8557_v17 = vand.u32 4294901760, %v8556_v45  ;;  %12050 = vmatprep.subr.bf16.mxu1 %v20786_v58  ;;  %v17521_v54 = vpack.c.bf16 %v20788_v46, %v20787_v15  ;;  %5034 = vmatprep.mubr.f32.mxu1 %v17020_v49  ;;  %v20796_v45 = vld [vmem:[#allocation202_spill] sm:$0xff]  ;;  %v20799_v8 = vand.u32 4294901760, %v20798_v35  ;;  %v20800_v16 = vld [vmem:[#allocation275_spill] sm:$0xff]  ;;  %v20805_v58 = vld [vmem:[#allocation281_spill] sm:$0xff] }
 0x4fd   :  { %20779 = vst [vmem:[#allocation181_spill] sm:$0xff] %v17499_v10  ;;  %8233 = vmatmul.mubr.f32.vlgmr.msra.gmra.mrb[68].mxu0 %v20783_v60  ;;  %v17511_v43 = vpack.c.bf16 %v8676_v29, %v8669_v41  ;;  %v20792_v41 = vand.u32 4294901760, %v20791_v56  ;;  %v20793_v29 = vld [vmem:[#allocation270_spill] sm:$0xff]  ;;  %v20806_v15 = vand.u32 4294901760, %v20805_v58  ;;  %v20808_v56 = vld [vmem:[#allocation205_spill] sm:$0xff]  ;;  %v20819_v58 = vld [vmem:[#allocation144_spill] sm:$0xff] }
 0x4fe   :  { %20782 = vst [vmem:[#allocation246_spill] sm:$0xff] %v17508_v51  ;;  %12784 = vmatpush3.bf16.msra.mxu0 %v17499_v10  ;;  %20789 = vst [vmem:[#allocation261_spill] sm:$0xff] %v17521_v54  ;;  %8443 = vmatprep.mubr.f32.mxu0 %v8442_v12  ;;  %v17524_v23 = vpack.c.bf16 %v8564_v14, %v8557_v17  ;;  %v20794_v1 = vand.u32 4294901760, %v20793_v29  ;;  %v20801_v12 = vand.u32 4294901760, %v20800_v16  ;;  %v20803_v17 = vld [vmem:[#allocation286_spill] sm:$0xff]  ;;  %v20809_v29 = vld [vmem:[#allocation171_spill] sm:$0xff] }
 0x4ff   :  { %20784 = vst [vmem:[#allocation106_spill] sm:$0xff] %v17511_v43  ;;  %12786 = vmatprep.subr.bf16.mxu0 %v17508_v51  ;;  %12052 = vmatpush3.bf16.msra.mxu1 %v20796_v45  ;;  %v20804_v18 = vand.u32 4294901760, %v20803_v17  ;;  %v20811_v45 = vld [vmem:[#allocation287_spill] sm:$0xff]  ;;  %v20815_v16 = vand.u32 4294901760, %v17140_v11  ;;  %v20823_v11 = vand.u32 4294901760, %v17248_v42  ;;  %v20868_v61 = vld [vmem:[#allocation273_spill] sm:$0xff] }
 0x500   :  { %20790 = vst [vmem:[#allocation197_spill] sm:$0xff] %v17524_v23  ;;  %v17530_v53 = vpack.c.bf16 %v20794_v1, %v20792_v41  ;;  %12054 = vmatprep.subr.bf16.mxu1 %v20797_v4  ;;  %v17540_v14 = vpack.c.bf16 %v20801_v12, %v20799_v8  ;;  %v9299_v41 = vld [vmem:[%s18740_s3 + $0x50] sm:$0xff]  ;;  %v20810_v1 = vand.u32 4294901760, %v17138_v28  ;;  %v20812_v4 = vand.u32 4294901760, %v20811_v45  ;;  %v21083_v51 = vld [vmem:[#allocation134_spill] sm:$0xff] }
 0x501   :  { %v17546_v46 = vpack.c.bf16 %v20806_v15, %v20804_v18  ;;  %v20814_v8 = vand.u32 4294901760, %v17173_v62  ;;  %v17567_v17 = vand.u32 4294901760, %v9299_v41  ;;  %v20818_v18 = vld [vmem:[#allocation214_spill] sm:$0xff]  ;;  %v20820_v28 = vand.u32 4294901760, %v17213_v2  ;;  %v20827_v45 = vld [vmem:[#allocation220_spill] sm:$0xff] }
 0x502   :  { %20795 = vst [vmem:[#allocation112_spill] sm:$0xff] %v17530_v53  ;;  %12788 = vmatpush3.bf16.msra.mxu0 %v17521_v54  ;;  %20802 = vst [vmem:[#allocation274_spill] sm:$0xff] %v17540_v14  ;;  %v17559_v35 = vpack.c.bf16 %v20812_v4, %v20810_v1  ;;  %v20821_v15 = vand.u32 4294901760, %v17175_v36  ;;  %v20824_v62 = vand.u32 4294901760, %v17216_v32  ;;  %v20828_v4 = vld [vmem:[#allocation245_spill] sm:$0xff]  ;;  %v20829_v2 = vand.u32 4294901760, %v17287_v55 }
 0x503   :  { %12790 = vmatprep.subr.bf16.mxu0 %v17530_v53  ;;  %20807 = vst [vmem:[#allocation270_spill] sm:$0xff] %v17546_v46  ;;  %12056 = vmatpush3.bf16.msra.mxu1 %v20808_v56  ;;  %v17565_v12 = vpack.c.bf16 %v20815_v16, %v20814_v8  ;;  %20817 = vst [vmem:[#allocation280_spill] sm:$0xff] %v17567_v17  ;;  %v17586_v1 = vsub.f32 %v9299_v41, %v17567_v17  ;;  %v20830_v36 = vand.u32 4294901760, %v17250_v5  ;;  %v20836_v55 = vld [vmem:[#allocation248_spill] sm:$0xff]  ;;  %v21087_v23 = vld [vmem:[#allocation42_spill] sm:$0xff] }
 0x504   :  { %12058 = vmatprep.subr.bf16.mxu1 %v20809_v29  ;;  %20813 = vst [vmem:[#allocation202_spill] sm:$0xff] %v17559_v35  ;;  %v17577_v56 = vpack.c.bf16 %v20821_v15, %v20820_v28  ;;  %v17583_v29 = vpack.c.bf16 %v20824_v62, %v20823_v11  ;;  %v20832_v8 = vand.u32 4294901760, %v17328_v39  ;;  %v20833_v41 = vand.u32 4294901760, %v17289_v48  ;;  %v20835_v15 = vld [vmem:[#allocation222_spill] sm:$0xff]  ;;  %v20900_v53 = vld [vmem:[#allocation212_spill] sm:$0xff] }
 0x505   :  { %20816 = vst [vmem:[#allocation237_spill] sm:$0xff] %v17565_v12  ;;  %20826 = vst [vmem:[#allocation281_spill] sm:$0xff] %v17586_v1  ;;  %v17596_v42 = vpack.c.bf16 %v20830_v36, %v20829_v2  ;;  %v20837_v5 = vand.u32 4294901760, %v17369_v21  ;;  %v20838_v39 = vand.u32 4294901760, %v17330_v37  ;;  %v20840_v11 = vand.u32 4294901760, %v17410_v20  ;;  %v20843_v2 = vld [vmem:[#allocation228_spill] sm:$0xff] }
 0x506   :  { %12792 = vmatpush3.bf16.msra.mxu0 %v17540_v14  ;;  %20822 = vst [vmem:[#allocation275_spill] sm:$0xff] %v17577_v56  ;;  %20825 = vst [vmem:[#allocation286_spill] sm:$0xff] %v17583_v29  ;;  %v17602_v16 = vpack.c.bf16 %v20833_v41, %v20832_v8  ;;  %v20841_v62 = vand.u32 4294901760, %v17371_v25  ;;  %v20844_v36 = vld [vmem:[#allocation95_spill] sm:$0xff]  ;;  %v20845_v37 = vand.u32 4294901760, %v17446_v38  ;;  %v20846_v21 = vand.u32 4294901760, %v17412_v7 }
 0x507   :  { %12794 = vmatprep.subr.bf16.mxu0 %v17546_v46  ;;  %12060 = vmatpush3.bf16.msra.mxu1 %v20818_v18  ;;  %20831 = vst [vmem:[#allocation205_spill] sm:$0xff] %v17596_v42  ;;  %v17615_v48 = vpack.c.bf16 %v20838_v39, %v20837_v5  ;;  %v20848_v25 = vld [vmem:[#allocation116_spill] sm:$0xff]  ;;  %v20854_v39 = vld [vmem:[#allocation265_spill] sm:$0xff]  ;;  %v21088_v43 = vand.u32 4294901760, %v21087_v23 }
 0x508   :  { %12062 = vmatprep.subr.bf16.mxu1 %v20819_v58  ;;  %20834 = vst [vmem:[#allocation171_spill] sm:$0xff] %v17602_v16  ;;  %v19580_v58 = vand.u32 4294901760, %v17586_v1  ;;  %v17634_v20 = vpack.c.bf16 %v20846_v21, %v20845_v37  ;;  %v20856_v7 = vld [vmem:[#allocation268_spill] sm:$0xff]  ;;  %v20861_v21 = vld [vmem:[#allocation226_spill] sm:$0xff]  ;;  %v20899_v14 = vld [vmem:[#allocation209_spill] sm:$0xff] }
 0x509   :  { %v9777_v32 = vpop.f32.mrb[0].mxu1  ;;  %20839 = vst [vmem:[#allocation287_spill] sm:$0xff] %v17615_v48  ;;  %v20901_v54 = vpack.c.bf16 %v20899_v14, %v20900_v53  ;;  %v20909_v53 = vld [vmem:[#allocation243_spill] sm:$0xff] }
 0x50a   :  { %12796 = vmatpush3.bf16.msra.mxu0 %v17559_v35  ;;  %v9778_v18 = vpop.f32.mrb[1].mxu1  ;;  %20847 = vst [vmem:[#allocation144_spill] sm:$0xff] %v17634_v20  ;;  %v20888_v35 = vld [vmem:[#allocation232_spill] sm:$0xff] }
 0x50b   :  { %12798 = vmatprep.subr.bf16.mxu0 %v17565_v12  ;;  %12064 = vmatpush3.bf16.msra.mxu1 %v20827_v45  ;;  %v17605_v28 = vadd.f32 %v9778_v18, %v9777_v32  ;;  %v17621_v45 = vpack.c.bf16 %v20841_v62, %v20840_v11  ;;  %v20849_v32 = vld [vmem:[#allocation186_spill] sm:$0xff]  ;;  %v20855_v11 = vld [vmem:[#allocation263_spill] sm:$0xff]  ;;  %v20881_v12 = vld [vmem:[#allocation105_spill] sm:$0xff] }
 0x50c   :  { %12066 = vmatprep.subr.bf16.mxu1 %v20828_v4  ;;  %v8447_v4 = vsub.f32 %v17586_v1, %v19580_v58  ;;  %v12845_v8 = vpack.c.bf16 %v20849_v32, %v20848_v25  ;;  %v20850_v18 = vld [vmem:[#allocation158_spill] sm:$0xff]  ;;  %v12847_v38 = vpack.c.bf16 %v20855_v11, %v20854_v39 }
 0x50d   :  { %20842 = vst [vmem:[#allocation214_spill] sm:$0xff] %v17621_v45  ;;  %v20857_v62 = vld [vmem:[#allocation266_spill] sm:$0xff] }
 0x50e   :  { %12800 = vmatpush3.bf16.msra.mxu0 %v17577_v56  ;;  %v8448_v41 = vand.u32 4294901760, %v8447_v4  ;;  %v20859_v4 = vld [vmem:[#allocation188_spill] sm:$0xff] }
 0x50f   :  { %12802 = vmatprep.subr.bf16.mxu0 %v17583_v29  ;;  %12068 = vmatpush3.bf16.msra.mxu1 %v20835_v15  ;;  %v20851_v15 = vld [vmem:[#allocation219_spill] sm:$0xff] }
 0x510   :  { %12070 = vmatprep.subr.bf16.mxu1 %v20836_v55  ;;  %v20852_v55 = vld [vmem:[#allocation225_spill] sm:$0xff]  ;;  %v20879_v29 = vld [vmem:[#allocation195_spill] sm:$0xff] }
 0x511   :  { %v20853_v5 = vpack.c.bf16 %v20851_v15, %v20852_v55  ;;  %v20865_v15 = vld [vmem:[#allocation269_spill] sm:$0xff] }
 0x512   :  { %12804 = vmatpush3.bf16.msra.mxu0 %v17596_v42  ;;  %v20878_v42 = vld [vmem:[#allocation193_spill] sm:$0xff] }
 0x513   :  { %12806 = vmatprep.subr.bf16.mxu0 %v17602_v16  ;;  %12072 = vmatpush3.bf16.msra.mxu1 %v20843_v2  ;;  %v12849_v2 = vpack.c.bf16 %v20857_v62, %v20856_v7  ;;  %v20880_v56 = vpack.c.bf16 %v20878_v42, %v20879_v29  ;;  %v20889_v29 = vld [vmem:[#allocation235_spill] sm:$0xff]  ;;  %v12865_v42 = vpack.c.bf16 %v17238_v22, %v17273_v19 }
 0x514   :  { %12074 = vmatprep.subr.bf16.mxu1 %v20844_v36  ;;  %v20858_v36 = vld [vmem:[#allocation184_spill] sm:$0xff] }
 0x515   :  { %v20860_v37 = vpack.c.bf16 %v20858_v36, %v20859_v4  ;;  %v20873_v4 = vld [vmem:[#allocation126_spill] sm:$0xff] }
 0x516   :  { %12808 = vmatpush3.bf16.msra.mxu0 %v17615_v48  ;;  %v20870_v48 = vld [vmem:[#allocation192_spill] sm:$0xff] }
 0x517   :  { %12810 = vmatprep.subr.bf16.mxu0 %v17621_v45  ;;  %12076 = vmatpush3.bf16.msra.mxu1 %v20850_v18  ;;  %v20862_v18 = vld [vmem:[#allocation83_spill] sm:$0xff]  ;;  %v20869_v45 = vld [vmem:[#allocation189_spill] sm:$0xff] }
 0x518   :  { %12078 = vmatprep.subr.bf16.mxu1 %v20853_v5  ;;  %v20863_v58 = vpack.c.bf16 %v20861_v21, %v20862_v18  ;;  %v20866_v5 = vld [vmem:[#allocation278_spill] sm:$0xff]  ;;  %v20871_v36 = vpack.c.bf16 %v20869_v45, %v20870_v48  ;;  %v20877_v18 = vld [vmem:[#allocation284_spill] sm:$0xff]  ;;  %v20882_v48 = vld [vmem:[#allocation231_spill] sm:$0xff] }
 0x519   :  { %v12857_v16 = vpack.c.bf16 %v20877_v18, %v17131_v6  ;;  %v20883_v45 = vpack.c.bf16 %v20881_v12, %v20882_v48  ;;  %v12863_v12 = vpack.c.bf16 %v17211_v31, %v17233_v24 }
 0x51a   :  { %12812 = vmatpush3.bf16.msra.mxu0 %v17634_v20  ;;  %5036 = vmatmul.mubr.f32.vlgmr.msra.gmra.mrb[14].mxu1 %v17305_v9 }
 0x51b   :  { %12846 = vmatprep.subr.bf16.mxu0 %v12845_v8  ;;  %12080 = vmatpush3.bf16.msra.mxu1 %v20860_v37  ;;  %v20864_v8 = vld [vmem:[#allocation272_spill] sm:$0xff] }
 0x51c   :  { %12082 = vmatprep.subr.bf16.mxu1 %v20863_v58  ;;  %v12851_v55 = vpack.c.bf16 %v20865_v15, %v20864_v8  ;;  %5171 = vmatprep.mubr.f32.mxu1 %v20866_v5  ;;  %v20875_v58 = vld [vmem:[#allocation283_spill] sm:$0xff] }
 0x51d   :  { %8449 = vmatmul.mubr.f32.vlgmr.msra.gmra.mrb[70].mxu0 %v8448_v41  ;;  %v20867_v41 = vld [vmem:[#allocation277_spill] sm:$0xff] }
 0x51e   :  { %12848 = vmatpush3.bf16.msra.mxu0 %v12847_v38  ;;  %8816 = vmatprep.mubr.f32.mxu0 %v17388_v52  ;;  %v12853_v20 = vpack.c.bf16 %v20868_v61, %v20867_v41  ;;  %v20872_v38 = vld [vmem:[#allocation227_spill] sm:$0xff] }
 0x51f   :  { %12850 = vmatprep.subr.bf16.mxu0 %v12849_v2  ;;  %12084 = vmatpush3.bf16.msra.mxu1 %v20871_v36  ;;  %v20874_v37 = vpack.c.bf16 %v20872_v38, %v20873_v4  ;;  %v20876_v2 = vld [vmem:[#allocation279_spill] sm:$0xff]  ;;  %v20885_v38 = vld [vmem:[#allocation196_spill] sm:$0xff] }
 0x520   :  { %v12855_v21 = vpack.c.bf16 %v20876_v2, %v20875_v58  ;;  %v20886_v4 = vld [vmem:[#allocation200_spill] sm:$0xff] }
 0x521   :  { %12086 = vmatprep.subr.bf16.mxu1 %v20874_v37  ;;  %v20887_v37 = vpack.c.bf16 %v20885_v38, %v20886_v4  ;;  %v20895_v38 = vld [vmem:[#allocation240_spill] sm:$0xff] }
 0x522   :  { %12852 = vmatpush3.bf16.msra.mxu0 %v12851_v55  ;;  %v20884_v55 = vld [vmem:[#allocation177_spill] sm:$0xff] }
 0x523   :  { %12854 = vmatprep.subr.bf16.mxu0 %v12853_v20  ;;  %12088 = vmatpush3.bf16.msra.mxu1 %v20880_v56  ;;  %v12859_v36 = vpack.c.bf16 %v20884_v55, %v17166_v26  ;;  %v12861_v20 = vpack.c.bf16 %v17171_v34, %v17198_v27  ;;  %v20890_v56 = vpack.c.bf16 %v20888_v35, %v20889_v29  ;;  %v20898_v35 = vld [vmem:[#allocation185_spill] sm:$0xff] }
 0x524   :  { %12090 = vmatprep.subr.bf16.mxu1 %v20883_v45  ;;  %v20894_v45 = vld [vmem:[#allocation236_spill] sm:$0xff] }
 0x525   :  { %v20896_v4 = vpack.c.bf16 %v20894_v45, %v20895_v38  ;;  %v12873_v45 = vpack.c.bf16 %v17399_v30, %v17435_v59  ;;  %v20905_v38 = vld [vmem:[#allocation213_spill] sm:$0xff] }
 0x526   :  { %12856 = vmatpush3.bf16.msra.mxu0 %v12855_v21  ;;  %v20892_v21 = vld [vmem:[#allocation208_spill] sm:$0xff] }
 0x527   :  { %12858 = vmatprep.subr.bf16.mxu0 %v12857_v16  ;;  %12092 = vmatpush3.bf16.msra.mxu1 %v20887_v37  ;;  %v20891_v16 = vld [vmem:[#allocation201_spill] sm:$0xff] }
 0x528   :  { %12094 = vmatprep.subr.bf16.mxu1 %v20890_v56  ;;  %v20893_v48 = vpack.c.bf16 %v20891_v16, %v20892_v21  ;;  %v12869_v56 = vpack.c.bf16 %v17322_v50, %v17355_v47  ;;  %v20903_v16 = vld [vmem:[#allocation242_spill] sm:$0xff] }
 0x52a   :  { %12860 = vmatpush3.bf16.msra.mxu0 %v12859_v36  ;;  %v20897_v36 = vld [vmem:[#allocation289_spill] sm:$0xff] }
 0x52b   :  { %12862 = vmatprep.subr.bf16.mxu0 %v12861_v20  ;;  %12096 = vmatpush3.bf16.msra.mxu1 %v20893_v48  ;;  %v12867_v37 = vpack.c.bf16 %v20898_v35, %v20897_v36  ;;  %v9812_v20 = vpop.f32.mrb[2].mxu1 }
 0x52c   :  { %12098 = vmatprep.subr.bf16.mxu1 %v20896_v4  ;;  %v9813_v29 = vpop.f32.mrb[3].mxu1  ;;  %v20906_v4 = vld [vmem:[#allocation218_spill] sm:$0xff] }
 0x52d   :  { %v9814_v46 = vadd.f32 %v9813_v29, %v9812_v20  ;;  %v20907_v20 = vpack.c.bf16 %v20905_v38, %v20906_v4  ;;  %v20911_v29 = vand.u32 4294901760, %v20848_v25  ;;  %v20919_v25 = vand.u32 4294901760, %v20856_v7 }
 0x52e   :  { %12864 = vmatpush3.bf16.msra.mxu0 %v12863_v12  ;;  %v20902_v12 = vld [vmem:[#allocation241_spill] sm:$0xff]  ;;  %v20927_v7 = vand.u32 4294901760, %v20867_v41  ;;  %v20935_v41 = vld [vmem:[#allocation194_spill] sm:$0xff] }
 0x52f   :  { %12866 = vmatprep.subr.bf16.mxu0 %v12865_v42  ;;  %12100 = vmatpush3.bf16.msra.mxu1 %v20901_v54  ;;  %v20904_v21 = vpack.c.bf16 %v20902_v12, %v20903_v16  ;;  %v12871_v42 = vpack.c.bf16 %v17367_v63, %v17394_v40  ;;  %v4176_v48 = vadd.f32 %v9814_v46, %v17605_v28  ;;  %v20908_v54 = vld [vmem:[#allocation143_spill] sm:$0xff]  ;;  %v20912_v46 = vand.u32 4294901760, %v20849_v32 }
 0x530   :  { %v20910_v14 = vpack.c.bf16 %v20908_v54, %v20909_v53  ;;  %v20914_v12 = vld [vmem:[#allocation247_spill] sm:$0xff]  ;;  %v20920_v32 = vand.u32 4294901760, %v20857_v62  ;;  %v20922_v54 = vld [vmem:[#allocation84_spill] sm:$0xff]  ;;  %v20928_v62 = vand.u32 4294901760, %v20868_v61  ;;  %v20936_v61 = vld [vmem:[#allocation230_spill] sm:$0xff] }
 0x531   :  { %12102 = vmatprep.subr.bf16.mxu1 %v20904_v21  ;;  %v12909_v28 = vpack.c.bf16 %v20912_v46, %v20911_v29  ;;  %v20916_v21 = vld [vmem:[#allocation224_spill] sm:$0xff]  ;;  %v20929_v46 = vld [vmem:[#allocation191_spill] sm:$0xff] }
 0x532   :  { %12868 = vmatpush3.bf16.msra.mxu0 %v12867_v37  ;;  %v12875_v37 = vpack.c.bf16 %v17440_v57, %v17474_v13  ;;  %v12913_v4 = vpack.c.bf16 %v20920_v32, %v20919_v25  ;;  %v12917_v29 = vpack.c.bf16 %v20928_v62, %v20927_v7  ;;  %v20943_v32 = vand.u32 4294901760, %v17233_v24 }
 0x533   :  { %12870 = vmatprep.subr.bf16.mxu0 %v12869_v56  ;;  %12104 = vmatpush3.bf16.msra.mxu1 %v20907_v20  ;;  %v20913_v56 = vld [vmem:[#allocation244_spill] sm:$0xff]  ;;  %v20921_v20 = vld [vmem:[#allocation187_spill] sm:$0xff]  ;;  %v20950_v7 = vand.u32 4294901760, %v20898_v35 }
 0x534   :  { %12106 = vmatprep.subr.bf16.mxu1 %v20910_v14  ;;  %v20915_v16 = vpack.c.bf16 %v20913_v56, %v20914_v12  ;;  %v20925_v14 = vand.u32 4294901760, %v20866_v5  ;;  %v20933_v5 = vand.u32 4294901760, %v17131_v6  ;;  %v20934_v12 = vand.u32 4294901760, %v20877_v18  ;;  %v20941_v6 = vld [vmem:[#allocation199_spill] sm:$0xff]  ;;  %v20942_v18 = vld [vmem:[#allocation234_spill] sm:$0xff] }
 0x536   :  { %12872 = vmatpush3.bf16.msra.mxu0 %v12871_v42  ;;  %v20917_v42 = vand.u32 4294901760, %v20854_v39  ;;  %v20923_v39 = vand.u32 4294901760, %v20864_v8  ;;  %v20931_v8 = vand.u32 4294901760, %v20875_v58  ;;  %v20939_v58 = vand.u32 4294901760, %v17198_v27  ;;  %v20947_v27 = vld [vmem:[#allocation207_spill] sm:$0xff] }
 0x537   :  { %12874 = vmatprep.subr.bf16.mxu0 %v12873_v45  ;;  %12108 = vmatpush3.bf16.msra.mxu1 %v20915_v16  ;;  %v20918_v45 = vand.u32 4294901760, %v20855_v11  ;;  %v20924_v11 = vand.u32 4294901760, %v20865_v15  ;;  %v20932_v15 = vand.u32 4294901760, %v20876_v2  ;;  %v12921_v16 = vpack.c.bf16 %v20934_v12, %v20933_v5 }
 0x538   :  { %12110 = vmatprep.subr.bf16.mxu1 %v20916_v21  ;;  %v20940_v2 = vand.u32 4294901760, %v17171_v34  ;;  %v20948_v34 = vld [vmem:[#allocation239_spill] sm:$0xff]  ;;  %v20955_v5 = vand.u32 4294901760, %v17394_v40  ;;  %v20957_v12 = vand.u32 4294901760, %v17435_v59  ;;  %v20964_v40 = vand.u32 4294901760, %v17362_v3  ;;  %v20966_v59 = vld [vmem:[#allocation229_spill] sm:$0xff] }
 0x539   :  { %v12911_v38 = vpack.c.bf16 %v20918_v45, %v20917_v42  ;;  %v12915_v53 = vpack.c.bf16 %v20924_v11, %v20923_v39  ;;  %v12919_v56 = vpack.c.bf16 %v20932_v15, %v20931_v8  ;;  %v20937_v42 = vand.u32 4294901760, %v17166_v26  ;;  %v20953_v8 = vld [vmem:[#allocation211_spill] sm:$0xff]  ;;  %v20954_v15 = vld [vmem:[#allocation136_spill] sm:$0xff] }
 0x53a   :  { %12876 = vmatpush3.bf16.msra.mxu0 %v12875_v37  ;;  %5174 = vmatmul.mubr.f32.vlgmr.msra.gmra.mrb[16].mxu1 %v17362_v3  ;;  %v20926_v37 = vld [vmem:[#allocation291_spill] sm:$0xff]  ;;  %v20938_v45 = vand.u32 4294901760, %v20884_v55  ;;  %v12925_v25 = vpack.c.bf16 %v20940_v2, %v20939_v58  ;;  %v20945_v26 = vand.u32 4294901760, %v17273_v19  ;;  %v20946_v55 = vand.u32 4294901760, %v17238_v22  ;;  %v20970_v2 = vld [vmem:[#allocation238_spill] sm:$0xff]  ;;  %v20972_v3 = vld [vmem:[#allocation132_spill] sm:$0xff] }
 0x53b   :  { %12910 = vmatprep.subr.bf16.mxu0 %v12909_v28  ;;  %12112 = vmatpush3.bf16.msra.mxu1 %v20921_v20  ;;  %v20930_v28 = vld [vmem:[#allocation94_spill] sm:$0xff]  ;;  %v20952_v19 = vand.u32 4294901760, %v17322_v50  ;;  %v20959_v50 = vld [vmem:[#allocation217_spill] sm:$0xff]  ;;  %v20969_v58 = vld [vmem:[#allocation203_spill] sm:$0xff] }
 0x53c   :  { %12114 = vmatprep.subr.bf16.mxu1 %v20922_v54  ;;  %5278 = vmatprep.mubr.f32.mxu1 %v20925_v14  ;;  %v12929_v11 = vpack.c.bf16 %v20946_v55, %v20945_v26  ;;  %v20949_v14 = vand.u32 4294901760, %v20897_v36  ;;  %v20956_v36 = vand.u32 4294901760, %v17367_v63  ;;  %v20963_v63 = vld [vmem:[#allocation87_spill] sm:$0xff] }
 0x53d   :  { %8819 = vmatmul.mubr.f32.vlgmr.msra.gmra.mrb[72].mxu0 %v17586_v1 }
 0x53e   :  { %12912 = vmatpush3.bf16.msra.mxu0 %v12911_v38  ;;  %9093 = vmatprep.mubr.f32.mxu0 %v20926_v37  ;;  %v12923_v38 = vpack.c.bf16 %v20938_v45, %v20937_v42  ;;  %v12931_v24 = vpack.c.bf16 %v20950_v7, %v20949_v14  ;;  %v12935_v35 = vpack.c.bf16 %v20956_v36, %v20955_v5  ;;  %v20960_v42 = vld [vmem:[#allocation175_spill] sm:$0xff]  ;;  %v20961_v45 = vand.u32 4294901760, %v17474_v13  ;;  %v20967_v13 = vld [vmem:[#allocation198_spill] sm:$0xff]  ;;  %v20989_v36 = vld [vmem:[#allocation97_spill] sm:$0xff] }
 0x53f   :  { %12914 = vmatprep.subr.bf16.mxu0 %v12913_v4  ;;  %12116 = vmatpush3.bf16.msra.mxu1 %v20929_v46  ;;  %v20944_v4 = vand.u32 4294901760, %v17211_v31  ;;  %v20951_v31 = vand.u32 4294901760, %v17355_v47  ;;  %v20958_v47 = vand.u32 4294901760, %v17399_v30  ;;  %v20965_v30 = vld [vmem:[#allocation190_spill] sm:$0xff]  ;;  %v20977_v7 = vld [vmem:[#allocation223_spill] sm:$0xff]  ;;  %v21097_v37 = vld [vmem:[#allocation4_spill] sm:$0xff] }
 0x540   :  { %12118 = vmatprep.subr.bf16.mxu1 %v20930_v28  ;;  %v21098_v60 = vand.u32 4294901760, %v21097_v37 }
 0x541   :  { %v12927_v39 = vpack.c.bf16 %v20944_v4, %v20943_v32  ;;  %v20973_v32 = vld [vmem:[#allocation215_spill] sm:$0xff]  ;;  %v20974_v4 = vld [vmem:[#allocation176_spill] sm:$0xff] }
 0x542   :  { %12916 = vmatpush3.bf16.msra.mxu0 %v12915_v53 }
 0x543   :  { %12918 = vmatprep.subr.bf16.mxu0 %v12917_v29  ;;  %12120 = vmatpush3.bf16.msra.mxu1 %v20935_v41  ;;  %v12933_v29 = vpack.c.bf16 %v20952_v19, %v20951_v31 }
 0x544   :  { %12122 = vmatprep.subr.bf16.mxu1 %v20936_v61 }
 0x546   :  { %12920 = vmatpush3.bf16.msra.mxu0 %v12919_v56 }
 0x547   :  { %12922 = vmatprep.subr.bf16.mxu0 %v12921_v16  ;;  %12124 = vmatpush3.bf16.msra.mxu1 %v20941_v6  ;;  %v12937_v16 = vpack.c.bf16 %v20958_v47, %v20957_v12  ;;  %v20991_v12 = vld [vmem:[#allocation91_spill] sm:$0xff] }
 0x548   :  { %12126 = vmatprep.subr.bf16.mxu1 %v20942_v18  ;;  %v20992_v47 = vand.u32 4294901760, %v20991_v12  ;;  %v21032_v12 = vld [vmem:[#allocation57_spill] sm:$0xff] }
 0x54a   :  { %12924 = vmatpush3.bf16.msra.mxu0 %v12923_v38 }
 0x54b   :  { %12926 = vmatprep.subr.bf16.mxu0 %v12925_v25  ;;  %12128 = vmatpush3.bf16.msra.mxu1 %v20947_v27  ;;  %v9847_v53 = vpop.f32.mrb[4].mxu1  ;;  %v20971_v25 = vld [vmem:[#allocation206_spill] sm:$0xff] }
 0x54c   :  { %12130 = vmatprep.subr.bf16.mxu1 %v20948_v34  ;;  %v9848_v62 = vpop.f32.mrb[5].mxu1 }
 0x54d   :  { %v9849_v22 = vadd.f32 %v9848_v62, %v9847_v53  ;;  %v20976_v53 = vld [vmem:[#allocation154_spill] sm:$0xff]  ;;  %v20979_v62 = vld [vmem:[#allocation251_spill] sm:$0xff] }
 0x54e   :  { %12928 = vmatpush3.bf16.msra.mxu0 %v12927_v39 }
 0x54f   :  { %12930 = vmatprep.subr.bf16.mxu0 %v12929_v11  ;;  %12132 = vmatpush3.bf16.msra.mxu1 %v20953_v8  ;;  %v4314_v56 = vadd.f32 %v9849_v22, %v4176_v48  ;;  %v20962_v48 = vand.u32 4294901760, %v17440_v57  ;;  %v20968_v57 = vld [vmem:[#allocation233_spill] sm:$0xff]  ;;  %v20985_v22 = vld [vmem:[#allocation10_spill] sm:$0xff] }
 0x550   :  { %12134 = vmatprep.subr.bf16.mxu1 %v20954_v15  ;;  %v20975_v11 = vld [vmem:[#allocation221_spill] sm:$0xff] }
 0x551   :  { %v12939_v38 = vpack.c.bf16 %v20962_v48, %v20961_v45 }
 0x552   :  { %12932 = vmatpush3.bf16.msra.mxu0 %v12931_v24  ;;  %v20978_v24 = vld [vmem:[#allocation148_spill] sm:$0xff] }
 0x553   :  { %12934 = vmatprep.subr.bf16.mxu0 %v12933_v29  ;;  %12136 = vmatpush3.bf16.msra.mxu1 %v20959_v50 }
 0x554   :  { %12138 = vmatprep.subr.bf16.mxu1 %v20960_v42 }
 0x556   :  { %12936 = vmatpush3.bf16.msra.mxu0 %v12935_v35  ;;  %v20990_v35 = vand.u32 4294901760, %v20989_v36 }
 0x557   :  { %12938 = vmatprep.subr.bf16.mxu0 %v12937_v16  ;;  %12140 = vmatpush3.bf16.msra.mxu1 %v20774_v44 }
 0x558   :  { %12142 = vmatprep.subr.bf16.mxu1 %v20963_v63  ;;  %v17875_v16 = vpack.c.bf16 %v20992_v47, %v20990_v35  ;;  %v21033_v47 = vand.u32 4294901760, %v21032_v12  ;;  %v21057_v12 = vld [vmem:[#allocation133_spill] sm:$0xff] }
 0x55a   :  { %12940 = vmatpush3.bf16.msra.mxu0 %v12939_v38  ;;  %5282 = vmatmul.mubr.f32.vlgmr.msra.gmra.mrb[18].mxu1 %v20964_v40  ;;  %v20997_v38 = vld [vmem:[#allocation115_spill] sm:$0xff] }
 0x55b   :  { %12144 = vmatpush3.bf16.msra.mxu1 %v20965_v30  ;;  %5448 = vmatprep.mubr.f32.mxu1 %v17020_v49  ;;  %v20998_v63 = vand.u32 4294901760, %v20997_v38 }
 0x55c   :  { %12146 = vmatprep.subr.bf16.mxu1 %v20966_v59  ;;  %v21002_v59 = vld [vmem:[#allocation6_spill] sm:$0xff] }
 0x55d   :  { %9095 = vmatmul.mubr.f32.vlgmr.msra.gmra.mrb[74].mxu0 %v17567_v17 }
 0x55f   :  { %12148 = vmatpush3.bf16.msra.mxu1 %v20967_v13  ;;  %v21003_v13 = vand.u32 4294901760, %v21002_v59 }
 0x560   :  { %12150 = vmatprep.subr.bf16.mxu1 %v20968_v57  ;;  %v21004_v57 = vld [vmem:[#allocation25_spill] sm:$0xff] }
 0x563   :  { %12152 = vmatpush3.bf16.msra.mxu1 %v20969_v58  ;;  %v21005_v58 = vand.u32 4294901760, %v21004_v57  ;;  %v21041_v57 = vld [vmem:[#allocation128_spill] sm:$0xff] }
 0x564   :  { %12154 = vmatprep.subr.bf16.mxu1 %v20970_v2 }
 0x565   :  { %v17897_v2 = vpack.c.bf16 %v21005_v58, %v21003_v13  ;;  %v21042_v58 = vand.u32 4294901760, %v21041_v57 }
 0x567   :  { %12156 = vmatpush3.bf16.msra.mxu1 %v20971_v25  ;;  %21006 = vst [vmem:[#allocation222_spill] sm:$0xff] %v17897_v2  ;;  %v21007_v25 = vld [vmem:[#allocation100_spill] sm:$0xff] }
 0x568   :  { %12158 = vmatprep.subr.bf16.mxu1 %v20972_v3  ;;  %v21008_v3 = vand.u32 4294901760, %v21007_v25  ;;  %v21043_v25 = vld [vmem:[#allocation123_spill] sm:$0xff] }
 0x56b   :  { %12160 = vmatpush3.bf16.msra.mxu1 %v20973_v32  ;;  %v9882_v39 = vpop.f32.mrb[6].mxu1  ;;  %v21009_v32 = vld [vmem:[#allocation121_spill] sm:$0xff] }
 0x56c   :  { %12162 = vmatprep.subr.bf16.mxu1 %v20974_v4  ;;  %v9883_v26 = vpop.f32.mrb[7].mxu1  ;;  %v21010_v4 = vand.u32 4294901760, %v21009_v32 }
 0x56d   :  { %v9884_v55 = vadd.f32 %v9883_v26, %v9882_v39  ;;  %v3570_v26 = vld [vmem:[%s18740_s3] sm:$0xff] }
 0x56e   :  { %v17903_v39 = vpack.c.bf16 %v21010_v4, %v21008_v3  ;;  %v21044_v3 = vand.u32 4294901760, %v21043_v25 }
 0x56f   :  { %12164 = vmatpush3.bf16.msra.mxu1 %v20975_v11  ;;  %v4422_v14 = vadd.f32 %v9884_v55, %v4314_v56  ;;  %v21012_v55 = vld [vmem:[#allocation34_spill] sm:$0xff] }
 0x570   :  { %12166 = vmatprep.subr.bf16.mxu1 %v20976_v53  ;;  %21011 = vst [vmem:[#allocation248_spill] sm:$0xff] %v17903_v39  ;;  %v21013_v11 = vand.u32 4294901760, %v21012_v55  ;;  %v21014_v53 = vld [vmem:[#allocation30_spill] sm:$0xff]  ;;  %v17959_v32 = vpack.c.bf16 %v21044_v3, %v21042_v58  ;;  %v21046_v55 = vld [vmem:[#allocation67_spill] sm:$0xff]  ;;  %v21064_v58 = vld [vmem:[#allocation21_spill] sm:$0xff] }
 0x571   :  { %v21065_v25 = vand.u32 4294901760, %v21064_v58 }
 0x572   :  { %21045 = vst [vmem:[#allocation219_spill] sm:$0xff] %v17959_v32 }
 0x573   :  { %12168 = vmatpush3.bf16.msra.mxu1 %v20977_v7  ;;  %v5696_v3 = vsub.f32 %v21064_v58, %v21065_v25 }
 0x574   :  { %12170 = vmatprep.subr.bf16.mxu1 %v20978_v24  ;;  %v21017_v24 = vld [vmem:[#allocation98_spill] sm:$0xff] }
 0x577   :  { %12172 = vmatpush3.bf16.msra.mxu1 %v20979_v62  ;;  %v21018_v62 = vand.u32 4294901760, %v21017_v24 }
 0x578   :  { %12174 = vmatprep.subr.bf16.mxu1 %v20916_v21  ;;  %v3571_v21 = vld [vmem:[%s18740_s3 + $0x8] sm:$0xff] }
 0x579   :  { %v17840_v31 = vand.u32 4294901760, %v3571_v21 }
 0x57a   :  { %5450 = vmatmul.mubr.f32.vlgmr.msra.gmra.mrb[20].mxu1 %v17305_v9 }
 0x57b   :  { %12176 = vmatpush3.bf16.msra.mxu1 %v20921_v20  ;;  %5552 = vmatprep.mubr.f32.mxu1 %v17020_v49  ;;  %20980 = vst [vmem:[#allocation220_spill] sm:$0xff] %v17840_v31  ;;  %v17845_v49 = vsub.f32 %v3571_v21, %v17840_v31  ;;  %v21019_v21 = vld [vmem:[#allocation101_spill] sm:$0xff] }
 0x57c   :  { %12178 = vmatprep.subr.bf16.mxu1 %v20922_v54 }
 0x57f   :  { %12180 = vmatpush3.bf16.msra.mxu1 %v20929_v46 }
 0x580   :  { %12182 = vmatprep.subr.bf16.mxu1 %v20930_v28  ;;  %v19609_v28 = vand.u32 4294901760, %v17845_v49 }
 0x583   :  { %12184 = vmatpush3.bf16.msra.mxu1 %v20935_v41 }
 0x584   :  { %12186 = vmatprep.subr.bf16.mxu1 %v20936_v61  ;;  %v5658_v61 = vsub.f32 %v17845_v49, %v19609_v28  ;;  %v21081_v28 = vld [vmem:[#allocation135_spill] sm:$0xff] }
 0x586   :  { %v5659_v29 = vand.u32 4294901760, %v5658_v61  ;;  %v21022_v61 = vld [vmem:[#allocation44_spill] sm:$0xff] }
 0x587   :  { %12188 = vmatpush3.bf16.msra.mxu1 %v20941_v6  ;;  %v20981_v6 = vld [vmem:[#allocation88_spill] sm:$0xff] }
 0x588   :  { %12190 = vmatprep.subr.bf16.mxu1 %v20942_v18  ;;  %v20982_v18 = vand.u32 4294901760, %v20981_v6  ;;  %v21023_v6 = vand.u32 4294901760, %v21022_v61  ;;  %v21053_v61 = vld [vmem:[#allocation13_spill] sm:$0xff] }
 0x58b   :  { %12192 = vmatpush3.bf16.msra.mxu1 %v20947_v27  ;;  %v9917_v20 = vpop.f32.mrb[8].mxu1  ;;  %v20983_v27 = vld [vmem:[#allocation85_spill] sm:$0xff] }
 0x58c   :  { %12194 = vmatprep.subr.bf16.mxu1 %v20948_v34  ;;  %v9918_v54 = vpop.f32.mrb[9].mxu1  ;;  %v20984_v34 = vand.u32 4294901760, %v20983_v27 }
 0x58d   :  { %v9919_v46 = vadd.f32 %v9918_v54, %v9917_v20  ;;  %v21020_v20 = vand.u32 4294901760, %v21019_v21 }
 0x58e   :  { %v17860_v19 = vpack.c.bf16 %v20984_v34, %v20982_v18  ;;  %v21024_v18 = vld [vmem:[#allocation41_spill] sm:$0xff] }
 0x58f   :  { %12196 = vmatpush3.bf16.msra.mxu1 %v20953_v8  ;;  %v4590_v41 = vadd.f32 %v9919_v46, %v4422_v14  ;;  %v20986_v8 = vand.u32 4294901760, %v20985_v22  ;;  %v21015_v14 = vand.u32 4294901760, %v21014_v53  ;;  %v17920_v54 = vpack.c.bf16 %v21020_v20, %v21018_v62  ;;  %v21048_v53 = vld [vmem:[#allocation62_spill] sm:$0xff]  ;;  %v21051_v62 = vld [vmem:[#allocation17_spill] sm:$0xff] }
 0x590   :  { %12198 = vmatprep.subr.bf16.mxu1 %v20954_v15  ;;  %v20987_v15 = vld [vmem:[#allocation8_spill] sm:$0xff]  ;;  %v17922_v46 = vand.u32 4294901760, %v3570_v26  ;;  %v21025_v27 = vand.u32 4294901760, %v21024_v18  ;;  %v21052_v21 = vand.u32 4294901760, %v21051_v62 }
 0x591   :  { %v20988_v56 = vand.u32 4294901760, %v20987_v15  ;;  %v17914_v7 = vpack.c.bf16 %v21015_v14, %v21013_v11  ;;  %21021 = vst [vmem:[#allocation95_spill] sm:$0xff] %v17920_v54  ;;  %v21047_v11 = vand.u32 4294901760, %v21046_v55  ;;  %v21049_v14 = vand.u32 4294901760, %v21048_v53 }
 0x592   :  { %v17930_v34 = vpack.c.bf16 %v21025_v27, %v21023_v6  ;;  %v17939_v36 = vsub.f32 %v3570_v26, %v17922_v46  ;;  %v5675_v20 = vsub.f32 %v21051_v62, %v21052_v21  ;;  %v21054_v6 = vand.u32 4294901760, %v21053_v61 }
 0x593   :  { %12200 = vmatpush3.bf16.msra.mxu1 %v20959_v50  ;;  %v17868_v5 = vpack.c.bf16 %v20988_v56, %v20986_v8  ;;  %21016 = vst [vmem:[#allocation228_spill] sm:$0xff] %v17914_v7  ;;  %v21029_v8 = vld [vmem:[#allocation102_spill] sm:$0xff]  ;;  %v17968_v24 = vpack.c.bf16 %v21049_v14, %v21047_v11 }
 0x594   :  { %12202 = vmatprep.subr.bf16.mxu1 %v20960_v42  ;;  %v20995_v42 = vld [vmem:[#allocation16_spill] sm:$0xff]  ;;  %21026 = vst [vmem:[#allocation116_spill] sm:$0xff] %v17930_v34  ;;  %v21030_v15 = vand.u32 4294901760, %v21029_v8  ;;  %v19608_v4 = vand.u32 4294901760, %v17939_v36  ;;  %v5682_v18 = vsub.f32 %v21053_v61, %v21054_v6  ;;  %v21055_v8 = vld [vmem:[#allocation114_spill] sm:$0xff] }
 0x595   :  { %v20996_v45 = vand.u32 4294901760, %v20995_v42  ;;  %21050 = vst [vmem:[#allocation225_spill] sm:$0xff] %v17968_v24  ;;  %v21068_v11 = vld [vmem:[#allocation70_spill] sm:$0xff] }
 0x596   :  { %v21069_v53 = vand.u32 4294901760, %v21068_v11  ;;  %v21079_v11 = vld [vmem:[#allocation28_spill] sm:$0xff] }
 0x597   :  { %12204 = vmatpush3.bf16.msra.mxu1 %v20774_v44  ;;  %v20993_v44 = vld [vmem:[#allocation19_spill] sm:$0xff] }
 0x598   :  { %12206 = vmatprep.subr.bf16.mxu1 %v17860_v19  ;;  %v20994_v50 = vand.u32 4294901760, %v20993_v44  ;;  %v21034_v44 = vld [vmem:[#allocation48_spill] sm:$0xff] }
 0x59a   :  { %5554 = vmatmul.mubr.f32.vlgmr.msra.gmra.mrb[22].mxu1 %v17305_v9  ;;  %v17883_v48 = vpack.c.bf16 %v20996_v45, %v20994_v50  ;;  %v20999_v9 = vld [vmem:[#allocation113_spill] sm:$0xff]  ;;  %v21035_v50 = vand.u32 4294901760, %v21034_v44  ;;  %v21037_v45 = vld [vmem:[#allocation108_spill] sm:$0xff]  ;;  %v21059_v44 = vld [vmem:[#allocation130_spill] sm:$0xff] }
 0x59b   :  { %12208 = vmatpush3.bf16.msra.mxu1 %v17868_v5  ;;  %5660 = vmatprep.mubr.f32.mxu1 %v5659_v29  ;;  %v21000_v40 = vand.u32 4294901760, %v20999_v9  ;;  %v21027_v29 = vld [vmem:[#allocation122_spill] sm:$0xff]  ;;  %v21038_v38 = vand.u32 4294901760, %v21037_v45  ;;  %v21039_v9 = vld [vmem:[#allocation92_spill] sm:$0xff] }
 0x59c   :  { %12210 = vmatprep.subr.bf16.mxu1 %v17875_v16  ;;  %v21028_v22 = vand.u32 4294901760, %v21027_v29  ;;  %v17947_v42 = vpack.c.bf16 %v21035_v50, %v21033_v47  ;;  %v21058_v47 = vand.u32 4294901760, %v21057_v12  ;;  %v21060_v50 = vand.u32 4294901760, %v21059_v44 }
 0x59d   :  { %v17889_v30 = vpack.c.bf16 %v21000_v40, %v20998_v63  ;;  %v5787_v63 = vsub.f32 %v21037_v45, %v21038_v38  ;;  %v21040_v40 = vand.u32 4294901760, %v21039_v9 }
 0x59e   :  { %v17936_v56 = vpack.c.bf16 %v21030_v15, %v21028_v22  ;;  %21036 = vst [vmem:[#allocation158_spill] sm:$0xff] %v17947_v42  ;;  %v21056_v15 = vand.u32 4294901760, %v21055_v8  ;;  %v17985_v38 = vpack.c.bf16 %v21060_v50, %v21058_v47 }
 0x59f   :  { %21001 = vst [vmem:[#allocation245_spill] sm:$0xff] %v17889_v30  ;;  %12212 = vmatpush3.bf16.msra.mxu1 %v17883_v48  ;;  %v5794_v59 = vsub.f32 %v21039_v9, %v21040_v40  ;;  %v5788_v29 = vand.u32 4294901760, %v5787_v63  ;;  %v5664_v40 = vsub.f32 %v17939_v36, %v19608_v4  ;;  %v5676_v63 = vand.u32 4294901760, %v5675_v20  ;;  %v21073_v20 = vld [vmem:[#allocation76_spill] sm:$0xff]  ;;  %v21075_v4 = vld [vmem:[#allocation51_spill] sm:$0xff] }
 0x5a0   :  { %12214 = vmatprep.subr.bf16.mxu1 %v17889_v30  ;;  %21031 = vst [vmem:[#allocation186_spill] sm:$0xff] %v17936_v56  ;;  %21061 = vst [vmem:[#allocation265_spill] sm:$0xff] %v17985_v38  ;;  %v21076_v25 = vand.u32 4294901760, %v21075_v4 }
 0x5a1   :  { %v5795_v22 = vand.u32 4294901760, %v5794_v59  ;;  %v5683_v59 = vand.u32 4294901760, %v5682_v18  ;;  %v5665_v44 = vand.u32 4294901760, %v5664_v40  ;;  %v21074_v18 = vand.u32 4294901760, %v21073_v20 }
 0x5a3   :  { %12216 = vmatpush3.bf16.msra.mxu1 %v17897_v2  ;;  %v12237_v21 = vpack.c.bf16 %v5795_v22, %v5788_v29  ;;  %v21077_v29 = vld [vmem:[#allocation32_spill] sm:$0xff] }
 0x5a4   :  { %12218 = vmatprep.subr.bf16.mxu1 %v17903_v39  ;;  %v21078_v22 = vand.u32 4294901760, %v21077_v29 }
 0x5a7   :  { %12220 = vmatpush3.bf16.msra.mxu1 %v17914_v7 }
 0x5a8   :  { %12222 = vmatprep.subr.bf16.mxu1 %v17920_v54 }
 0x5ab   :  { %12224 = vmatpush3.bf16.msra.mxu1 %v17930_v34  ;;  %v9952_v35 = vpop.f32.mrb[10].mxu1 }
 0x5ac   :  { %12226 = vmatprep.subr.bf16.mxu1 %v17936_v56  ;;  %v9953_v13 = vpop.f32.mrb[11].mxu1 }
 0x5ad   :  { %v9954_v26 = vadd.f32 %v9953_v13, %v9952_v35  ;;  %v5808_v35 = vsub.f32 %v21055_v8, %v21056_v15  ;;  %v21062_v13 = vld [vmem:[#allocation120_spill] sm:$0xff]  ;;  %v21071_v15 = vld [vmem:[#allocation26_spill] sm:$0xff] }
 0x5ae   :  { %v21063_v57 = vand.u32 4294901760, %v21062_v13  ;;  %v21072_v12 = vand.u32 4294901760, %v21071_v15 }
 0x5af   :  { %12228 = vmatpush3.bf16.msra.mxu1 %v17947_v42  ;;  %v17976_v27 = vadd.f32 %v9954_v26, %v4590_v41  ;;  %v21066_v26 = vld [vmem:[#allocation75_spill] sm:$0xff]  ;;  %v5809_v6 = vand.u32 4294901760, %v5808_v35  ;;  %v5703_v35 = vsub.f32 %v21077_v29, %v21078_v22 }
 0x5b0   :  { %12230 = vmatprep.subr.bf16.mxu1 %v17959_v32  ;;  %v5801_v41 = vsub.f32 %v21062_v13, %v21063_v57  ;;  %v21067_v55 = vand.u32 4294901760, %v21066_v26  ;;  %v5689_v47 = vsub.f32 %v21071_v15, %v21072_v12  ;;  %v5815_v57 = vsub.f32 %v21073_v20, %v21074_v18 }
 0x5b1   :  { %v5822_v26 = vsub.f32 %v21075_v4, %v21076_v25  ;;  %v5697_v12 = vand.u32 4294901760, %v5696_v3  ;;  %v21082_v18 = vand.u32 4294901760, %v21081_v28  ;;  %v21084_v25 = vand.u32 4294901760, %v21083_v51 }
 0x5b2   :  { %v18002_v14 = vpack.c.bf16 %v21069_v53, %v21067_v55  ;;  %v5802_v50 = vand.u32 4294901760, %v5801_v41  ;;  %v12239_v55 = vpack.c.bf16 %v5683_v59, %v5676_v63  ;;  %v21080_v53 = vand.u32 4294901760, %v21079_v11 }
 0x5b3   :  { %12232 = vmatpush3.bf16.msra.mxu1 %v17968_v24  ;;  %v5690_v41 = vand.u32 4294901760, %v5689_v47  ;;  %v5829_v1 = vsub.f32 %v21081_v28, %v21082_v18  ;;  %v5836_v52 = vsub.f32 %v21083_v51, %v21084_v25  ;;  %v5816_v59 = vand.u32 4294901760, %v5815_v57  ;;  %v21085_v47 = vld [vmem:[#allocation38_spill] sm:$0xff] }
 0x5b4   :  { %12234 = vmatprep.subr.bf16.mxu1 %v17985_v38  ;;  %21070 = vst [vmem:[#allocation263_spill] sm:$0xff] %v18002_v14  ;;  %v5710_v40 = vsub.f32 %v21079_v11, %v21080_v53  ;;  %v12241_v63 = vpack.c.bf16 %v5809_v6, %v5802_v50  ;;  %v5704_v22 = vand.u32 4294901760, %v5703_v35  ;;  %v21086_v3 = vand.u32 4294901760, %v21085_v47  ;;  %v21089_v50 = vld [vmem:[#allocation138_spill] sm:$0xff] }
 0x5b5   :  { %v12243_v17 = vpack.c.bf16 %v5697_v12, %v5690_v41  ;;  %v5830_v18 = vand.u32 4294901760, %v5829_v1  ;;  %v5837_v0 = vand.u32 4294901760, %v5836_v52  ;;  %v21090_v57 = vand.u32 4294901760, %v21089_v50  ;;  %v21093_v52 = vld [vmem:[#allocation53_spill] sm:$0xff] }
 0x5b6   :  { %v5711_v53 = vand.u32 4294901760, %v5710_v40  ;;  %v5724_v10 = vsub.f32 %v21085_v47, %v21086_v3  ;;  %v21094_v12 = vand.u32 4294901760, %v21093_v52 }
 0x5b7   :  { %12236 = vmatpush3.bf16.msra.mxu1 %v18002_v14  ;;  %v12249_v41 = vpack.c.bf16 %v5837_v0, %v5830_v18  ;;  %v21101_v0 = vld [vmem:[#allocation64_spill] sm:$0xff] }
 0x5b8   :  { %12238 = vmatprep.subr.bf16.mxu1 %v12237_v21  ;;  %v5823_v21 = vand.u32 4294901760, %v5822_v26  ;;  %v5843_v26 = vsub.f32 %v21089_v50, %v21090_v57  ;;  %v12247_v40 = vpack.c.bf16 %v5711_v53, %v5704_v22  ;;  %v5731_v3 = vsub.f32 %v21093_v52, %v21094_v12  ;;  %v21103_v18 = vld [vmem:[#allocation60_spill] sm:$0xff] }
 0x5b9   :  { %v21102_v22 = vand.u32 4294901760, %v21101_v0 }
 0x5ba   :  { %5666 = vmatmul.mubr.f32.vlgmr.msra.gmra.mrb[24].mxu1 %v5665_v44  ;;  %v5717_v44 = vsub.f32 %v21087_v23, %v21088_v43  ;;  %v12245_v6 = vpack.c.bf16 %v5823_v21, %v5816_v59  ;;  %v21095_v43 = vld [vmem:[#allocation47_spill] sm:$0xff]  ;;  %v5844_v33 = vand.u32 4294901760, %v5843_v26 }
 0x5bb   :  { %12240 = vmatpush3.bf16.msra.mxu1 %v12239_v55  ;;  %5896 = vmatprep.mubr.f32.mxu1 %v17840_v31  ;;  %v21091_v55 = vld [vmem:[#allocation140_spill] sm:$0xff]  ;;  %v21096_v59 = vand.u32 4294901760, %v21095_v43  ;;  %v5745_v53 = vsub.f32 %v21101_v0, %v21102_v22  ;;  %v21105_v31 = vld [vmem:[#allocation5_spill] sm:$0xff] }
 0x5bc   :  { %12242 = vmatprep.subr.bf16.mxu1 %v12241_v63  ;;  %v21092_v25 = vand.u32 4294901760, %v21091_v55  ;;  %v5725_v63 = vand.u32 4294901760, %v5724_v10  ;;  %v5718_v1 = vand.u32 4294901760, %v5717_v44  ;;  %v21104_v44 = vand.u32 4294901760, %v21103_v18 }
 0x5bd   :  { %v5738_v21 = vsub.f32 %v21095_v43, %v21096_v59  ;;  %v21106_v14 = vand.u32 4294901760, %v21105_v31  ;;  %v5746_v22 = vand.u32 4294901760, %v5745_v53 }
 0x5be   :  { %v5850_v35 = vsub.f32 %v21091_v55, %v21092_v25  ;;  %v5857_v25 = vsub.f32 %v21097_v37, %v21098_v60  ;;  %v5752_v12 = vsub.f32 %v21103_v18, %v21104_v44  ;;  %v12251_v26 = vpack.c.bf16 %v5725_v63, %v5718_v1  ;;  %v21109_v63 = vld [vmem:[#allocation74_spill] sm:$0xff] }
 0x5bf   :  { %12244 = vmatpush3.bf16.msra.mxu1 %v12243_v17  ;;  %v21099_v17 = vld [vmem:[#allocation141_spill] sm:$0xff]  ;;  %v5739_v59 = vand.u32 4294901760, %v5738_v21  ;;  %v5871_v60 = vsub.f32 %v21105_v31, %v21106_v14  ;;  %v21110_v1 = vand.u32 4294901760, %v21109_v63  ;;  %v21111_v21 = vld [vmem:[#allocation68_spill] sm:$0xff] }
 0x5c0   :  { %12246 = vmatprep.subr.bf16.mxu1 %v12245_v6  ;;  %v5851_v57 = vand.u32 4294901760, %v5850_v35  ;;  %v21100_v6 = vand.u32 4294901760, %v21099_v17  ;;  %v5732_v35 = vand.u32 4294901760, %v5731_v3  ;;  %v5858_v24 = vand.u32 4294901760, %v5857_v25  ;;  %v21113_v25 = vld [vmem:[#allocation2_spill] sm:$0xff] }
 0x5c1   :  { %v5753_v42 = vand.u32 4294901760, %v5752_v12  ;;  %v5872_v44 = vand.u32 4294901760, %v5871_v60  ;;  %v5759_v3 = vsub.f32 %v21109_v63, %v21110_v1  ;;  %v21112_v34 = vand.u32 4294901760, %v21111_v21  ;;  %v21117_v1 = vld [vmem:[#allocation86_spill] sm:$0xff] }
 0x5c2   :  { %v5864_v10 = vsub.f32 %v21099_v17, %v21100_v6  ;;  %v12253_v38 = vpack.c.bf16 %v5851_v57, %v5844_v33  ;;  %v12255_v56 = vpack.c.bf16 %v5739_v59, %v5732_v35  ;;  %v21118_v54 = vand.u32 4294901760, %v21117_v1 }
 0x5c3   :  { %12248 = vmatpush3.bf16.msra.mxu1 %v12247_v40  ;;  %v21107_v40 = vld [vmem:[#allocation9_spill] sm:$0xff]  ;;  %v5766_v33 = vsub.f32 %v21111_v21, %v21112_v34  ;;  %v12259_v12 = vpack.c.bf16 %v5753_v42, %v5746_v22  ;;  %v5760_v59 = vand.u32 4294901760, %v5759_v3 }
 0x5c4   :  { %12250 = vmatprep.subr.bf16.mxu1 %v12249_v41  ;;  %v5865_v6 = vand.u32 4294901760, %v5864_v10  ;;  %v21108_v41 = vand.u32 4294901760, %v21107_v40  ;;  %v21114_v10 = vand.u32 4294901760, %v21113_v25  ;;  %v5773_v34 = vsub.f32 %v21117_v1, %v21118_v54 }
 0x5c5   :  { %v5767_v60 = vand.u32 4294901760, %v5766_v33 }
 0x5c6   :  { %v5878_v32 = vsub.f32 %v21107_v40, %v21108_v41  ;;  %v12257_v14 = vpack.c.bf16 %v5865_v6, %v5858_v24  ;;  %v5885_v41 = vsub.f32 %v21113_v25, %v21114_v10  ;;  %v21119_v24 = vld [vmem:[#allocation82_spill] sm:$0xff]  ;;  %v5774_v22 = vand.u32 4294901760, %v5773_v34  ;;  %v21144_v34 = vld [vmem:[#allocation12_spill] sm:$0xff] }
 0x5c7   :  { %12252 = vmatpush3.bf16.msra.mxu1 %v12251_v26  ;;  %v21115_v26 = vld [vmem:[#allocation11_spill] sm:$0xff]  ;;  %v12263_v42 = vpack.c.bf16 %v5767_v60, %v5760_v59  ;;  %v21141_v59 = vld [vmem:[#allocation49_spill] sm:$0xff]  ;;  %v21142_v60 = vld [vmem:[#allocation20_spill] sm:$0xff] }
 0x5c8   :  { %12254 = vmatprep.subr.bf16.mxu1 %v12253_v38  ;;  %v5879_v57 = vand.u32 4294901760, %v5878_v32  ;;  %v21116_v38 = vand.u32 4294901760, %v21115_v26  ;;  %v21120_v32 = vand.u32 4294901760, %v21119_v24  ;;  %v5886_v39 = vand.u32 4294901760, %v5885_v41 }
 0x5c9   :  { %v21135_v41 = vand.u32 4294901760, %v17939_v36 }
 0x5ca   :  { %v5892_v53 = vsub.f32 %v21115_v26, %v21116_v38  ;;  %v5780_v6 = vsub.f32 %v21119_v24, %v21120_v32  ;;  %v12261_v10 = vpack.c.bf16 %v5879_v57, %v5872_v44  ;;  %v12271_v44 = vpack.c.bf16 %v21053_v61, %v21051_v62  ;;  %v21133_v57 = vld [vmem:[#allocation263_spill] sm:$0xff]  ;;  %v21137_v38 = vld [vmem:[#allocation220_spill] sm:$0xff] }
 0x5cb   :  { %12256 = vmatpush3.bf16.msra.mxu1 %v12255_v56  ;;  %v12285_v62 = vpack.c.bf16 %v21091_v55, %v21089_v50  ;;  %v12289_v61 = vpack.c.bf16 %v21099_v17, %v21097_v37  ;;  %v12297_v37 = vpack.c.bf16 %v21115_v26, %v21113_v25  ;;  %v21126_v50 = vld [vmem:[#allocation95_spill] sm:$0xff]  ;;  %v21127_v55 = vld [vmem:[#allocation116_spill] sm:$0xff] }
 0x5cc   :  { %12258 = vmatprep.subr.bf16.mxu1 %v12257_v14  ;;  %v5893_v2 = vand.u32 4294901760, %v5892_v53  ;;  %v5781_v3 = vand.u32 4294901760, %v5780_v6  ;;  %v12269_v14 = vpack.c.bf16 %v21039_v9, %v21037_v45  ;;  %v12281_v45 = vpack.c.bf16 %v21083_v51, %v21081_v28  ;;  %v21134_v25 = vld [vmem:[#allocation56_spill] sm:$0xff]  ;;  %v21136_v26 = vld [vmem:[#allocation7_spill] sm:$0xff] }
 0x5cd   :  { %v9987_v35 = vpop.f32.mrb[12].mxu1  ;;  %v12283_v9 = vpack.c.bf16 %v21085_v47, %v21087_v23  ;;  %v12291_v51 = vpack.c.bf16 %v21103_v18, %v21101_v0  ;;  %v12293_v23 = vpack.c.bf16 %v21107_v40, %v21105_v31  ;;  %v21121_v31 = vand.u32 4294901760, %v17845_v49  ;;  %v21125_v47 = vld [vmem:[#allocation228_spill] sm:$0xff]  ;;  %v21129_v0 = vld [vmem:[#allocation158_spill] sm:$0xff]  ;;  %v21130_v18 = vld [vmem:[#allocation219_spill] sm:$0xff] }
 0x5ce   :  { %v9988_v7 = vpop.f32.mrb[13].mxu1  ;;  %v12265_v33 = vpack.c.bf16 %v5893_v2, %v5886_v39  ;;  %v12267_v54 = vpack.c.bf16 %v5781_v3, %v5774_v22  ;;  %v12275_v2 = vpack.c.bf16 %v21064_v58, %v21071_v15  ;;  %v12277_v39 = vpack.c.bf16 %v21075_v4, %v21073_v20  ;;  %v21122_v20 = vld [vmem:[#allocation245_spill] sm:$0xff]  ;;  %v21138_v53 = vld [vmem:[#allocation79_spill] sm:$0xff] }
 0x5cf   :  { %v9989_v30 = vadd.f32 %v9988_v7, %v9987_v35  ;;  %12260 = vmatpush3.bf16.msra.mxu1 %v12259_v12  ;;  %v12279_v7 = vpack.c.bf16 %v21079_v11, %v21077_v29  ;;  %v12287_v4 = vpack.c.bf16 %v21095_v43, %v21093_v52  ;;  %v12295_v58 = vpack.c.bf16 %v21111_v21, %v21109_v63  ;;  %v21123_v29 = vld [vmem:[#allocation222_spill] sm:$0xff]  ;;  %v21124_v11 = vld [vmem:[#allocation248_spill] sm:$0xff]  ;;  %v21131_v63 = vld [vmem:[#allocation225_spill] sm:$0xff] }
 0x5d0   :  { %12262 = vmatprep.subr.bf16.mxu1 %v12261_v10  ;;  %v12299_v15 = vpack.c.bf16 %v21119_v24, %v21117_v1  ;;  %v21128_v52 = vld [vmem:[#allocation186_spill] sm:$0xff]  ;;  %v21132_v21 = vld [vmem:[#allocation265_spill] sm:$0xff]  ;;  %v21140_v35 = vld [vmem:[#allocation104_spill] sm:$0xff] }
 0x5d1   :  { %v4806_v56 = vadd.f32 %v9989_v30, %v17976_v27  ;;  %v12273_v30 = vpack.c.bf16 %v21055_v8, %v21062_v13  ;;  %v21139_v12 = vld [vmem:[#allocation37_spill] sm:$0xff]  ;;  %v21143_v1 = vld [vmem:[#allocation58_spill] sm:$0xff] }
 0x5d2   :  { %v21146_v24 = vld [vmem:[#allocation22_spill] sm:$0xff]  ;;  %v21149_v3 = vld [vmem:[#allocation93_spill] sm:$0xff] }
 0x5d3   :  { %12264 = vmatpush3.bf16.msra.mxu1 %v12263_v42  ;;  %v21148_v42 = vld [vmem:[#allocation23_spill] sm:$0xff] }
 0x5d4   :  { %12266 = vmatprep.subr.bf16.mxu1 %v12265_v33  ;;  %v21150_v33 = vld [vmem:[#allocation18_spill] sm:$0xff] }
 0x5d7   :  { %12268 = vmatpush3.bf16.msra.mxu1 %v12267_v54  ;;  %v21151_v54 = vld [vmem:[#allocation110_spill] sm:$0xff] }
 0x5d8   :  { %12270 = vmatprep.subr.bf16.mxu1 %v12269_v14 }
 0x5da   :  { %5898 = vmatmul.mubr.f32.vlgmr.msra.gmra.mrb[26].mxu1 %v17922_v46 }
 0x5db   :  { %12272 = vmatpush3.bf16.msra.mxu1 %v12271_v44  ;;  %6033 = vmatprep.mubr.f32.mxu1 %v17845_v49 }
 0x5dc   :  { %12274 = vmatprep.subr.bf16.mxu1 %v12273_v30 }
 0x5df   :  { %12276 = vmatpush3.bf16.msra.mxu1 %v12275_v2 }
 0x5e0   :  { %12278 = vmatprep.subr.bf16.mxu1 %v12277_v39 }
 0x5e3   :  { %12280 = vmatpush3.bf16.msra.mxu1 %v12279_v7  ;;  %v21153_v7 = vld [vmem:[#allocation14_spill] sm:$0xff] }
 0x5e4   :  { %12282 = vmatprep.subr.bf16.mxu1 %v12281_v45  ;;  %v6425_v45 = vand.u32 4294901760, %v21153_v7 }
 0x5e7   :  { %12284 = vmatpush3.bf16.msra.mxu1 %v12283_v9  ;;  %v21154_v9 = vld [vmem:[#allocation3_spill] sm:$0xff] }
 0x5e8   :  { %12286 = vmatprep.subr.bf16.mxu1 %v12285_v62  ;;  %v6422_v62 = vand.u32 4294901760, %v21154_v9 }
 0x5eb   :  { %12288 = vmatpush3.bf16.msra.mxu1 %v12287_v4  ;;  %v21155_v4 = vld [vmem:[#allocation50_spill] sm:$0xff] }
 0x5ec   :  { %12290 = vmatprep.subr.bf16.mxu1 %v12289_v61  ;;  %v21156_v61 = vand.u32 4294901760, %v21155_v4 }
 0x5ed   :  { %v10022_v27 = vpop.f32.mrb[14].mxu1 }
 0x5ee   :  { %v10023_v28 = vpop.f32.mrb[15].mxu1 }
 0x5ef   :  { %v10024_v8 = vadd.f32 %v10023_v28, %v10022_v27  ;;  %12292 = vmatpush3.bf16.msra.mxu1 %v12291_v51  ;;  %v21157_v27 = vld [vmem:[#allocation46_spill] sm:$0xff] }
 0x5f0   :  { %12294 = vmatprep.subr.bf16.mxu1 %v12293_v23  ;;  %v21158_v51 = vand.u32 4294901760, %v21157_v27 }
 0x5f1   :  { %v5038_v13 = vadd.f32 %v10024_v8, %v4806_v56  ;;  %v21147_v56 = vld [vmem:[#allocation81_spill] sm:$0xff]  ;;  %v21159_v8 = vld [vmem:[#allocation15_spill] sm:$0xff] }
 0x5f2   :  { %v18191_v28 = vpack.c.bf16 %v21158_v51, %v21156_v61 }
 0x5f3   :  { %12296 = vmatpush3.bf16.msra.mxu1 %v12295_v58  ;;  %v21160_v58 = vld [vmem:[#allocation24_spill] sm:$0xff] }
 0x5f4   :  { %12298 = vmatprep.subr.bf16.mxu1 %v12297_v37  ;;  %v6428_v37 = vand.u32 4294901760, %v21160_v58 }
 0x5f7   :  { %12300 = vmatpush3.bf16.msra.mxu1 %v12299_v15  ;;  %v18197_v15 = vpack.c.bf16 %v6425_v45, %v6422_v62 }
 0x5f8   :  { %12302 = vmatprep.subr.bf16.mxu1 %v17860_v19 }
 0x5fa   :  { %6036 = vmatmul.mubr.f32.vlgmr.msra.gmra.mrb[28].mxu1 %v17939_v36  ;;  %v21145_v36 = vld [vmem:[#allocation73_spill] sm:$0xff] }
 0x5fb   :  { %12304 = vmatpush3.bf16.msra.mxu1 %v17868_v5  ;;  %6140 = vmatprep.mubr.f32.mxu1 %v21121_v31  ;;  %v21161_v31 = vld [vmem:[#allocation54_spill] sm:$0xff] }
 0x5fc   :  { %12306 = vmatprep.subr.bf16.mxu1 %v17875_v16 }
 0x5ff   :  { %12308 = vmatpush3.bf16.msra.mxu1 %v17883_v48 }
 0x600   :  { %12310 = vmatprep.subr.bf16.mxu1 %v21122_v20 }
 0x603   :  { %12312 = vmatpush3.bf16.msra.mxu1 %v21123_v29 }
 0x604   :  { %12314 = vmatprep.subr.bf16.mxu1 %v21124_v11 }
 0x607   :  { %12316 = vmatpush3.bf16.msra.mxu1 %v21125_v47 }
 0x608   :  { %12318 = vmatprep.subr.bf16.mxu1 %v21126_v50 }
 0x60b   :  { %12320 = vmatpush3.bf16.msra.mxu1 %v21127_v55 }
 0x60c   :  { %12322 = vmatprep.subr.bf16.mxu1 %v21128_v52 }
 0x60d   :  { %v10057_v49 = vpop.f32.mrb[16].mxu1 }
 0x60e   :  { %v10058_v43 = vpop.f32.mrb[17].mxu1 }
 0x60f   :  { %v10059_v17 = vadd.f32 %v10058_v43, %v10057_v49  ;;  %12324 = vmatpush3.bf16.msra.mxu1 %v21129_v0 }
 0x610   :  { %12326 = vmatprep.subr.bf16.mxu1 %v21130_v18 }
 0x611   :  { %v5176_v40 = vadd.f32 %v10059_v17, %v5038_v13  ;;  %v6431_v13 = vand.u32 4294901760, %v21159_v8  ;;  %v21167_v17 = vld [vmem:[#allocation59_spill] sm:$0xff] }
 0x613   :  { %12328 = vmatpush3.bf16.msra.mxu1 %v21131_v63  ;;  %v18210_v43 = vpack.c.bf16 %v6431_v13, %v6428_v37  ;;  %v18278_v51 = vsub.f32 %v21159_v8, %v6431_v13  ;;  %v21201_v13 = vld [vmem:[#allocation65_spill] sm:$0xff] }
 0x614   :  { %12330 = vmatprep.subr.bf16.mxu1 %v21132_v21 }
 0x617   :  { %12332 = vmatpush3.bf16.msra.mxu1 %v21133_v57 }
 0x618   :  { %12334 = vmatprep.subr.bf16.mxu1 %v21134_v25 }
 0x61a   :  { %6144 = vmatmul.mubr.f32.vlgmr.msra.gmra.mrb[30].mxu1 %v21135_v41 }
 0x61b   :  { %12336 = vmatpush3.bf16.msra.mxu1 %v21136_v26  ;;  %6310 = vmatprep.mubr.f32.mxu1 %v21137_v38  ;;  %v21175_v26 = vld [vmem:[#allocation66_spill] sm:$0xff] }
 0x61c   :  { %12338 = vmatprep.subr.bf16.mxu1 %v21138_v53  ;;  %v21177_v53 = vld [vmem:[#allocation61_spill] sm:$0xff] }
 0x61f   :  { %12340 = vmatpush3.bf16.msra.mxu1 %v21139_v12  ;;  %v21178_v12 = vand.u32 4294901760, %v21177_v53  ;;  %v21203_v53 = vld [vmem:[#allocation89_spill] sm:$0xff] }
 0x620   :  { %12342 = vmatprep.subr.bf16.mxu1 %v21140_v35 }
 0x623   :  { %12344 = vmatpush3.bf16.msra.mxu1 %v21141_v59  ;;  %v3572_v59 = vld [vmem:[%s18740_s3 + $0x10] sm:$0xff] }
 0x624   :  { %12346 = vmatprep.subr.bf16.mxu1 %v21142_v60  ;;  %v21180_v60 = vld [vmem:[#allocation35_spill] sm:$0xff] }
 0x627   :  { %12348 = vmatpush3.bf16.msra.mxu1 %v21143_v1  ;;  %v6449_v1 = vand.u32 4294901760, %v21180_v60 }
 0x628   :  { %12350 = vmatprep.subr.bf16.mxu1 %v21144_v34  ;;  %v21181_v34 = vld [vmem:[#allocation36_spill] sm:$0xff] }
 0x62b   :  { %12352 = vmatpush3.bf16.msra.mxu1 %v21145_v36  ;;  %v19653_v36 = vand.u32 4294901760, %v21181_v34 }
 0x62c   :  { %12354 = vmatprep.subr.bf16.mxu1 %v21146_v24 }
 0x62d   :  { %v10092_v32 = vpop.f32.mrb[18].mxu1 }
 0x62e   :  { %v10093_v6 = vpop.f32.mrb[19].mxu1 }
 0x62f   :  { %v10094_v10 = vadd.f32 %v10093_v6, %v10092_v32  ;;  %12356 = vmatpush3.bf16.msra.mxu1 %v21147_v56  ;;  %v21183_v32 = vld [vmem:[#allocation71_spill] sm:$0xff] }
 0x630   :  { %12358 = vmatprep.subr.bf16.mxu1 %v21148_v42  ;;  %v21184_v6 = vand.u32 4294901760, %v21183_v32 }
 0x631   :  { %v5284_v22 = vadd.f32 %v10094_v10, %v5176_v40  ;;  %v21185_v10 = vld [vmem:[#allocation69_spill] sm:$0xff] }
 0x632   :  { %v21186_v56 = vand.u32 4294901760, %v21185_v10 }
 0x633   :  { %12360 = vmatpush3.bf16.msra.mxu1 %v21149_v3  ;;  %v18248_v3 = vsub.f32 %v21154_v9, %v6422_v62  ;;  %v21193_v62 = vld [vmem:[#allocation72_spill] sm:$0xff] }
 0x634   :  { %12362 = vmatprep.subr.bf16.mxu1 %v21150_v33  ;;  %v18243_v42 = vpack.c.bf16 %v21186_v56, %v21184_v6  ;;  %v18252_v33 = vsub.f32 %v21153_v7, %v6425_v45  ;;  %v21194_v4 = vand.u32 4294901760, %v21193_v62  ;;  %v18273_v45 = vsub.f32 %v21160_v58, %v6428_v37  ;;  %v21199_v37 = vld [vmem:[#allocation63_spill] sm:$0xff] }
 0x635   :  { %v19646_v27 = vand.u32 4294901760, %v18248_v3 }
 0x636   :  { %21187 = vst [vmem:[#allocation83_spill] sm:$0xff] %v18243_v42 }
 0x637   :  { %12364 = vmatpush3.bf16.msra.mxu1 %v21151_v54  ;;  %v21188_v54 = vld [vmem:[#allocation39_spill] sm:$0xff] }
 0x638   :  { %12366 = vmatprep.subr.bf16.mxu1 %v17860_v19  ;;  %v3573_v19 = vld [vmem:[%s18740_s3 + $0x18] sm:$0xff] }
 0x639   :  { %v18167_v14 = vand.u32 4294901760, %v3573_v19 }
 0x63a   :  { %6312 = vmatmul.mubr.f32.vlgmr.msra.gmra.mrb[32].mxu1 %v17922_v46 }
 0x63b   :  { %12368 = vmatpush3.bf16.msra.mxu1 %v17868_v5  ;;  %6414 = vmatprep.mubr.f32.mxu1 %v21137_v38  ;;  %21152 = vst [vmem:[#allocation268_spill] sm:$0xff] %v18167_v14  ;;  %v18172_v5 = vsub.f32 %v3573_v19, %v18167_v14  ;;  %v21176_v38 = vand.u32 4294901760, %v21175_v26  ;;  %v19652_v19 = vand.u32 4294901760, %v21188_v54 }
 0x63c   :  { %12370 = vmatprep.subr.bf16.mxu1 %v17875_v16 }
 0x63d   :  { %v19647_v30 = vand.u32 4294901760, %v18172_v5  ;;  %v18228_v35 = vpack.c.bf16 %v21178_v12, %v21176_v38  ;;  %v21204_v12 = vand.u32 4294901760, %v21203_v53 }
 0x63f   :  { %12372 = vmatpush3.bf16.msra.mxu1 %v17883_v48  ;;  %v6520_v39 = vsub.f32 %v18172_v5, %v19647_v30  ;;  %21179 = vst [vmem:[#allocation188_spill] sm:$0xff] %v18228_v35 }
 0x640   :  { %12374 = vmatprep.subr.bf16.mxu1 %v21122_v20  ;;  %v21162_v20 = vand.u32 4294901760, %v21161_v31 }
 0x641   :  { %v6521_v23 = vand.u32 4294901760, %v6520_v39  ;;  %v21191_v39 = vld [vmem:[#allocation78_spill] sm:$0xff] }
 0x642   :  { %v21192_v9 = vand.u32 4294901760, %v21191_v39 }
 0x643   :  { %12376 = vmatpush3.bf16.msra.mxu1 %v21123_v29  ;;  %v21163_v29 = vld [vmem:[#allocation52_spill] sm:$0xff] }
 0x644   :  { %12378 = vmatprep.subr.bf16.mxu1 %v21124_v11  ;;  %v21164_v11 = vand.u32 4294901760, %v21163_v29  ;;  %v18267_v61 = vpack.c.bf16 %v21194_v4, %v21192_v9  ;;  %v21208_v9 = vld [vmem:[#allocation99_spill] sm:$0xff] }
 0x645   :  { %v19657_v62 = vand.u32 4294901760, %v21208_v9 }
 0x646   :  { %21195 = vst [vmem:[#allocation269_spill] sm:$0xff] %v18267_v61 }
 0x647   :  { %12380 = vmatpush3.bf16.msra.mxu1 %v21125_v47  ;;  %v18204_v47 = vpack.c.bf16 %v21164_v11, %v21162_v20  ;;  %v21197_v20 = vld [vmem:[#allocation45_spill] sm:$0xff]  ;;  %v19649_v11 = vand.u32 4294901760, %v18252_v33 }
 0x648   :  { %12382 = vmatprep.subr.bf16.mxu1 %v21126_v50  ;;  %v21165_v50 = vld [vmem:[#allocation27_spill] sm:$0xff]  ;;  %v19648_v29 = vand.u32 4294901760, %v21197_v20 }
 0x64b   :  { %12384 = vmatpush3.bf16.msra.mxu1 %v21127_v55  ;;  %v6437_v55 = vand.u32 4294901760, %v21165_v50 }
 0x64c   :  { %12386 = vmatprep.subr.bf16.mxu1 %v21128_v52  ;;  %v21166_v52 = vld [vmem:[#allocation29_spill] sm:$0xff] }
 0x64d   :  { %v10127_v16 = vpop.f32.mrb[20].mxu1  ;;  %v6434_v49 = vand.u32 4294901760, %v21166_v52  ;;  %v18297_v26 = vsub.f32 %v21165_v50, %v6437_v55  ;;  %v6537_v50 = vsub.f32 %v18248_v3, %v19646_v27 }
 0x64e   :  { %v10128_v48 = vpop.f32.mrb[21].mxu1 }
 0x64f   :  { %v10129_v44 = vadd.f32 %v10128_v48, %v10127_v16  ;;  %12388 = vmatpush3.bf16.msra.mxu1 %v21129_v0  ;;  %v21168_v0 = vand.u32 4294901760, %v21167_v17  ;;  %v18222_v41 = vpack.c.bf16 %v6437_v55, %v6434_v49  ;;  %v21189_v16 = vld [vmem:[#allocation40_spill] sm:$0xff]  ;;  %v18307_v56 = vsub.f32 %v21166_v52, %v6434_v49 }
 0x650   :  { %12390 = vmatprep.subr.bf16.mxu1 %v21130_v18  ;;  %v19651_v48 = vand.u32 4294901760, %v21189_v16  ;;  %v19654_v55 = vand.u32 4294901760, %v18273_v45  ;;  %v6544_v52 = vsub.f32 %v18252_v33, %v19649_v11  ;;  %v19658_v49 = vand.u32 4294901760, %v18278_v51  ;;  %v21216_v11 = vld [vmem:[#allocation119_spill] sm:$0xff] }
 0x651   :  { %v18178_v2 = vadd.f32 %v10129_v44, %v5284_v22  ;;  %21174 = vst [vmem:[#allocation184_spill] sm:$0xff] %v18222_v41  ;;  %v18245_v22 = vand.u32 4294901760, %v3572_v59  ;;  %v18261_v44 = vpack.c.bf16 %v6449_v1, %v19653_v36 }
 0x652   :  { %v18288_v58 = vpack.c.bf16 %v19652_v19, %v19651_v48  ;;  %v21218_v19 = vld [vmem:[#allocation118_spill] sm:$0xff] }
 0x653   :  { %12392 = vmatpush3.bf16.msra.mxu1 %v21131_v63  ;;  %v21172_v63 = vld [vmem:[#allocation31_spill] sm:$0xff]  ;;  %21190 = vst [vmem:[#allocation272_spill] sm:$0xff] %v18261_v44  ;;  %v18270_v7 = vsub.f32 %v3572_v59, %v18245_v22  ;;  %v21205_v59 = vld [vmem:[#allocation80_spill] sm:$0xff]  ;;  %v21219_v36 = vand.u32 4294901760, %v21218_v19 }
 0x654   :  { %12394 = vmatprep.subr.bf16.mxu1 %v21132_v21  ;;  %v6443_v21 = vand.u32 4294901760, %v21172_v63  ;;  %21198 = vst [vmem:[#allocation278_spill] sm:$0xff] %v18288_v58  ;;  %v21206_v32 = vand.u32 4294901760, %v21205_v59 }
 0x655   :  { %v19655_v10 = vand.u32 4294901760, %v18270_v7 }
 0x656   :  { %v18303_v6 = vpack.c.bf16 %v21206_v32, %v21204_v12  ;;  %v21211_v12 = vld [vmem:[#allocation103_spill] sm:$0xff]  ;;  %v21213_v32 = vld [vmem:[#allocation90_spill] sm:$0xff] }
 0x657   :  { %12396 = vmatpush3.bf16.msra.mxu1 %v21133_v57  ;;  %v21173_v57 = vld [vmem:[#allocation33_spill] sm:$0xff]  ;;  %v21212_v59 = vand.u32 4294901760, %v21211_v12  ;;  %v21214_v27 = vand.u32 4294901760, %v21213_v32 }
 0x658   :  { %12398 = vmatprep.subr.bf16.mxu1 %v18191_v28  ;;  %v6440_v25 = vand.u32 4294901760, %v21173_v57  ;;  %21207 = vst [vmem:[#allocation277_spill] sm:$0xff] %v18303_v6 }
 0x659   :  { %v18334_v30 = vpack.c.bf16 %v21214_v27, %v21212_v59  ;;  %v6551_v27 = vsub.f32 %v18273_v45, %v19654_v55 }
 0x65a   :  { %6416 = vmatmul.mubr.f32.vlgmr.msra.gmra.mrb[34].mxu1 %v17922_v46  ;;  %v21169_v46 = vld [vmem:[#allocation55_spill] sm:$0xff]  ;;  %v18237_v24 = vpack.c.bf16 %v6443_v21, %v6440_v25 }
 0x65b   :  { %12400 = vmatpush3.bf16.msra.mxu1 %v18197_v15  ;;  %6522 = vmatprep.mubr.f32.mxu1 %v6521_v23  ;;  %v21170_v18 = vand.u32 4294901760, %v21169_v46  ;;  %v21196_v23 = vld [vmem:[#allocation43_spill] sm:$0xff]  ;;  %v21202_v46 = vand.u32 4294901760, %v21201_v13  ;;  %21215 = vst [vmem:[#allocation189_spill] sm:$0xff] %v18334_v30 }
 0x65c   :  { %12402 = vmatprep.subr.bf16.mxu1 %v18204_v47  ;;  %21182 = vst [vmem:[#allocation226_spill] sm:$0xff] %v18237_v24  ;;  %v19650_v31 = vand.u32 4294901760, %v21196_v23 }
 0x65d   :  { %v18216_v40 = vpack.c.bf16 %v21170_v18, %v21168_v0  ;;  %v21200_v0 = vand.u32 4294901760, %v21199_v37  ;;  %v6656_v18 = vsub.f32 %v21201_v13, %v21202_v46 }
 0x65e   :  { %v18320_v4 = vpack.c.bf16 %v19650_v31, %v19648_v29  ;;  %v6526_v29 = vsub.f32 %v18270_v7, %v19655_v10  ;;  %v21217_v31 = vand.u32 4294901760, %v21216_v11 }
 0x65f   :  { %21171 = vst [vmem:[#allocation266_spill] sm:$0xff] %v18216_v40  ;;  %12404 = vmatpush3.bf16.msra.mxu1 %v18210_v43  ;;  %v6649_v8 = vsub.f32 %v21199_v37, %v21200_v0  ;;  %v6657_v53 = vand.u32 4294901760, %v6656_v18  ;;  %v18349_v18 = vsub.f32 %v21173_v57, %v6440_v25  ;;  %v21221_v57 = vld [vmem:[#allocation127_spill] sm:$0xff] }
 0x660   :  { %12406 = vmatprep.subr.bf16.mxu1 %v18216_v40  ;;  %21209 = vst [vmem:[#allocation273_spill] sm:$0xff] %v18320_v4  ;;  %v6663_v48 = vsub.f32 %v21216_v11, %v21217_v31  ;;  %v6545_v31 = vand.u32 4294901760, %v6544_v52  ;;  %v21222_v25 = vand.u32 4294901760, %v21221_v57  ;;  %v6527_v10 = vand.u32 4294901760, %v6526_v29 }
 0x662   :  { %v6677_v59 = vsub.f32 %v21221_v57, %v21222_v25 }
 0x663   :  { %12408 = vmatpush3.bf16.msra.mxu1 %v18222_v41 }
 0x664   :  { %12410 = vmatprep.subr.bf16.mxu1 %v18228_v35 }
 0x667   :  { %12412 = vmatpush3.bf16.msra.mxu1 %v18237_v24 }
 0x668   :  { %12414 = vmatprep.subr.bf16.mxu1 %v18243_v42 }
 0x66b   :  { %12416 = vmatpush3.bf16.msra.mxu1 %v18261_v44 }
 0x66c   :  { %12418 = vmatprep.subr.bf16.mxu1 %v18267_v61 }
 0x66d   :  { %v10162_v17 = vpop.f32.mrb[22].mxu1 }
 0x66e   :  { %v10163_v38 = vpop.f32.mrb[23].mxu1 }
 0x66f   :  { %v10164_v39 = vadd.f32 %v10163_v38, %v10162_v17  ;;  %12420 = vmatpush3.bf16.msra.mxu1 %v18288_v58  ;;  %v21210_v17 = vld [vmem:[#allocation109_spill] sm:$0xff]  ;;  %v6650_v38 = vand.u32 4294901760, %v6649_v8  ;;  %v18346_v8 = vsub.f32 %v21172_v63, %v6443_v21  ;;  %v6558_v21 = vsub.f32 %v18278_v51, %v19658_v49  ;;  %v21238_v58 = vld [vmem:[#allocation139_spill] sm:$0xff] }
 0x670   :  { %12422 = vmatprep.subr.bf16.mxu1 %v18303_v6  ;;  %v19656_v0 = vand.u32 4294901760, %v21210_v17  ;;  %v21239_v61 = vand.u32 4294901760, %v21238_v58 }
 0x671   :  { %v18328_v46 = vadd.f32 %v10164_v39, %v18178_v2  ;;  %v6670_v2 = vsub.f32 %v21218_v19, %v21219_v36  ;;  %v6538_v39 = vand.u32 4294901760, %v6537_v50  ;;  %v21223_v50 = vld [vmem:[#allocation124_spill] sm:$0xff]  ;;  %v12429_v55 = vpack.c.bf16 %v6657_v53, %v6650_v38 }
 0x672   :  { %v18362_v63 = vpack.c.bf16 %v19657_v62, %v19656_v0  ;;  %v21224_v52 = vand.u32 4294901760, %v21223_v50  ;;  %v6664_v36 = vand.u32 4294901760, %v6663_v48  ;;  %v18376_v0 = vsub.f32 %v21180_v60, %v6449_v1 }
 0x673   :  { %12424 = vmatpush3.bf16.msra.mxu1 %v18320_v4  ;;  %v6671_v12 = vand.u32 4294901760, %v6670_v2  ;;  %v21225_v62 = vand.u32 4294901760, %v21181_v34  ;;  %v12431_v29 = vpack.c.bf16 %v6545_v31, %v6538_v39  ;;  %v6552_v48 = vand.u32 4294901760, %v6551_v27 }
 0x674   :  { %12426 = vmatprep.subr.bf16.mxu1 %v18334_v30  ;;  %21220 = vst [vmem:[#allocation192_spill] sm:$0xff] %v18362_v63  ;;  %v6684_v32 = vsub.f32 %v21223_v50, %v21224_v52  ;;  %v21226_v38 = vand.u32 4294901760, %v18307_v56  ;;  %v6559_v60 = vand.u32 4294901760, %v6558_v21  ;;  %v6678_v1 = vand.u32 4294901760, %v6677_v59 }
 0x675   :  { %v18381_v49 = vsub.f32 %v21181_v34, %v21225_v62  ;;  %v21227_v30 = vand.u32 4294901760, %v18297_v26  ;;  %v12433_v62 = vpack.c.bf16 %v6671_v12, %v6664_v36  ;;  %v21232_v31 = vand.u32 4294901760, %v18349_v18 }
 0x676   :  { %v6565_v53 = vsub.f32 %v18307_v56, %v21226_v38  ;;  %v6685_v2 = vand.u32 4294901760, %v6684_v32  ;;  %v21233_v59 = vand.u32 4294901760, %v18346_v8  ;;  %v21234_v12 = vand.u32 4294901760, %v21188_v54 }
 0x677   :  { %12428 = vmatpush3.bf16.msra.mxu1 %v18362_v63  ;;  %v6572_v34 = vsub.f32 %v18297_v26, %v21227_v30  ;;  %v21228_v63 = vld [vmem:[#allocation131_spill] sm:$0xff]  ;;  %v6579_v21 = vsub.f32 %v18349_v18, %v21232_v31  ;;  %v12435_v38 = vpack.c.bf16 %v6559_v60, %v6552_v48  ;;  %v21242_v60 = vand.u32 4294901760, %v21196_v23 }
 0x678   :  { %12430 = vmatprep.subr.bf16.mxu1 %v12429_v55  ;;  %v21229_v25 = vand.u32 4294901760, %v21228_v63  ;;  %v21230_v55 = vld [vmem:[#allocation129_spill] sm:$0xff]  ;;  %v6586_v32 = vsub.f32 %v18346_v8, %v21233_v59  ;;  %v18410_v36 = vsub.f32 %v21188_v54, %v21234_v12  ;;  %v6566_v31 = vand.u32 4294901760, %v6565_v53 }
 0x679   :  { %v21231_v39 = vand.u32 4294901760, %v21230_v55  ;;  %v6573_v59 = vand.u32 4294901760, %v6572_v34  ;;  %v6712_v54 = vsub.f32 %v21238_v58, %v21239_v61  ;;  %v6580_v12 = vand.u32 4294901760, %v6579_v21 }
 0x67a   :  { %6528 = vmatmul.mubr.f32.vlgmr.msra.gmra.mrb[36].mxu1 %v6527_v10  ;;  %v6691_v52 = vsub.f32 %v21228_v63, %v21229_v25  ;;  %v21235_v25 = vand.u32 4294901760, %v21189_v16  ;;  %v21236_v10 = vld [vmem:[#allocation137_spill] sm:$0xff]  ;;  %v6587_v44 = vand.u32 4294901760, %v6586_v32  ;;  %v21241_v53 = vand.u32 4294901760, %v18376_v0 }
 0x67b   :  { %v6698_v27 = vsub.f32 %v21230_v55, %v21231_v39  ;;  %12432 = vmatpush3.bf16.msra.mxu1 %v12431_v29  ;;  %6758 = vmatprep.mubr.f32.mxu1 %v18167_v14  ;;  %v12437_v39 = vpack.c.bf16 %v6685_v2, %v6678_v1  ;;  %v21237_v6 = vand.u32 4294901760, %v21236_v10  ;;  %v18432_v1 = vsub.f32 %v21196_v23, %v21242_v60 }
 0x67c   :  { %v18415_v29 = vsub.f32 %v21189_v16, %v21235_v25  ;;  %12434 = vmatprep.subr.bf16.mxu1 %v12433_v62  ;;  %v6692_v30 = vand.u32 4294901760, %v6691_v52  ;;  %v21240_v16 = vand.u32 4294901760, %v18381_v49  ;;  %v6600_v52 = vsub.f32 %v18376_v0, %v21241_v53  ;;  %v21246_v25 = vld [vmem:[#allocation145_spill] sm:$0xff] }
 0x67d   :  { %v6699_v4 = vand.u32 4294901760, %v6698_v27  ;;  %v6705_v14 = vsub.f32 %v21236_v10, %v21237_v6  ;;  %v21243_v6 = vand.u32 4294901760, %v21197_v20  ;;  %v19675_v34 = vand.u32 4294901760, %v18410_v36  ;;  %v21244_v27 = vld [vmem:[#allocation147_spill] sm:$0xff] }
 0x67e   :  { %v6593_v48 = vsub.f32 %v18381_v49, %v21240_v16  ;;  %v19676_v2 = vand.u32 4294901760, %v18415_v29  ;;  %v12439_v62 = vpack.c.bf16 %v6573_v59, %v6566_v31  ;;  %v21245_v21 = vand.u32 4294901760, %v21244_v27 }
 0x67f   :  { %12436 = vmatpush3.bf16.msra.mxu1 %v12435_v38  ;;  %v18437_v61 = vsub.f32 %v21197_v20, %v21243_v6  ;;  %v21247_v38 = vand.u32 4294901760, %v21246_v25  ;;  %v12441_v16 = vpack.c.bf16 %v6699_v4, %v6692_v30  ;;  %v6706_v53 = vand.u32 4294901760, %v6705_v14 }
 0x680   :  { %12438 = vmatprep.subr.bf16.mxu1 %v12437_v39  ;;  %v6719_v32 = vsub.f32 %v21244_v27, %v21245_v21  ;;  %v6713_v60 = vand.u32 4294901760, %v6712_v54  ;;  %v12443_v20 = vpack.c.bf16 %v6587_v44, %v6580_v12  ;;  %v6594_v6 = vand.u32 4294901760, %v6593_v48 }
 0x681   :  { %v6726_v23 = vsub.f32 %v21246_v25, %v21247_v38  ;;  %v6601_v39 = vand.u32 4294901760, %v6600_v52  ;;  %v6607_v31 = vsub.f32 %v18415_v29, %v19676_v2  ;;  %v6614_v59 = vsub.f32 %v18410_v36, %v19675_v34  ;;  %v21250_v52 = vld [vmem:[#allocation152_spill] sm:$0xff]  ;;  %v21252_v34 = vld [vmem:[#allocation149_spill] sm:$0xff] }
 0x682   :  { %v21248_v14 = vand.u32 4294901760, %v21208_v9  ;;  %v21249_v44 = vand.u32 4294901760, %v21210_v17  ;;  %v6720_v54 = vand.u32 4294901760, %v6719_v32  ;;  %v12445_v48 = vpack.c.bf16 %v6713_v60, %v6706_v53 }
 0x683   :  { %12440 = vmatpush3.bf16.msra.mxu1 %v12439_v62  ;;  %v6727_v12 = vand.u32 4294901760, %v6726_v23  ;;  %v21251_v62 = vand.u32 4294901760, %v21250_v52  ;;  %v21253_v2 = vand.u32 4294901760, %v21252_v34  ;;  %v6615_v38 = vand.u32 4294901760, %v6614_v59 }
 0x684   :  { %12442 = vmatprep.subr.bf16.mxu1 %v12441_v16  ;;  %v18458_v4 = vsub.f32 %v21208_v9, %v21248_v14  ;;  %v18463_v30 = vsub.f32 %v21210_v17, %v21249_v44  ;;  %v12447_v9 = vpack.c.bf16 %v6601_v39, %v6594_v6  ;;  %v6608_v14 = vand.u32 4294901760, %v6607_v31  ;;  %v21258_v39 = vld [vmem:[#allocation157_spill] sm:$0xff] }
 0x685   :  { %v6733_v16 = vsub.f32 %v21250_v52, %v21251_v62  ;;  %v6740_v21 = vsub.f32 %v21252_v34, %v21253_v2  ;;  %v21254_v42 = vand.u32 4294901760, %v18432_v1  ;;  %v12449_v32 = vpack.c.bf16 %v6727_v12, %v6720_v54 }
 0x686   :  { %v21255_v23 = vand.u32 4294901760, %v18437_v61  ;;  %v6634_v60 = vand.u32 4294901760, %v18463_v30  ;;  %v21259_v31 = vand.u32 4294901760, %v21258_v39 }
 0x687   :  { %12444 = vmatpush3.bf16.msra.mxu1 %v12443_v20  ;;  %v6628_v17 = vsub.f32 %v18432_v1, %v21254_v42  ;;  %v6734_v62 = vand.u32 4294901760, %v6733_v16  ;;  %v6741_v2 = vand.u32 4294901760, %v6740_v21  ;;  %v21256_v20 = vld [vmem:[#allocation155_spill] sm:$0xff]  ;;  %v12451_v42 = vpack.c.bf16 %v6615_v38, %v6608_v14 }
 0x688   :  { %12446 = vmatprep.subr.bf16.mxu1 %v12445_v48  ;;  %v6621_v53 = vsub.f32 %v18437_v61, %v21255_v23  ;;  %v21257_v48 = vand.u32 4294901760, %v21256_v20  ;;  %v6754_v59 = vsub.f32 %v21258_v39, %v21259_v31  ;;  %v6635_v44 = vsub.f32 %v18463_v30, %v6634_v60 }
 0x689   :  { %v6629_v23 = vand.u32 4294901760, %v6628_v17  ;;  %v21260_v21 = vand.u32 4294901760, %v18458_v4  ;;  %v12461_v31 = vpack.c.bf16 %v21201_v13, %v21199_v37  ;;  %v12473_v37 = vpack.c.bf16 %v21230_v55, %v21228_v63 }
 0x68a   :  { %v6747_v6 = vsub.f32 %v21256_v20, %v21257_v48  ;;  %v6622_v12 = vand.u32 4294901760, %v6621_v53  ;;  %v12453_v48 = vpack.c.bf16 %v6741_v2, %v6734_v62  ;;  %v6755_v41 = vand.u32 4294901760, %v6754_v59  ;;  %v21263_v2 = vld [vmem:[#allocation184_spill] sm:$0xff] }
 0x68b   :  { %12448 = vmatpush3.bf16.msra.mxu1 %v12447_v9  ;;  %v6642_v16 = vsub.f32 %v18458_v4, %v21260_v21  ;;  %v6636_v14 = vand.u32 4294901760, %v6635_v44  ;;  %v12463_v62 = vpack.c.bf16 %v18252_v33, %v18248_v3  ;;  %v12479_v13 = vpack.c.bf16 %v18376_v0, %v18381_v49  ;;  %v21267_v59 = vld [vmem:[#allocation272_spill] sm:$0xff]  ;;  %v21270_v21 = vld [vmem:[#allocation277_spill] sm:$0xff] }
 0x68c   :  { %12450 = vmatprep.subr.bf16.mxu1 %v12449_v32  ;;  %v6748_v35 = vand.u32 4294901760, %v6747_v6  ;;  %v12455_v9 = vpack.c.bf16 %v6629_v23, %v6622_v12  ;;  %v12483_v63 = vpack.c.bf16 %v18410_v36, %v18415_v29  ;;  %v12485_v55 = vpack.c.bf16 %v21252_v34, %v21250_v52  ;;  %v21262_v52 = vld [vmem:[#allocation266_spill] sm:$0xff] }
 0x68d   :  { %v10197_v54 = vpop.f32.mrb[24].mxu1  ;;  %v6643_v17 = vand.u32 4294901760, %v6642_v16  ;;  %v21261_v34 = vand.u32 4294901760, %v18172_v5  ;;  %v21265_v6 = vld [vmem:[#allocation226_spill] sm:$0xff] }
 0x68e   :  { %v10198_v24 = vpop.f32.mrb[25].mxu1  ;;  %v12457_v32 = vpack.c.bf16 %v6755_v41, %v6748_v35  ;;  %v12467_v41 = vpack.c.bf16 %v18278_v51, %v18273_v45  ;;  %v12469_v35 = vpack.c.bf16 %v21223_v50, %v21221_v57  ;;  %v21269_v23 = vld [vmem:[#allocation278_spill] sm:$0xff] }
 0x68f   :  { %v10199_v40 = vadd.f32 %v10198_v24, %v10197_v54  ;;  %12452 = vmatpush3.bf16.msra.mxu1 %v12451_v42  ;;  %v12459_v53 = vpack.c.bf16 %v6643_v17, %v6636_v14  ;;  %v12471_v24 = vpack.c.bf16 %v18297_v26, %v18307_v56  ;;  %v21268_v42 = vld [vmem:[#allocation269_spill] sm:$0xff]  ;;  %v21275_v17 = vand.u32 4294901760, %v18248_v3 }
 0x690   :  { %12454 = vmatprep.subr.bf16.mxu1 %v12453_v48  ;;  %v21271_v48 = vld [vmem:[#allocation273_spill] sm:$0xff]  ;;  %v21283_v3 = vand.u32 4294901760, %v18307_v56  ;;  %v21291_v56 = vld [vmem:[#allocation204_spill] sm:$0xff] }
 0x691   :  { %v5668_v38 = vadd.f32 %v10199_v40, %v18328_v46  ;;  %v12465_v40 = vpack.c.bf16 %v21218_v19, %v21216_v11  ;;  %v12475_v19 = vpack.c.bf16 %v18346_v8, %v18349_v18  ;;  %v12477_v11 = vpack.c.bf16 %v21238_v58, %v21236_v10  ;;  %v21274_v14 = vld [vmem:[#allocation77_spill] sm:$0xff] }
 0x692   :  { %v12481_v46 = vpack.c.bf16 %v21246_v25, %v21244_v27  ;;  %v12487_v10 = vpack.c.bf16 %v18432_v1, %v18437_v61  ;;  %v12489_v27 = vpack.c.bf16 %v21258_v39, %v21256_v20  ;;  %v12491_v25 = vpack.c.bf16 %v18458_v4, %v18463_v30  ;;  %v21264_v20 = vld [vmem:[#allocation188_spill] sm:$0xff]  ;;  %v21266_v39 = vld [vmem:[#allocation83_spill] sm:$0xff] }
 0x693   :  { %12456 = vmatpush3.bf16.msra.mxu1 %v12455_v9  ;;  %v21273_v9 = vld [vmem:[#allocation192_spill] sm:$0xff] }
 0x694   :  { %12458 = vmatprep.subr.bf16.mxu1 %v12457_v32  ;;  %v21276_v32 = vand.u32 4294901760, %v18252_v33  ;;  %v21284_v33 = vand.u32 4294901760, %v18297_v26  ;;  %v21302_v30 = vld [vmem:[#allocation168_spill] sm:$0xff] }
 0x697   :  { %12460 = vmatpush3.bf16.msra.mxu1 %v12459_v53  ;;  %v12527_v53 = vpack.c.bf16 %v21276_v32, %v21275_v17  ;;  %v21319_v17 = vld [vmem:[#allocation183_spill] sm:$0xff] }
 0x698   :  { %12462 = vmatprep.subr.bf16.mxu1 %v12461_v31  ;;  %v21277_v31 = vand.u32 4294901760, %v18270_v7  ;;  %v21320_v32 = vand.u32 4294901760, %v21319_v17  ;;  %v21365_v17 = vld [vmem:[#allocation237_spill] sm:$0xff] }
 0x69a   :  { %6760 = vmatmul.mubr.f32.vlgmr.msra.gmra.mrb[38].mxu1 %v18245_v22 }
 0x69b   :  { %12464 = vmatpush3.bf16.msra.mxu1 %v12463_v62  ;;  %6895 = vmatprep.mubr.f32.mxu1 %v18172_v5  ;;  %v21278_v62 = vld [vmem:[#allocation268_spill] sm:$0xff] }
 0x69c   :  { %12466 = vmatprep.subr.bf16.mxu1 %v12465_v40  ;;  %v21279_v40 = vld [vmem:[#allocation167_spill] sm:$0xff] }
 0x69f   :  { %12468 = vmatpush3.bf16.msra.mxu1 %v12467_v41  ;;  %v21280_v41 = vand.u32 4294901760, %v18273_v45  ;;  %v21288_v45 = vld [vmem:[#allocation179_spill] sm:$0xff] }
 0x6a0   :  { %12470 = vmatprep.subr.bf16.mxu1 %v12469_v35  ;;  %v21281_v35 = vand.u32 4294901760, %v18278_v51  ;;  %v21289_v51 = vand.u32 4294901760, %v18381_v49  ;;  %v21295_v49 = vand.u32 4294901760, %v18437_v61  ;;  %v21300_v61 = vld [vmem:[#allocation165_spill] sm:$0xff] }
 0x6a3   :  { %12472 = vmatpush3.bf16.msra.mxu1 %v12471_v24  ;;  %v12531_v24 = vpack.c.bf16 %v21281_v35, %v21280_v41  ;;  %v21325_v41 = vld [vmem:[#allocation161_spill] sm:$0xff] }
 0x6a4   :  { %12474 = vmatprep.subr.bf16.mxu1 %v12473_v37  ;;  %v21282_v37 = vld [vmem:[#allocation170_spill] sm:$0xff]  ;;  %v21326_v35 = vld [vmem:[#allocation253_spill] sm:$0xff] }
 0x6a7   :  { %12476 = vmatpush3.bf16.msra.mxu1 %v12475_v19  ;;  %v12535_v19 = vpack.c.bf16 %v21284_v33, %v21283_v3  ;;  %v21329_v3 = vld [vmem:[#allocation111_spill] sm:$0xff] }
 0x6a8   :  { %12478 = vmatprep.subr.bf16.mxu1 %v12477_v11  ;;  %v21286_v11 = vand.u32 4294901760, %v18349_v18 }
 0x6ab   :  { %12480 = vmatpush3.bf16.msra.mxu1 %v12479_v13  ;;  %v21287_v13 = vand.u32 4294901760, %v18346_v8 }
 0x6ac   :  { %12482 = vmatprep.subr.bf16.mxu1 %v12481_v46 }
 0x6ad   :  { %v10232_v57 = vpop.f32.mrb[26].mxu1  ;;  %v12539_v46 = vpack.c.bf16 %v21287_v13, %v21286_v11  ;;  %v21330_v11 = vld [vmem:[#allocation166_spill] sm:$0xff]  ;;  %v21331_v13 = vld [vmem:[#allocation125_spill] sm:$0xff] }
 0x6ae   :  { %v10233_v50 = vpop.f32.mrb[27].mxu1 }
 0x6af   :  { %v10234_v44 = vadd.f32 %v10233_v50, %v10232_v57  ;;  %12484 = vmatpush3.bf16.msra.mxu1 %v12483_v63  ;;  %v21290_v57 = vand.u32 4294901760, %v18376_v0  ;;  %v21292_v50 = vand.u32 4294901760, %v18415_v29  ;;  %v21296_v0 = vand.u32 4294901760, %v18432_v1 }
 0x6b0   :  { %12486 = vmatprep.subr.bf16.mxu1 %v12485_v55  ;;  %v21293_v55 = vand.u32 4294901760, %v18410_v36  ;;  %v21298_v29 = vand.u32 4294901760, %v18458_v4  ;;  %v21301_v4 = vld [vmem:[#allocation182_spill] sm:$0xff] }
 0x6b1   :  { %v5900_v58 = vadd.f32 %v10234_v44, %v5668_v38  ;;  %v21272_v38 = vld [vmem:[#allocation189_spill] sm:$0xff]  ;;  %v12543_v63 = vpack.c.bf16 %v21290_v57, %v21289_v51  ;;  %v21333_v51 = vld [vmem:[#allocation146_spill] sm:$0xff]  ;;  %v21334_v57 = vld [vmem:[#allocation151_spill] sm:$0xff] }
 0x6b2   :  { %v12547_v18 = vpack.c.bf16 %v21293_v55, %v21292_v50  ;;  %v12555_v36 = vpack.c.bf16 %v21298_v29, %v6634_v60  ;;  %v21303_v60 = vld [vmem:[#allocation172_spill] sm:$0xff]  ;;  %v21342_v29 = vld [vmem:[#allocation178_spill] sm:$0xff] }
 0x6b3   :  { %12488 = vmatpush3.bf16.msra.mxu1 %v12487_v10 }
 0x6b4   :  { %12490 = vmatprep.subr.bf16.mxu1 %v12489_v27  ;;  %v12551_v27 = vpack.c.bf16 %v21296_v0, %v21295_v49  ;;  %v21338_v49 = vld [vmem:[#allocation276_spill] sm:$0xff]  ;;  %v21339_v0 = vld [vmem:[#allocation291_spill] sm:$0xff] }
 0x6b7   :  { %12492 = vmatpush3.bf16.msra.mxu1 %v12491_v25  ;;  %v21297_v25 = vld [vmem:[#allocation216_spill] sm:$0xff] }
 0x6b8   :  { %12494 = vmatprep.subr.bf16.mxu1 %v18191_v28 }
 0x6ba   :  { %6898 = vmatmul.mubr.f32.vlgmr.msra.gmra.mrb[40].mxu1 %v18270_v7  ;;  %v21285_v7 = vld [vmem:[#allocation174_spill] sm:$0xff] }
 0x6bb   :  { %12496 = vmatpush3.bf16.msra.mxu1 %v18197_v15  ;;  %7002 = vmatprep.mubr.f32.mxu1 %v21261_v34  ;;  %v21304_v34 = vld [vmem:[#allocation252_spill] sm:$0xff] }
 0x6bc   :  { %12498 = vmatprep.subr.bf16.mxu1 %v18204_v47 }
 0x6bf   :  { %12500 = vmatpush3.bf16.msra.mxu1 %v18210_v43 }
 0x6c0   :  { %12502 = vmatprep.subr.bf16.mxu1 %v21262_v52 }
 0x6c3   :  { %12504 = vmatpush3.bf16.msra.mxu1 %v21263_v2 }
 0x6c4   :  { %12506 = vmatprep.subr.bf16.mxu1 %v21264_v20 }
 0x6c7   :  { %12508 = vmatpush3.bf16.msra.mxu1 %v21265_v6 }
 0x6c8   :  { %12510 = vmatprep.subr.bf16.mxu1 %v21266_v39 }
 0x6cb   :  { %12512 = vmatpush3.bf16.msra.mxu1 %v21267_v59 }
 0x6cc   :  { %12514 = vmatprep.subr.bf16.mxu1 %v21268_v42 }
 0x6cd   :  { %v10267_v5 = vpop.f32.mrb[28].mxu1 }
 0x6ce   :  { %v10268_v54 = vpop.f32.mrb[29].mxu1 }
 0x6cf   :  { %v10269_v12 = vadd.f32 %v10268_v54, %v10267_v5  ;;  %12516 = vmatpush3.bf16.msra.mxu1 %v21269_v23  ;;  %v21311_v54 = vld [vmem:[#allocation258_spill] sm:$0xff] }
 0x6d0   :  { %12518 = vmatprep.subr.bf16.mxu1 %v21270_v21 }
 0x6d1   :  { %v6038_v16 = vadd.f32 %v10269_v12, %v5900_v58  ;;  %v21294_v58 = vld [vmem:[#allocation210_spill] sm:$0xff]  ;;  %v21312_v12 = vld [vmem:[#allocation259_spill] sm:$0xff] }
 0x6d3   :  { %12520 = vmatpush3.bf16.msra.mxu1 %v21271_v48 }
 0x6d4   :  { %12522 = vmatprep.subr.bf16.mxu1 %v21272_v38 }
 0x6d7   :  { %12524 = vmatpush3.bf16.msra.mxu1 %v21273_v9 }
 0x6d8   :  { %12526 = vmatprep.subr.bf16.mxu1 %v21274_v14  ;;  %v21318_v14 = vld [vmem:[#allocation250_spill] sm:$0xff] }
 0x6da   :  { %7006 = vmatmul.mubr.f32.vlgmr.msra.gmra.mrb[42].mxu1 %v21277_v31  ;;  %v21322_v31 = vld [vmem:[#allocation153_spill] sm:$0xff] }
 0x6db   :  { %12528 = vmatpush3.bf16.msra.mxu1 %v12527_v53  ;;  %7172 = vmatprep.mubr.f32.mxu1 %v21278_v62  ;;  %v21321_v53 = vld [vmem:[#allocation150_spill] sm:$0xff] }
 0x6dc   :  { %12530 = vmatprep.subr.bf16.mxu1 %v21279_v40  ;;  %v21324_v40 = vld [vmem:[#allocation159_spill] sm:$0xff] }
 0x6df   :  { %12532 = vmatpush3.bf16.msra.mxu1 %v12531_v24  ;;  %v21327_v24 = vld [vmem:[#allocation160_spill] sm:$0xff] }
 0x6e0   :  { %12534 = vmatprep.subr.bf16.mxu1 %v21282_v37  ;;  %v21328_v37 = vld [vmem:[#allocation96_spill] sm:$0xff] }
 0x6e3   :  { %12536 = vmatpush3.bf16.msra.mxu1 %v12535_v19 }
 0x6e4   :  { %12538 = vmatprep.subr.bf16.mxu1 %v21285_v7 }
 0x6e7   :  { %12540 = vmatpush3.bf16.msra.mxu1 %v12539_v46 }
 0x6e8   :  { %12542 = vmatprep.subr.bf16.mxu1 %v21288_v45  ;;  %v21332_v45 = vld [vmem:[#allocation142_spill] sm:$0xff] }
 0x6eb   :  { %12544 = vmatpush3.bf16.msra.mxu1 %v12543_v63  ;;  %v21335_v63 = vld [vmem:[#allocation256_spill] sm:$0xff] }
 0x6ec   :  { %12546 = vmatprep.subr.bf16.mxu1 %v21291_v56  ;;  %v21336_v56 = vand.u32 4294901760, %v21335_v63 }
 0x6ed   :  { %v10302_v26 = vpop.f32.mrb[30].mxu1 }
 0x6ee   :  { %v10303_v44 = vpop.f32.mrb[31].mxu1 }
 0x6ef   :  { %v10304_v8 = vadd.f32 %v10303_v44, %v10302_v26  ;;  %12548 = vmatpush3.bf16.msra.mxu1 %v12547_v18  ;;  %v10617_v44 = vpop.f32.mrb[64].mxu0 }
 0x6f0   :  { %12550 = vmatprep.subr.bf16.mxu1 %v21294_v58 }
 0x6f1   :  { %v6146_v10 = vadd.f32 %v10304_v8, %v6038_v16  ;;  %v21314_v16 = vld [vmem:[#allocation264_spill] sm:$0xff]  ;;  %v10618_v8 = vpop.f32.mrb[65].mxu0 }
 0x6f2   :  { %v18660_v58 = vadd.f32 %v10618_v8, %v10617_v44 }
 0x6f3   :  { %12552 = vmatpush3.bf16.msra.mxu1 %v12551_v27  ;;  %v21340_v27 = vld [vmem:[#allocation282_spill] sm:$0xff] }
 0x6f4   :  { %12554 = vmatprep.subr.bf16.mxu1 %v21297_v25  ;;  %v21341_v25 = vld [vmem:[#allocation285_spill] sm:$0xff] }
 0x6f7   :  { %12556 = vmatpush3.bf16.msra.mxu1 %v12555_v36  ;;  %v21343_v36 = vld [vmem:[#allocation173_spill] sm:$0xff] }
 0x6f8   :  { %12558 = vmatprep.subr.bf16.mxu1 %v18191_v28 }
 0x6fa   :  { %7174 = vmatmul.mubr.f32.vlgmr.msra.gmra.mrb[44].mxu1 %v18245_v22 }
 0x6fb   :  { %12560 = vmatpush3.bf16.msra.mxu1 %v18197_v15  ;;  %7276 = vmatprep.mubr.f32.mxu1 %v21278_v62  ;;  %v21323_v62 = vld [vmem:[#allocation156_spill] sm:$0xff] }
 0x6fc   :  { %12562 = vmatprep.subr.bf16.mxu1 %v18204_v47 }
 0x6ff   :  { %12564 = vmatpush3.bf16.msra.mxu1 %v18210_v43  ;;  %v21299_v43 = vld [vmem:[#allocation162_spill] sm:$0xff] }
 0x700   :  { %12566 = vmatprep.subr.bf16.mxu1 %v21262_v52  ;;  %v21305_v52 = vld [vmem:[#allocation254_spill] sm:$0xff] }
 0x703   :  { %12568 = vmatpush3.bf16.msra.mxu1 %v21263_v2  ;;  %v21306_v2 = vld [vmem:[#allocation107_spill] sm:$0xff] }
 0x704   :  { %12570 = vmatprep.subr.bf16.mxu1 %v21264_v20  ;;  %v21307_v20 = vld [vmem:[#allocation163_spill] sm:$0xff] }
 0x707   :  { %12572 = vmatpush3.bf16.msra.mxu1 %v21265_v6  ;;  %v21308_v6 = vld [vmem:[#allocation169_spill] sm:$0xff] }
 0x708   :  { %12574 = vmatprep.subr.bf16.mxu1 %v21266_v39  ;;  %v21309_v39 = vld [vmem:[#allocation255_spill] sm:$0xff] }
 0x70b   :  { %12576 = vmatpush3.bf16.msra.mxu1 %v21267_v59 }
 0x70c   :  { %12578 = vmatprep.subr.bf16.mxu1 %v21268_v42 }
 0x70d   :  { %v10337_v28 = vpop.f32.mrb[32].mxu1 }
 0x70e   :  { %v10338_v15 = vpop.f32.mrb[33].mxu1 }
 0x70f   :  { %v10339_v1 = vadd.f32 %v10338_v15, %v10337_v28  ;;  %12580 = vmatpush3.bf16.msra.mxu1 %v21269_v23  ;;  %v21344_v28 = vld [vmem:[#allocation164_spill] sm:$0xff] }
 0x710   :  { %12582 = vmatprep.subr.bf16.mxu1 %v21270_v21  ;;  %v21313_v21 = vld [vmem:[#allocation262_spill] sm:$0xff]  ;;  %v21345_v15 = vld [vmem:[#allocation180_spill] sm:$0xff] }
 0x711   :  { %v6314_v47 = vadd.f32 %v10339_v1, %v6146_v10  ;;  %v21337_v10 = vld [vmem:[#allocation271_spill] sm:$0xff]  ;;  %v21346_v1 = vld [vmem:[#allocation288_spill] sm:$0xff] }
 0x713   :  { %12584 = vmatpush3.bf16.msra.mxu1 %v21271_v48  ;;  %v21315_v48 = vld [vmem:[#allocation267_spill] sm:$0xff] }
 0x714   :  { %12586 = vmatprep.subr.bf16.mxu1 %v21272_v38  ;;  %v21316_v38 = vld [vmem:[#allocation249_spill] sm:$0xff] }
 0x717   :  { %12588 = vmatpush3.bf16.msra.mxu1 %v21273_v9  ;;  %v21317_v9 = vld [vmem:[#allocation117_spill] sm:$0xff] }
 0x718   :  { %12622 = vmatprep.subr.bf16.mxu1 %v21299_v43  ;;  %v21348_v43 = vld [vmem:[#allocation292_spill] sm:$0xff] }
 0x71a   :  { %7278 = vmatmul.mubr.f32.vlgmr.msra.gmra.mrb[46].mxu1 %v18245_v22  ;;  %v21310_v22 = vld [vmem:[#allocation257_spill] sm:$0xff] }
 0x71b   :  { %12624 = vmatpush3.bf16.msra.mxu1 %v21300_v61  ;;  %7817 = vmatprep.mubr.f32.mxu1 %v21301_v4 }
 0x71c   :  { %12626 = vmatprep.subr.bf16.mxu1 %v21302_v30 }
 0x71f   :  { %12628 = vmatpush3.bf16.msra.mxu1 %v21303_v60  ;;  %v21349_v60 = vld [vmem:[#allocation294_spill] sm:$0xff] }
 0x720   :  { %12630 = vmatprep.subr.bf16.mxu1 %v21304_v34  ;;  %v21350_v34 = vld [vmem:[#allocation295_spill] sm:$0xff] }
 0x723   :  { %12632 = vmatpush3.bf16.msra.mxu1 %v21305_v52 }
 0x724   :  { %12634 = vmatprep.subr.bf16.mxu1 %v21306_v2  ;;  %v10687_v2 = vpop.f32.mrb[66].mxu0 }
 0x727   :  { %12636 = vmatpush3.bf16.msra.mxu1 %v21307_v20  ;;  %v10688_v20 = vpop.f32.mrb[67].mxu0 }
 0x728   :  { %12638 = vmatprep.subr.bf16.mxu1 %v21308_v6  ;;  %v21351_v6 = vld [vmem:[#allocation296_spill] sm:$0xff] }
 0x72b   :  { %12640 = vmatpush3.bf16.msra.mxu1 %v21309_v39  ;;  %v18680_v39 = vadd.f32 %v10688_v20, %v10687_v2 }
 0x72c   :  { %12642 = vmatprep.subr.bf16.mxu1 %v21310_v22  ;;  %v21352_v22 = vld [vmem:[#allocation106_spill] sm:$0xff] }
 0x72d   :  { %v10372_v59 = vpop.f32.mrb[34].mxu1 }
 0x72e   :  { %v10373_v42 = vpop.f32.mrb[35].mxu1 }
 0x72f   :  { %v10374_v5 = vadd.f32 %v10373_v42, %v10372_v59  ;;  %12644 = vmatpush3.bf16.msra.mxu1 %v21311_v54  ;;  %v21353_v59 = vld [vmem:[#allocation197_spill] sm:$0xff]  ;;  %v21354_v42 = vld [vmem:[#allocation260_spill] sm:$0xff] }
 0x730   :  { %12646 = vmatprep.subr.bf16.mxu1 %v21312_v12  ;;  %v21356_v54 = vld [vmem:[#allocation181_spill] sm:$0xff] }
 0x731   :  { %v6418_v23 = vadd.f32 %v10374_v5, %v6314_v47  ;;  %v21347_v47 = vld [vmem:[#allocation290_spill] sm:$0xff]  ;;  %v21355_v5 = vld [vmem:[#allocation280_spill] sm:$0xff]  ;;  %v21357_v12 = vld [vmem:[#allocation293_spill] sm:$0xff] }
 0x733   :  { %12648 = vmatpush3.bf16.msra.mxu1 %v21313_v21  ;;  %v21359_v21 = vld [vmem:[#allocation246_spill] sm:$0xff] }
 0x734   :  { %12650 = vmatprep.subr.bf16.mxu1 %v21314_v16  ;;  %v21360_v16 = vld [vmem:[#allocation261_spill] sm:$0xff] }
 0x737   :  { %12652 = vmatpush3.bf16.msra.mxu1 %v21315_v48  ;;  %v21361_v48 = vld [vmem:[#allocation112_spill] sm:$0xff] }
 0x738   :  { %12686 = vmatprep.subr.bf16.mxu1 %v21316_v38 }
 0x73a   :  { %7819 = vmatmul.mubr.f32.vlgmr.msra.gmra.mrb[48].mxu1 %v21317_v9 }
 0x73b   :  { %12688 = vmatpush3.bf16.msra.mxu1 %v21318_v14  ;;  %8061 = vmatprep.mubr.f32.mxu1 %v21320_v32  ;;  %v21366_v32 = vld [vmem:[#allocation275_spill] sm:$0xff] }
 0x73c   :  { %12690 = vmatprep.subr.bf16.mxu1 %v21321_v53 }
 0x73f   :  { %12692 = vmatpush3.bf16.msra.mxu1 %v21322_v31 }
 0x740   :  { %12694 = vmatprep.subr.bf16.mxu1 %v21323_v62 }
 0x743   :  { %12696 = vmatpush3.bf16.msra.mxu1 %v21324_v40 }
 0x744   :  { %12698 = vmatprep.subr.bf16.mxu1 %v21325_v41 }
 0x747   :  { %12700 = vmatpush3.bf16.msra.mxu1 %v21326_v35 }
 0x748   :  { %12702 = vmatprep.subr.bf16.mxu1 %v21327_v24 }
 0x74b   :  { %12704 = vmatpush3.bf16.msra.mxu1 %v21328_v37 }
 0x74c   :  { %12706 = vmatprep.subr.bf16.mxu1 %v21329_v3 }
 0x74d   :  { %v10407_v33 = vpop.f32.mrb[36].mxu1 }
 0x74e   :  { %v10408_v19 = vpop.f32.mrb[37].mxu1 }
 0x74f   :  { %v10409_v7 = vadd.f32 %v10408_v19, %v10407_v33  ;;  %12708 = vmatpush3.bf16.msra.mxu1 %v21330_v11  ;;  %v21370_v33 = vld [vmem:[#allocation287_spill] sm:$0xff] }
 0x750   :  { %12710 = vmatprep.subr.bf16.mxu1 %v21331_v13 }
 0x751   :  { %v6530_v46 = vadd.f32 %v10409_v7, %v6418_v23  ;;  %v21358_v23 = vand.u32 4294901760, %v21357_v12  ;;  %v21371_v7 = vld [vmem:[#allocation214_spill] sm:$0xff] }
 0x753   :  { %12712 = vmatpush3.bf16.msra.mxu1 %v21332_v45 }
 0x754   :  { %12714 = vmatprep.subr.bf16.mxu1 %v21333_v51 }
 0x757   :  { %12716 = vmatpush3.bf16.msra.mxu1 %v21334_v57 }
 0x758   :  { %12750 = vmatprep.subr.bf16.mxu1 %v21316_v38  ;;  %v21362_v38 = vld [vmem:[#allocation274_spill] sm:$0xff] }
 0x75a   :  { %8065 = vmatmul.mubr.f32.vlgmr.msra.gmra.mrb[50].mxu1 %v21336_v56 }
 0x75b   :  { %12752 = vmatpush3.bf16.msra.mxu1 %v21318_v14  ;;  %8335 = vmatprep.mubr.f32.mxu1 %v21301_v4  ;;  %v21364_v14 = vld [vmem:[#allocation202_spill] sm:$0xff] }
 0x75c   :  { %12754 = vmatprep.subr.bf16.mxu1 %v21321_v53  ;;  %v21367_v53 = vld [vmem:[#allocation286_spill] sm:$0xff] }
 0x75f   :  { %12756 = vmatpush3.bf16.msra.mxu1 %v21322_v31 }
 0x760   :  { %12758 = vmatprep.subr.bf16.mxu1 %v21323_v62 }
 0x763   :  { %12760 = vmatpush3.bf16.msra.mxu1 %v21324_v40 }
 0x764   :  { %12762 = vmatprep.subr.bf16.mxu1 %v21325_v41  ;;  %v21368_v41 = vld [vmem:[#allocation205_spill] sm:$0xff] }
 0x767   :  { %12764 = vmatpush3.bf16.msra.mxu1 %v21326_v35  ;;  %v21369_v35 = vld [vmem:[#allocation171_spill] sm:$0xff] }
 0x768   :  { %12766 = vmatprep.subr.bf16.mxu1 %v21327_v24 }
 0x76b   :  { %12768 = vmatpush3.bf16.msra.mxu1 %v21328_v37  ;;  %v10757_v37 = vpop.f32.mrb[68].mxu0 }
 0x76c   :  { %12770 = vmatprep.subr.bf16.mxu1 %v21329_v3  ;;  %v10758_v3 = vpop.f32.mrb[69].mxu0 }
 0x76d   :  { %v10442_v26 = vpop.f32.mrb[38].mxu1  ;;  %v10759_v19 = vadd.f32 %v10758_v3, %v10757_v37  ;;  %v10827_v56 = vpop.f32.mrb[70].mxu0 }
 0x76e   :  { %v10443_v50 = vpop.f32.mrb[39].mxu1 }
 0x76f   :  { %v10444_v55 = vadd.f32 %v10443_v50, %v10442_v26  ;;  %12772 = vmatpush3.bf16.msra.mxu1 %v21330_v11  ;;  %v21372_v11 = vld [vmem:[#allocation144_spill] sm:$0xff]  ;;  %v10828_v26 = vpop.f32.mrb[71].mxu0 }
 0x770   :  { %12774 = vmatprep.subr.bf16.mxu1 %v21331_v13  ;;  %v21373_v13 = vld [vmem:[#allocation281_spill] sm:$0xff]  ;;  %v10829_v50 = vadd.f32 %v10828_v26, %v10827_v56  ;;  %v9226_v56 = vld [vmem:[%s18741_s4 + $0x8] sm:$0xff]  ;;  %v9227_v26 = vld [vmem:[%s18741_s4 + $0x10] sm:$0xff] }
 0x771   :  { %v6762_v18 = vadd.f32 %v10444_v55, %v6530_v46  ;;  %v21374_v46 = vand.u32 4294901760, %v21373_v13 }
 0x773   :  { %12776 = vmatpush3.bf16.msra.mxu1 %v21332_v45 }
 0x774   :  { %12778 = vmatprep.subr.bf16.mxu1 %v21333_v51 }
 0x777   :  { %12780 = vmatpush3.bf16.msra.mxu1 %v21334_v57 }
 0x778   :  { %12814 = vmatprep.subr.bf16.mxu1 %v21337_v10  ;;  %v10897_v10 = vpop.f32.mrb[72].mxu0 }
 0x77a   :  { %8337 = vmatmul.mubr.f32.vlgmr.msra.gmra.mrb[52].mxu1 %v21317_v9  ;;  %v21363_v9 = vld [vmem:[#allocation270_spill] sm:$0xff] }
 0x77b   :  { %12816 = vmatpush3.bf16.msra.mxu1 %v21338_v49  ;;  %8679 = vmatprep.mubr.f32.mxu1 %v21339_v0  ;;  %v10898_v49 = vpop.f32.mrb[73].mxu0 }
 0x77c   :  { %12818 = vmatprep.subr.bf16.mxu1 %v21340_v27 }
 0x77f   :  { %12820 = vmatpush3.bf16.msra.mxu1 %v21341_v25 }
 0x780   :  { %12822 = vmatprep.subr.bf16.mxu1 %v21342_v29 }
 0x783   :  { %12824 = vmatpush3.bf16.msra.mxu1 %v21343_v36 }
 0x784   :  { %12826 = vmatprep.subr.bf16.mxu1 %v21344_v28  ;;  %v10967_v28 = vpop.f32.mrb[74].mxu0 }
 0x787   :  { %12828 = vmatpush3.bf16.msra.mxu1 %v21345_v15  ;;  %v10968_v15 = vpop.f32.mrb[75].mxu0 }
 0x788   :  { %12830 = vmatprep.subr.bf16.mxu1 %v21346_v1 }
 0x78b   :  { %12832 = vmatpush3.bf16.msra.mxu1 %v21347_v47  ;;  %v10969_v47 = vadd.f32 %v10968_v15, %v10967_v28 }
 0x78c   :  { %12834 = vmatprep.subr.bf16.mxu1 %v21348_v43 }
 0x78d   :  { %v10477_v61 = vpop.f32.mrb[40].mxu1 }
 0x78e   :  { %v10478_v4 = vpop.f32.mrb[41].mxu1 }
 0x78f   :  { %v10479_v30 = vadd.f32 %v10478_v4, %v10477_v61  ;;  %12836 = vmatpush3.bf16.msra.mxu1 %v21349_v60 }
 0x790   :  { %12838 = vmatprep.subr.bf16.mxu1 %v21350_v34 }
 0x791   :  { %v6900_v52 = vadd.f32 %v10479_v30, %v6762_v18 }
 0x793   :  { %12840 = vmatpush3.bf16.msra.mxu1 %v21351_v6 }
 0x794   :  { %12842 = vmatprep.subr.bf16.mxu1 %v21352_v22  ;;  %v13368_v22 = vmov 0  }
 0x795   :  { %13361 = vset.pattern.permute.xlu0 %v13368_v22 }
 0x797   :  { %12844 = vmatpush3.bf16.msra.mxu1 %v21353_v59 }
 0x798   :  { %12878 = vmatprep.subr.bf16.mxu1 %v21354_v42 }
 0x79a   :  { %8681 = vmatmul.mubr.f32.vlgmr.msra.gmra.mrb[54].mxu1 %v21355_v5 }
 0x79b   :  { %12880 = vmatpush3.bf16.msra.mxu1 %v21356_v54  ;;  %8923 = vmatprep.mubr.f32.mxu1 %v21358_v23 }
 0x79c   :  { %12882 = vmatprep.subr.bf16.mxu1 %v21359_v21 }
 0x79f   :  { %12884 = vmatpush3.bf16.msra.mxu1 %v21360_v16 }
 0x7a0   :  { %12886 = vmatprep.subr.bf16.mxu1 %v21361_v48 }
 0x7a3   :  { %12888 = vmatpush3.bf16.msra.mxu1 %v21362_v38 }
 0x7a4   :  { %12890 = vmatprep.subr.bf16.mxu1 %v21363_v9 }
 0x7a7   :  { %12892 = vmatpush3.bf16.msra.mxu1 %v21364_v14 }
 0x7a8   :  { %12894 = vmatprep.subr.bf16.mxu1 %v21365_v17 }
 0x7ab   :  { %12896 = vmatpush3.bf16.msra.mxu1 %v21366_v32 }
 0x7ac   :  { %12898 = vmatprep.subr.bf16.mxu1 %v21367_v53 }
 0x7ad   :  { %v10512_v31 = vpop.f32.mrb[42].mxu1 }
 0x7ae   :  { %v10513_v62 = vpop.f32.mrb[43].mxu1 }
 0x7af   :  { %v10514_v40 = vadd.f32 %v10513_v62, %v10512_v31  ;;  %12900 = vmatpush3.bf16.msra.mxu1 %v21368_v41 }
 0x7b0   :  { %12902 = vmatprep.subr.bf16.mxu1 %v21369_v35 }
 0x7b1   :  { %v7008_v24 = vadd.f32 %v10514_v40, %v6900_v52 }
 0x7b3   :  { %12904 = vmatpush3.bf16.msra.mxu1 %v21370_v33 }
 0x7b4   :  { %12906 = vmatprep.subr.bf16.mxu1 %v21371_v7 }
 0x7b7   :  { %12908 = vmatpush3.bf16.msra.mxu1 %v21372_v11 }
 0x7b8   :  { %12942 = vmatprep.subr.bf16.mxu1 %v21354_v42 }
 0x7ba   :  { %8927 = vmatmul.mubr.f32.vlgmr.msra.gmra.mrb[56].mxu1 %v21374_v46 }
 0x7bb   :  { %12944 = vmatpush3.bf16.msra.mxu1 %v21356_v54  ;;  %9197 = vmatprep.mubr.f32.mxu1 %v21339_v0  ;;  %v10899_v0 = vadd.f32 %v10898_v49, %v10897_v10 }
 0x7bc   :  { %12946 = vmatprep.subr.bf16.mxu1 %v21359_v21 }
 0x7bf   :  { %12948 = vmatpush3.bf16.msra.mxu1 %v21360_v16 }
 0x7c0   :  { %12950 = vmatprep.subr.bf16.mxu1 %v21361_v48 }
 0x7c3   :  { %12952 = vmatpush3.bf16.msra.mxu1 %v21362_v38 }
 0x7c4   :  { %12954 = vmatprep.subr.bf16.mxu1 %v21363_v9 }
 0x7c7   :  { %12956 = vmatpush3.bf16.msra.mxu1 %v21364_v14 }
 0x7c8   :  { %12958 = vmatprep.subr.bf16.mxu1 %v21365_v17 }
 0x7cb   :  { %12960 = vmatpush3.bf16.msra.mxu1 %v21366_v32 }
 0x7cc   :  { %12962 = vmatprep.subr.bf16.mxu1 %v21367_v53 }
 0x7cd   :  { %v10547_v45 = vpop.f32.mrb[44].mxu1 }
 0x7ce   :  { %v10548_v51 = vpop.f32.mrb[45].mxu1 }
 0x7cf   :  { %v10549_v57 = vadd.f32 %v10548_v51, %v10547_v45  ;;  %12964 = vmatpush3.bf16.msra.mxu1 %v21368_v41 }
 0x7d0   :  { %12966 = vmatprep.subr.bf16.mxu1 %v21369_v35 }
 0x7d1   :  { %v7176_v63 = vadd.f32 %v10549_v57, %v7008_v24 }
 0x7d3   :  { %12968 = vmatpush3.bf16.msra.mxu1 %v21370_v33 }
 0x7d4   :  { %12970 = vmatprep.subr.bf16.mxu1 %v21371_v7 }
 0x7d7   :  { %12972 = vmatpush3.bf16.msra.mxu1 %v21372_v11 }
 0x7da   :  { %9199 = vmatmul.mubr.f32.vlgmr.msra.gmra.mrb[58].mxu1 %v21355_v5 }
 0x7ed   :  { %v10582_v55 = vpop.f32.mrb[46].mxu1 }
 0x7ee   :  { %v10583_v18 = vpop.f32.mrb[47].mxu1 }
 0x7ef   :  { %v10584_v44 = vadd.f32 %v10583_v18, %v10582_v55 }
 0x7f1   :  { %v7280_v8 = vadd.f32 %v10584_v44, %v7176_v63  ;;  %v9225_v63 = vld [vmem:[%s18741_s4] sm:$0xff] }
 0x80d   :  { %v10652_v27 = vpop.f32.mrb[48].mxu1 }
 0x80e   :  { %v10653_v25 = vpop.f32.mrb[49].mxu1 }
 0x80f   :  { %v10654_v29 = vadd.f32 %v10653_v25, %v10652_v27  ;;  %v9263_v25 = vlaneseq }
 0x811   :  { %v7821_v36 = vadd.f32 %v10654_v29, %v18660_v58  ;;  %vm9285_vm4 = vcmp.lt.s32.totalorder %v9263_v25, 324 }
 0x813   :  { %v7959_v1 = vadd.f32 %v18680_v39, %v7821_v36 }
 0x82d   :  { %v10722_v43 = vpop.f32.mrb[50].mxu1 }
 0x82e   :  { %v10723_v61 = vpop.f32.mrb[51].mxu1 }
 0x82f   :  { %v10724_v4 = vadd.f32 %v10723_v61, %v10722_v43  ;;  %v9264_v61 = vshrl.u32 %v9263_v25, 7 }
 0x831   :  { %v8067_v30 = vadd.f32 %v10724_v4, %v7959_v1 }
 0x833   :  { %v8235_v60 = vadd.f32 %v10759_v19, %v8067_v30 }
 0x84d   :  { %v10792_v34 = vpop.f32.mrb[52].mxu1 }
 0x84e   :  { %v10793_v52 = vpop.f32.mrb[53].mxu1 }
 0x84f   :  { %v10794_v2 = vadd.f32 %v10793_v52, %v10792_v34 }
 0x851   :  { %v8339_v20 = vadd.f32 %v10794_v2, %v8235_v60 }
 0x853   :  { %v8451_v6 = vadd.f32 %v10829_v50, %v8339_v20 }
 0x86d   :  { %v10862_v59 = vpop.f32.mrb[54].mxu1 }
 0x86e   :  { %v10863_v42 = vpop.f32.mrb[55].mxu1 }
 0x86f   :  { %v10864_v58 = vadd.f32 %v10863_v42, %v10862_v59 }
 0x871   :  { %v8683_v5 = vadd.f32 %v10864_v58, %v8451_v6 }
 0x873   :  { %v8821_v54 = vadd.f32 %v10899_v0, %v8683_v5  ;;  %v13369_v0 = vmov 1966171168  }
 0x874   :  { %v9261_v27 = vunpack.c.l.s4 %v13369_v0 }
 0x876   :  { %v9262_v43 = vunpack.c.0.s8 %v9261_v27 }
 0x878   :  { %v9265_v20 = vsub.s32 %v9262_v43, %v9264_v61 }
 0x88d   :  { %v10932_v12 = vpop.f32.mrb[56].mxu1 }
 0x88e   :  { %v10933_v39 = vpop.f32.mrb[57].mxu1 }
 0x88f   :  { %v10934_v23 = vadd.f32 %v10933_v39, %v10932_v12 }
 0x891   :  { %v8929_v21 = vadd.f32 %v10934_v23, %v8821_v54 }
 0x893   :  { %v9097_v16 = vadd.f32 %v10969_v47, %v8929_v21 }
 0x8ad   :  { %v11002_v48 = vpop.f32.mrb[58].mxu1 }
 0x8ae   :  { %v11003_v38 = vpop.f32.mrb[59].mxu1 }
 0x8af   :  { %v11004_v9 = vadd.f32 %v11003_v38, %v11002_v48 }
 0x8b1   :  { %v9201_v14 = vadd.f32 %v11004_v9, %v9097_v16 }
 0x8b3   :  { %v9204_v17 = vadd.f32 %v9201_v14, %v7280_v8 }
 0x8b5   :  { %v9206_v32 = vsel %vm9205_vm2, %v9204_v17, -inf }
 0x8b6   :  { %v9207_v53 = vrot.slane %v9206_v32, 4 }
 0x8b8   :  { %v9208_v31 = vmax.f32 %v9206_v32, %v9207_v53 }
 0x8ba   :  { %v9209_v62 = vrot.slane %v9208_v31, 2 }
 0x8bc   :  { %v9210_v40 = vmax.f32 %v9208_v31, %v9209_v62 }
 0x8be   :  { %v9211_v41 = vrot.slane %v9210_v40, 1 }
 0x8c0   :  { %v9212_v35 = vmax.f32 %v9210_v40, %v9211_v41 }
 0x8c2   :  { %v9213_v24 = vsub.f32 %v9204_v17, %v9212_v35 }
 0x8c4   :  { %v9214_v37 = vmul.f32 1.442695, %v9213_v24 }
 0x8c6   :  { %13362 = vpow2.f32 %v9214_v37 }
 0x8d0   :  { %v13363_v3 = vpop.eup %13362 }
 0x8d1   :  { %v9216_v33 = vsel %vm9205_vm2, %v13363_v3, 0.0 }
 0x8d2   :  { %v9217_v19 = vrot.slane %v9216_v33, 4 }
 0x8d4   :  { %v9218_v7 = vadd.f32 %v9217_v19, %v9216_v33 }
 0x8d6   :  { %v9219_v11 = vrot.slane %v9218_v7, 2 }
 0x8d8   :  { %v9220_v13 = vadd.f32 %v9219_v11, %v9218_v7 }
 0x8da   :  { %v9221_v46 = vrot.slane %v9220_v13, 1 }
 0x8dc   :  { %v9222_v45 = vadd.f32 %v9221_v46, %v9220_v13 }
 0x8de   :  { %13364 = vrcp.f32 %v9222_v45 }
 0x8e8   :  { %v13365_v51 = vpop.eup %13364 }
 0x8e9   :  { %v9224_v57 = vmul.f32 %v13365_v51, %v13363_v3 }
 0x8eb   :  { %9230 = vperm.xlu0 %13361, %v9224_v57  }
 0x96a   :  { %v9231_v50 = vpop.permute.xlu0 %9230 }
 0x96b   :  { %v9233_v55 = vmul.f32 %v9231_v50, %v9225_v63  ;;  %v9234_v18 = vmul.f32 %v9231_v50, %v9226_v56  ;;  %v9235_v44 = vmul.f32 %v9231_v50, %v9227_v26 }
 0x96d   :  { %v9236_v8 = vrot.slane %v9233_v55, 4  ;;  %v9242_v10 = vrot.slane %v9234_v18, 4  ;;  %v9249_v49 = vsel %vm9248_vm3, %v9235_v44, 0.0 }
 0x96e   :  { %v9250_v29 = vrot.slane %v9249_v49, 4 }
 0x96f   :  { %v9237_v36 = vadd.f32 %v9236_v8, %v9233_v55  ;;  %v9243_v28 = vadd.f32 %v9242_v10, %v9234_v18 }
 0x970   :  { %v9251_v15 = vadd.f32 %v9250_v29, %v9249_v49 }
 0x971   :  { %v9238_v1 = vrot.slane %v9237_v36, 2  ;;  %v9244_v47 = vrot.slane %v9243_v28, 2 }
 0x972   :  { %v9252_v4 = vrot.slane %v9251_v15, 2 }
 0x973   :  { %v9239_v30 = vadd.f32 %v9238_v1, %v9237_v36  ;;  %v9245_v60 = vadd.f32 %v9244_v47, %v9243_v28 }
 0x974   :  { %v9253_v34 = vadd.f32 %v9252_v4, %v9251_v15 }
 0x975   :  { %v9240_v52 = vrot.slane %v9239_v30, 1  ;;  %v9246_v2 = vrot.slane %v9245_v60, 1 }
 0x976   :  { %v9254_v6 = vrot.slane %v9253_v34, 1 }
 0x977   :  { %v9241_v22 = vadd.f32 %v9240_v52, %v9239_v30  ;;  %v9247_v59 = vadd.f32 %v9246_v2, %v9245_v60 }
 0x978   :  { %v9255_v42 = vadd.f32 %v9254_v6, %v9253_v34 }
 0x979   :  { %v9259_v58 = vcombine.low %v9241_v22, %v9247_v59 }
 0x97a   :  { %v9273_v5 = vrot.slane %v9255_v42, %v9265_v20 }
 0x97b   :  { %v9266_v54 = vrot.slane %v9259_v58, %v9265_v20 }
 0x97d   :  { %v9274_v12 = vcombine.low %v9266_v54, %v9273_v5 }
 0x97f   :  { %v9281_v39 = vrot.slane %v9274_v12, %v9265_v20 }
 0x981   :  { %9287 = vst.msk [vmem:[%s18742_s5] sm:$0x7] %vm9285_vm4, %v9281_v39 }

</bundles_post_ra>
